<compile_context>
chip_gen: v5e
topology: v5e:2x2
jax: 0.10.0
libtpu: 0.0.40
codegen_flags: <defaults>
</compile_context>

<pallas_src>
import math
import numpy as np
import jax
import jax.numpy as jnp
from jax.experimental import pallas as pl
from jax.experimental.pallas import tpu as pltpu


# --------------------------------------------------------------------------
# Kernel: one grid step processes G graphs (GA = G*A_pad query rows).
# --------------------------------------------------------------------------
def make_xattn_kernel(n_heads, head_dim, G, A, S, E, R):
    def kernel(h_ref, rf_ref, wq_ref, wkv_ref, wo_ref,
               bq_ref, bkv_ref, bo_ref, out_ref):
        GA = G * A
        GS = G * S

        # Full-width projections (bf16 operands, f32 accumulation):
        #   Q  = [GA, E] @ [E, E]    (scale folded into wq)
        #   KV = [GS, R] @ [R, 2E]   (linear_query folded into wkv; N=256)
        q = jnp.dot(h_ref[...], wq_ref[...],
                    preferred_element_type=jnp.float32) + bq_ref[...]
        kv = jnp.dot(rf_ref[...], wkv_ref[...],
                     preferred_element_type=jnp.float32) + bkv_ref[...]

        # Attention inner part.  S == 8 -> <2% of FLOPs, kept as a static
        # per-head loop over lane slices (review item: revisit layout if S
        # ever grows toward 128).
        o_parts = []
        for hh in range(n_heads):          # static, unrolled (n_heads small)
            lo = hh * head_dim
            qh = q[:, lo:lo + head_dim].reshape(G, A, head_dim)
            kh = kv[:, lo:lo + head_dim].reshape(G, S, head_dim)
            vh = kv[:, E + lo:E + lo + head_dim].reshape(G, S, head_dim)

            s = jnp.einsum('gad,gsd->gas', qh, kh,
                           preferred_element_type=jnp.float32)      # [G,A,S]
            s = s - jnp.max(s, axis=-1, keepdims=True)
            p = jnp.exp(s)
            l = jnp.sum(p, axis=-1, keepdims=True)                  # [G,A,1]
            p = p * pl.reciprocal(l, approx=True)                   # EUP slot
            oh = jnp.einsum('gas,gsd->gad', p, vh,
                            preferred_element_type=jnp.float32)     # [G,A,Dh]
            o_parts.append(oh.reshape(GA, head_dim))

        # Fused out_proj: single full-depth [GA,E] @ [E,E] matmul over the
        # head-concat slab (heads contiguous along lanes, matching torch MHA).
        o_flat = jnp.concatenate(o_parts, axis=-1).astype(jnp.bfloat16)
        out = jnp.dot(o_flat, wo_ref[...],
                      preferred_element_type=jnp.float32) + bo_ref[...]
        out_ref[...] = out.astype(out_ref.dtype)                    # [GA, E]

    return kernel


def cross_attention_pallas(h_flat, rf_flat, packed, n_heads, G, A_pad, S):
    """h_flat: [B_pad*A_pad, E] bf16; rf_flat: [B_pad*S, R] bf16."""
    rows, E = h_flat.shape
    R = rf_flat.shape[1]
    B_pad = rows // A_pad
    assert B_pad % G == 0
    nb = B_pad // G
    head_dim = E // n_heads
    wq, wkv, wo, bq, bkv, bo = packed

    # Weights/biases are resident (constant index_map); block = full array.
    # (pipeline_mode=pl.Buffered(1) could drop their double-buffer, but at
    #  ~0.25 MiB total it is negligible -- left at the default.)
    def wspec(x):
        return pl.BlockSpec(x.shape, lambda g: (0, 0))

    return pl.pallas_call(
        make_xattn_kernel(n_heads, head_dim, G, A_pad, S, E, R),
        out_shape=jax.ShapeDtypeStruct((rows, E), jnp.float32),
        grid=(nb,),
        in_specs=[
            pl.BlockSpec((G * A_pad, E), lambda g: (g, 0)),   # h rows
            pl.BlockSpec((G * S, R), lambda g: (g, 0)),       # ret_feat rows
            wspec(wq), wspec(wkv), wspec(wo),
            wspec(bq), wspec(bkv), wspec(bo),
        ],
        out_specs=pl.BlockSpec((G * A_pad, E), lambda g: (g, 0)),
        compiler_params=pltpu.CompilerParams(
            dimension_semantics=("parallel",)),   # independent graph blocks
    )(h_flat, rf_flat, wq, wkv, wo, bq, bkv, bo)


# --------------------------------------------------------------------------
# Parameter folding / packing (one-time, host side, f32 before bf16 cast).
# --------------------------------------------------------------------------
def pack_params(raw_params, n_heads):
    W_lq, b_lq, in_proj_w, in_proj_b, out_proj_w, out_proj_b = raw_params
    E = W_lq.shape[0]
    head_dim = E // n_heads
    Wq, Wk, Wv = jnp.split(in_proj_w, 3, axis=0)
    bq, bk, bv = jnp.split(in_proj_b, 3)
    scale = 1.0 / math.sqrt(head_dim)

    wq = Wq.T * scale                          # fold 1/sqrt(Dh) into Q proj
    bq_s = (bq * scale).reshape(1, E)
    wk = W_lq.T @ Wk.T                         # fold linear_query into K proj
    bk_f = b_lq @ Wk.T + bk
    wv = W_lq.T @ Wv.T                         # fold linear_query into V proj
    bv_f = b_lq @ Wv.T + bv
    wkv = jnp.concatenate([wk, wv], axis=1)    # [R, 2E]
    bkv = jnp.concatenate([bk_f, bv_f]).reshape(1, 2 * E)
    wo = out_proj_w.T                          # [E, E]
    bo = out_proj_b.reshape(1, E)

    return (wq.astype(jnp.bfloat16), wkv.astype(jnp.bfloat16),
            wo.astype(jnp.bfloat16), bq_s, bkv, bo)


# --------------------------------------------------------------------------
# Module forward (fusion_type='xattn').
# --------------------------------------------------------------------------
def cross_attention_module_forward(h, ret_feat, batch_ids, raw_params, n_heads,
                                   graphs_per_block=32):
    E = h.shape[1]
    B_rf, S, R = ret_feat.shape
    packed = pack_params(raw_params, n_heads)

    # Host-side (numpy) shape metadata -- data-dependent, like torch.bincount.
    batch_np = np.asarray(batch_ids)
    B = int(batch_np.max()) + 1
    counts = np.bincount(batch_np, minlength=B)
    A_pad = max(8, int(-(-int(counts.max()) // 8) * 8))   # sublane-align atoms
    G = int(max(1, min(graphs_per_block, B)))
    B_pad = int(-(-B // G) * G)
    pos = np.concatenate([np.arange(c) for c in counts]).astype(np.int32)
    flat_idx = jnp.asarray(batch_np.astype(np.int32) * A_pad + pos)   # [N]

    @jax.jit
    def run(h, ret_feat, flat_idx, packed):
        # scatter-pad (precomputed indices), bf16 at the kernel boundary
        hp = jnp.zeros((B_pad * A_pad, E), jnp.bfloat16)
        hp = hp.at[flat_idx].set(h.astype(jnp.bfloat16))
        rfp = jnp.zeros((B_pad * S, R), jnp.bfloat16)
        rfp = rfp.at[:B * S].set(ret_feat.reshape(B * S, R).astype(jnp.bfloat16))
        outp = cross_attention_pallas(hp, rfp, packed, n_heads, G, A_pad, S)
        # gather-unpad (drop padded atom rows and padded graphs)
        return jnp.take(outp, flat_idx, axis=0)                       # [N, E]

    output = run(h, ret_feat, flat_idx, packed)
    aux = {"A_pad": A_pad, "flat_idx": flat_idx, "B": B, "B_pad": B_pad, "G": G}
    return output, aux


# --------------------------------------------------------------------------
# Pure-JAX f32 reference of CrossAttentionCore.forward (unfolded math).
# --------------------------------------------------------------------------
def reference_forward(h, ret_feat, raw_params, n_heads, A_pad, flat_idx):
    W_lq, b_lq, in_proj_w, in_proj_b, out_proj_w, out_proj_b = raw_params
    E = h.shape[1]
    B, S, R = ret_feat.shape
    hd = E // n_heads
    Wq, Wk, Wv = jnp.split(in_proj_w, 3, axis=0)
    bq, bk, bv = jnp.split(in_proj_b, 3)

    hp = jnp.zeros((B * A_pad, E), jnp.float32).at[flat_idx].set(h)
    hp = hp.reshape(B, A_pad, E)
    kv = jnp.einsum('bsr,er->bse', ret_feat, W_lq) + b_lq
    q = jnp.einsum('bae,fe->baf', hp, Wq) + bq
    k = jnp.einsum('bse,fe->bsf', kv, Wk) + bk
    v = jnp.einsum('bse,fe->bsf', kv, Wv) + bv
    qh = q.reshape(B, A_pad, n_heads, hd)
    kh = k.reshape(B, S, n_heads, hd)
    vh = v.reshape(B, S, n_heads, hd)
    s = jnp.einsum('bahd,bshd->bhas', qh, kh) / math.sqrt(hd)
    p = jax.nn.softmax(s, axis=-1)
    o = jnp.einsum('bhas,bshd->bahd', p, vh).reshape(B, A_pad, E)
    o = jnp.einsum('bae,fe->baf', o, out_proj_w) + out_proj_b
    return o.reshape(B * A_pad, E)[flat_idx]


if __name__ == "__main__":
    # Module hyper-params (fusion_type='xattn'); E=128 keeps stores lane-dense.
    h_dim = 128
    ret_feat_dim = 128
    n_heads = 4
    seq_len = 8

    # Graph batching: 64 graphs, 2..8 atoms each -> GA = 256 rows per grid
    # step with graphs_per_block=32, grid of 2 "parallel" steps.
    B = 64
    counts = (np.arange(B) % 7 + 2).astype(np.int32)
    N = int(counts.sum())
    batch_ids = np.repeat(np.arange(B), counts)          # [N]
    mask_ligand = np.ones((N,), dtype=bool)               # unused by the core

    key = jax.random.PRNGKey(0)
    keys = jax.random.split(key, 8)
    h = jax.random.normal(keys[0], (N, h_dim), jnp.float32)
    ret_feat = jax.random.normal(keys[1], (B, seq_len, ret_feat_dim), jnp.float32)

    def init(k, shape, scale=0.1):
        return scale * jax.random.normal(k, shape, jnp.float32)

    W_lq = init(keys[2], (h_dim, ret_feat_dim))          # linear_query.weight
    b_lq = init(keys[3], (h_dim,))
    in_proj_w = init(keys[4], (3 * h_dim, h_dim))        # MHA in_proj_weight
    in_proj_b = init(keys[5], (3 * h_dim,))
    out_proj_w = init(keys[6], (h_dim, h_dim))           # MHA out_proj.weight
    out_proj_b = init(keys[7], (h_dim,))
    raw_params = (W_lq, b_lq, in_proj_w, in_proj_b, out_proj_w, out_proj_b)

    output, aux = cross_attention_module_forward(
        h, ret_feat, batch_ids, raw_params, n_heads, graphs_per_block=32)
    jax.block_until_ready(output)

    ref = reference_forward(h, ret_feat, raw_params, n_heads,
                            aux["A_pad"], aux["flat_idx"])
    assert output.shape == (N, h_dim)
    # Tolerance covers bf16 MXU inputs (f32 accumulation), host-side weight
    # folding and the approx (EUP) reciprocal in the softmax normalisation.
    assert jnp.allclose(output, ref, atol=5e-2, rtol=5e-2), "mismatch vs reference"
    print("KERNEL_OK")
</pallas_src>

<mosaic_0001>
module attributes {stable_mosaic.version = 11 : i64} {
  func.func @kernel(%arg0: i32, %arg1: memref<256x128xbf16, #tpu.memory_space<vmem>>, %arg2: memref<256x128xbf16, #tpu.memory_space<vmem>>, %arg3: memref<128x128xbf16, #tpu.memory_space<vmem>>, %arg4: memref<128x256xbf16, #tpu.memory_space<vmem>>, %arg5: memref<128x128xbf16, #tpu.memory_space<vmem>>, %arg6: memref<1x128xf32, #tpu.memory_space<vmem>>, %arg7: memref<1x256xf32, #tpu.memory_space<vmem>>, %arg8: memref<1x128xf32, #tpu.memory_space<vmem>>, %arg9: memref<256x128xf32, #tpu.memory_space<vmem>>) attributes {dimension_semantics = [#tpu.dimension_semantics<parallel>], iteration_bounds = array<i64: 2>, scalar_prefetch = 0 : i64, scratch_operands = 0 : i64, tpu.core_type = #tpu.core_type<tc>, window_params = [{transform_indices = @transform_0, window_bounds = array<i64: 256, 128>}, {transform_indices = @transform_1, window_bounds = array<i64: 256, 128>}, {pipeline_mode = #tpu.pipeline_mode<synchronous>, transform_indices = @transform_2, window_bounds = array<i64: 128, 128>}, {pipeline_mode = #tpu.pipeline_mode<synchronous>, transform_indices = @transform_3, window_bounds = array<i64: 128, 256>}, {pipeline_mode = #tpu.pipeline_mode<synchronous>, transform_indices = @transform_4, window_bounds = array<i64: 128, 128>}, {pipeline_mode = #tpu.pipeline_mode<synchronous>, transform_indices = @transform_5, window_bounds = array<i64: 1, 128>}, {pipeline_mode = #tpu.pipeline_mode<synchronous>, transform_indices = @transform_6, window_bounds = array<i64: 1, 256>}, {pipeline_mode = #tpu.pipeline_mode<synchronous>, transform_indices = @transform_7, window_bounds = array<i64: 1, 128>}, {transform_indices = @transform_8, window_bounds = array<i64: 256, 128>}]} {
    %c0 = arith.constant 0 : index
    %c0_0 = arith.constant 0 : index
    %0 = vector.load %arg1[%c0, %c0_0] : memref<256x128xbf16, #tpu.memory_space<vmem>>, vector<256x128xbf16>
    %c0_1 = arith.constant 0 : index
    %c0_2 = arith.constant 0 : index
    %1 = vector.load %arg3[%c0_1, %c0_2] : memref<128x128xbf16, #tpu.memory_space<vmem>>, vector<128x128xbf16>
    %cst = arith.constant dense<0.000000e+00> : vector<256x128xf32>
    %2 = tpu.matmul %0, %1, %cst {dimension_numbers = #tpu.dot_dimension_numbers<[1], [0], [0], [1], [0, 0, 1, 1], [], []>} : vector<256x128xbf16>, vector<128x128xbf16>, vector<256x128xf32> -> vector<256x128xf32>
    %c0_3 = arith.constant 0 : index
    %c0_4 = arith.constant 0 : index
    %3 = vector.load %arg6[%c0_3, %c0_4] : memref<1x128xf32, #tpu.memory_space<vmem>>, vector<1x128xf32>
    %4 = vector.broadcast %3 : vector<1x128xf32> to vector<256x128xf32>
    %5 = arith.addf %2, %4 : vector<256x128xf32>
    %c0_5 = arith.constant 0 : index
    %c0_6 = arith.constant 0 : index
    %6 = vector.load %arg2[%c0_5, %c0_6] : memref<256x128xbf16, #tpu.memory_space<vmem>>, vector<256x128xbf16>
    %c0_7 = arith.constant 0 : index
    %c0_8 = arith.constant 0 : index
    %7 = vector.load %arg4[%c0_7, %c0_8] : memref<128x256xbf16, #tpu.memory_space<vmem>>, vector<128x256xbf16>
    %cst_9 = arith.constant dense<0.000000e+00> : vector<256x256xf32>
    %8 = tpu.matmul %6, %7, %cst_9 {dimension_numbers = #tpu.dot_dimension_numbers<[1], [0], [0], [1], [0, 0, 1, 1], [], []>} : vector<256x128xbf16>, vector<128x256xbf16>, vector<256x256xf32> -> vector<256x256xf32>
    %c0_10 = arith.constant 0 : index
    %c0_11 = arith.constant 0 : index
    %9 = vector.load %arg7[%c0_10, %c0_11] : memref<1x256xf32, #tpu.memory_space<vmem>>, vector<1x256xf32>
    %10 = vector.broadcast %9 : vector<1x256xf32> to vector<256x256xf32>
    %11 = arith.addf %8, %10 : vector<256x256xf32>
    %12 = vector.extract_strided_slice %5 {offsets = [0, 0], sizes = [256, 32], strides = [1, 1]} : vector<256x128xf32> to vector<256x32xf32>
    %13 = vector.shape_cast %12 : vector<256x32xf32> to vector<32x8x32xf32>
    %14 = vector.extract_strided_slice %11 {offsets = [0, 0], sizes = [256, 32], strides = [1, 1]} : vector<256x256xf32> to vector<256x32xf32>
    %15 = vector.shape_cast %14 : vector<256x32xf32> to vector<32x8x32xf32>
    %16 = vector.extract_strided_slice %11 {offsets = [0, 128], sizes = [256, 32], strides = [1, 1]} : vector<256x256xf32> to vector<256x32xf32>
    %17 = vector.shape_cast %16 : vector<256x32xf32> to vector<32x8x32xf32>
    "tpu.trace_start"() <{level = 10 : i32, message = "gad,gsd->gas"}> : () -> ()
    %cst_12 = arith.constant dense<0.000000e+00> : vector<32x8x8xf32>
    %18 = tpu.matmul %13, %15, %cst_12 {dimension_numbers = #tpu.dot_dimension_numbers<[2], [2], [1], [1], [0, 0, 0, 1, 1, 1], [0], [0]>} : vector<32x8x32xf32>, vector<32x8x32xf32>, vector<32x8x8xf32> -> vector<32x8x8xf32>
    "tpu.trace_stop"() : () -> ()
    %cst_13 = arith.constant dense<0xFF800000> : vector<32x8xf32>
    %19 = vector.multi_reduction <maximumf>, %18, %cst_13 [2] : vector<32x8x8xf32> to vector<32x8xf32>
    %20 = vector.shape_cast %19 : vector<32x8xf32> to vector<32x8x1xf32>
    %21 = vector.broadcast %20 : vector<32x8x1xf32> to vector<32x8x8xf32>
    %22 = arith.subf %18, %21 : vector<32x8x8xf32>
    %23 = math.exp %22 : vector<32x8x8xf32>
    %cst_14 = arith.constant dense<0.000000e+00> : vector<32x8xf32>
    %24 = vector.multi_reduction <add>, %23, %cst_14 [2] : vector<32x8x8xf32> to vector<32x8xf32>
    %25 = vector.shape_cast %24 : vector<32x8xf32> to vector<32x8x1xf32>
    %26 = tpu.reciprocal %25 {approx = true} : vector<32x8x1xf32> -> vector<32x8x1xf32>
    %27 = vector.broadcast %26 : vector<32x8x1xf32> to vector<32x8x8xf32>
    %28 = arith.mulf %23, %27 : vector<32x8x8xf32>
    "tpu.trace_start"() <{level = 10 : i32, message = "gas,gsd->gad"}> : () -> ()
    %cst_15 = arith.constant dense<0.000000e+00> : vector<32x8x32xf32>
    %29 = tpu.matmul %28, %17, %cst_15 {dimension_numbers = #tpu.dot_dimension_numbers<[2], [1], [1], [2], [0, 0, 0, 1, 1, 2], [0], [0]>} : vector<32x8x8xf32>, vector<32x8x32xf32>, vector<32x8x32xf32> -> vector<32x8x32xf32>
    "tpu.trace_stop"() : () -> ()
    %30 = vector.shape_cast %29 : vector<32x8x32xf32> to vector<256x32xf32>
    %31 = vector.extract_strided_slice %5 {offsets = [0, 32], sizes = [256, 32], strides = [1, 1]} : vector<256x128xf32> to vector<256x32xf32>
    %32 = vector.shape_cast %31 : vector<256x32xf32> to vector<32x8x32xf32>
    %33 = vector.extract_strided_slice %11 {offsets = [0, 32], sizes = [256, 32], strides = [1, 1]} : vector<256x256xf32> to vector<256x32xf32>
    %34 = vector.shape_cast %33 : vector<256x32xf32> to vector<32x8x32xf32>
    %35 = vector.extract_strided_slice %11 {offsets = [0, 160], sizes = [256, 32], strides = [1, 1]} : vector<256x256xf32> to vector<256x32xf32>
    %36 = vector.shape_cast %35 : vector<256x32xf32> to vector<32x8x32xf32>
    "tpu.trace_start"() <{level = 10 : i32, message = "gad,gsd->gas"}> : () -> ()
    %cst_16 = arith.constant dense<0.000000e+00> : vector<32x8x8xf32>
    %37 = tpu.matmul %32, %34, %cst_16 {dimension_numbers = #tpu.dot_dimension_numbers<[2], [2], [1], [1], [0, 0, 0, 1, 1, 1], [0], [0]>} : vector<32x8x32xf32>, vector<32x8x32xf32>, vector<32x8x8xf32> -> vector<32x8x8xf32>
    "tpu.trace_stop"() : () -> ()
    %cst_17 = arith.constant dense<0xFF800000> : vector<32x8xf32>
    %38 = vector.multi_reduction <maximumf>, %37, %cst_17 [2] : vector<32x8x8xf32> to vector<32x8xf32>
    %39 = vector.shape_cast %38 : vector<32x8xf32> to vector<32x8x1xf32>
    %40 = vector.broadcast %39 : vector<32x8x1xf32> to vector<32x8x8xf32>
    %41 = arith.subf %37, %40 : vector<32x8x8xf32>
    %42 = math.exp %41 : vector<32x8x8xf32>
    %cst_18 = arith.constant dense<0.000000e+00> : vector<32x8xf32>
    %43 = vector.multi_reduction <add>, %42, %cst_18 [2] : vector<32x8x8xf32> to vector<32x8xf32>
    %44 = vector.shape_cast %43 : vector<32x8xf32> to vector<32x8x1xf32>
    %45 = tpu.reciprocal %44 {approx = true} : vector<32x8x1xf32> -> vector<32x8x1xf32>
    %46 = vector.broadcast %45 : vector<32x8x1xf32> to vector<32x8x8xf32>
    %47 = arith.mulf %42, %46 : vector<32x8x8xf32>
    "tpu.trace_start"() <{level = 10 : i32, message = "gas,gsd->gad"}> : () -> ()
    %cst_19 = arith.constant dense<0.000000e+00> : vector<32x8x32xf32>
    %48 = tpu.matmul %47, %36, %cst_19 {dimension_numbers = #tpu.dot_dimension_numbers<[2], [1], [1], [2], [0, 0, 0, 1, 1, 2], [0], [0]>} : vector<32x8x8xf32>, vector<32x8x32xf32>, vector<32x8x32xf32> -> vector<32x8x32xf32>
    "tpu.trace_stop"() : () -> ()
    %49 = vector.shape_cast %48 : vector<32x8x32xf32> to vector<256x32xf32>
    %50 = vector.extract_strided_slice %5 {offsets = [0, 64], sizes = [256, 32], strides = [1, 1]} : vector<256x128xf32> to vector<256x32xf32>
    %51 = vector.shape_cast %50 : vector<256x32xf32> to vector<32x8x32xf32>
    %52 = vector.extract_strided_slice %11 {offsets = [0, 64], sizes = [256, 32], strides = [1, 1]} : vector<256x256xf32> to vector<256x32xf32>
    %53 = vector.shape_cast %52 : vector<256x32xf32> to vector<32x8x32xf32>
    %54 = vector.extract_strided_slice %11 {offsets = [0, 192], sizes = [256, 32], strides = [1, 1]} : vector<256x256xf32> to vector<256x32xf32>
    %55 = vector.shape_cast %54 : vector<256x32xf32> to vector<32x8x32xf32>
    "tpu.trace_start"() <{level = 10 : i32, message = "gad,gsd->gas"}> : () -> ()
    %cst_20 = arith.constant dense<0.000000e+00> : vector<32x8x8xf32>
    %56 = tpu.matmul %51, %53, %cst_20 {dimension_numbers = #tpu.dot_dimension_numbers<[2], [2], [1], [1], [0, 0, 0, 1, 1, 1], [0], [0]>} : vector<32x8x32xf32>, vector<32x8x32xf32>, vector<32x8x8xf32> -> vector<32x8x8xf32>
    "tpu.trace_stop"() : () -> ()
    %cst_21 = arith.constant dense<0xFF800000> : vector<32x8xf32>
    %57 = vector.multi_reduction <maximumf>, %56, %cst_21 [2] : vector<32x8x8xf32> to vector<32x8xf32>
    %58 = vector.shape_cast %57 : vector<32x8xf32> to vector<32x8x1xf32>
    %59 = vector.broadcast %58 : vector<32x8x1xf32> to vector<32x8x8xf32>
    %60 = arith.subf %56, %59 : vector<32x8x8xf32>
    %61 = math.exp %60 : vector<32x8x8xf32>
    %cst_22 = arith.constant dense<0.000000e+00> : vector<32x8xf32>
    %62 = vector.multi_reduction <add>, %61, %cst_22 [2] : vector<32x8x8xf32> to vector<32x8xf32>
    %63 = vector.shape_cast %62 : vector<32x8xf32> to vector<32x8x1xf32>
    %64 = tpu.reciprocal %63 {approx = true} : vector<32x8x1xf32> -> vector<32x8x1xf32>
    %65 = vector.broadcast %64 : vector<32x8x1xf32> to vector<32x8x8xf32>
    %66 = arith.mulf %61, %65 : vector<32x8x8xf32>
    "tpu.trace_start"() <{level = 10 : i32, message = "gas,gsd->gad"}> : () -> ()
    %cst_23 = arith.constant dense<0.000000e+00> : vector<32x8x32xf32>
    %67 = tpu.matmul %66, %55, %cst_23 {dimension_numbers = #tpu.dot_dimension_numbers<[2], [1], [1], [2], [0, 0, 0, 1, 1, 2], [0], [0]>} : vector<32x8x8xf32>, vector<32x8x32xf32>, vector<32x8x32xf32> -> vector<32x8x32xf32>
    "tpu.trace_stop"() : () -> ()
    %68 = vector.shape_cast %67 : vector<32x8x32xf32> to vector<256x32xf32>
    %69 = vector.extract_strided_slice %5 {offsets = [0, 96], sizes = [256, 32], strides = [1, 1]} : vector<256x128xf32> to vector<256x32xf32>
    %70 = vector.shape_cast %69 : vector<256x32xf32> to vector<32x8x32xf32>
    %71 = vector.extract_strided_slice %11 {offsets = [0, 96], sizes = [256, 32], strides = [1, 1]} : vector<256x256xf32> to vector<256x32xf32>
    %72 = vector.shape_cast %71 : vector<256x32xf32> to vector<32x8x32xf32>
    %73 = vector.extract_strided_slice %11 {offsets = [0, 224], sizes = [256, 32], strides = [1, 1]} : vector<256x256xf32> to vector<256x32xf32>
    %74 = vector.shape_cast %73 : vector<256x32xf32> to vector<32x8x32xf32>
    "tpu.trace_start"() <{level = 10 : i32, message = "gad,gsd->gas"}> : () -> ()
    %cst_24 = arith.constant dense<0.000000e+00> : vector<32x8x8xf32>
    %75 = tpu.matmul %70, %72, %cst_24 {dimension_numbers = #tpu.dot_dimension_numbers<[2], [2], [1], [1], [0, 0, 0, 1, 1, 1], [0], [0]>} : vector<32x8x32xf32>, vector<32x8x32xf32>, vector<32x8x8xf32> -> vector<32x8x8xf32>
    "tpu.trace_stop"() : () -> ()
    %cst_25 = arith.constant dense<0xFF800000> : vector<32x8xf32>
    %76 = vector.multi_reduction <maximumf>, %75, %cst_25 [2] : vector<32x8x8xf32> to vector<32x8xf32>
    %77 = vector.shape_cast %76 : vector<32x8xf32> to vector<32x8x1xf32>
    %78 = vector.broadcast %77 : vector<32x8x1xf32> to vector<32x8x8xf32>
    %79 = arith.subf %75, %78 : vector<32x8x8xf32>
    %80 = math.exp %79 : vector<32x8x8xf32>
    %cst_26 = arith.constant dense<0.000000e+00> : vector<32x8xf32>
    %81 = vector.multi_reduction <add>, %80, %cst_26 [2] : vector<32x8x8xf32> to vector<32x8xf32>
    %82 = vector.shape_cast %81 : vector<32x8xf32> to vector<32x8x1xf32>
    %83 = tpu.reciprocal %82 {approx = true} : vector<32x8x1xf32> -> vector<32x8x1xf32>
    %84 = vector.broadcast %83 : vector<32x8x1xf32> to vector<32x8x8xf32>
    %85 = arith.mulf %80, %84 : vector<32x8x8xf32>
    "tpu.trace_start"() <{level = 10 : i32, message = "gas,gsd->gad"}> : () -> ()
    %cst_27 = arith.constant dense<0.000000e+00> : vector<32x8x32xf32>
    %86 = tpu.matmul %85, %74, %cst_27 {dimension_numbers = #tpu.dot_dimension_numbers<[2], [1], [1], [2], [0, 0, 0, 1, 1, 2], [0], [0]>} : vector<32x8x8xf32>, vector<32x8x32xf32>, vector<32x8x32xf32> -> vector<32x8x32xf32>
    "tpu.trace_stop"() : () -> ()
    %87 = vector.shape_cast %86 : vector<32x8x32xf32> to vector<256x32xf32>
    %88 = tpu.concatenate %30, %49, %68, %87 in 1 : vector<256x32xf32>, vector<256x32xf32>, vector<256x32xf32>, vector<256x32xf32> -> vector<256x128xf32>
    %89 = arith.truncf %88 : vector<256x128xf32> to vector<256x128xbf16>
    %c0_28 = arith.constant 0 : index
    %c0_29 = arith.constant 0 : index
    %90 = vector.load %arg5[%c0_28, %c0_29] : memref<128x128xbf16, #tpu.memory_space<vmem>>, vector<128x128xbf16>
    %cst_30 = arith.constant dense<0.000000e+00> : vector<256x128xf32>
    %91 = tpu.matmul %89, %90, %cst_30 {dimension_numbers = #tpu.dot_dimension_numbers<[1], [0], [0], [1], [0, 0, 1, 1], [], []>} : vector<256x128xbf16>, vector<128x128xbf16>, vector<256x128xf32> -> vector<256x128xf32>
    %c0_31 = arith.constant 0 : index
    %c0_32 = arith.constant 0 : index
    %92 = vector.load %arg8[%c0_31, %c0_32] : memref<1x128xf32, #tpu.memory_space<vmem>>, vector<1x128xf32>
    %93 = vector.broadcast %92 : vector<1x128xf32> to vector<256x128xf32>
    %94 = arith.addf %91, %93 : vector<256x128xf32>
    %c0_33 = arith.constant 0 : index
    %c0_34 = arith.constant 0 : index
    %95 = vector.load %arg9[%c0_33, %c0_34] : memref<256x128xf32, #tpu.memory_space<vmem>>, vector<256x128xf32>
    tpu.vector_store %arg9[%c0_33, %c0_34], %94 {strides = array<i32>} : memref<256x128xf32, #tpu.memory_space<vmem>>, vector<256x128xf32>,
    return
  }
  func.func @transform_0(%arg0: i32) -> (i32, i32) {
    %c0_i32 = arith.constant 0 : i32
    %c0_i32_0 = arith.constant 0 : i32
    return %arg0, %c0_i32 : i32, i32
  }
  func.func @transform_1(%arg0: i32) -> (i32, i32) {
    %c0_i32 = arith.constant 0 : i32
    %c0_i32_0 = arith.constant 0 : i32
    return %arg0, %c0_i32 : i32, i32
  }
  func.func @transform_2(%arg0: i32) -> (i32, i32) {
    %c0_i32 = arith.constant 0 : i32
    %c0_i32_0 = arith.constant 0 : i32
    %c0_i32_1 = arith.constant 0 : i32
    return %c0_i32, %c0_i32_0 : i32, i32
  }
  func.func @transform_3(%arg0: i32) -> (i32, i32) {
    %c0_i32 = arith.constant 0 : i32
    %c0_i32_0 = arith.constant 0 : i32
    %c0_i32_1 = arith.constant 0 : i32
    return %c0_i32, %c0_i32_0 : i32, i32
  }
  func.func @transform_4(%arg0: i32) -> (i32, i32) {
    %c0_i32 = arith.constant 0 : i32
    %c0_i32_0 = arith.constant 0 : i32
    %c0_i32_1 = arith.constant 0 : i32
    return %c0_i32, %c0_i32_0 : i32, i32
  }
  func.func @transform_5(%arg0: i32) -> (i32, i32) {
    %c0_i32 = arith.constant 0 : i32
    %c0_i32_0 = arith.constant 0 : i32
    %c0_i32_1 = arith.constant 0 : i32
    return %c0_i32, %c0_i32_0 : i32, i32
  }
  func.func @transform_6(%arg0: i32) -> (i32, i32) {
    %c0_i32 = arith.constant 0 : i32
    %c0_i32_0 = arith.constant 0 : i32
    %c0_i32_1 = arith.constant 0 : i32
    return %c0_i32, %c0_i32_0 : i32, i32
  }
  func.func @transform_7(%arg0: i32) -> (i32, i32) {
    %c0_i32 = arith.constant 0 : i32
    %c0_i32_0 = arith.constant 0 : i32
    %c0_i32_1 = arith.constant 0 : i32
    return %c0_i32, %c0_i32_0 : i32, i32
  }
  func.func @transform_8(%arg0: i32) -> (i32, i32) {
    %c0_i32 = arith.constant 0 : i32
    %c0_i32_0 = arith.constant 0 : i32
    return %arg0, %c0_i32 : i32, i32
  }
}

</mosaic_0001>

<bundles_post_ra>
// kernel: run.1
= control target key start
LH: loop header
LB: loop body
LE: loop exit
PB: predicated region body
PF: predicated region fallthrough
CT: control target
= control target key end

     0   :  { %s11775_s27 = smov 0   ;;  %s15891_s0 = inlined_call_operand.vmem [shape: bf16[512,128], index: 0, kind: input, shape index: {}]   ;;  %s15892_s1 = inlined_call_operand.vmem [shape: bf16[512,128], index: 1, kind: input, shape index: {}]   ;;  %s15893_s2 = inlined_call_operand.vmem [shape: bf16[128,128], index: 2, kind: input, shape index: {}]   ;;  %s15894_s3 = inlined_call_operand.vmem [shape: bf16[128,256], index: 3, kind: input, shape index: {}]   ;;  %s15895_s4 = inlined_call_operand.vmem [shape: bf16[128,128], index: 4, kind: input, shape index: {}]   ;;  %s15896_s5 = inlined_call_operand.vmem [shape: f32[1,128], index: 5, kind: input, shape index: {}]   ;;  %s15897_s6 = inlined_call_operand.vmem [shape: f32[1,256], index: 6, kind: input, shape index: {}]   ;;  %s15898_s7 = inlined_call_operand.vmem [shape: f32[1,128], index: 7, kind: input, shape index: {}]   ;;  %s15899_s8 = inlined_call_operand.vmem [shape: f32[512,128], index: 8, kind: output, shape index: {}]  }
   0x1 LB: > { %s9973_s28 = sadd.s32 4294967295, %s11725_s27   ;;  %p9977_p0 = scmp.ge.s32.totalorder %s11725_s27, 1  ;;  %s11725_s27 = sphi %s11775_s27, %s18_s27  }
   0x2   : > { %p274_p1 = scmp.lt.s32.totalorder %s11725_s27, 3 }
   0x4   : > { %p275_p2 = pnand %p9977_p0, %p274_p1 }
   0x6   : > { %278 = sbr.rel (%p275_p2) target bundleno = 3394 (0xd42), region = 52 }
   0xb   : > { %v10649_v0 = vld [vmem:[%s15893_s2 + $0x38] sm:$0xff]  ;;  %v10648_v1 = vld [vmem:[%s15893_s2 + $0x30] sm:$0xff]  ;;  %v10647_v2 = vld [vmem:[%s15893_s2 + $0x28] sm:$0xff]  ;;  %s9978_s15 = sshll.u32 %s9973_s28, 5  ;;  %s11727_s21 = smov 96   ;;  %vm1024_vm0 = vcmask 261120  }
   0xc   : > { %527 = vmatpush.bf16.msra.mxu0 %v10649_v0  ;;  %10690 = vmatpush.bf16.msra.mxu1 %v10649_v0  ;;  %v10646_v3 = vld [vmem:[%s15893_s2 + $0x20] sm:$0xff]  ;;  %v10645_v4 = vld [vmem:[%s15893_s2 + $0x18] sm:$0xff]  ;;  %p314_p3 = scmp.lt.s32.totalorder %s9978_s15, 63  ;;  %v10644_v5 = vld [vmem:[%s15893_s2 + $0x10] sm:$0xff]  ;;  %s11728_s24 = smov 64   ;;  %vm1857_vm1 = vcmask 64512  }
   0xd   : > { %10691 = vmatpush.bf16.msra.mxu2 %v10649_v0  ;;  %10692 = vmatpush.bf16.msra.mxu3 %v10649_v0  ;;  %v10643_v6 = vld [vmem:[%s15893_s2 + $0x8] sm:$0xff]  ;;  %v10642_v7 = vld [vmem:[%s15893_s2] sm:$0xff]  ;;  %v10202_v15 = vld [vmem:[%s15894_s3 + $0x70] sm:$0xf]  ;;  %vm9634_vm2 = vcmask 523264   ;;  %vm9667_vm3 = vcmask 785408  }
   0xe   : > { %s16784_s15 = smov (!%p314_p3, %s9978_s15), 63  ;;  %v10681_v16 = vld [vmem:[%s15894_s3 + $0x74] sm:$0xf0]  ;;  %v10194_v18 = vld [vmem:[%s15894_s3 + $0x60] sm:$0xf] }
   0xf   : > { %s9979_s22 = sshll.u32 %s16784_s15, 2  ;;  %v10203_v17 = vor.u32 %v10681_v16, %v10202_v15  ;;  %v10679_v19 = vld [vmem:[%s15894_s3 + $0x64] sm:$0xf0]  ;;  %v10186_v22 = vld [vmem:[%s15894_s3 + $0x50] sm:$0xf] }
  0x10   : > { %528 = vmatpush.bf16.msra.mxu0 %v10648_v1  ;;  %10693 = vmatpush.bf16.msra.mxu1 %v10648_v1  ;;  %s11815_s28 = scalar_lea.vmem %s15891_s0, %s9979_s22  ;;  %v10195_v21 = vor.u32 %v10679_v19, %v10194_v18  ;;  %v10677_v23 = vld [vmem:[%s15894_s3 + $0x54] sm:$0xf0]  ;;  %v10178_v25 = vld [vmem:[%s15894_s3 + $0x40] sm:$0xf]  ;;  %v10675_v26 = vld [vmem:[%s15894_s3 + $0x44] sm:$0xf0]  ;;  %s11909_s23 = scalar_lea.vmem %s15892_s1, %s9979_s22 }
  0x11   : > { %10694 = vmatpush.bf16.msra.mxu2 %v10648_v1  ;;  %10695 = vmatpush.bf16.msra.mxu3 %v10648_v1  ;;  %v10626_v8 = vld [vmem:[%s11815_s28] sm:$0xff]  ;;  %v10629_v9 = vld [vmem:[%s11815_s28 + $0x18] sm:$0xff]  ;;  %v10639_v11 = vld [vmem:[%s11815_s28 + $0x68] sm:$0xff]  ;;  %v10187_v24 = vor.u32 %v10677_v23, %v10186_v22  ;;  %v10179_v27 = vor.u32 %v10675_v26, %v10178_v25 }
  0x12   : > { %v10634_v10 = vld [vmem:[%s11815_s28 + $0x40] sm:$0xff]  ;;  %v10627_v13 = vld [vmem:[%s11815_s28 + $0x8] sm:$0xff]  ;;  %v10640_v20 = vld [vmem:[%s11815_s28 + $0x70] sm:$0xff] }
  0x13   : > { %v10630_v12 = vld [vmem:[%s11815_s28 + $0x20] sm:$0xff]  ;;  %v10635_v14 = vld [vmem:[%s11815_s28 + $0x48] sm:$0xff]  ;;  %v10170_v29 = vld [vmem:[%s15894_s3 + $0x30] sm:$0xf] }
  0x14   : > { %529 = vmatpush.bf16.msra.mxu0 %v10647_v2  ;;  %10696 = vmatpush.bf16.msra.mxu1 %v10647_v2  ;;  %v10631_v28 = vld [vmem:[%s11815_s28 + $0x28] sm:$0xff]  ;;  %v10673_v30 = vld [vmem:[%s15894_s3 + $0x34] sm:$0xf0]  ;;  %v10162_v32 = vld [vmem:[%s15894_s3 + $0x20] sm:$0xf] }
  0x15   : > { %10697 = vmatpush.bf16.msra.mxu2 %v10647_v2  ;;  %10698 = vmatpush.bf16.msra.mxu3 %v10647_v2  ;;  %v10171_v31 = vor.u32 %v10673_v30, %v10170_v29  ;;  %v10671_v33 = vld [vmem:[%s15894_s3 + $0x24] sm:$0xf0]  ;;  %v10641_v34 = vld [vmem:[%s11815_s28 + $0x78] sm:$0xff]  ;;  %v10680_v36 = vld [vmem:[%s15894_s3 + $0x74] sm:$0xf] }
  0x16   : > { %v10163_v35 = vor.u32 %v10671_v33, %v10162_v32  ;;  %v10204_v37 = vld [vmem:[%s15894_s3 + $0x78] sm:$0xf0]  ;;  %v10154_v38 = vld [vmem:[%s15894_s3 + $0x10] sm:$0xf]  ;;  %v10669_v39 = vld [vmem:[%s15894_s3 + $0x14] sm:$0xf0] }
  0x17   : > { %v10207_v40 = vor.u32 %v10680_v36, %v10204_v37  ;;  %v10155_v41 = vor.u32 %v10669_v39, %v10154_v38  ;;  %v10146_v42 = vld [vmem:[%s15894_s3] sm:$0xf]  ;;  %v10667_v43 = vld [vmem:[%s15894_s3 + $0x4] sm:$0xf0]  ;;  %v10632_v45 = vld [vmem:[%s11815_s28 + $0x30] sm:$0xff] }
  0x18   : > { %530 = vmatpush.bf16.msra.mxu0 %v10646_v3  ;;  %10699 = vmatpush.bf16.msra.mxu1 %v10646_v3  ;;  %v10147_v44 = vor.u32 %v10667_v43, %v10146_v42  ;;  %v10636_v46 = vld [vmem:[%s11815_s28 + $0x50] sm:$0xff]  ;;  %v10678_v48 = vld [vmem:[%s15894_s3 + $0x64] sm:$0xf]  ;;  %v10196_v49 = vld [vmem:[%s15894_s3 + $0x68] sm:$0xf0] }
  0x19   : > { %10700 = vmatpush.bf16.msra.mxu2 %v10646_v3  ;;  %10701 = vmatpush.bf16.msra.mxu3 %v10646_v3  ;;  %v10628_v47 = vld [vmem:[%s11815_s28 + $0x10] sm:$0xff]  ;;  %v10199_v50 = vor.u32 %v10678_v48, %v10196_v49  ;;  %v10633_v51 = vld [vmem:[%s11815_s28 + $0x38] sm:$0xff]  ;;  %v10674_v56 = vld [vmem:[%s15894_s3 + $0x44] sm:$0xf] }
  0x1a   : > { %v10676_v52 = vld [vmem:[%s15894_s3 + $0x54] sm:$0xf]  ;;  %v10188_v53 = vld [vmem:[%s15894_s3 + $0x58] sm:$0xf0]  ;;  %v10180_v57 = vld [vmem:[%s15894_s3 + $0x48] sm:$0xf0] }
  0x1b   : > { %v10637_v54 = vld [vmem:[%s11815_s28 + $0x58] sm:$0xff]  ;;  %v10191_v55 = vor.u32 %v10676_v52, %v10188_v53  ;;  %v10183_v58 = vor.u32 %v10674_v56, %v10180_v57  ;;  %v10650_v59 = vld [vmem:[%s11909_s23] sm:$0xff]  ;;  %v10672_v60 = vld [vmem:[%s15894_s3 + $0x34] sm:$0xf] }
  0x1c   : > { %531 = vmatpush.bf16.msra.mxu0 %v10645_v4  ;;  %10702 = vmatpush.bf16.msra.mxu1 %v10645_v4  ;;  %v10172_v61 = vld [vmem:[%s15894_s3 + $0x38] sm:$0xf0]  ;;  %v10638_v62 = vld [vmem:[%s11815_s28 + $0x60] sm:$0xff]  ;;  %v10651_v0 = vld [vmem:[%s11909_s23 + $0x8] sm:$0xff] }
  0x1d   : > { %10703 = vmatpush.bf16.msra.mxu2 %v10645_v4  ;;  %10704 = vmatpush.bf16.msra.mxu3 %v10645_v4  ;;  %v10175_v63 = vor.u32 %v10672_v60, %v10172_v61  ;;  %v10670_v1 = vld [vmem:[%s15894_s3 + $0x24] sm:$0xf]  ;;  %v10164_v2 = vld [vmem:[%s15894_s3 + $0x28] sm:$0xf0]  ;;  %v10668_v4 = vld [vmem:[%s15894_s3 + $0x14] sm:$0xf] }
  0x1e   : > { %v10167_v3 = vor.u32 %v10670_v1, %v10164_v2  ;;  %v10654_v22 = vld [vmem:[%s11909_s23 + $0x20] sm:$0xff]  ;;  %v10655_v30 = vld [vmem:[%s11909_s23 + $0x28] sm:$0xff]  ;;  %v10656_v39 = vld [vmem:[%s11909_s23 + $0x30] sm:$0xff] }
  0x1f   : > { %v10657_v48 = vld [vmem:[%s11909_s23 + $0x38] sm:$0xff]  ;;  %v12066_v56 = vld [vmem:[%s15897_s6] sm:$0x3] }
  0x20   : > { %532 = vmatpush.bf16.msra.mxu0 %v10644_v5  ;;  %10705 = vmatpush.bf16.msra.mxu1 %v10644_v5 }
  0x21   : > { %10706 = vmatpush.bf16.msra.mxu2 %v10644_v5  ;;  %10707 = vmatpush.bf16.msra.mxu3 %v10644_v5  ;;  %v10156_v5 = vld [vmem:[%s15894_s3 + $0x18] sm:$0xf0] }
  0x24   : > { %533 = vmatpush.bf16.msra.mxu0 %v10643_v6  ;;  %10708 = vmatpush.bf16.msra.mxu1 %v10643_v6 }
  0x25   : > { %10709 = vmatpush.bf16.msra.mxu2 %v10643_v6  ;;  %10710 = vmatpush.bf16.msra.mxu3 %v10643_v6  ;;  %v10159_v6 = vor.u32 %v10668_v4, %v10156_v5 }
  0x28   : > { %534 = vmatpush.bf16.msra.mxu0 %v10642_v7  ;;  %10711 = vmatpush.bf16.msra.mxu1 %v10642_v7 }
  0x29   : > { %10712 = vmatpush.bf16.msra.mxu2 %v10642_v7  ;;  %10713 = vmatpush.bf16.msra.mxu3 %v10642_v7  ;;  %v10652_v7 = vld [vmem:[%s11909_s23 + $0x10] sm:$0xff] }
  0x2b   : > { %535 = vmatmul.bf16.vlgmr.msra.gmra.mxu0 %v10626_v8  ;;  %550 = vmatmul.bf16.vlgmr.msra.gmra.mxu1 %v10629_v9  ;;  %v10666_v8 = vld [vmem:[%s15894_s3 + $0x4] sm:$0xf]  ;;  %v10148_v9 = vld [vmem:[%s15894_s3 + $0x8] sm:$0xf0] }
  0x2c   : > { %575 = vmatmul.bf16.vlgmr.msra.gmra.mxu2 %v10634_v10  ;;  %600 = vmatmul.bf16.vlgmr.msra.gmra.mxu3 %v10639_v11  ;;  %v10151_v10 = vor.u32 %v10666_v8, %v10148_v9  ;;  %v11942_v11 = vld [vmem:[%s15896_s5] ss:$0 sm:$0xff] }
  0x2d   : > { %846 = vmatpush.bf16.msrb.mxu1 %v10203_v17  ;;  %935 = vmatpush.bf16.msrb.mxu2 %v10207_v40 }
  0x31   : > { %847 = vmatpush.bf16.msrb.mxu1 %v10195_v21  ;;  %936 = vmatpush.bf16.msrb.mxu2 %v10199_v50 }
  0x35   : > { %848 = vmatpush.bf16.msrb.mxu1 %v10187_v24  ;;  %937 = vmatpush.bf16.msrb.mxu2 %v10191_v55 }
  0x39   : > { %849 = vmatpush.bf16.msrb.mxu1 %v10179_v27  ;;  %938 = vmatpush.bf16.msrb.mxu2 %v10183_v58  ;;  %v12073_v58 = vperm.slane %v12066_v56, 0 }
  0x3b   : > { %555 = vmatmul.bf16.gmra.mxu1 %v10630_v12  ;;  %540 = vmatmul.bf16.gmra.mxu0 %v10627_v13  ;;  %v10653_v12 = vld [vmem:[%s11909_s23 + $0x18] sm:$0xff] }
  0x3c   : > { %580 = vmatmul.bf16.gmra.mxu2 %v10635_v14  ;;  %605 = vmatmul.bf16.gmra.mxu3 %v10640_v20 }
  0x3d   : > { %850 = vmatpush.bf16.msrb.mxu1 %v10171_v31  ;;  %939 = vmatpush.bf16.msrb.mxu2 %v10175_v63 }
  0x41   : > { %851 = vmatpush.bf16.msrb.mxu1 %v10163_v35  ;;  %940 = vmatpush.bf16.msrb.mxu2 %v10167_v3 }
  0x45   : > { %852 = vmatpush.bf16.msrb.mxu1 %v10155_v41  ;;  %941 = vmatpush.bf16.msrb.mxu2 %v10159_v6 }
  0x49   : > { %853 = vmatpush.bf16.msrb.mxu1 %v10147_v44  ;;  %942 = vmatpush.bf16.msrb.mxu2 %v10151_v10 }
  0x4b   : > { %560 = vmatmul.bf16.gmra.mxu1 %v10631_v28  ;;  %545 = vmatmul.bf16.gmra.mxu0 %v10628_v47 }
  0x4c   : > { %610 = vmatmul.bf16.gmra.mxu3 %v10641_v34  ;;  %585 = vmatmul.bf16.gmra.mxu2 %v10636_v46 }
  0x5b   : > { %565 = vmatmul.bf16.gmra.mxu1 %v10632_v45 }
  0x5c   : > { %590 = vmatmul.bf16.gmra.mxu2 %v10637_v54 }
  0x6b   : > { %570 = vmatmul.bf16.gmra.mxu1 %v10633_v51 }
  0x6c   : > { %595 = vmatmul.bf16.gmra.mxu2 %v10638_v62 }
  0x7b   : > { %854 = vmatmul.bf16.vlgmr.msrb.gmra.mxu1 %v10650_v59 }
  0x7c   : > { %943 = vmatmul.bf16.vlgmr.msrb.gmra.mxu2 %v10650_v59  ;;  %v10658_v59 = vld [vmem:[%s11909_s23 + $0x40] sm:$0xff] }
  0x8b   : > { %859 = vmatmul.bf16.gmra.mxu1 %v10651_v0 }
  0x8c   : > { %948 = vmatmul.bf16.gmra.mxu2 %v10651_v0 }
  0x9b   : > { %864 = vmatmul.bf16.gmra.mxu1 %v10652_v7 }
  0x9c   : > { %953 = vmatmul.bf16.gmra.mxu2 %v10652_v7  ;;  %v10659_v7 = vld [vmem:[%s11909_s23 + $0x48] sm:$0xff] }
  0xa8   : > { %v536_v13 = vpop.f32.mrf.mxu0  ;;  %v551_v14 = vpop.f32.mrf.mxu1 }
  0xa9   : > { %v11946_v15 = vadd.f32 %v11942_v11, %v536_v13  ;;  %v11949_v16 = vadd.f32 %v11942_v11, %v551_v14 }
  0xab   : > { %16041 = vst [vmem:[#allocation2_spill] sm:$0xff] %v11946_v15  ;;  %869 = vmatmul.bf16.gmra.mxu1 %v10653_v12  ;;  %3114 = vrot.lane.b32.xlu2 %v11949_v16, %s11727_s21 }
  0xac   : > { %16042 = vst [vmem:[#allocation3_spill] sm:$0xff] %v11949_v16  ;;  %2946 = vrot.lane.b32.xlu1 %v11946_v15, %s11727_s21  ;;  %958 = vmatmul.bf16.gmra.mxu2 %v10653_v12 }
  0xaf   : > { %v576_v17 = vpop.f32.mrf.mxu2  ;;  %v601_v18 = vpop.f32.mrf.mxu3 }
  0xb0   : > { %v11956_v19 = vadd.f32 %v11942_v11, %v576_v17  ;;  %v11959_v20 = vadd.f32 %v11942_v11, %v601_v18  ;;  %v553_v21 = vpop.f32.mrf.mxu1  ;;  %v538_v24 = vpop.f32.mrf.mxu0 }
  0xb1   : > { %v11975_v26 = vadd.f32 %v11942_v11, %v538_v24  ;;  %v11988_v31 = vadd.f32 %v11942_v11, %v553_v21  ;;  %v10660_v21 = vld [vmem:[%s11909_s23 + $0x50] sm:$0xff] }
  0xb2   : > { %16043 = vst [vmem:[#allocation4_spill] sm:$0xff] %v11956_v19  ;;  %3394 = vrot.lane.b32.xlu0 %v11956_v19, %s11727_s21 }
  0xb3   : > { %16044 = vst [vmem:[#allocation5_spill] sm:$0xff] %v11959_v20  ;;  %5058 = vrot.lane.b32.xlu2 %v11946_v15, %s11728_s24 }
  0xb4   : > { %3674 = vrot.lane.b32.xlu1 %v11959_v20, %s11727_s21  ;;  %16045 = vst [vmem:[#allocation6_spill] sm:$0xff] %v11975_v26 }
  0xb5   : > { %16047 = vst [vmem:[#allocation8_spill] sm:$0xff] %v11988_v31 }
  0xb7   : > { %v603_v25 = vpop.f32.mrf.mxu3  ;;  %v578_v29 = vpop.f32.mrf.mxu2 }
  0xb8   : > { %v556_v23 = vpop.f32.mrf.mxu1  ;;  %v11978_v28 = vadd.f32 %v11942_v11, %v603_v25  ;;  %v12002_v35 = vadd.f32 %v11942_v11, %v578_v29  ;;  %v541_v37 = vpop.f32.mrf.mxu0 }
  0xb9   : > { %v12013_v38 = vadd.f32 %v11942_v11, %v541_v37  ;;  %v12025_v41 = vadd.f32 %v11942_v11, %v556_v23  ;;  %v10661_v37 = vld [vmem:[%s11909_s23 + $0x58] sm:$0xff] }
  0xba   : > { %5786 = vrot.lane.b32.xlu0 %v11959_v20, %s11728_s24  ;;  %16046 = vst [vmem:[#allocation7_spill] sm:$0xff] %v11978_v28 }
  0xbb   : > { %874 = vmatmul.bf16.gmra.mxu1 %v10654_v22  ;;  %5226 = vrot.lane.b32.xlu2 %v11949_v16, %s11728_s24  ;;  %16049 = vst [vmem:[#allocation10_spill] sm:$0xff] %v12002_v35 }
  0xbc   : > { %5506 = vrot.lane.b32.xlu1 %v11956_v19, %s11728_s24  ;;  %16050 = vst [vmem:[#allocation11_spill] sm:$0xff] %v12013_v38  ;;  %963 = vmatmul.bf16.gmra.mxu2 %v10654_v22 }
  0xbd   : > { %16051 = vst [vmem:[#allocation12_spill] sm:$0xff] %v12025_v41 }
  0xbf   : > { %v581_v33 = vpop.f32.mrf.mxu2  ;;  %v606_v46 = vpop.f32.mrf.mxu3 }
  0xc0   : > { %v558_v27 = vpop.f32.mrf.mxu1  ;;  %v11999_v34 = vadd.f32 %v11942_v11, %v581_v33  ;;  %v543_v42 = vpop.f32.mrf.mxu0  ;;  %v12039_v47 = vadd.f32 %v11942_v11, %v606_v46 }
  0xc1   : > { %v12030_v45 = vadd.f32 %v11942_v11, %v543_v42  ;;  %v12045_v51 = vadd.f32 %v11942_v11, %v558_v27 }
  0xc2   : > { %2974 = vrot.lane.b32.xlu0 %v11975_v26, %s11727_s21  ;;  %16048 = vst [vmem:[#allocation9_spill] sm:$0xff] %v11999_v34 }
  0xc3   : > { %3702 = vrot.lane.b32.xlu2 %v11978_v28, %s11727_s21  ;;  %16052 = vst [vmem:[#allocation13_spill] sm:$0xff] %v12030_v45 }
  0xc4   : > { %5086 = vrot.lane.b32.xlu1 %v11975_v26, %s11728_s24  ;;  %16053 = vst [vmem:[#allocation14_spill] sm:$0xff] %v12039_v47 }
  0xc5   : > { %16054 = vst [vmem:[#allocation15_spill] sm:$0xff] %v12045_v51 }
  0xc7   : > { %v583_v43 = vpop.f32.mrf.mxu2  ;;  %v608_v52 = vpop.f32.mrf.mxu3 }
  0xc8   : > { %v11990_v32 = vpop.f32.mrf.mxu1  ;;  %v12054_v53 = vadd.f32 %v11942_v11, %v583_v43  ;;  %v12059_v55 = vadd.f32 %v11942_v11, %v608_v52  ;;  %v546_v63 = vpop.f32.mrf.mxu0 }
  0xc9   : > { %v12090_v0 = vadd.f32 %v11942_v11, %v546_v63  ;;  %v12112_v6 = vadd.f32 %v11942_v11, %v11990_v32 }
  0xca   : > { %3142 = vrot.lane.b32.xlu0 %v11988_v31, %s11727_s21  ;;  %16055 = vst [vmem:[#allocation16_spill] sm:$0xff] %v12054_v53 }
  0xcb   : > { %879 = vmatmul.bf16.gmra.mxu1 %v10655_v30  ;;  %5814 = vrot.lane.b32.xlu2 %v11978_v28, %s11728_s24  ;;  %16056 = vst [vmem:[#allocation17_spill] sm:$0xff] %v12059_v55 }
  0xcc   : > { %5254 = vrot.lane.b32.xlu1 %v11988_v31, %s11728_s24  ;;  %968 = vmatmul.bf16.gmra.mxu2 %v10655_v30  ;;  %16058 = vst [vmem:[#allocation19_spill] sm:$0xff] %v12090_v0 }
  0xcd   : > { %16061 = vst [vmem:[#allocation22_spill] sm:$0xff] %v12112_v6 }
  0xcf   : > { %v586_v50 = vpop.f32.mrf.mxu2  ;;  %v611_v1 = vpop.f32.mrf.mxu3 }
  0xd0   : > { %v12004_v36 = vpop.f32.mrf.mxu1  ;;  %v12095_v2 = vadd.f32 %v11942_v11, %v611_v1  ;;  %v12131_v12 = vadd.f32 %v11942_v11, %v586_v50  ;;  %v548_v18 = vpop.f32.mrf.mxu0 }
  0xd1   : > { %v12151_v22 = vadd.f32 %v11942_v11, %v548_v18  ;;  %v12170_v27 = vadd.f32 %v11942_v11, %v12004_v36 }
  0xd2   : > { %5534 = vrot.lane.b32.xlu0 %v12002_v35, %s11728_s24  ;;  %16059 = vst [vmem:[#allocation20_spill] sm:$0xff] %v12095_v2 }
  0xd3   : > { %3450 = vrot.lane.b32.xlu2 %v11999_v34, %s11727_s21  ;;  %16063 = vst [vmem:[#allocation24_spill] sm:$0xff] %v12131_v12 }
  0xd4   : > { %3422 = vrot.lane.b32.xlu1 %v12002_v35, %s11727_s21  ;;  %16066 = vst [vmem:[#allocation27_spill] sm:$0xff] %v12151_v22 }
  0xd5   : > { %16068 = vst [vmem:[#allocation29_spill] sm:$0xff] %v12170_v27 }
  0xd7   : > { %v588_v57 = vpop.f32.mrf.mxu2  ;;  %v613_v36 = vpop.f32.mrf.mxu3 }
  0xd8   : > { %v12016_v40 = vpop.f32.mrf.mxu1  ;;  %v12137_v17 = vadd.f32 %v11942_v11, %v588_v57 }
  0xd9   : > { %v12174_v29 = vadd.f32 %v11942_v11, %v12016_v40 }
  0xda   : > { %5114 = vrot.lane.b32.xlu0 %v12013_v38, %s11728_s24  ;;  %16065 = vst [vmem:[#allocation26_spill] sm:$0xff] %v12137_v17 }
  0xdb   : > { %884 = vmatmul.bf16.gmra.mxu1 %v10656_v39  ;;  %5562 = vrot.lane.b32.xlu2 %v11999_v34, %s11728_s24  ;;  %16069 = vst [vmem:[#allocation30_spill] sm:$0xff] %v12174_v29 }
  0xdc   : > { %3002 = vrot.lane.b32.xlu1 %v12013_v38, %s11727_s21  ;;  %973 = vmatmul.bf16.gmra.mxu2 %v10656_v39  ;;  %v12193_v39 = vadd.f32 %v11942_v11, %v613_v36 }
  0xde   : > { %16071 = vst [vmem:[#allocation32_spill] sm:$0xff] %v12193_v39 }
  0xdf   : > { %v12081_v62 = vpop.f32.mrf.mxu2 }
  0xe0   : > { %v12027_v44 = vpop.f32.mrf.mxu1  ;;  %v12212_v46 = vadd.f32 %v11942_v11, %v12081_v62 }
  0xe2   : > { %5282 = vrot.lane.b32.xlu0 %v12025_v41, %s11728_s24  ;;  %16073 = vst [vmem:[#allocation34_spill] sm:$0xff] %v12212_v46 }
  0xe3   : > { %3030 = vrot.lane.b32.xlu2 %v12030_v45, %s11727_s21 }
  0xe4   : > { %3170 = vrot.lane.b32.xlu1 %v12025_v41, %s11727_s21 }
  0xe7   : > { %v12108_v5 = vpop.f32.mrf.mxu2 }
  0xe8   : > { %v12042_v49 = vpop.f32.mrf.mxu1 }
  0xea   : > { %3730 = vrot.lane.b32.xlu0 %v12039_v47, %s11727_s21 }
  0xeb   : > { %889 = vmatmul.bf16.gmra.mxu1 %v10657_v48  ;;  %3198 = vrot.lane.b32.xlu2 %v12045_v51, %s11727_s21 }
  0xec   : > { %5842 = vrot.lane.b32.xlu1 %v12039_v47, %s11728_s24  ;;  %978 = vmatmul.bf16.gmra.mxu2 %v10657_v48 }
  0xef   : > { %v596_v10 = vpop.f32.mrf.mxu2 }
  0xf0   : > { %v12056_v54 = vpop.f32.mrf.mxu1  ;;  %v12215_v48 = vadd.f32 %v11942_v11, %v596_v10 }
  0xf1   : > { %v12265_v18 = vadd.f32 %v11942_v11, %v12056_v54  ;;  %v12280_v54 = vadd.f32 %v11942_v11, %v12042_v49 }
  0xf2   : > { %3478 = vrot.lane.b32.xlu0 %v12054_v53, %s11727_s21  ;;  %16074 = vst [vmem:[#allocation35_spill] sm:$0xff] %v12215_v48 }
  0xf3   : > { %5142 = vrot.lane.b32.xlu2 %v12030_v45, %s11728_s24  ;;  %16080 = vst [vmem:[#allocation41_spill] sm:$0xff] %v12265_v18 }
  0xf4   : > { %3758 = vrot.lane.b32.xlu1 %v12059_v55, %s11727_s21  ;;  %16081 = vst [vmem:[#allocation42_spill] sm:$0xff] %v12280_v54 }
  0xf7   : > { %v12153_v24 = vpop.f32.mrf.mxu2 }
  0xf8   : > { %v855_v60 = vpop.f32.mrf.mxu1  ;;  %v12298_v49 = vadd.f32 %v11942_v11, %v12153_v24 }
  0xf9   : > { %v12077_v61 = vadd.f32 %v855_v60, %v12073_v58  ;;  %v12235_v60 = vadd.f32 %v11942_v11, %v12027_v44  ;;  %v12253_v44 = vperm.slane %v12066_v56, 1  ;;  %v10663_v56 = vld [vmem:[%s11909_s23 + $0x68] sm:$0xff] }
  0xfa   : > { %5870 = vrot.lane.b32.xlu0 %v12059_v55, %s11728_s24  ;;  %16083 = vst [vmem:[#allocation44_spill] sm:$0xff] %v12298_v49 }
  0xfb   : > { %16057 = vst [vmem:[#allocation18_spill] sm:$0xff] %v12077_v61  ;;  %894 = vmatmul.bf16.gmra.mxu1 %v10658_v59  ;;  %10208 = vmatpush.xpose.msk.msrb.mxu3 %vm1024_vm0, %v12077_v61 }
  0xfc   : > { %5310 = vrot.lane.b32.xlu2 %v12045_v51, %s11728_s24  ;;  %5590 = vrot.lane.b32.xlu1 %v12054_v53, %s11728_s24  ;;  %16076 = vst [vmem:[#allocation37_spill] sm:$0xff] %v12235_v60 }
  0xfd   : > { %983 = vmatmul.bf16.gmra.mxu2 %v10658_v59  ;;  %v10662_v59 = vld [vmem:[%s11909_s23 + $0x60] sm:$0xff] }
  0xfe   : > { %10209 = vmatmul.msk.f32.vlgmr.msrb.gmra.mxu3 %vm1024_vm0, %v11946_v15 }
  0xff   : > { %v12176_v32 = vpop.f32.mrf.mxu2 }
 0x100   : > { %v857_v3 = vpop.f32.mrf.mxu1 }
 0x101   : > { %v12098_v4 = vadd.f32 %v857_v3, %v12073_v58  ;;  %v12257_v3 = vadd.f32 %v11942_v11, %v12108_v5  ;;  %v12317_v11 = vadd.f32 %v12176_v32, %v12253_v44 }
 0x102   : > { %3058 = vrot.lane.b32.xlu0 %v12090_v0, %s11727_s21 }
 0x103   : > { %16060 = vst [vmem:[#allocation21_spill] sm:$0xff] %v12098_v4  ;;  %10210 = vmatpush.xpose.msk.msra.mxu3 %vm1024_vm0, %v12098_v4 }
 0x104   : > { %3786 = vrot.lane.b32.xlu2 %v12095_v2, %s11727_s21  ;;  %5170 = vrot.lane.b32.xlu1 %v12090_v0, %s11728_s24  ;;  %16078 = vst [vmem:[#allocation39_spill] sm:$0xff] %v12257_v3 }
 0x106   : > { %10211 = vmatmul.msk.f32.vlgmr.msra.gmra.mxu3 %vm1024_vm0, %v11975_v26 }
 0x107   : > { %v12195_v42 = vpop.f32.mrf.mxu2 }
 0x108   : > { %v860_v8 = vpop.f32.mrf.mxu1  ;;  %v12321_v24 = vadd.f32 %v12195_v42, %v12253_v44 }
 0x109   : > { %v12118_v9 = vadd.f32 %v860_v8, %v12073_v58 }
 0x10a   : > { %3226 = vrot.lane.b32.xlu0 %v12112_v6, %s11727_s21  ;;  %v12335_v32 = vpack.i.bf16 %v12321_v24, %v12317_v11 }
 0x10b   : > { %16062 = vst [vmem:[#allocation23_spill] sm:$0xff] %v12118_v9  ;;  %899 = vmatmul.bf16.gmra.mxu1 %v10659_v7  ;;  %10212 = vmatpush.xpose.msk.msrb.mxu3 %vm1024_vm0, %v12118_v9 }
 0x10c   : > { %5898 = vrot.lane.b32.xlu2 %v12095_v2, %s11728_s24  ;;  %5338 = vrot.lane.b32.xlu1 %v12112_v6, %s11728_s24  ;;  %16087 = vst [vmem:[#allocation48_spill] sm:$0xff] %v12335_v32 }
 0x10d   : > { %988 = vmatmul.bf16.gmra.mxu2 %v10659_v7 }
 0x10e   : > { %10213 = vmatmul.msk.f32.vlgmr.msrb.gmra.mxu3 %vm1024_vm0, %v12013_v38 }
 0x10f   : > { %v12217_v52 = vpop.f32.mrf.mxu2 }
 0x110   : > { %v862_v13 = vpop.f32.mrf.mxu1 }
 0x111   : > { %v12134_v14 = vadd.f32 %v862_v13, %v12073_v58 }
 0x112   : > { %5618 = vrot.lane.b32.xlu0 %v12131_v12, %s11728_s24 }
 0x113   : > { %16064 = vst [vmem:[#allocation25_spill] sm:$0xff] %v12134_v14  ;;  %10214 = vmatpush.xpose.msk.msra.mxu3 %vm1024_vm0, %v12134_v14 }
 0x114   : > { %3534 = vrot.lane.b32.xlu2 %v12137_v17, %s11727_s21  ;;  %3506 = vrot.lane.b32.xlu1 %v12131_v12, %s11727_s21 }
 0x116   : > { %10215 = vmatmul.msk.f32.vlgmr.msra.gmra.mxu3 %vm1024_vm0, %v12030_v45 }
 0x117   : > { %v12237_v63 = vpop.f32.mrf.mxu2 }
 0x118   : > { %v865_v23 = vpop.f32.mrf.mxu1 }
 0x119   : > { %v12156_v25 = vadd.f32 %v865_v23, %v12073_v58 }
 0x11a   : > { %5198 = vrot.lane.b32.xlu0 %v12151_v22, %s11728_s24 }
 0x11b   : > { %16067 = vst [vmem:[#allocation28_spill] sm:$0xff] %v12156_v25  ;;  %904 = vmatmul.bf16.gmra.mxu1 %v10660_v21  ;;  %10216 = vmatpush.xpose.msk.msrb.mxu3 %vm1024_vm0, %v12156_v25 }
 0x11c   : > { %5646 = vrot.lane.b32.xlu2 %v12137_v17, %s11728_s24  ;;  %3086 = vrot.lane.b32.xlu1 %v12151_v22, %s11727_s21 }
 0x11d   : > { %993 = vmatmul.bf16.gmra.mxu2 %v10660_v21 }
 0x11e   : > { %10217 = vmatmul.msk.f32.vlgmr.msrb.gmra.mxu3 %vm1024_vm0, %v12090_v0 }
 0x11f   : > { %v954_v8 = vpop.f32.mrf.mxu2 }
 0x120   : > { %v867_v30 = vpop.f32.mrf.mxu1  ;;  %v955_v13 = vadd.f32 %v954_v8, %v12253_v44 }
 0x121   : > { %v12179_v33 = vadd.f32 %v867_v30, %v12073_v58 }
 0x122   : > { %5366 = vrot.lane.b32.xlu0 %v12170_v27, %s11728_s24  ;;  %2320 = vmatpush.msrb.mxu0 %v955_v13 }
 0x123   : > { %16070 = vst [vmem:[#allocation31_spill] sm:$0xff] %v12179_v33  ;;  %10218 = vmatpush.xpose.msk.msra.mxu3 %vm1024_vm0, %v12179_v33 }
 0x124   : > { %3282 = vrot.lane.b32.xlu2 %v12174_v29, %s11727_s21  ;;  %3254 = vrot.lane.b32.xlu1 %v12170_v27, %s11727_s21 }
 0x126   : > { %10219 = vmatmul.msk.f32.vlgmr.msra.gmra.mxu3 %vm1024_vm0, %v12151_v22 }
 0x127   : > { %v956_v21 = vpop.f32.mrf.mxu2 }
 0x128   : > { %v870_v40 = vpop.f32.mrf.mxu1  ;;  %v957_v30 = vadd.f32 %v956_v21, %v12253_v44 }
 0x129   : > { %v12198_v43 = vadd.f32 %v870_v40, %v12073_v58 }
 0x12a   : > { %3814 = vrot.lane.b32.xlu0 %v12193_v39, %s11727_s21  ;;  %2343 = vmatpush.msra.mxu1 %v957_v30 }
 0x12b   : > { %16072 = vst [vmem:[#allocation33_spill] sm:$0xff] %v12198_v43  ;;  %909 = vmatmul.bf16.gmra.mxu1 %v10661_v37  ;;  %10220 = vmatpush.xpose.msk.msrb.mxu3 %vm1024_vm0, %v12198_v43 }
 0x12c   : > { %5394 = vrot.lane.b32.xlu2 %v12174_v29, %s11728_s24  ;;  %5926 = vrot.lane.b32.xlu1 %v12193_v39, %s11728_s24 }
 0x12d   : > { %998 = vmatmul.bf16.gmra.mxu2 %v10661_v37  ;;  %v10664_v37 = vld [vmem:[%s11909_s23 + $0x70] sm:$0xff] }
 0x12e   : > { %10221 = vmatmul.msk.f32.vlgmr.msrb.gmra.mxu3 %vm1024_vm0, %v11949_v16 }
 0x12f   : > { %v959_v40 = vpop.f32.mrf.mxu2 }
 0x130   : > { %v872_v50 = vpop.f32.mrf.mxu1 }
 0x131   : > { %v12220_v57 = vadd.f32 %v872_v50, %v12073_v58 }
 0x132   : > { %3562 = vrot.lane.b32.xlu0 %v12212_v46, %s11727_s21 }
 0x133   : > { %16075 = vst [vmem:[#allocation36_spill] sm:$0xff] %v12220_v57  ;;  %10222 = vmatpush.xpose.msk.msra.mxu3 %vm1024_vm0, %v12220_v57 }
 0x134   : > { %3618 = vrot.lane.b32.xlu2 %v12215_v48, %s11727_s21  ;;  %5674 = vrot.lane.b32.xlu1 %v12212_v46, %s11728_s24 }
 0x136   : > { %10223 = vmatmul.msk.f32.vlgmr.msra.gmra.mxu3 %vm1024_vm0, %v11988_v31 }
 0x137   : > { %v961_v8 = vpop.f32.mrf.mxu2 }
 0x138   : > { %v875_v62 = vpop.f32.mrf.mxu1 }
 0x139   : > { %v12240_v1 = vadd.f32 %v875_v62, %v12073_v58  ;;  %v12304_v62 = vadd.f32 %v959_v40, %v12253_v44  ;;  %v12363_v40 = vadd.f32 %v12237_v63, %v12253_v44 }
 0x13a   : > { %3310 = vrot.lane.b32.xlu0 %v12235_v60, %s11727_s21 }
 0x13b   : > { %16077 = vst [vmem:[#allocation38_spill] sm:$0xff] %v12240_v1  ;;  %914 = vmatmul.bf16.gmra.mxu1 %v10662_v59  ;;  %10224 = vmatpush.xpose.msk.msrb.mxu3 %vm1024_vm0, %v12240_v1 }
 0x13c   : > { %5730 = vrot.lane.b32.xlu2 %v12215_v48, %s11728_s24  ;;  %5422 = vrot.lane.b32.xlu1 %v12235_v60, %s11728_s24 }
 0x13d   : > { %2366 = vmatpush.msra.mxu2 %v12304_v62 }
 0x13e   : > { %10225 = vmatmul.msk.f32.vlgmr.msrb.gmra.mxu3 %vm1024_vm0, %v12025_v41  ;;  %1003 = vmatmul.bf16.gmra.mxu2 %v10662_v59  ;;  %v12359_v59 = vadd.f32 %v12217_v52, %v12253_v44 }
 0x140   : > { %v877_v7 = vpop.f32.mrf.mxu1  ;;  %v12376_v52 = vpack.i.bf16 %v12363_v40, %v12359_v59 }
 0x141   : > { %v12260_v10 = vadd.f32 %v877_v7, %v12073_v58 }
 0x142   : > { %5702 = vrot.lane.b32.xlu0 %v12257_v3, %s11728_s24  ;;  %16090 = vst [vmem:[#allocation51_spill] sm:$0xff] %v12376_v52 }
 0x143   : > { %16079 = vst [vmem:[#allocation40_spill] sm:$0xff] %v12260_v10  ;;  %10226 = vmatpush.xpose.msk.msra.mxu3 %vm1024_vm0, %v12260_v10 }
 0x144   : > { %3366 = vrot.lane.b32.xlu2 %v12265_v18, %s11727_s21  ;;  %3590 = vrot.lane.b32.xlu1 %v12257_v3, %s11727_s21 }
 0x146   : > { %10227 = vmatmul.msk.f32.vlgmr.msra.gmra.mxu3 %vm1024_vm0, %v12045_v51 }
 0x148   : > { %v880_v5 = vpop.f32.mrf.mxu1 }
 0x149   : > { %v12283_v23 = vadd.f32 %v880_v5, %v12073_v58  ;;  %v12326_v5 = vpack.i.bf16 %v957_v30, %v955_v13  ;;  %v964_v13 = vpop.f32.mrf.mxu2 }
 0x14a   : > { %5450 = vrot.lane.b32.xlu0 %v12280_v54, %s11728_s24 }
 0x14b   : > { %16082 = vst [vmem:[#allocation43_spill] sm:$0xff] %v12283_v23  ;;  %919 = vmatmul.bf16.gmra.mxu1 %v10663_v56  ;;  %10228 = vmatpush.xpose.msk.msrb.mxu3 %vm1024_vm0, %v12283_v23 }
 0x14c   : > { %5478 = vrot.lane.b32.xlu2 %v12265_v18, %s11728_s24  ;;  %3338 = vrot.lane.b32.xlu1 %v12280_v54, %s11727_s21  ;;  %16085 = vst [vmem:[#allocation46_spill] sm:$0xff] %v12326_v5 }
 0x14e   : > { %10229 = vmatmul.msk.f32.vlgmr.msrb.gmra.mxu3 %vm1024_vm0, %v12112_v6  ;;  %1008 = vmatmul.bf16.gmra.mxu2 %v10663_v56 }
 0x150   : > { %v882_v36 = vpop.f32.mrf.mxu1 }
 0x151   : > { %v12301_v50 = vadd.f32 %v882_v36, %v12073_v58  ;;  %v965_v36 = vadd.f32 %v964_v13, %v12253_v44  ;;  %v966_v13 = vpop.f32.mrf.mxu2 }
 0x152   : > { %3646 = vrot.lane.b32.xlu0 %v12298_v49, %s11727_s21 }
 0x153   : > { %16084 = vst [vmem:[#allocation45_spill] sm:$0xff] %v12301_v50  ;;  %10230 = vmatpush.xpose.msk.msra.mxu3 %vm1024_vm0, %v12301_v50  ;;  %2412 = vmatpush.msra.mxu0 %v965_v36 }
 0x154   : > { %2948 = vrot.lane.b32.xlu2 %v12077_v61, %s11727_s21  ;;  %5758 = vrot.lane.b32.xlu1 %v12298_v49, %s11728_s24 }
 0x156   : > { %10231 = vmatmul.msk.f32.vlgmr.msra.gmra.mxu3 %vm1024_vm0, %v12170_v27 }
 0x158   : > { %v885_v7 = vpop.f32.mrf.mxu1 }
 0x159   : > { %v12329_v21 = vadd.f32 %v885_v7, %v12073_v58  ;;  %v10665_v7 = vld [vmem:[%s11909_s23 + $0x78] sm:$0xff]  ;;  %s11729_s23 = smov 32  }
 0x15a   : > { %5060 = vrot.lane.b32.xlu0 %v12077_v61, %s11728_s24 }
 0x15b   : > { %16086 = vst [vmem:[#allocation47_spill] sm:$0xff] %v12329_v21  ;;  %924 = vmatmul.bf16.gmra.mxu1 %v10664_v37  ;;  %10232 = vmatpush.xpose.msk.msrb.mxu3 %vm1024_vm0, %v12329_v21 }
 0x15c   : > { %2976 = vrot.lane.b32.xlu2 %v12098_v4, %s11727_s21  ;;  %10731 = vrot.lane.b32.xlu1 %v12335_v32, %s11728_s24 }
 0x15e   : > { %10233 = vmatmul.msk.f32.vlgmr.msrb.gmra.mxu3 %vm1024_vm0, %v12174_v29  ;;  %v967_v29 = vadd.f32 %v966_v13, %v12253_v44  ;;  %1013 = vmatmul.bf16.gmra.mxu2 %v10664_v37  ;;  %v12430_v37 = vadd.f32 %v961_v8, %v12253_v44 }
 0x160   : > { %v887_v42 = vpop.f32.mrf.mxu1  ;;  %2435 = vmatpush.msrb.mxu1 %v967_v29 }
 0x161   : > { %v12346_v30 = vadd.f32 %v887_v42, %v12073_v58 }
 0x162   : > { %10726 = vrot.lane.b32.xlu0 %v12335_v32, %s11727_s21 }
 0x163   : > { %16088 = vst [vmem:[#allocation49_spill] sm:$0xff] %v12346_v30  ;;  %10234 = vmatpush.xpose.msk.msra.mxu3 %vm1024_vm0, %v12346_v30 }
 0x164   : > { %5088 = vrot.lane.b32.xlu2 %v12098_v4, %s11728_s24  ;;  %5116 = vrot.lane.b32.xlu1 %v12118_v9, %s11728_s24 }
 0x166   : > { %10235 = vmatmul.msk.f32.vlgmr.msra.gmra.mxu3 %vm1024_vm0, %v12235_v60 }
 0x168   : > { %v890_v42 = vpop.f32.mrf.mxu1 }
 0x169   : > { %v12369_v32 = vadd.f32 %v890_v42, %v12073_v58  ;;  %v969_v42 = vpop.f32.mrf.mxu2 }
 0x16a   : > { %3004 = vrot.lane.b32.xlu0 %v12118_v9, %s11727_s21  ;;  %v12390_v60 = vadd.f32 %v969_v42, %v12253_v44 }
 0x16b   : > { %16089 = vst [vmem:[#allocation50_spill] sm:$0xff] %v12369_v32  ;;  %929 = vmatmul.bf16.gmra.mxu1 %v10665_v7  ;;  %10236 = vmatpush.xpose.msk.msrb.mxu3 %vm1024_vm0, %v12369_v32 }
 0x16c   : > { %10736 = vrot.lane.b32.xlu2 %v12376_v52, %s11727_s21  ;;  %3032 = vrot.lane.b32.xlu1 %v12134_v14, %s11727_s21 }
 0x16d   : > { %2458 = vmatpush.msrb.mxu2 %v12390_v60 }
 0x16e   : > { %10237 = vmatmul.msk.f32.vlgmr.msrb.gmra.mxu3 %vm1024_vm0, %v12280_v54  ;;  %1018 = vmatmul.bf16.gmra.mxu2 %v10665_v7 }
 0x170   : > { %v892_v63 = vpop.f32.mrf.mxu1 }
 0x171   : > { %v12387_v13 = vadd.f32 %v892_v63, %v12073_v58  ;;  %v12403_v63 = vpack.i.bf16 %v967_v29, %v965_v36  ;;  %v971_v7 = vpop.f32.mrf.mxu2 }
 0x172   : > { %5144 = vrot.lane.b32.xlu0 %v12134_v14, %s11728_s24 }
 0x173   : > { %16091 = vst [vmem:[#allocation52_spill] sm:$0xff] %v12387_v13  ;;  %10238 = vmatpush.xpose.msk.msra.mxu3 %vm1024_vm0, %v12387_v13 }
 0x174   : > { %10741 = vrot.lane.b32.xlu2 %v12376_v52, %s11728_s24  ;;  %5200 = vrot.lane.b32.xlu1 %v12179_v33, %s11728_s24  ;;  %16092 = vst [vmem:[#allocation53_spill] sm:$0xff] %v12403_v63 }
 0x176   : > { %10239 = vmatmul.msk.f32.vlgmr.msra.gmra.mxu3 %vm1024_vm0, %v12265_v18 }
 0x178   : > { %v895_v56 = vpop.f32.mrf.mxu1 }
 0x179   : > { %v12406_v42 = vadd.f32 %v895_v56, %v12073_v58 }
 0x17a   : > { %3088 = vrot.lane.b32.xlu0 %v12179_v33, %s11727_s21 }
 0x17b   : > { %16093 = vst [vmem:[#allocation54_spill] sm:$0xff] %v12406_v42  ;;  %10240 = vmatpush.xpose.msk.msrb.mxu3 %vm1024_vm0, %v12406_v42 }
 0x17c   : > { %3060 = vrot.lane.b32.xlu2 %v12156_v25, %s11727_s21  ;;  %10746 = vrot.lane.b32.xlu1 %v12326_v5, %s11727_s21 }
 0x17e   : > { %10241 = vmatmul.msk.f32.vlgmr.msrb.gmra.mxu3 %vm1024_vm0, %v11956_v19 }
 0x180   : > { %v897_v29 = vpop.f32.mrf.mxu1 }
 0x181   : > { %v12419_v36 = vadd.f32 %v897_v29, %v12073_v58 }
 0x182   : > { %10751 = vrot.lane.b32.xlu0 %v12326_v5, %s11728_s24  ;;  %v12441_v5 = vpack.i.bf16 %v12430_v37, %v12304_v62 }
 0x183   : > { %16094 = vst [vmem:[#allocation55_spill] sm:$0xff] %v12419_v36  ;;  %10242 = vmatpush.xpose.msk.msra.mxu3 %vm1024_vm0, %v12419_v36 }
 0x184   : > { %5172 = vrot.lane.b32.xlu2 %v12156_v25, %s11728_s24  ;;  %3116 = vrot.lane.b32.xlu1 %v12198_v43, %s11727_s21  ;;  %16096 = vst [vmem:[#allocation57_spill] sm:$0xff] %v12441_v5 }
 0x186   : > { %10243 = vmatmul.msk.f32.vlgmr.msra.gmra.mxu3 %vm1024_vm0, %v12002_v35  ;;  %v12514_v35 = vpop.f32.mrf.mxu3 }
 0x188   : > { %v900_v56 = vpop.f32.mrf.mxu1 }
 0x189   : > { %v12435_v29 = vadd.f32 %v900_v56, %v12073_v58 }
 0x18a   : > { %5228 = vrot.lane.b32.xlu0 %v12198_v43, %s11728_s24 }
 0x18b   : > { %16095 = vst [vmem:[#allocation56_spill] sm:$0xff] %v12435_v29  ;;  %10244 = vmatpush.xpose.msk.msrb.mxu3 %vm1024_vm0, %v12435_v29 }
 0x18c   : > { %3144 = vrot.lane.b32.xlu2 %v12220_v57, %s11727_s21  ;;  %10761 = vrot.lane.b32.xlu1 %v12441_v5, %s11728_s24 }
 0x18e   : > { %10245 = vmatmul.msk.f32.vlgmr.msrb.gmra.mxu3 %vm1024_vm0, %v11999_v34  ;;  %v12544_v18 = vpop.f32.mrf.mxu3 }
 0x190   : > { %v902_v8 = vpop.f32.mrf.mxu1 }
 0x191   : > { %v12452_v56 = vadd.f32 %v902_v8, %v12073_v58 }
 0x192   : > { %10756 = vrot.lane.b32.xlu0 %v12441_v5, %s11727_s21 }
 0x193   : > { %16097 = vst [vmem:[#allocation58_spill] sm:$0xff] %v12452_v56  ;;  %10246 = vmatpush.xpose.msk.msra.mxu3 %vm1024_vm0, %v12452_v56 }
 0x194   : > { %5256 = vrot.lane.b32.xlu2 %v12220_v57, %s11728_s24  ;;  %5284 = vrot.lane.b32.xlu1 %v12240_v1, %s11728_s24 }
 0x196   : > { %10247 = vmatmul.msk.f32.vlgmr.msra.gmra.mxu3 %vm1024_vm0, %v12054_v53 }
 0x198   : > { %v905_v62 = vpop.f32.mrf.mxu1 }
 0x199   : > { %v12465_v8 = vadd.f32 %v905_v62, %v12073_v58  ;;  %v974_v62 = vpop.f32.mrf.mxu2 }
 0x19a   : > { %3172 = vrot.lane.b32.xlu0 %v12240_v1, %s11727_s21 }
 0x19b   : > { %16098 = vst [vmem:[#allocation59_spill] sm:$0xff] %v12465_v8  ;;  %10248 = vmatpush.xpose.msk.msrb.mxu3 %vm1024_vm0, %v12465_v8 }
 0x19c   : > { %10766 = vrot.lane.b32.xlu2 %v12403_v63, %s11727_s21  ;;  %3200 = vrot.lane.b32.xlu1 %v12260_v10, %s11727_s21 }
 0x19e   : > { %10249 = vmatmul.msk.f32.vlgmr.msrb.gmra.mxu3 %vm1024_vm0, %v12131_v12  ;;  %v12502_v12 = vadd.f32 %v971_v7, %v12253_v44 }
 0x1a0   : > { %v907_v5 = vpop.f32.mrf.mxu1  ;;  %v12523_v7 = vpack.i.bf16 %v12502_v12, %v12390_v60  ;;  %v12539_v60 = vpop.permute.xlu1 %2946 }
 0x1a1   : > { %v12478_v52 = vadd.f32 %v907_v5, %v12073_v58  ;;  %v976_v34 = vpop.f32.mrf.mxu2  ;;  %16106 = vst [vmem:[#allocation67_spill] sm:$0xff] %v12539_v60 }
 0x1a2   : > { %5312 = vrot.lane.b32.xlu0 %v12260_v10, %s11728_s24  ;;  %16103 = vst [vmem:[#allocation64_spill] sm:$0xff] %v12523_v7 }
 0x1a3   : > { %16099 = vst [vmem:[#allocation60_spill] sm:$0xff] %v12478_v52  ;;  %10250 = vmatpush.xpose.msk.msra.mxu3 %vm1024_vm0, %v12478_v52 }
 0x1a4   : > { %3228 = vrot.lane.b32.xlu2 %v12283_v23, %s11727_s21  ;;  %5368 = vrot.lane.b32.xlu1 %v12301_v50, %s11728_s24 }
 0x1a6   : > { %10251 = vmatmul.msk.f32.vlgmr.msra.gmra.mxu3 %vm1024_vm0, %v12137_v17  ;;  %v12505_v17 = vadd.f32 %v974_v62, %v12253_v44 }
 0x1a8   : > { %v910_v53 = vpop.f32.mrf.mxu1 }
 0x1a9   : > { %v12491_v5 = vadd.f32 %v910_v53, %v12073_v58  ;;  %v12508_v53 = vadd.f32 %v976_v34, %v12253_v44  ;;  %v979_v27 = vpop.f32.mrf.mxu2 }
 0x1aa   : > { %10771 = vrot.lane.b32.xlu0 %v12403_v63, %s11728_s24  ;;  %v12512_v63 = vpop.permute.xlu2 %3114 }
 0x1ab   : > { %16100 = vst [vmem:[#allocation61_spill] sm:$0xff] %v12491_v5  ;;  %10252 = vmatpush.xpose.msk.msrb.mxu3 %vm1024_vm0, %v12491_v5  ;;  %v12527_v34 = vpack.i.bf16 %v12508_v53, %v12505_v17 }
 0x1ac   : > { %5340 = vrot.lane.b32.xlu2 %v12283_v23, %s11728_s24  ;;  %3284 = vrot.lane.b32.xlu1 %v12329_v21, %s11727_s21  ;;  %16101 = vst [vmem:[#allocation62_spill] sm:$0xff] %v12512_v63 }
 0x1ad   : > { %16104 = vst [vmem:[#allocation65_spill] sm:$0xff] %v12527_v34 }
 0x1ae   : > { %10253 = vmatmul.msk.f32.vlgmr.msrb.gmra.mxu3 %vm1024_vm0, %v12212_v46 }
 0x1b0   : > { %v912_v19 = vpop.f32.mrf.mxu1 }
 0x1b1   : > { %v12517_v54 = vadd.f32 %v912_v19, %v12073_v58 }
 0x1b2   : > { %3256 = vrot.lane.b32.xlu0 %v12301_v50, %s11727_s21  ;;  %v12537_v62 = vpop.permute.xlu2 %5058  ;;  %v12565_v50 = vpop.permute.xlu1 %3674 }
 0x1b3   : > { %16102 = vst [vmem:[#allocation63_spill] sm:$0xff] %v12517_v54  ;;  %10254 = vmatpush.xpose.msk.msra.mxu3 %vm1024_vm0, %v12517_v54 }
 0x1b4   : > { %10781 = vrot.lane.b32.xlu2 %v12523_v7, %s11728_s24  ;;  %10786 = vrot.lane.b32.xlu1 %v12527_v34, %s11727_s21  ;;  %16105 = vst [vmem:[#allocation66_spill] sm:$0xff] %v12537_v62 }
 0x1b5   : > { %16111 = vst [vmem:[#allocation72_spill] sm:$0xff] %v12565_v50 }
 0x1b6   : > { %10255 = vmatmul.msk.f32.vlgmr.msra.gmra.mxu3 %vm1024_vm0, %v12257_v3  ;;  %v12556_v3 = vpop.permute.xlu0 %3394 }
 0x1b7   : > { %16108 = vst [vmem:[#allocation69_spill] sm:$0xff] %v12556_v3 }
 0x1b8   : > { %v915_v19 = vpop.f32.mrf.mxu1 }
 0x1b9   : > { %v12542_v46 = vadd.f32 %v915_v19, %v12073_v58 }
 0x1ba   : > { %10776 = vrot.lane.b32.xlu0 %v12523_v7, %s11727_s21  ;;  %v12563_v7 = vpop.permute.xlu2 %5226 }
 0x1bb   : > { %16107 = vst [vmem:[#allocation68_spill] sm:$0xff] %v12542_v46  ;;  %10256 = vmatpush.xpose.msk.msrb.mxu3 %vm1024_vm0, %v12542_v46 }
 0x1bc   : > { %3312 = vrot.lane.b32.xlu2 %v12346_v30, %s11727_s21  ;;  %10791 = vrot.lane.b32.xlu1 %v12527_v34, %s11728_s24  ;;  %16110 = vst [vmem:[#allocation71_spill] sm:$0xff] %v12563_v7  ;;  %v12569_v34 = vpop.f32.mrf.mxu3 }
 0x1be   : > { %10257 = vmatmul.msk.f32.vlgmr.msrb.gmra.mxu3 %vm1024_vm0, %v12215_v48  ;;  %v12576_v48 = vadd.f32 %v979_v27, %v12253_v44  ;;  %v12592_v50 = vpop.permute.xlu0 %5786 }
 0x1bf   : > { %16114 = vst [vmem:[#allocation75_spill] sm:$0xff] %v12592_v50 }
 0x1c0   : > { %v917_v19 = vpop.f32.mrf.mxu1 }
 0x1c1   : > { %v12559_v62 = vadd.f32 %v917_v19, %v12073_v58  ;;  %v981_v19 = vpop.f32.mrf.mxu2 }
 0x1c2   : > { %5396 = vrot.lane.b32.xlu0 %v12329_v21, %s11728_s24  ;;  %v12579_v21 = vadd.f32 %v981_v19, %v12253_v44  ;;  %v12600_v27 = vpop.permute.xlu2 %3702 }
 0x1c3   : > { %16109 = vst [vmem:[#allocation70_spill] sm:$0xff] %v12559_v62  ;;  %10258 = vmatpush.xpose.msk.msra.mxu3 %vm1024_vm0, %v12559_v62 }
 0x1c4   : > { %5424 = vrot.lane.b32.xlu2 %v12346_v30, %s11728_s24  ;;  %5452 = vrot.lane.b32.xlu1 %v12369_v32, %s11728_s24  ;;  %v12590_v30 = vpack.i.bf16 %v12579_v21, %v12576_v48  ;;  %16115 = vst [vmem:[#allocation76_spill] sm:$0xff] %v12600_v27  ;;  %v12604_v19 = vpop.f32.mrf.mxu3 }
 0x1c6   : > { %10259 = vmatmul.msk.f32.vlgmr.msra.gmra.mxu3 %vm1024_vm0, %v12298_v49  ;;  %16113 = vst [vmem:[#allocation74_spill] sm:$0xff] %v12590_v30 }
 0x1c8   : > { %v920_v7 = vpop.f32.mrf.mxu1 }
 0x1c9   : > { %v12584_v6 = vadd.f32 %v920_v7, %v12073_v58  ;;  %v12602_v7 = vpop.permute.xlu1 %5506 }
 0x1ca   : > { %3340 = vrot.lane.b32.xlu0 %v12369_v32, %s11727_s21  ;;  %16116 = vst [vmem:[#allocation77_spill] sm:$0xff] %v12602_v7  ;;  %v12619_v7 = vpop.permute.xlu0 %2974 }
 0x1cb   : > { %16112 = vst [vmem:[#allocation73_spill] sm:$0xff] %v12584_v6  ;;  %10260 = vmatpush.xpose.msk.msrb.mxu3 %vm1024_vm0, %v12584_v6 }
 0x1cc   : > { %10796 = vrot.lane.b32.xlu2 %v12590_v30, %s11727_s21  ;;  %3368 = vrot.lane.b32.xlu1 %v12387_v13, %s11727_s21  ;;  %16118 = vst [vmem:[#allocation79_spill] sm:$0xff] %v12619_v7  ;;  %v12627_v32 = vpop.f32.mrf.mxu3 }
 0x1ce   : > { %10261 = vmatmul.msk.f32.vlgmr.msrb.gmra.mxu3 %vm1024_vm0, %v11959_v20  ;;  %v12623_v20 = vpop.permute.xlu2 %5814 }
 0x1cf   : > { %16119 = vst [vmem:[#allocation80_spill] sm:$0xff] %v12623_v20 }
 0x1d0   : > { %v922_v49 = vpop.f32.mrf.mxu1 }
 0x1d1   : > { %v12609_v50 = vadd.f32 %v922_v49, %v12073_v58  ;;  %v12625_v49 = vpop.permute.xlu1 %5086 }
 0x1d2   : > { %5480 = vrot.lane.b32.xlu0 %v12387_v13, %s11728_s24  ;;  %16120 = vst [vmem:[#allocation81_spill] sm:$0xff] %v12625_v49 }
 0x1d3   : > { %16117 = vst [vmem:[#allocation78_spill] sm:$0xff] %v12609_v50  ;;  %10262 = vmatpush.xpose.msk.msra.mxu3 %vm1024_vm0, %v12609_v50 }
 0x1d4   : > { %3396 = vrot.lane.b32.xlu2 %v12406_v42, %s11727_s21  ;;  %5536 = vrot.lane.b32.xlu1 %v12419_v36, %s11728_s24  ;;  %v12649_v7 = vpop.f32.mrf.mxu3 }
 0x1d6   : > { %10263 = vmatmul.msk.f32.vlgmr.msra.gmra.mxu3 %vm1024_vm0, %v11978_v28  ;;  %v12640_v28 = vpop.permute.xlu0 %3142  ;;  %v12647_v3 = vpop.permute.xlu2 %3450 }
 0x1d7   : > { %16122 = vst [vmem:[#allocation83_spill] sm:$0xff] %v12640_v28 }
 0x1d8   : > { %v925_v13 = vpop.f32.mrf.mxu1  ;;  %16125 = vst [vmem:[#allocation86_spill] sm:$0xff] %v12647_v3 }
 0x1d9   : > { %v12630_v27 = vadd.f32 %v925_v13, %v12073_v58  ;;  %v12642_v49 = vpop.permute.xlu1 %5254 }
 0x1da   : > { %16123 = vst [vmem:[#allocation84_spill] sm:$0xff] %v12642_v49 }
 0x1db   : > { %16121 = vst [vmem:[#allocation82_spill] sm:$0xff] %v12630_v27  ;;  %10264 = vmatpush.xpose.msk.msrb.mxu3 %vm1024_vm0, %v12630_v27 }
 0x1dc   : > { %5508 = vrot.lane.b32.xlu2 %v12406_v42, %s11728_s24  ;;  %3452 = vrot.lane.b32.xlu1 %v12435_v29, %s11727_s21  ;;  %v12668_v28 = vpop.f32.mrf.mxu3 }
 0x1de   : > { %10265 = vmatmul.msk.f32.vlgmr.msrb.gmra.mxu3 %vm1024_vm0, %v12039_v47  ;;  %v12657_v42 = vpop.permute.xlu0 %5534  ;;  %v12666_v3 = vpop.permute.xlu2 %5562 }
 0x1df   : > { %16126 = vst [vmem:[#allocation87_spill] sm:$0xff] %v12657_v42 }
 0x1e0   : > { %v927_v20 = vpop.f32.mrf.mxu1  ;;  %16129 = vst [vmem:[#allocation90_spill] sm:$0xff] %v12666_v3 }
 0x1e1   : > { %v12645_v13 = vadd.f32 %v927_v20, %v12073_v58  ;;  %v12662_v20 = vpop.permute.xlu1 %3422 }
 0x1e2   : > { %16128 = vst [vmem:[#allocation89_spill] sm:$0xff] %v12662_v20  ;;  %v984_v20 = vpop.f32.mrf.mxu2 }
 0x1e3   : > { %16124 = vst [vmem:[#allocation85_spill] sm:$0xff] %v12645_v13  ;;  %10266 = vmatpush.xpose.msk.msra.mxu3 %vm1024_vm0, %v12645_v13 }
 0x1e4   : > { %3480 = vrot.lane.b32.xlu2 %v12452_v56, %s11727_s21 }
 0x1e6   : > { %10267 = vmatmul.msk.f32.vlgmr.msra.gmra.mxu3 %vm1024_vm0, %v12059_v55  ;;  %v12684_v63 = vpop.permute.xlu2 %3030 }
 0x1e7   : > { %16133 = vst [vmem:[#allocation94_spill] sm:$0xff] %v12684_v63  ;;  %v1864_v63 = vsel %vm1857_vm1, %v12569_v34, -inf }
 0x1e8   : > { %v930_v47 = vpop.f32.mrf.mxu1 }
 0x1e9   : > { %v12660_v49 = vadd.f32 %v930_v47, %v12073_v58  ;;  %v12677_v47 = vpop.permute.xlu0 %5114  ;;  %v12682_v3 = vpop.permute.xlu1 %3002 }
 0x1ea   : > { %16131 = vst [vmem:[#allocation92_spill] sm:$0xff] %v12677_v47 }
 0x1eb   : > { %16127 = vst [vmem:[#allocation88_spill] sm:$0xff] %v12660_v49  ;;  %10268 = vmatpush.xpose.msk.msrb.mxu3 %vm1024_vm0, %v12660_v49 }
 0x1ec   : > { %5592 = vrot.lane.b32.xlu2 %v12452_v56, %s11728_s24  ;;  %16132 = vst [vmem:[#allocation93_spill] sm:$0xff] %v12682_v3  ;;  %v12686_v56 = vpop.f32.mrf.mxu3 }
 0x1ee   : > { %10269 = vmatmul.msk.f32.vlgmr.msrb.gmra.mxu3 %vm1024_vm0, %v12095_v2  ;;  %v986_v2 = vpop.f32.mrf.mxu2  ;;  %v12697_v47 = vpop.permute.xlu2 %3198 }
 0x1ef   : > { %16136 = vst [vmem:[#allocation97_spill] sm:$0xff] %v12697_v47  ;;  %v12715_v47 = vadd.f32 %v986_v2, %v12253_v44 }
 0x1f0   : > { %v932_v55 = vpop.f32.mrf.mxu1 }
 0x1f1   : > { %v12675_v42 = vadd.f32 %v932_v55, %v12073_v58  ;;  %v1858_v55 = vsel %vm1857_vm1, %v12514_v35, -inf  ;;  %v12693_v58 = vpop.permute.xlu0 %5282 }
 0x1f2   : > { %16134 = vst [vmem:[#allocation95_spill] sm:$0xff] %v12693_v58  ;;  %v12712_v58 = vadd.f32 %v984_v20, %v12253_v44 }
 0x1f3   : > { %16130 = vst [vmem:[#allocation91_spill] sm:$0xff] %v12675_v42  ;;  %10270 = vmatpush.xpose.msk.msra.mxu3 %vm1024_vm0, %v12675_v42 }
 0x1f6   : > { %10271 = vmatmul.msk.f32.vlgmr.msra.gmra.mxu3 %vm1024_vm0, %v12193_v39  ;;  %v989_v39 = vpop.f32.mrf.mxu2  ;;  %v12705_v3 = vpop.permute.xlu2 %5142 }
 0x1f7   : > { %2228 = vmatpush.msrb.mxu3 %v12317_v11  ;;  %v12695_v11 = vpop.permute.xlu1 %3170  ;;  %16139 = vst [vmem:[#allocation100_spill] sm:$0xff] %v12705_v3  ;;  %v12730_v20 = vadd.f32 %v989_v39, %v12253_v44 }
 0x1f8   : > { %16135 = vst [vmem:[#allocation96_spill] sm:$0xff] %v12695_v11 }
 0x1f9   : > { %2251 = vmatpush.msra.mxu3 %v12321_v24  ;;  %v12701_v60 = vpop.permute.xlu0 %3730 }
 0x1fa   : > { %16137 = vst [vmem:[#allocation98_spill] sm:$0xff] %v12701_v60 }
 0x1fc   : > { %1859 = vmax.xlane.f32.xlu0 %v1858_v55 }
 0x1fe   : > { %v991_v11 = vpop.f32.mrf.mxu2  ;;  %v12719_v60 = vpop.permute.xlu2 %5310 }
 0x1ff   : > { %v12703_v24 = vpop.permute.xlu1 %5842  ;;  %16142 = vst [vmem:[#allocation103_spill] sm:$0xff] %v12719_v60  ;;  %v12733_v2 = vadd.f32 %v991_v11, %v12253_v44 }
 0x200   : > { %16138 = vst [vmem:[#allocation99_spill] sm:$0xff] %v12703_v24  ;;  %v1870_v24 = vsel %vm1857_vm1, %v12627_v32, -inf }
 0x201   : > { %v12709_v55 = vpop.permute.xlu0 %3478 }
 0x202   : > { %16140 = vst [vmem:[#allocation101_spill] sm:$0xff] %v12709_v55 }
 0x206   : > { %1865 = vmax.xlane.f32.xlu1 %v1864_v63  ;;  %v994_v60 = vpop.f32.mrf.mxu2  ;;  %v12743_v55 = vpop.permute.xlu2 %3786 }
 0x207   : > { %v12717_v63 = vpop.permute.xlu1 %3758  ;;  %16147 = vst [vmem:[#allocation108_spill] sm:$0xff] %v12743_v55  ;;  %v12752_v11 = vadd.f32 %v994_v60, %v12253_v44 }
 0x208   : > { %16141 = vst [vmem:[#allocation102_spill] sm:$0xff] %v12717_v63 }
 0x209   : > { %v12735_v3 = vpop.permute.xlu0 %5870  ;;  %16150 = vst [vmem:[#allocation111_spill] sm:$0xff] %v12752_v11 }
 0x20a   : > { %16144 = vst [vmem:[#allocation105_spill] sm:$0xff] %v12735_v3 }
 0x20e   : > { %v996_v39 = vpop.f32.mrf.mxu2 }
 0x20f   : > { %v12737_v63 = vpop.permute.xlu1 %5590  ;;  %v12755_v3 = vadd.f32 %v996_v39, %v12253_v44 }
 0x210   : > { %3424 = vrot.lane.b32.xlu0 %v12419_v36, %s11727_s21  ;;  %v12725_v36 = vpack.i.bf16 %v12715_v47, %v12712_v58  ;;  %16145 = vst [vmem:[#allocation106_spill] sm:$0xff] %v12737_v63  ;;  %v12757_v63 = vpop.permute.xlu2 %5898 }
 0x211   : > { %v12747_v41 = vpop.permute.xlu0 %3058  ;;  %16151 = vst [vmem:[#allocation112_spill] sm:$0xff] %v12755_v3  ;;  %v12761_v31 = vpack.i.bf16 %v12755_v3, %v12752_v11 }
 0x212   : > { %16143 = vst [vmem:[#allocation104_spill] sm:$0xff] %v12725_v36 }
 0x213   : > { %16148 = vst [vmem:[#allocation109_spill] sm:$0xff] %v12747_v41 }
 0x214   : > { %16152 = vst [vmem:[#allocation113_spill] sm:$0xff] %v12757_v63  ;;  %v1861_v63 = vsel %vm1857_vm1, %v12544_v18, -inf }
 0x215   : > { %1871 = vmax.xlane.f32.xlu2 %v1870_v24  ;;  %v12741_v24 = vpack.i.bf16 %v12733_v2, %v12730_v20  ;;  %16153 = vst [vmem:[#allocation114_spill] sm:$0xff] %v12761_v31 }
 0x217   : > { %16146 = vst [vmem:[#allocation107_spill] sm:$0xff] %v12741_v24  ;;  %v12749_v23 = vpop.permute.xlu1 %5170 }
 0x218   : > { %10801 = vrot.lane.b32.xlu0 %v12725_v36, %s11727_s21  ;;  %16149 = vst [vmem:[#allocation110_spill] sm:$0xff] %v12749_v23  ;;  %v12769_v23 = vpop.permute.xlu2 %3534 }
 0x219   : > { %v12765_v55 = vpop.permute.xlu0 %3226  ;;  %16156 = vst [vmem:[#allocation117_spill] sm:$0xff] %v12769_v23 }
 0x21a   : > { %16154 = vst [vmem:[#allocation115_spill] sm:$0xff] %v12765_v55 }
 0x21f   : > { %10806 = vrot.lane.b32.xlu1 %v12741_v24, %s11727_s21  ;;  %v12767_v41 = vpop.permute.xlu1 %5338 }
 0x220   : > { %16155 = vst [vmem:[#allocation116_spill] sm:$0xff] %v12767_v41  ;;  %v12775_v39 = vpop.permute.xlu2 %5646  ;;  %v1867_v41 = vsel %vm1857_vm1, %v12604_v19, -inf }
 0x221   : > { %v12771_v60 = vpop.permute.xlu0 %5618  ;;  %16159 = vst [vmem:[#allocation120_spill] sm:$0xff] %v12775_v39  ;;  %v1873_v39 = vsel %vm1857_vm1, %v12649_v7, -inf }
 0x222   : > { %16157 = vst [vmem:[#allocation118_spill] sm:$0xff] %v12771_v60 }
 0x227   : > { %v12773_v10 = vpop.permute.xlu1 %3506 }
 0x228   : > { %16158 = vst [vmem:[#allocation119_spill] sm:$0xff] %v12773_v10  ;;  %v12783_v16 = vpop.permute.xlu2 %3282 }
 0x229   : > { %v12779_v51 = vpop.permute.xlu0 %5198  ;;  %16162 = vst [vmem:[#allocation123_spill] sm:$0xff] %v12783_v16 }
 0x22a   : > { %16160 = vst [vmem:[#allocation121_spill] sm:$0xff] %v12779_v51 }
 0x22d   : > { %10811 = vrot.lane.b32.xlu2 %v12761_v31, %s11727_s21 }
 0x22f   : > { %v12781_v43 = vpop.permute.xlu1 %3086 }
 0x230   : > { %16161 = vst [vmem:[#allocation122_spill] sm:$0xff] %v12781_v43  ;;  %v12791_v10 = vpop.permute.xlu2 %5394 }
 0x231   : > { %v12787_v23 = vpop.permute.xlu0 %5366  ;;  %16165 = vst [vmem:[#allocation126_spill] sm:$0xff] %v12791_v10 }
 0x232   : > { %16163 = vst [vmem:[#allocation124_spill] sm:$0xff] %v12787_v23 }
 0x237   : > { %v12789_v60 = vpop.permute.xlu1 %3254 }
 0x238   : > { %16164 = vst [vmem:[#allocation125_spill] sm:$0xff] %v12789_v60  ;;  %v12801_v16 = vpop.permute.xlu2 %3618 }
 0x239   : > { %16168 = vst [vmem:[#allocation129_spill] sm:$0xff] %v12801_v16 }
 0x23f   : > { %v12799_v51 = vpop.permute.xlu1 %5926 }
 0x240   : > { %16167 = vst [vmem:[#allocation128_spill] sm:$0xff] %v12799_v51  ;;  %v12811_v10 = vpop.permute.xlu2 %5730 }
 0x241   : > { %16171 = vst [vmem:[#allocation132_spill] sm:$0xff] %v12811_v10 }
 0x242   : > { %1862 = vmax.xlane.f32.xlu0 %v1861_v63  ;;  %v12797_v63 = vpop.permute.xlu0 %3814 }
 0x243   : > { %16166 = vst [vmem:[#allocation127_spill] sm:$0xff] %v12797_v63 }
 0x247   : > { %v12809_v23 = vpop.permute.xlu1 %5674 }
 0x248   : > { %16170 = vst [vmem:[#allocation131_spill] sm:$0xff] %v12809_v23  ;;  %v12821_v51 = vpop.permute.xlu2 %3366 }
 0x249   : > { %1868 = vmax.xlane.f32.xlu1 %v1867_v41  ;;  %16174 = vst [vmem:[#allocation135_spill] sm:$0xff] %v12821_v51 }
 0x24a   : > { %v12805_v41 = vpop.permute.xlu0 %3562 }
 0x24b   : > { %16169 = vst [vmem:[#allocation130_spill] sm:$0xff] %v12805_v41 }
 0x256   : > { %5564 = vrot.lane.b32.xlu0 %v12435_v29, %s11728_s24  ;;  %1874 = vmax.xlane.f32.xlu2 %v1873_v39  ;;  %v12817_v39 = vpop.permute.xlu0 %3310  ;;  %v12819_v29 = vpop.permute.xlu1 %5422 }
 0x257   : > { %16172 = vst [vmem:[#allocation133_spill] sm:$0xff] %v12817_v39  ;;  %v12855_v39 = vpop.f32.mrf.mxu3 }
 0x258   : > { %16173 = vst [vmem:[#allocation134_spill] sm:$0xff] %v12819_v29 }
 0x25e   : > { %3508 = vrot.lane.b32.xlu0 %v12465_v8, %s11727_s21  ;;  %v12831_v23 = vpop.permute.xlu1 %3590 }
 0x25f   : > { %16176 = vst [vmem:[#allocation137_spill] sm:$0xff] %v12831_v23 }
 0x262   : > { %5620 = vrot.lane.b32.xlu1 %v12465_v8, %s11728_s24  ;;  %v12827_v8 = vpop.permute.xlu0 %5702 }
 0x263   : > { %16175 = vst [vmem:[#allocation136_spill] sm:$0xff] %v12827_v8  ;;  %v999_v8 = vpop.f32.mrf.mxu2 }
 0x266   : > { %5648 = vrot.lane.b32.xlu0 %v12478_v52, %s11728_s24  ;;  %v12837_v29 = vpop.permute.xlu1 %3338 }
 0x267   : > { %16179 = vst [vmem:[#allocation140_spill] sm:$0xff] %v12837_v29  ;;  %v1882_v29 = vsel %vm1857_vm1, %v12855_v39, -inf }
 0x26a   : > { %3536 = vrot.lane.b32.xlu1 %v12478_v52, %s11727_s21  ;;  %v12833_v52 = vpop.permute.xlu2 %5478  ;;  %v12835_v10 = vpop.permute.xlu0 %5450 }
 0x26b   : > { %16177 = vst [vmem:[#allocation138_spill] sm:$0xff] %v12833_v52  ;;  %v1001_v60 = vpop.f32.mrf.mxu2 }
 0x26c   : > { %16178 = vst [vmem:[#allocation139_spill] sm:$0xff] %v12835_v10 }
 0x26e   : > { %3564 = vrot.lane.b32.xlu2 %v12491_v5, %s11727_s21  ;;  %v12843_v51 = vpop.permute.xlu1 %5758 }
 0x26f   : > { %16182 = vst [vmem:[#allocation143_spill] sm:$0xff] %v12843_v51 }
 0x272   : > { %5704 = vrot.lane.b32.xlu1 %v12517_v54, %s11728_s24  ;;  %v12839_v63 = vpop.permute.xlu2 %2948  ;;  %v12841_v16 = vpop.permute.xlu0 %3646 }
 0x273   : > { %16180 = vst [vmem:[#allocation141_spill] sm:$0xff] %v12839_v63 }
 0x274   : > { %16181 = vst [vmem:[#allocation142_spill] sm:$0xff] %v12841_v16  ;;  %v1879_v16 = vsel %vm1857_vm1, %v12686_v56, -inf }
 0x276   : > { %5676 = vrot.lane.b32.xlu2 %v12491_v5, %s11728_s24  ;;  %v1876_v5 = vsel %vm1857_vm1, %v12668_v28, -inf  ;;  %v12851_v52 = vpop.permute.xlu1 %10731 }
 0x277   : > { %16185 = vst [vmem:[#allocation146_spill] sm:$0xff] %v12851_v52  ;;  %v1004_v52 = vpop.f32.mrf.mxu2 }
 0x27a   : > { %v12845_v41 = vpop.permute.xlu2 %2976  ;;  %v12849_v23 = vpop.permute.xlu0 %5060 }
 0x27b   : > { %16183 = vst [vmem:[#allocation144_spill] sm:$0xff] %v12845_v41 }
 0x27c   : > { %16184 = vst [vmem:[#allocation145_spill] sm:$0xff] %v12849_v23  ;;  %v12873_v23 = vadd.f32 %v1001_v60, %v12253_v44 }
 0x27e   : > { %v12863_v43 = vpop.permute.xlu1 %5116  ;;  %16190 = vst [vmem:[#allocation151_spill] sm:$0xff] %v12873_v23 }
 0x27f   : > { %16188 = vst [vmem:[#allocation149_spill] sm:$0xff] %v12863_v43  ;;  %v1006_v43 = vpop.f32.mrf.mxu2 }
 0x282   : > { %v12853_v10 = vpop.permute.xlu2 %5088  ;;  %v12859_v51 = vpop.permute.xlu0 %10726 }
 0x283   : > { %16186 = vst [vmem:[#allocation147_spill] sm:$0xff] %v12853_v10  ;;  %v12870_v10 = vadd.f32 %v999_v8, %v12253_v44 }
 0x284   : > { %16187 = vst [vmem:[#allocation148_spill] sm:$0xff] %v12859_v51 }
 0x286   : > { %v12877_v51 = vpop.permute.xlu1 %3032 }
 0x287   : > { %16192 = vst [vmem:[#allocation153_spill] sm:$0xff] %v12877_v51 }
 0x28e   : > { %v12889_v8 = vpop.permute.xlu1 %5200 }
 0x28f   : > { %16196 = vst [vmem:[#allocation157_spill] sm:$0xff] %v12889_v8 }
 0x290   : > { %1877 = vmax.xlane.f32.xlu0 %v1876_v5  ;;  %v12865_v5 = vpop.permute.xlu2 %10736 }
 0x291   : > { %16189 = vst [vmem:[#allocation150_spill] sm:$0xff] %v12865_v5  ;;  %v12898_v5 = vadd.f32 %v1006_v43, %v12253_v44 }
 0x293   : > { %16198 = vst [vmem:[#allocation159_spill] sm:$0xff] %v12898_v5 }
 0x298   : > { %v12879_v55 = vpop.permute.xlu2 %10741 }
 0x299   : > { %16193 = vst [vmem:[#allocation154_spill] sm:$0xff] %v12879_v55  ;;  %v1009_v55 = vpop.f32.mrf.mxu2 }
 0x29c   : > { %1880 = vmax.xlane.f32.xlu1 %v1879_v16  ;;  %v12875_v16 = vpop.permute.xlu0 %3004 }
 0x29d   : > { %16191 = vst [vmem:[#allocation152_spill] sm:$0xff] %v12875_v16  ;;  %v12903_v16 = vadd.f32 %v1004_v52, %v12253_v44  ;;  %v12920_v52 = vadd.f32 %v1009_v55, %v12253_v44 }
 0x29f   : > { %1883 = vmax.xlane.f32.xlu2 %v1882_v29  ;;  %v12883_v29 = vpack.i.bf16 %v12873_v23, %v12870_v10  ;;  %16199 = vst [vmem:[#allocation160_spill] sm:$0xff] %v12903_v16  ;;  %v12909_v8 = vpack.i.bf16 %v12898_v5, %v12903_v16 }
 0x2a0   : > { %v12891_v60 = vpop.permute.xlu2 %3060  ;;  %16204 = vst [vmem:[#allocation165_spill] sm:$0xff] %v12920_v52 }
 0x2a1   : > { %16194 = vst [vmem:[#allocation155_spill] sm:$0xff] %v12883_v29  ;;  %v1011_v43 = vpop.f32.mrf.mxu2 }
 0x2a2   : > { %16197 = vst [vmem:[#allocation158_spill] sm:$0xff] %v12891_v60  ;;  %v12911_v60 = vpop.permute.xlu1 %10746 }
 0x2a3   : > { %16201 = vst [vmem:[#allocation162_spill] sm:$0xff] %v12909_v8 }
 0x2a4   : > { %3592 = vrot.lane.b32.xlu0 %v12517_v54, %s11727_s21  ;;  %v12887_v54 = vpop.permute.xlu0 %5144  ;;  %16202 = vst [vmem:[#allocation163_spill] sm:$0xff] %v12911_v60 }
 0x2a5   : > { %16195 = vst [vmem:[#allocation156_spill] sm:$0xff] %v12887_v54 }
 0x2ac   : > { %10816 = vrot.lane.b32.xlu0 %v12883_v29, %s11727_s21  ;;  %v12905_v54 = vpop.permute.xlu0 %3088 }
 0x2ad   : > { %16200 = vst [vmem:[#allocation161_spill] sm:$0xff] %v12905_v54  ;;  %v12923_v54 = vadd.f32 %v1011_v43, %v12253_v44 }
 0x2af   : > { %16205 = vst [vmem:[#allocation166_spill] sm:$0xff] %v12923_v54  ;;  %v12931_v60 = vpack.i.bf16 %v12923_v54, %v12920_v52 }
 0x2b1   : > { %16207 = vst [vmem:[#allocation168_spill] sm:$0xff] %v12931_v60 }
 0x2b4   : > { %5732 = vrot.lane.b32.xlu0 %v12542_v46, %s11728_s24  ;;  %v12925_v41 = vpop.permute.xlu0 %10751 }
 0x2b5   : > { %3620 = vrot.lane.b32.xlu1 %v12542_v46, %s11727_s21  ;;  %v12915_v46 = vpop.permute.xlu2 %5172  ;;  %16206 = vst [vmem:[#allocation167_spill] sm:$0xff] %v12925_v41  ;;  %v12945_v41 = vpop.f32.mrf.mxu3 }
 0x2b6   : > { %16203 = vst [vmem:[#allocation164_spill] sm:$0xff] %v12915_v46  ;;  %v12933_v46 = vpop.permute.xlu1 %3116 }
 0x2b7   : > { %3648 = vrot.lane.b32.xlu2 %v12559_v62, %s11727_s21  ;;  %16208 = vst [vmem:[#allocation169_spill] sm:$0xff] %v12933_v46  ;;  %v1885_v46 = vsel %vm1857_vm1, %v12945_v41, -inf }
 0x2bc   : > { %v12939_v55 = vpop.permute.xlu0 %5228 }
 0x2bd   : > { %10821 = vrot.lane.b32.xlu1 %v12909_v8, %s11727_s21  ;;  %16210 = vst [vmem:[#allocation171_spill] sm:$0xff] %v12939_v55  ;;  %v12955_v22 = vpop.f32.mrf.mxu3 }
 0x2be   : > { %v12941_v43 = vpop.permute.xlu1 %10761 }
 0x2bf   : > { %5760 = vrot.lane.b32.xlu2 %v12559_v62, %s11728_s24  ;;  %v12937_v62 = vpop.permute.xlu2 %3144  ;;  %16211 = vst [vmem:[#allocation172_spill] sm:$0xff] %v12941_v43 }
 0x2c0   : > { %16209 = vst [vmem:[#allocation170_spill] sm:$0xff] %v12937_v62 }
 0x2c4   : > { %v12947_v63 = vpop.permute.xlu0 %10756 }
 0x2c5   : > { %5788 = vrot.lane.b32.xlu1 %v12584_v6, %s11728_s24  ;;  %16213 = vst [vmem:[#allocation174_spill] sm:$0xff] %v12947_v63 }
 0x2c6   : > { %v12949_v1 = vpop.permute.xlu1 %5284 }
 0x2c7   : > { %10826 = vrot.lane.b32.xlu2 %v12931_v60, %s11727_s21  ;;  %v12943_v51 = vpop.permute.xlu2 %5256  ;;  %16214 = vst [vmem:[#allocation175_spill] sm:$0xff] %v12949_v1  ;;  %v1888_v1 = vsel %vm1857_vm1, %v12955_v22, -inf }
 0x2c8   : > { %16212 = vst [vmem:[#allocation173_spill] sm:$0xff] %v12943_v51  ;;  %v12963_v51 = vpop.f32.mrf.mxu3 }
 0x2cc   : > { %v12957_v62 = vpop.permute.xlu0 %3172 }
 0x2cd   : > { %16216 = vst [vmem:[#allocation177_spill] sm:$0xff] %v12957_v62 }
 0x2ce   : > { %v12959_v55 = vpop.permute.xlu1 %3200 }
 0x2cf   : > { %v12951_v33 = vpop.permute.xlu2 %10766  ;;  %16217 = vst [vmem:[#allocation178_spill] sm:$0xff] %v12959_v55 }
 0x2d0   : > { %16215 = vst [vmem:[#allocation176_spill] sm:$0xff] %v12951_v33 }
 0x2d4   : > { %v12965_v54 = vpop.permute.xlu0 %5312 }
 0x2d5   : > { %16219 = vst [vmem:[#allocation180_spill] sm:$0xff] %v12965_v54 }
 0x2d6   : > { %v12969_v33 = vpop.permute.xlu1 %5368 }
 0x2d7   : > { %v12961_v43 = vpop.permute.xlu2 %3228  ;;  %16220 = vst [vmem:[#allocation181_spill] sm:$0xff] %v12969_v33 }
 0x2d8   : > { %16218 = vst [vmem:[#allocation179_spill] sm:$0xff] %v12961_v43 }
 0x2dc   : > { %v12977_v55 = vpop.permute.xlu0 %10771 }
 0x2dd   : > { %16222 = vst [vmem:[#allocation183_spill] sm:$0xff] %v12977_v55 }
 0x2de   : > { %1886 = vmax.xlane.f32.xlu0 %v1885_v46  ;;  %v1891_v46 = vsel %vm1857_vm1, %v12963_v51, -inf  ;;  %v12979_v62 = vpop.permute.xlu1 %3284 }
 0x2df   : > { %v12973_v63 = vpop.permute.xlu2 %5340  ;;  %16223 = vst [vmem:[#allocation184_spill] sm:$0xff] %v12979_v62 }
 0x2e0   : > { %16221 = vst [vmem:[#allocation182_spill] sm:$0xff] %v12973_v63 }
 0x2e4   : > { %v12985_v33 = vpop.permute.xlu0 %3256 }
 0x2e5   : > { %16225 = vst [vmem:[#allocation186_spill] sm:$0xff] %v12985_v33 }
 0x2e7   : > { %v12981_v54 = vpop.permute.xlu2 %10781 }
 0x2e8   : > { %16224 = vst [vmem:[#allocation185_spill] sm:$0xff] %v12981_v54 }
 0x2ef   : > { %1889 = vmax.xlane.f32.xlu1 %v1888_v1  ;;  %v12987_v1 = vpop.permute.xlu1 %10786  ;;  %v12989_v43 = vpop.permute.xlu2 %3312 }
 0x2f0   : > { %1892 = vmax.xlane.f32.xlu2 %v1891_v46  ;;  %16226 = vst [vmem:[#allocation187_spill] sm:$0xff] %v12987_v1  ;;  %v12995_v46 = vpop.f32.mrf.mxu3 }
 0x2f1   : > { %16227 = vst [vmem:[#allocation188_spill] sm:$0xff] %v12989_v43  ;;  %v1894_v62 = vsel %vm1857_vm1, %v12995_v46, -inf }
 0x2f2   : > { %3676 = vrot.lane.b32.xlu0 %v12584_v6, %s11727_s21  ;;  %v12997_v6 = vpop.permute.xlu0 %10776 }
 0x2f3   : > { %16228 = vst [vmem:[#allocation189_spill] sm:$0xff] %v12997_v6 }
 0x2f7   : > { %v12999_v54 = vpop.permute.xlu1 %10791  ;;  %v13001_v55 = vpop.permute.xlu2 %5424 }
 0x2f8   : > { %16229 = vst [vmem:[#allocation190_spill] sm:$0xff] %v12999_v54  ;;  %v13007_v63 = vpop.f32.mrf.mxu3 }
 0x2f9   : > { %16230 = vst [vmem:[#allocation191_spill] sm:$0xff] %v13001_v55 }
 0x2fa   : > { %5816 = vrot.lane.b32.xlu0 %v12609_v50, %s11728_s24 }
 0x2ff   : > { %v13011_v1 = vpop.permute.xlu1 %5452  ;;  %v13013_v33 = vpop.permute.xlu2 %10796 }
 0x300   : > { %16232 = vst [vmem:[#allocation193_spill] sm:$0xff] %v13011_v1  ;;  %v13015_v43 = vpop.f32.mrf.mxu3 }
 0x301   : > { %16233 = vst [vmem:[#allocation194_spill] sm:$0xff] %v13013_v33  ;;  %v1014_v33 = vpop.f32.mrf.mxu2 }
 0x307   : > { %v13019_v54 = vpop.permute.xlu1 %3368  ;;  %v13021_v55 = vpop.permute.xlu2 %3396 }
 0x308   : > { %3704 = vrot.lane.b32.xlu1 %v12609_v50, %s11727_s21  ;;  %3732 = vrot.lane.b32.xlu2 %v12630_v27, %s11727_s21  ;;  %v13009_v50 = vpop.permute.xlu0 %5396  ;;  %16235 = vst [vmem:[#allocation196_spill] sm:$0xff] %v13019_v54 }
 0x309   : > { %16231 = vst [vmem:[#allocation192_spill] sm:$0xff] %v13009_v50  ;;  %v1016_v54 = vpop.f32.mrf.mxu2 }
 0x30a   : > { %16236 = vst [vmem:[#allocation197_spill] sm:$0xff] %v13021_v55 }
 0x30f   : > { %v13029_v50 = vpop.permute.xlu1 %5536  ;;  %v13031_v1 = vpop.permute.xlu2 %5508 }
 0x310   : > { %5872 = vrot.lane.b32.xlu1 %v12645_v13, %s11728_s24  ;;  %5844 = vrot.lane.b32.xlu2 %v12630_v27, %s11728_s24  ;;  %v13017_v6 = vpop.permute.xlu0 %3340  ;;  %v13025_v27 = vpop.f32.mrf.mxu3  ;;  %16238 = vst [vmem:[#allocation199_spill] sm:$0xff] %v13029_v50 }
 0x311   : > { %16234 = vst [vmem:[#allocation195_spill] sm:$0xff] %v13017_v6  ;;  %v1903_v60 = vsel %vm1857_vm1, %v13025_v27, -inf }
 0x312   : > { %16239 = vst [vmem:[#allocation200_spill] sm:$0xff] %v13031_v1  ;;  %v1897_v1 = vsel %vm1857_vm1, %v13007_v63, -inf }
 0x317   : > { %v13035_v6 = vpop.permute.xlu1 %3452  ;;  %v13037_v55 = vpop.permute.xlu2 %3480 }
 0x318   : > { %v13027_v57 = vpop.permute.xlu0 %5480  ;;  %v13033_v25 = vpop.f32.mrf.mxu3  ;;  %16240 = vst [vmem:[#allocation201_spill] sm:$0xff] %v13035_v6  ;;  %v13051_v6 = vadd.f32 %v1014_v33, %v12253_v44 }
 0x319   : > { %16237 = vst [vmem:[#allocation198_spill] sm:$0xff] %v13027_v57  ;;  %v13044_v57 = vadd.f32 %v1016_v54, %v12253_v44 }
 0x31a   : > { %16241 = vst [vmem:[#allocation202_spill] sm:$0xff] %v13037_v55 }
 0x31b   : > { %16242 = vst [vmem:[#allocation203_spill] sm:$0xff] %v13044_v57 }
 0x31c   : > { %16244 = vst [vmem:[#allocation205_spill] sm:$0xff] %v13051_v6 }
 0x31f   : > { %v1866_v0 = vpop.xlane.xlu1 %1865  ;;  %v13059_v26 = vpop.permute.xlu2 %5592 }
 0x320   : > { %v1860_v38 = vpop.xlane.xlu0 %1859  ;;  %v13053_v55 = vpop.f32.mrf.mxu3  ;;  %16246 = vst [vmem:[#allocation207_spill] sm:$0xff] %v13059_v26 }
 0x324   : > { %1895 = vmax.xlane.f32.xlu0 %v1894_v62  ;;  %v1900_v62 = vsel %vm1857_vm1, %v13015_v43, -inf }
 0x327   : > { %v1872_v33 = vpop.xlane.xlu2 %1871 }
 0x328   : > { %v13046_v50 = vpop.permute.xlu0 %3424 }
 0x329   : > { %16243 = vst [vmem:[#allocation204_spill] sm:$0xff] %v13046_v50  ;;  %v13067_v50 = vpop.f32.mrf.mxu3 }
 0x32f   : > { %v13075_v26 = vpop.permute.xlu2 %10811 }
 0x330   : > { %v13063_v54 = vpop.permute.xlu0 %10801  ;;  %16249 = vst [vmem:[#allocation210_spill] sm:$0xff] %v13075_v26 }
 0x331   : > { %16247 = vst [vmem:[#allocation208_spill] sm:$0xff] %v13063_v54 }
 0x338   : > { %3760 = vrot.lane.b32.xlu0 %v12645_v13, %s11727_s21  ;;  %v13057_v13 = vpack.i.bf16 %v13044_v57, %v13051_v6  ;;  %v1863_v5 = vpop.xlane.xlu0 %1862  ;;  %v13071_v57 = vpop.f32.mrf.mxu3 }
 0x339   : > { %1901 = vmax.xlane.f32.xlu2 %v1900_v62  ;;  %v13065_v62 = vpop.permute.xlu1 %10806 }
 0x33a   : > { %1898 = vmax.xlane.f32.xlu1 %v1897_v1  ;;  %16245 = vst [vmem:[#allocation206_spill] sm:$0xff] %v13057_v13  ;;  %v1019_v1 = vpop.f32.mrf.mxu2 }
 0x33b   : > { %16248 = vst [vmem:[#allocation209_spill] sm:$0xff] %v13065_v62  ;;  %v13084_v16 = vadd.f32 %v1019_v1, %v12253_v44 }
 0x33d   : > { %16252 = vst [vmem:[#allocation213_spill] sm:$0xff] %v13084_v16 }
 0x340   : > { %10831 = vrot.lane.b32.xlu0 %v13057_v13, %s11727_s21  ;;  %v13077_v54 = vpop.permute.xlu0 %5564  ;;  %v13095_v61 = vpop.f32.mrf.mxu3 }
 0x341   : > { %v1869_v6 = vpop.xlane.xlu1 %1868  ;;  %16250 = vst [vmem:[#allocation211_spill] sm:$0xff] %v13077_v54  ;;  %v13097_v54 = vpop.xlane.xlu2 %1874 }
 0x342   : > { %v1021_v14 = vpop.f32.mrf.mxu2 }
 0x343   : > { %v13087_v45 = vadd.f32 %v1021_v14, %v12253_v44 }
 0x345   : > { %16253 = vst [vmem:[#allocation214_spill] sm:$0xff] %v13087_v45  ;;  %v13093_v26 = vpack.i.bf16 %v13087_v45, %v13084_v16 }
 0x347   : > { %16254 = vst [vmem:[#allocation215_spill] sm:$0xff] %v13093_v26 }
 0x348   : > { %5900 = vrot.lane.b32.xlu0 %v12660_v49, %s11728_s24  ;;  %v13105_v14 = vpop.f32.mrf.mxu3 }
 0x349   : > { %v13081_v62 = vpop.permute.xlu1 %5620  ;;  %v13107_v44 = vpop.permute.xlu2 %3564 }
 0x34a   : > { %16251 = vst [vmem:[#allocation212_spill] sm:$0xff] %v13081_v62  ;;  %v1955_v62 = vsub.f32 %v12544_v18, %v1863_v5 }
 0x34b   : > { %16257 = vst [vmem:[#allocation218_spill] sm:$0xff] %v13107_v44 }
 0x34c   : > { %v1988_v16 = vmul.f32 1.442695, %v1955_v62 }
 0x34e   : > { %11207 = vpow2.f32 %v1988_v16 }
 0x350   : > { %v13114_v52 = vpop.f32.mrf.mxu3 }
 0x351   : > { %3816 = vrot.lane.b32.xlu2 %v12675_v42, %s11727_s21  ;;  %v13103_v1 = vpop.permute.xlu1 %3536  ;;  %v13116_v15 = vpop.permute.xlu2 %5676 }
 0x352   : > { %16256 = vst [vmem:[#allocation217_spill] sm:$0xff] %v13103_v1 }
 0x353   : > { %3788 = vrot.lane.b32.xlu1 %v12660_v49, %s11727_s21  ;;  %v13101_v49 = vpop.permute.xlu0 %3508  ;;  %16260 = vst [vmem:[#allocation221_spill] sm:$0xff] %v13116_v15 }
 0x354   : > { %16255 = vst [vmem:[#allocation216_spill] sm:$0xff] %v13101_v49  ;;  %v1954_v49 = vsub.f32 %v12514_v35, %v1860_v38  ;;  %v1956_v38 = vsub.f32 %v12569_v34, %v1866_v0 }
 0x356   : > { %v1986_v44 = vmul.f32 1.442695, %v1954_v49 }
 0x358   : > { %v13127_v62 = vpop.f32.mrf.mxu3  ;;  %11209 = vpow2.f32 %v1986_v44 }
 0x359   : > { %5928 = vrot.lane.b32.xlu2 %v12675_v42, %s11728_s24  ;;  %v13112_v45 = vpop.permute.xlu1 %5704  ;;  %v13123_v18 = vpop.xlane.xlu2 %1883 }
 0x35a   : > { %16259 = vst [vmem:[#allocation220_spill] sm:$0xff] %v13112_v45  ;;  %v1958_v45 = vsub.f32 %v12627_v32, %v1872_v33  ;;  %v1912_v33 = vsel %vm1857_vm1, %v13067_v50, -inf }
 0x35b   : > { %10836 = vrot.lane.b32.xlu1 %v13093_v26, %s11727_s21  ;;  %v13109_v42 = vpop.permute.xlu0 %5648 }
 0x35c   : > { %16258 = vst [vmem:[#allocation219_spill] sm:$0xff] %v13109_v42  ;;  %v13121_v42 = vpop.eup %11207  ;;  %v1994_v49 = vmul.f32 1.442695, %v1958_v45 }
 0x35d   : > { %v2053_v35 = vsel %vm1857_vm1, %v13121_v42, 0.0 }
 0x35e   : > { %v13135_v16 = vpop.eup %11209  ;;  %11211 = vpow2.f32 %v1994_v49  ;;  %v1909_v49 = vsel %vm1857_vm1, %v13053_v55, -inf }
 0x35f   : > { %v2050_v32 = vsel %vm1857_vm1, %v13135_v16, 0.0 }
 0x361   : > { %v1881_v1 = vpop.xlane.xlu1 %1880  ;;  %v13138_v26 = vpop.permute.xlu2 %3648 }
 0x362   : > { %16263 = vst [vmem:[#allocation224_spill] sm:$0xff] %v13138_v26 }
 0x363   : > { %v1878_v9 = vpop.xlane.xlu0 %1877 }
 0x364   : > { %v13152_v34 = vpop.eup %11211 }
 0x369   : > { %v13130_v15 = vpop.permute.xlu1 %3620 }
 0x36a   : > { %16262 = vst [vmem:[#allocation223_spill] sm:$0xff] %v13130_v15 }
 0x36b   : > { %v13125_v5 = vpop.permute.xlu0 %3592 }
 0x36c   : > { %16261 = vst [vmem:[#allocation222_spill] sm:$0xff] %v13125_v5  ;;  %v1957_v5 = vsub.f32 %v12604_v19, %v1869_v6  ;;  %v1906_v6 = vsel %vm1857_vm1, %v13033_v25, -inf  ;;  %v1961_v19 = vsub.f32 %v12686_v56, %v1881_v1 }
 0x36e   : > { %v1992_v0 = vmul.f32 1.442695, %v1957_v5  ;;  %v1959_v5 = vsub.f32 %v12649_v7, %v13097_v54  ;;  %v2000_v1 = vmul.f32 1.442695, %v1961_v19  ;;  %v1921_v54 = vsel %vm1857_vm1, %v13105_v14, -inf }
 0x371   : > { %v13148_v45 = vpop.permute.xlu1 %10821 }
 0x372   : > { %1904 = vmax.xlane.f32.xlu0 %v1903_v60  ;;  %v1990_v60 = vmul.f32 1.442695, %v1956_v38  ;;  %16265 = vst [vmem:[#allocation226_spill] sm:$0xff] %v13148_v45  ;;  %v1996_v45 = vmul.f32 1.442695, %v1959_v5  ;;  %v1915_v5 = vsel %vm1857_vm1, %v13071_v57, -inf }
 0x373   : > { %v13140_v44 = vpop.permute.xlu0 %10816 }
 0x374   : > { %16264 = vst [vmem:[#allocation225_spill] sm:$0xff] %v13140_v44  ;;  %11213 = vpow2.f32 %v1990_v60  ;;  %v2062_v60 = vsel %vm1857_vm1, %v13152_v34, 0.0 }
 0x375   : > { %11215 = vpow2.f32 %v1992_v0 }
 0x376   : > { %11217 = vpow2.f32 %v2000_v1 }
 0x377   : > { %11219 = vpow2.f32 %v1996_v45  ;;  %v1918_v45 = vsel %vm1857_vm1, %v13095_v61, -inf }
 0x379   : > { %v13167_v0 = vpop.permute.xlu1 %5788 }
 0x37a   : > { %2054 = vadd.xlane.f32.xlu0 %v2053_v35  ;;  %v13146_v35 = vpop.f32.mrf.mxu3  ;;  %v13155_v38 = vpop.eup %11213  ;;  %16268 = vst [vmem:[#allocation229_spill] sm:$0xff] %v13167_v0 }
 0x37b   : > { %v13173_v44 = vpop.eup %11215 }
 0x37c   : > { %v2059_v7 = vsel %vm1857_vm1, %v13173_v44, 0.0 }
 0x382   : > { %2051 = vadd.xlane.f32.xlu2 %v2050_v32  ;;  %1913 = vmax.xlane.f32.xlu0 %v1912_v33  ;;  %v13161_v32 = vpop.permute.xlu2 %5760  ;;  %v13165_v33 = vpop.permute.xlu0 %5732 }
 0x383   : > { %16266 = vst [vmem:[#allocation227_spill] sm:$0xff] %v13161_v32  ;;  %v13169_v56 = vpop.f32.mrf.mxu3 }
 0x384   : > { %16267 = vst [vmem:[#allocation228_spill] sm:$0xff] %v13165_v33 }
 0x385   : > { %1907 = vmax.xlane.f32.xlu1 %v1906_v6  ;;  %v2056_v6 = vsel %vm1857_vm1, %v13155_v38, 0.0 }
 0x38a   : > { %1910 = vmax.xlane.f32.xlu2 %v1909_v49  ;;  %2063 = vadd.xlane.f32.xlu0 %v2062_v60  ;;  %v1960_v49 = vsub.f32 %v12668_v28, %v1878_v9  ;;  %v1887_v19 = vpop.xlane.xlu0 %1886  ;;  %v1890_v60 = vpop.xlane.xlu1 %1889 }
 0x38b   : > { %v13180_v32 = vpop.permute.xlu2 %10826  ;;  %v13184_v28 = vpop.eup %11217  ;;  %v1964_v1 = vsub.f32 %v12955_v22, %v1890_v60 }
 0x38c   : > { %v1998_v0 = vmul.f32 1.442695, %v1960_v49  ;;  %16269 = vst [vmem:[#allocation230_spill] sm:$0xff] %v13180_v32  ;;  %v13186_v9 = vpop.f32.mrf.mxu3  ;;  %v2071_v49 = vsel %vm1857_vm1, %v13184_v28, 0.0 }
 0x38d   : > { %2057 = vadd.xlane.f32.xlu1 %v2056_v6  ;;  %v13189_v6 = vpop.eup %11219 }
 0x38e   : > { %11221 = vpow2.f32 %v1998_v0  ;;  %v2006_v0 = vmul.f32 1.442695, %v1964_v1  ;;  %v2065_v22 = vsel %vm1857_vm1, %v13189_v6, 0.0 }
 0x390   : > { %11223 = vpow2.f32 %v2006_v0 }
 0x392   : > { %2060 = vadd.xlane.f32.xlu2 %v2059_v7  ;;  %1922 = vmax.xlane.f32.xlu0 %v1921_v54  ;;  %v1962_v7 = vsub.f32 %v12855_v39, %v13123_v18  ;;  %v13197_v54 = vpop.permute.xlu0 %3676  ;;  %v1930_v18 = vsel %vm1857_vm1, %v13146_v35, -inf }
 0x393   : > { %16270 = vst [vmem:[#allocation231_spill] sm:$0xff] %v13197_v54  ;;  %v1893_v33 = vpop.xlane.xlu2 %1892 }
 0x394   : > { %v13203_v60 = vpop.eup %11221  ;;  %v2002_v32 = vmul.f32 1.442695, %v1962_v7  ;;  %v13205_v26 = vpop.f32.mrf.mxu3 }
 0x395   : > { %1916 = vmax.xlane.f32.xlu1 %v1915_v5  ;;  %v13199_v5 = vpop.permute.xlu1 %3704  ;;  %v2068_v39 = vsel %vm1857_vm1, %v13203_v60, 0.0 }
 0x396   : > { %16271 = vst [vmem:[#allocation232_spill] sm:$0xff] %v13199_v5  ;;  %11225 = vpow2.f32 %v2002_v32 }
 0x39a   : > { %1919 = vmax.xlane.f32.xlu2 %v1918_v45  ;;  %2072 = vadd.xlane.f32.xlu0 %v2071_v49  ;;  %v1963_v45 = vsub.f32 %v12945_v41, %v1887_v19  ;;  %v1924_v49 = vsel %vm1857_vm1, %v13114_v52, -inf  ;;  %v13218_v41 = vpop.eup %11223 }
 0x39b   : > { %v13220_v19 = vpop.permute.xlu2 %3732  ;;  %v2080_v32 = vsel %vm1857_vm1, %v13218_v41, 0.0 }
 0x39c   : > { %v2004_v1 = vmul.f32 1.442695, %v1963_v45  ;;  %16274 = vst [vmem:[#allocation235_spill] sm:$0xff] %v13220_v19  ;;  %v13222_v0 = vpop.eup %11225  ;;  %v13228_v45 = vpop.f32.mrf.mxu3 }
 0x39d   : > { %2066 = vadd.xlane.f32.xlu1 %v2065_v22  ;;  %v13214_v22 = vpop.permute.xlu0 %5816  ;;  %v13216_v7 = vpop.permute.xlu1 %5872 }
 0x39e   : > { %16272 = vst [vmem:[#allocation233_spill] sm:$0xff] %v13214_v22  ;;  %11227 = vpow2.f32 %v2004_v1 }
 0x39f   : > { %16273 = vst [vmem:[#allocation234_spill] sm:$0xff] %v13216_v7 }
 0x3a2   : > { %2069 = vadd.xlane.f32.xlu2 %v2068_v39  ;;  %1931 = vmax.xlane.f32.xlu0 %v1930_v18  ;;  %v1927_v39 = vsel %vm1857_vm1, %v13127_v62, -inf  ;;  %v1965_v18 = vsub.f32 %v12963_v51, %v1893_v33  ;;  %v1939_v51 = vsel %vm1857_vm1, %v13205_v26, -inf }
 0x3a3   : > { %v13236_v15 = vpop.permute.xlu2 %5844 }
 0x3a4   : > { %v13233_v1 = vpop.eup %11227  ;;  %v2008_v19 = vmul.f32 1.442695, %v1965_v18  ;;  %16275 = vst [vmem:[#allocation236_spill] sm:$0xff] %v13236_v15  ;;  %v13243_v33 = vpop.f32.mrf.mxu3 }
 0x3a5   : > { %1925 = vmax.xlane.f32.xlu1 %v1924_v49  ;;  %v2074_v49 = vsel %vm1857_vm1, %v13222_v0, 0.0  ;;  %v1896_v22 = vpop.xlane.xlu0 %1895 }
 0x3a6   : > { %v1966_v54 = vsub.f32 %v12995_v46, %v1896_v22  ;;  %v1936_v22 = vsel %vm1857_vm1, %v13186_v9, -inf }
 0x3aa   : > { %1928 = vmax.xlane.f32.xlu2 %v1927_v39  ;;  %2081 = vadd.xlane.f32.xlu0 %v2080_v32  ;;  %v2077_v39 = vsel %vm1857_vm1, %v13233_v1, 0.0  ;;  %v2010_v32 = vmul.f32 1.442695, %v1966_v54 }
 0x3ac   : > { %v1902_v46 = vpop.xlane.xlu2 %1901 }
 0x3ad   : > { %v1899_v7 = vpop.xlane.xlu1 %1898  ;;  %2075 = vadd.xlane.f32.xlu1 %v2074_v49  ;;  %v1968_v54 = vsub.f32 %v13015_v43, %v1902_v46  ;;  %v13260_v49 = vpop.f32.mrf.mxu3  ;;  %v1942_v43 = vsel %vm1857_vm1, %v13228_v45, -inf }
 0x3ae   : > { %v1967_v5 = vsub.f32 %v13007_v63, %v1899_v7  ;;  %v1933_v63 = vsel %vm1857_vm1, %v13169_v56, -inf  ;;  %v13270_v46 = vpop.permute.xlu0 %3760 }
 0x3af   : > { %16276 = vst [vmem:[#allocation237_spill] sm:$0xff] %v13270_v46 }
 0x3b0   : > { %v2012_v4 = vmul.f32 1.442695, %v1967_v5 }
 0x3b2   : > { %11229 = vpow2.f32 %v2012_v4  ;;  %2078 = vadd.xlane.f32.xlu2 %v2077_v39  ;;  %1940 = vmax.xlane.f32.xlu0 %v1939_v51  ;;  %v2014_v39 = vmul.f32 1.442695, %v1968_v54 }
 0x3b3   : > { %11231 = vpow2.f32 %v2008_v19 }
 0x3b4   : > { %11233 = vpow2.f32 %v2010_v32  ;;  %v1948_v32 = vsel %vm1857_vm1, %v13260_v49, -inf }
 0x3b5   : > { %1934 = vmax.xlane.f32.xlu1 %v1933_v63  ;;  %11235 = vpow2.f32 %v2014_v39  ;;  %v13276_v54 = vpop.f32.mrf.mxu3 }
 0x3b6   : > { %v1951_v39 = vsel %vm1857_vm1, %v13276_v54, -inf }
 0x3b8   : > { %v13247_v7 = vpop.eup %11229 }
 0x3b9   : > { %v13249_v5 = vpop.eup %11231  ;;  %v2089_v4 = vsel %vm1857_vm1, %v13247_v7, 0.0 }
 0x3ba   : > { %1937 = vmax.xlane.f32.xlu2 %v1936_v22  ;;  %2090 = vadd.xlane.f32.xlu0 %v2089_v4  ;;  %v2083_v19 = vsel %vm1857_vm1, %v13249_v5, 0.0  ;;  %v13258_v18 = vpop.eup %11233  ;;  %v1945_v22 = vsel %vm1857_vm1, %v13243_v33, -inf }
 0x3bb   : > { %v2086_v51 = vsel %vm1857_vm1, %v13258_v18, 0.0  ;;  %v13268_v63 = vpop.eup %11235 }
 0x3bc   : > { %v2092_v4 = vsel %vm1857_vm1, %v13268_v63, 0.0 }
 0x3bd   : > { %2084 = vadd.xlane.f32.xlu1 %v2083_v19  ;;  %v13278_v19 = vpop.permute.xlu0 %10831 }
 0x3be   : > { %16277 = vst [vmem:[#allocation238_spill] sm:$0xff] %v13278_v19 }
 0x3c2   : > { %2087 = vadd.xlane.f32.xlu2 %v2086_v51  ;;  %1949 = vmax.xlane.f32.xlu0 %v1948_v32  ;;  %v13284_v32 = vpop.permute.xlu2 %3816 }
 0x3c3   : > { %16279 = vst [vmem:[#allocation240_spill] sm:$0xff] %v13284_v32 }
 0x3c5   : > { %1943 = vmax.xlane.f32.xlu1 %v1942_v43  ;;  %v13282_v51 = vpop.permute.xlu0 %5900  ;;  %v13286_v15 = vpop.permute.xlu1 %3788 }
 0x3c6   : > { %16278 = vst [vmem:[#allocation239_spill] sm:$0xff] %v13282_v51 }
 0x3c7   : > { %16280 = vst [vmem:[#allocation241_spill] sm:$0xff] %v13286_v15 }
 0x3ca   : > { %1946 = vmax.xlane.f32.xlu2 %v1945_v22 }
 0x3cd   : > { %2093 = vadd.xlane.f32.xlu1 %v2092_v4  ;;  %v13289_v4 = vpop.permute.xlu2 %5928  ;;  %v13293_v19 = vpop.permute.xlu1 %10836 }
 0x3ce   : > { %16281 = vst [vmem:[#allocation242_spill] sm:$0xff] %v13289_v4 }
 0x3cf   : > { %16282 = vst [vmem:[#allocation243_spill] sm:$0xff] %v13293_v19 }
 0x3d5   : > { %1952 = vmax.xlane.f32.xlu1 %v1951_v39 }
 0x3e5   : > { %v1905_v43 = vpop.xlane.xlu0 %1904 }
 0x3e6   : > { %v1969_v22 = vsub.f32 %v13025_v27, %v1905_v43 }
 0x3e8   : > { %v2016_v46 = vmul.f32 1.442695, %v1969_v22 }
 0x3ea   : > { %11237 = vpow2.f32 %v2016_v46 }
 0x3ed   : > { %v2055_v31 = vpop.xlane.xlu0 %2054 }
 0x3f0   : > { %v13291_v23 = vpop.eup %11237 }
 0x3f1   : > { %v2095_v39 = vsel %vm1857_vm1, %v13291_v23, 0.0 }
 0x3f2   : > { %2096 = vadd.xlane.f32.xlu2 %v2095_v39 }
 0x3f5   : > { %v2052_v51 = vpop.xlane.xlu2 %2051  ;;  %v1914_v32 = vpop.xlane.xlu0 %1913 }
 0x3f6   : > { %11239 = vrcp.f32 %v2052_v51  ;;  %v1972_v15 = vsub.f32 %v13067_v50, %v1914_v32 }
 0x3f8   : > { %v2022_v8 = vmul.f32 1.442695, %v1972_v15  ;;  %v1908_v27 = vpop.xlane.xlu1 %1907 }
 0x3f9   : > { %v1970_v46 = vsub.f32 %v13033_v25, %v1908_v27 }
 0x3fa   : > { %11241 = vpow2.f32 %v2022_v8 }
 0x3fb   : > { %v2018_v43 = vmul.f32 1.442695, %v1970_v46  ;;  %11243 = vrcp.f32 %v2055_v31 }
 0x3fc   : > { %v11240_v22 = vpop.eup %11239 }
 0x3fd   : > { %v2178_v4 = vmul.f32 %v11240_v22, %v13135_v16  ;;  %11245 = vpow2.f32 %v2018_v43  ;;  %v1911_v19 = vpop.xlane.xlu2 %1910  ;;  %v2064_v13 = vpop.xlane.xlu0 %2063 }
 0x3fe   : > { %v1971_v39 = vsub.f32 %v13053_v55, %v1911_v19  ;;  %11247 = vrcp.f32 %v2064_v13 }
 0x3ff   : > { %10272 = vmatmul.msk.f32.vlgmr.msrb.gmra.mxu3 %vm1857_vm1, %v2178_v4 }
 0x400   : > { %v13302_v51 = vpop.eup %11241  ;;  %v2020_v15 = vmul.f32 1.442695, %v1971_v39  ;;  %2274 = vmatpush.msrb.mxu3 %v12359_v59  ;;  %v2058_v25 = vpop.xlane.xlu1 %2057 }
 0x401   : > { %v2104_v50 = vsel %vm1857_vm1, %v13302_v51, 0.0  ;;  %v11244_v31 = vpop.eup %11243 }
 0x402   : > { %11249 = vpow2.f32 %v2020_v15  ;;  %2105 = vadd.xlane.f32.xlu2 %v2104_v50  ;;  %v2179_v55 = vmul.f32 %v11244_v31, %v13121_v42 }
 0x403   : > { %v13307_v8 = vpop.eup %11245  ;;  %11251 = vrcp.f32 %v2058_v25 }
 0x404   : > { %v11248_v16 = vpop.eup %11247  ;;  %v2098_v13 = vsel %vm1857_vm1, %v13307_v8, 0.0 }
 0x405   : > { %v2061_v19 = vpop.xlane.xlu2 %2060  ;;  %v1923_v32 = vpop.xlane.xlu0 %1922  ;;  %2099 = vadd.xlane.f32.xlu0 %v2098_v13  ;;  %v2182_v59 = vmul.f32 %v11248_v16, %v13152_v34 }
 0x406   : > { %v1975_v4 = vsub.f32 %v13105_v14, %v1923_v32 }
 0x407   : > { %10273 = vmatmul.msk.f32.vlgmr.msra.gmra.mxu3 %vm1857_vm1, %v2179_v55  ;;  %10276 = vmatmul.msk.f32.vlgmr.msrb.gmra.mxu0 %vm1857_vm1, %v2182_v59 }
 0x408   : > { %v13316_v27 = vpop.eup %11249  ;;  %v2028_v46 = vmul.f32 1.442695, %v1975_v4  ;;  %2297 = vmatpush.msra.mxu3 %v12363_v40  ;;  %2504 = vmatpush.msrb.mxu0 %v12505_v17  ;;  %v1917_v43 = vpop.xlane.xlu1 %1916 }
 0x409   : > { %v1973_v42 = vsub.f32 %v13071_v57, %v1917_v43  ;;  %v2101_v22 = vsel %vm1857_vm1, %v13316_v27, 0.0  ;;  %v11252_v34 = vpop.eup %11251 }
 0x40a   : > { %11253 = vpow2.f32 %v2028_v46  ;;  %2102 = vadd.xlane.f32.xlu1 %v2101_v22  ;;  %v2180_v39 = vmul.f32 %v11252_v34, %v13155_v38 }
 0x40b   : > { %v2024_v14 = vmul.f32 1.442695, %v1973_v42  ;;  %11255 = vrcp.f32 %v2061_v19 }
 0x40d   : > { %11257 = vpow2.f32 %v2024_v14  ;;  %v1920_v15 = vpop.xlane.xlu2 %1919  ;;  %v2073_v25 = vpop.xlane.xlu0 %2072 }
 0x40e   : > { %v1974_v40 = vsub.f32 %v13095_v61, %v1920_v15 }
 0x40f   : > { %10274 = vmatmul.msk.f32.vlgmr.msrb.gmra.mxu3 %vm1857_vm1, %v2180_v39 }
 0x410   : > { %v13326_v17 = vpop.eup %11253  ;;  %v2026_v57 = vmul.f32 1.442695, %v1974_v40  ;;  %2389 = vmatpush.msrb.mxu3 %v12430_v37  ;;  %v2067_v50 = vpop.xlane.xlu1 %2066 }
 0x411   : > { %11259 = vrcp.f32 %v2067_v50  ;;  %v2113_v31 = vsel %vm1857_vm1, %v13326_v17, 0.0  ;;  %v11256_v16 = vpop.eup %11255 }
 0x412   : > { %11261 = vpow2.f32 %v2026_v57  ;;  %2114 = vadd.xlane.f32.xlu2 %v2113_v31  ;;  %v2181_v13 = vmul.f32 %v11256_v16, %v13173_v44 }
 0x413   : > { %v13331_v38 = vpop.eup %11257  ;;  %11263 = vrcp.f32 %v2073_v25 }
 0x414   : > { %v2107_v61 = vsel %vm1857_vm1, %v13331_v38, 0.0 }
 0x415   : > { %v2070_v55 = vpop.xlane.xlu2 %2069  ;;  %v1932_v19 = vpop.xlane.xlu0 %1931  ;;  %2108 = vadd.xlane.f32.xlu0 %v2107_v61 }
 0x416   : > { %11265 = vrcp.f32 %v2070_v55  ;;  %v1978_v37 = vsub.f32 %v13146_v35, %v1932_v19 }
 0x417   : > { %v11260_v32 = vpop.eup %11259  ;;  %10275 = vmatmul.msk.f32.vlgmr.msra.gmra.mxu3 %vm1857_vm1, %v2181_v13 }
 0x418   : > { %v13338_v59 = vpop.eup %11261  ;;  %v2183_v4 = vmul.f32 %v11260_v32, %v13189_v6  ;;  %v2034_v46 = vmul.f32 1.442695, %v1978_v37  ;;  %2481 = vmatpush.msra.mxu3 %v12502_v12  ;;  %v1926_v43 = vpop.xlane.xlu1 %1925 }
 0x419   : > { %v1976_v42 = vsub.f32 %v13114_v52, %v1926_v43  ;;  %v2110_v44 = vsel %vm1857_vm1, %v13338_v59, 0.0  ;;  %v11264_v22 = vpop.eup %11263 }
 0x41a   : > { %11267 = vpow2.f32 %v2034_v46  ;;  %10277 = vmatmul.msk.f32.vlgmr.msra.gmra.mxu1 %vm1857_vm1, %v2183_v4  ;;  %2111 = vadd.xlane.f32.xlu1 %v2110_v44  ;;  %v2185_v6 = vmul.f32 %v11264_v22, %v13184_v28 }
 0x41b   : > { %v2030_v35 = vmul.f32 1.442695, %v1976_v42  ;;  %2527 = vmatpush.msra.mxu1 %v12508_v53 }
 0x41c   : > { %v11266_v34 = vpop.eup %11265 }
 0x41d   : > { %v2184_v14 = vmul.f32 %v11266_v34, %v13203_v60  ;;  %11269 = vpow2.f32 %v2030_v35  ;;  %v1929_v12 = vpop.xlane.xlu2 %1928  ;;  %v2082_v39 = vpop.xlane.xlu0 %2081 }
 0x41e   : > { %v1977_v52 = vsub.f32 %v13127_v62, %v1929_v12  ;;  %11271 = vrcp.f32 %v2082_v39 }
 0x41f   : > { %10278 = vmatmul.msk.f32.vlgmr.msra.gmra.mxu2 %vm1857_vm1, %v2184_v14  ;;  %10279 = vmatmul.msk.f32.vlgmr.msrb.gmra.mxu3 %vm1857_vm1, %v2185_v6 }
 0x420   : > { %v13352_v15 = vpop.eup %11267  ;;  %v2032_v25 = vmul.f32 1.442695, %v1977_v52  ;;  %2550 = vmatpush.msra.mxu2 %v12576_v48  ;;  %2573 = vmatpush.msrb.mxu3 %v12579_v21  ;;  %v2076_v53 = vpop.xlane.xlu1 %2075 }
 0x421   : > { %11273 = vrcp.f32 %v2076_v53  ;;  %v2122_v28 = vsel %vm1857_vm1, %v13352_v15, 0.0 }
 0x422   : > { %11275 = vpow2.f32 %v2032_v25  ;;  %2123 = vadd.xlane.f32.xlu2 %v2122_v28 }
 0x423   : > { %v13358_v62 = vpop.eup %11269 }
 0x424   : > { %v11272_v60 = vpop.eup %11271  ;;  %v2116_v40 = vsel %vm1857_vm1, %v13358_v62, 0.0 }
 0x425   : > { %v2188_v57 = vmul.f32 %v11272_v60, %v13218_v41  ;;  %v2079_v50 = vpop.xlane.xlu2 %2078  ;;  %v1941_v31 = vpop.xlane.xlu0 %1940  ;;  %2117 = vadd.xlane.f32.xlu0 %v2116_v40 }
 0x426   : > { %11277 = vrcp.f32 %v2079_v50  ;;  %v1981_v48 = vsub.f32 %v13205_v26, %v1941_v31 }
 0x427   : > { %v11274_v21 = vpop.eup %11273  ;;  %10282 = vmatmul.msk.f32.vlgmr.msrb.gmra.mxu2 %vm1857_vm1, %v2188_v57 }
 0x428   : > { %v13365_v16 = vpop.eup %11275  ;;  %v2186_v61 = vmul.f32 %v11274_v21, %v13222_v0  ;;  %v2040_v13 = vmul.f32 1.442695, %v1981_v48  ;;  %2642 = vmatpush.msrb.mxu2 %v12730_v20  ;;  %v1935_v55 = vpop.xlane.xlu1 %1934 }
 0x429   : > { %v1979_v19 = vsub.f32 %v13169_v56, %v1935_v55  ;;  %v2119_v41 = vsel %vm1857_vm1, %v13365_v16, 0.0 }
 0x42a   : > { %11279 = vpow2.f32 %v2040_v13  ;;  %10280 = vmatmul.msk.f32.vlgmr.msra.gmra.mxu0 %vm1857_vm1, %v2186_v61  ;;  %2120 = vadd.xlane.f32.xlu1 %v2119_v41 }
 0x42b   : > { %v2036_v26 = vmul.f32 1.442695, %v1979_v19  ;;  %2596 = vmatpush.msra.mxu0 %v12712_v58 }
 0x42c   : > { %v11278_v37 = vpop.eup %11277 }
 0x42d   : > { %v2187_v32 = vmul.f32 %v11278_v37, %v13233_v1  ;;  %11281 = vpow2.f32 %v2036_v26  ;;  %v1938_v0 = vpop.xlane.xlu2 %1937  ;;  %v2091_v4 = vpop.xlane.xlu0 %2090  ;;  %v16285_v37 = vld [vmem:[#allocation151_spill] sm:$0xff] }
 0x42e   : > { %v1980_v20 = vsub.f32 %v13186_v9, %v1938_v0  ;;  %11283 = vrcp.f32 %v2091_v4  ;;  %v16287_v0 = vld [vmem:[#allocation21_spill] sm:$0xff]  ;;  %v16288_v4 = vld [vmem:[#allocation215_spill] sm:$0xff] }
 0x42f   : > { %10281 = vmatmul.msk.f32.vlgmr.msrb.gmra.mxu1 %vm1857_vm1, %v2187_v32  ;;  %v16286_v32 = vld [vmem:[#allocation114_spill] sm:$0xff] }
 0x430   : > { %v13377_v56 = vpop.eup %11279  ;;  %v2038_v46 = vmul.f32 1.442695, %v1980_v20  ;;  %2619 = vmatpush.msrb.mxu1 %v12715_v47  ;;  %v2085_v43 = vpop.xlane.xlu1 %2084 }
 0x431   : > { %11285 = vrcp.f32 %v2085_v43  ;;  %v2131_v58 = vsel %vm1857_vm1, %v13377_v56, 0.0  ;;  %v16290_v43 = vld [vmem:[#allocation23_spill] sm:$0xff] }
 0x432   : > { %11287 = vpow2.f32 %v2038_v46  ;;  %2132 = vadd.xlane.f32.xlu2 %v2131_v58  ;;  %v16291_v58 = vld [vmem:[#allocation2_spill] sm:$0xff] }
 0x433   : > { %v13382_v1 = vpop.eup %11281 }
 0x434   : > { %v11284_v42 = vpop.eup %11283  ;;  %v2125_v9 = vsel %vm1857_vm1, %v13382_v1, 0.0 }
 0x435   : > { %v2191_v44 = vmul.f32 %v11284_v42, %v13247_v7  ;;  %v2088_v22 = vpop.xlane.xlu2 %2087  ;;  %2126 = vadd.xlane.f32.xlu0 %v2125_v9  ;;  %v1950_v35 = vpop.xlane.xlu0 %1949 }
 0x436   : > { %11289 = vrcp.f32 %v2088_v22  ;;  %v1984_v47 = vsub.f32 %v13260_v49, %v1950_v35 }
 0x437   : > { %v11286_v34 = vpop.eup %11285  ;;  %10285 = vmatmul.msk.f32.vlgmr.msra.gmra.mxu1 %vm1857_vm1, %v2191_v44 }
 0x438   : > { %v13389_v6 = vpop.eup %11287  ;;  %v2189_v14 = vmul.f32 %v11286_v34, %v13249_v5  ;;  %v2046_v12 = vmul.f32 1.442695, %v1984_v47  ;;  %2711 = vmatpush.msra.mxu1 %v12755_v3  ;;  %v1944_v39 = vpop.xlane.xlu1 %1943  ;;  %v16292_v47 = vld [vmem:[#allocation165_spill] sm:$0xff]  ;;  %v16293_v34 = vld [vmem:[#allocation18_spill] sm:$0xff] }
 0x439   : > { %v1982_v52 = vsub.f32 %v13228_v45, %v1944_v39  ;;  %v2128_v7 = vsel %vm1857_vm1, %v13389_v6, 0.0 }
 0x43a   : > { %11291 = vpow2.f32 %v2046_v12  ;;  %10283 = vmatmul.msk.f32.vlgmr.msra.gmra.mxu3 %vm1857_vm1, %v2189_v14  ;;  %2129 = vadd.xlane.f32.xlu1 %v2128_v7  ;;  %v16294_v14 = vld [vmem:[#allocation13_spill] sm:$0xff]  ;;  %v16295_v12 = vld [vmem:[#allocation160_spill] sm:$0xff] }
 0x43b   : > { %v2042_v49 = vmul.f32 1.442695, %v1982_v52  ;;  %2665 = vmatpush.msra.mxu3 %v12733_v2 }
 0x43c   : > { %v11290_v25 = vpop.eup %11289 }
 0x43d   : > { %v2190_v53 = vmul.f32 %v11290_v25, %v13258_v18  ;;  %11293 = vpow2.f32 %v2042_v49  ;;  %v1947_v5 = vpop.xlane.xlu2 %1946  ;;  %v16298_v25 = vld [vmem:[#allocation6_spill] sm:$0xff] }
 0x43e   : > { %v1983_v28 = vsub.f32 %v13243_v33, %v1947_v5  ;;  %v16300_v5 = vld [vmem:[#allocation28_spill] sm:$0xff] }
 0x43f   : > { %10284 = vmatmul.msk.f32.vlgmr.msrb.gmra.mxu0 %vm1857_vm1, %v2190_v53  ;;  %v16299_v53 = vld [vmem:[#allocation19_spill] sm:$0xff] }
 0x440   : > { %v13401_v45 = vpop.eup %11291  ;;  %v2044_v60 = vmul.f32 1.442695, %v1983_v28  ;;  %2688 = vmatpush.msrb.mxu0 %v12752_v11  ;;  %v2094_v40 = vpop.xlane.xlu1 %2093 }
 0x441   : > { %11295 = vrcp.f32 %v2094_v40  ;;  %v2140_v57 = vsel %vm1857_vm1, %v13401_v45, 0.0 }
 0x442   : > { %11297 = vpow2.f32 %v2044_v60  ;;  %2141 = vadd.xlane.f32.xlu2 %v2140_v57 }
 0x443   : > { %v13406_v2 = vpop.eup %11293 }
 0x444   : > { %v2134_v18 = vsel %vm1857_vm1, %v13406_v2, 0.0 }
 0x445   : > { %2135 = vadd.xlane.f32.xlu0 %v2134_v18  ;;  %v16301_v18 = vld [vmem:[#allocation203_spill] sm:$0xff] }
 0x447   : > { %v11296_v33 = vpop.eup %11295 }
 0x448   : > { %v13410_v50 = vpop.eup %11297  ;;  %v2192_v31 = vmul.f32 %v11296_v33, %v13268_v63  ;;  %v1953_v48 = vpop.xlane.xlu1 %1952  ;;  %v16302_v33 = vld [vmem:[#allocation11_spill] sm:$0xff] }
 0x449   : > { %v1985_v21 = vsub.f32 %v13276_v54, %v1953_v48  ;;  %v2137_v61 = vsel %vm1857_vm1, %v13410_v50, 0.0  ;;  %v16284_v54 = vld [vmem:[#allocation162_spill] sm:$0xff] }
 0x44a   : > { %10286 = vmatmul.msk.f32.vlgmr.msra.gmra.mxu2 %vm1857_vm1, %v2192_v31  ;;  %2138 = vadd.xlane.f32.xlu1 %v2137_v61  ;;  %v16303_v31 = vld [vmem:[#allocation36_spill] sm:$0xff]  ;;  %v16304_v48 = vld [vmem:[#allocation166_spill] sm:$0xff] }
 0x44b   : > { %v2048_v13 = vmul.f32 1.442695, %v1985_v21  ;;  %2734 = vmatpush.msra.mxu2 %v12870_v10  ;;  %v16283_v10 = vld [vmem:[#allocation206_spill] sm:$0xff] }
 0x44d   : > { %11299 = vpow2.f32 %v2048_v13 }
 0x453   : > { %v13418_v55 = vpop.eup %11299 }
 0x454   : > { %v2143_v19 = vsel %vm1857_vm1, %v13418_v55, 0.0 }
 0x455   : > { %2144 = vadd.xlane.f32.xlu0 %v2143_v19 }
 0x45a   : > { %10846 = vrot.lane.b32.xlu2 %v12725_v36, %s11728_s24 }
 0x462   : > { %10861 = vrot.lane.b32.xlu2 %v12883_v29, %s11728_s24 }
 0x463   : > { %10851 = vrot.lane.b32.xlu1 %v12741_v24, %s11728_s24 }
 0x465   : > { %v2097_v63 = vpop.xlane.xlu2 %2096 }
 0x466   : > { %11301 = vrcp.f32 %v2097_v63  ;;  %v16307_v63 = vld [vmem:[#allocation31_spill] sm:$0xff] }
 0x469   : > { %10841 = vrot.lane.b32.xlu0 %v12590_v30, %s11728_s24 }
 0x46a   : > { %10876 = vrot.lane.b32.xlu2 %v16283_v10, %s11728_s24  ;;  %v16308_v10 = vld [vmem:[#allocation38_spill] sm:$0xff] }
 0x46b   : > { %10866 = vrot.lane.b32.xlu1 %v16284_v54, %s11728_s24  ;;  %v16309_v54 = vld [vmem:[#allocation3_spill] sm:$0xff] }
 0x46c   : > { %v11302_v41 = vpop.eup %11301 }
 0x46d   : > { %v2193_v26 = vmul.f32 %v11302_v41, %v13291_v23  ;;  %v16289_v23 = vld [vmem:[#allocation168_spill] sm:$0xff] }
 0x46f   : > { %10287 = vmatmul.msk.f32.vlgmr.msrb.gmra.mxu3 %vm1857_vm1, %v2193_v26 }
 0x470   : > { %2757 = vmatpush.msrb.mxu3 %v16285_v37 }
 0x471   : > { %10856 = vrot.lane.b32.xlu0 %v16286_v32, %s11728_s24 }
 0x472   : > { %7168 = vrot.lane.b32.xlu2 %v16287_v0, %s11729_s23  ;;  %v16310_v0 = vld [vmem:[#allocation141_spill] sm:$0xff] }
 0x473   : > { %10881 = vrot.lane.b32.xlu1 %v16288_v4, %s11728_s24 }
 0x475   : > { %v2106_v20 = vpop.xlane.xlu2 %2105 }
 0x476   : > { %11303 = vrcp.f32 %v2106_v20  ;;  %v16311_v20 = vld [vmem:[#allocation33_spill] sm:$0xff] }
 0x478   : > { %v2100_v46 = vpop.xlane.xlu0 %2099 }
 0x479   : > { %11305 = vrcp.f32 %v2100_v46  ;;  %10871 = vrot.lane.b32.xlu0 %v16289_v23, %s11728_s24  ;;  %v16312_v46 = vld [vmem:[#allocation15_spill] sm:$0xff]  ;;  %v16313_v23 = vld [vmem:[#allocation213_spill] sm:$0xff] }
 0x47a   : > { %7196 = vrot.lane.b32.xlu2 %v16290_v43, %s11729_s23 }
 0x47b   : > { %7138 = vrot.lane.b32.xlu1 %v16291_v58, %s11729_s23 }
 0x47c   : > { %v11304_v42 = vpop.eup %11303 }
 0x47d   : > { %v2196_v9 = vmul.f32 %v11304_v42, %v13302_v51  ;;  %v2103_v44 = vpop.xlane.xlu1 %2102  ;;  %v16296_v51 = vld [vmem:[#allocation25_spill] sm:$0xff]  ;;  %v16315_v42 = vld [vmem:[#allocation214_spill] sm:$0xff] }
 0x47e   : > { %11307 = vrcp.f32 %v2103_v44  ;;  %v16316_v44 = vld [vmem:[#allocation8_spill] sm:$0xff] }
 0x47f   : > { %v11306_v22 = vpop.eup %11305  ;;  %10290 = vmatmul.msk.f32.vlgmr.msrb.gmra.mxu2 %vm1857_vm1, %v2196_v9 }
 0x480   : > { %v2194_v35 = vmul.f32 %v11306_v22, %v13307_v8  ;;  %2826 = vmatpush.msrb.mxu2 %v16292_v47  ;;  %v16297_v8 = vld [vmem:[#allocation159_spill] sm:$0xff] }
 0x481   : > { %7140 = vrot.lane.b32.xlu0 %v16293_v34, %s11729_s23  ;;  %v16317_v22 = vld [vmem:[#allocation43_spill] sm:$0xff] }
 0x482   : > { %7222 = vrot.lane.b32.xlu2 %v16294_v14, %s11729_s23  ;;  %10288 = vmatmul.msk.f32.vlgmr.msra.gmra.mxu0 %vm1857_vm1, %v2194_v35 }
 0x483   : > { %2780 = vmatpush.msra.mxu0 %v16295_v12  ;;  %7224 = vrot.lane.b32.xlu1 %v16296_v51, %s11729_s23 }
 0x484   : > { %v11308_v39 = vpop.eup %11307 }
 0x485   : > { %v2195_v52 = vmul.f32 %v11308_v39, %v13316_v27  ;;  %v2115_v7 = vpop.xlane.xlu2 %2114  ;;  %v16318_v39 = vld [vmem:[#allocation153_spill] sm:$0xff] }
 0x486   : > { %11309 = vrcp.f32 %v2115_v7  ;;  %v16320_v7 = vld [vmem:[#allocation144_spill] sm:$0xff] }
 0x487   : > { %10289 = vmatmul.msk.f32.vlgmr.msrb.gmra.mxu1 %vm1857_vm1, %v2195_v52  ;;  %v16319_v52 = vld [vmem:[#allocation12_spill] sm:$0xff] }
 0x488   : > { %2803 = vmatpush.msrb.mxu1 %v16297_v8  ;;  %v2109_v49 = vpop.xlane.xlu0 %2108 }
 0x489   : > { %11311 = vrcp.f32 %v2109_v49  ;;  %7166 = vrot.lane.b32.xlu0 %v16298_v25, %s11729_s23 }
 0x48a   : > { %7250 = vrot.lane.b32.xlu2 %v16299_v53, %s11729_s23  ;;  %v16321_v53 = vld [vmem:[#allocation152_spill] sm:$0xff] }
 0x48b   : > { %7252 = vrot.lane.b32.xlu1 %v16300_v5, %s11729_s23 }
 0x48c   : > { %v11310_v28 = vpop.eup %11309 }
 0x48d   : > { %v2199_v27 = vmul.f32 %v11310_v28, %v13326_v17  ;;  %v2112_v60 = vpop.xlane.xlu1 %2111  ;;  %v16305_v17 = vld [vmem:[#allocation27_spill] sm:$0xff] }
 0x48e   : > { %11313 = vrcp.f32 %v2112_v60 }
 0x48f   : > { %v11312_v40 = vpop.eup %11311  ;;  %10293 = vmatmul.msk.f32.vlgmr.msra.gmra.mxu1 %vm1857_vm1, %v2199_v27 }
 0x490   : > { %v2197_v57 = vmul.f32 %v11312_v40, %v13331_v38  ;;  %2895 = vmatpush.msra.mxu1 %v16301_v18  ;;  %v16306_v38 = vld [vmem:[#allocation205_spill] sm:$0xff] }
 0x491   : > { %7194 = vrot.lane.b32.xlu0 %v16302_v33, %s11729_s23 }
 0x492   : > { %7336 = vrot.lane.b32.xlu2 %v16303_v31, %s11729_s23  ;;  %10291 = vmatmul.msk.f32.vlgmr.msra.gmra.mxu3 %vm1857_vm1, %v2197_v57  ;;  %v16323_v57 = vld [vmem:[#allocation158_spill] sm:$0xff] }
 0x493   : > { %2849 = vmatpush.msra.mxu3 %v16304_v48  ;;  %7278 = vrot.lane.b32.xlu1 %v16305_v17, %s11729_s23  ;;  %v16324_v17 = vld [vmem:[#allocation93_spill] sm:$0xff] }
 0x494   : > { %v11314_v21 = vpop.eup %11313 }
 0x495   : > { %v2198_v61 = vmul.f32 %v11314_v21, %v13338_v59  ;;  %v2124_v13 = vpop.xlane.xlu2 %2123  ;;  %v16326_v21 = vld [vmem:[#allocation161_spill] sm:$0xff] }
 0x496   : > { %11315 = vrcp.f32 %v2124_v13  ;;  %v16328_v13 = vld [vmem:[#allocation177_spill] sm:$0xff] }
 0x497   : > { %10292 = vmatmul.msk.f32.vlgmr.msrb.gmra.mxu0 %vm1857_vm1, %v2198_v61  ;;  %v16327_v61 = vld [vmem:[#allocation67_spill] sm:$0xff] }
 0x498   : > { %2872 = vmatpush.msrb.mxu0 %v16306_v38  ;;  %v2118_v19 = vpop.xlane.xlu0 %2117 }
 0x499   : > { %11317 = vrcp.f32 %v2118_v19  ;;  %7280 = vrot.lane.b32.xlu0 %v16307_v63, %s11729_s23  ;;  %v16329_v19 = vld [vmem:[#allocation62_spill] sm:$0xff] }
 0x49a   : > { %7364 = vrot.lane.b32.xlu2 %v16308_v10, %s11729_s23  ;;  %v16330_v10 = vld [vmem:[#allocation79_spill] sm:$0xff] }
 0x49b   : > { %7306 = vrot.lane.b32.xlu1 %v16309_v54, %s11729_s23  ;;  %v16331_v54 = vld [vmem:[#allocation195_spill] sm:$0xff] }
 0x49c   : > { %v11316_v41 = vpop.eup %11315 }
 0x49d   : > { %v2202_v59 = vmul.f32 %v11316_v41, %v13352_v15  ;;  %v2121_v26 = vpop.xlane.xlu1 %2120  ;;  %v16314_v15 = vld [vmem:[#allocation40_spill] sm:$0xff]  ;;  %v16332_v41 = vld [vmem:[#allocation178_spill] sm:$0xff] }
 0x49e   : > { %11319 = vrcp.f32 %v2121_v26  ;;  %v16334_v26 = vld [vmem:[#allocation170_spill] sm:$0xff] }
 0x49f   : > { %v11318_v37 = vpop.eup %11317  ;;  %10296 = vmatmul.msk.f32.vlgmr.msra.gmra.mxu0 %vm1857_vm1, %v2202_v59  ;;  %v16333_v59 = vld [vmem:[#allocation109_spill] sm:$0xff] }
 0x4a0   : > { %v2200_v32 = vmul.f32 %v11318_v37, %v13358_v62  ;;  %10304 = vmatpush.xpose.msk.msra.mxu0 %vm1024_vm0, %v16310_v0  ;;  %v16335_v37 = vld [vmem:[#allocation184_spill] sm:$0xff]  ;;  %v16338_v0 = vld [vmem:[#allocation201_spill] sm:$0xff] }
 0x4a1   : > { %7308 = vrot.lane.b32.xlu0 %v16311_v20, %s11729_s23  ;;  %v16339_v20 = vld [vmem:[#allocation188_spill] sm:$0xff] }
 0x4a2   : > { %7390 = vrot.lane.b32.xlu2 %v16312_v46, %s11729_s23  ;;  %10294 = vmatmul.msk.f32.vlgmr.msra.gmra.mxu2 %vm1857_vm1, %v2200_v32  ;;  %v16337_v32 = vld [vmem:[#allocation122_spill] sm:$0xff] }
 0x4a3   : > { %2918 = vmatpush.msra.mxu2 %v16313_v23  ;;  %7392 = vrot.lane.b32.xlu1 %v16314_v15, %s11729_s23  ;;  %v16340_v46 = vld [vmem:[#allocation94_spill] sm:$0xff]  ;;  %v16341_v23 = vld [vmem:[#allocation96_spill] sm:$0xff] }
 0x4a4   : > { %v11320_v43 = vpop.eup %11319  ;;  %v16342_v15 = vld [vmem:[#allocation186_spill] sm:$0xff] }
 0x4a5   : > { %v2201_v58 = vmul.f32 %v11320_v43, %v13365_v16  ;;  %v2133_v62 = vpop.xlane.xlu2 %2132  ;;  %v16343_v43 = vld [vmem:[#allocation197_spill] sm:$0xff] }
 0x4a6   : > { %11321 = vrcp.f32 %v2133_v62  ;;  %v16345_v62 = vld [vmem:[#allocation97_spill] sm:$0xff] }
 0x4a7   : > { %10295 = vmatmul.msk.f32.vlgmr.msrb.gmra.mxu3 %vm1857_vm1, %v2201_v58  ;;  %v16344_v58 = vld [vmem:[#allocation140_spill] sm:$0xff] }
 0x4a8   : > { %2941 = vmatpush.msrb.mxu3 %v16315_v42  ;;  %v2127_v9 = vpop.xlane.xlu0 %2126  ;;  %v16346_v42 = vld [vmem:[#allocation218_spill] sm:$0xff] }
 0x4a9   : > { %11323 = vrcp.f32 %v2127_v9  ;;  %7334 = vrot.lane.b32.xlu0 %v16316_v44, %s11729_s23  ;;  %v16347_v9 = vld [vmem:[#allocation204_spill] sm:$0xff]  ;;  %v16348_v44 = vld [vmem:[#allocation83_spill] sm:$0xff] }
 0x4ab   : > { %7420 = vrot.lane.b32.xlu1 %v16317_v22, %s11729_s23  ;;  %v16349_v22 = vld [vmem:[#allocation123_spill] sm:$0xff] }
 0x4ac   : > { %v11322_v35 = vpop.eup %11321 }
 0x4ad   : > { %v2205_v34 = vmul.f32 %v11322_v35, %v13377_v56  ;;  %v2130_v14 = vpop.xlane.xlu1 %2129  ;;  %v16350_v35 = vld [vmem:[#allocation196_spill] sm:$0xff] }
 0x4ae   : > { %11325 = vrcp.f32 %v2130_v14  ;;  %v16352_v14 = vld [vmem:[#allocation86_spill] sm:$0xff] }
 0x4af   : > { %v11324_v16 = vpop.eup %11323  ;;  %10299 = vmatmul.msk.f32.vlgmr.msra.gmra.mxu3 %vm1857_vm1, %v2205_v34  ;;  %v16351_v34 = vld [vmem:[#allocation216_spill] sm:$0xff] }
 0x4b0   : > { %v2203_v51 = vmul.f32 %v11324_v16, %v13382_v1  ;;  %10310 = vmatpush.xpose.msk.msra.mxu3 %vm1024_vm0, %v16318_v39  ;;  %v16353_v16 = vld [vmem:[#allocation133_spill] sm:$0xff] }
 0x4b1   : > { %7362 = vrot.lane.b32.xlu0 %v16319_v52, %s11729_s23  ;;  %v16355_v39 = vld [vmem:[#allocation217_spill] sm:$0xff] }
 0x4b2   : > { %10297 = vmatmul.msk.f32.vlgmr.msrb.gmra.mxu1 %vm1857_vm1, %v2203_v51  ;;  %v16354_v51 = vld [vmem:[#allocation231_spill] sm:$0xff]  ;;  %v16356_v52 = vld [vmem:[#allocation125_spill] sm:$0xff] }
 0x4b3   : > { %10306 = vmatpush.xpose.msk.msrb.mxu1 %vm1024_vm0, %v16320_v7  ;;  %v16357_v7 = vld [vmem:[#allocation69_spill] sm:$0xff] }
 0x4b4   : > { %v11326_v49 = vpop.eup %11325 }
 0x4b5   : > { %v2204_v56 = vmul.f32 %v11326_v49, %v13389_v6  ;;  %v2142_v25 = vpop.xlane.xlu2 %2141  ;;  %v16322_v6 = vld [vmem:[#allocation169_spill] sm:$0xff]  ;;  %v16358_v49 = vld [vmem:[#allocation202_spill] sm:$0xff] }
 0x4b6   : > { %11327 = vrcp.f32 %v2142_v25  ;;  %v16360_v25 = vld [vmem:[#allocation130_spill] sm:$0xff] }
 0x4b7   : > { %10298 = vmatmul.msk.f32.vlgmr.msrb.gmra.mxu2 %vm1857_vm1, %v2204_v56  ;;  %v16359_v56 = vld [vmem:[#allocation223_spill] sm:$0xff] }
 0x4b8   : > { %10308 = vmatpush.xpose.msk.msrb.mxu2 %vm1024_vm0, %v16321_v53  ;;  %v2136_v1 = vpop.xlane.xlu0 %2135  ;;  %v16361_v53 = vld [vmem:[#allocation89_spill] sm:$0xff] }
 0x4b9   : > { %11329 = vrcp.f32 %v2136_v1  ;;  %v16362_v1 = vld [vmem:[#allocation241_spill] sm:$0xff] }
 0x4bc   : > { %v11328_v5 = vpop.eup %11327 }
 0x4bd   : > { %v2208_v28 = vmul.f32 %v11328_v5, %v13401_v45  ;;  %v2139_v27 = vpop.xlane.xlu1 %2138  ;;  %v16325_v45 = vld [vmem:[#allocation179_spill] sm:$0xff]  ;;  %v16363_v5 = vld [vmem:[#allocation224_spill] sm:$0xff] }
 0x4be   : > { %11331 = vrcp.f32 %v2139_v27  ;;  %v16365_v27 = vld [vmem:[#allocation119_spill] sm:$0xff] }
 0x4bf   : > { %v11330_v60 = vpop.eup %11329  ;;  %10302 = vmatmul.msk.f32.vlgmr.msra.gmra.mxu2 %vm1857_vm1, %v2208_v28  ;;  %v16364_v28 = vld [vmem:[#allocation135_spill] sm:$0xff] }
 0x4c0   : > { %v2206_v40 = vmul.f32 %v11330_v60, %v13406_v2  ;;  %10316 = vmatpush.xpose.msk.msra.mxu2 %vm1024_vm0, %v16322_v6  ;;  %v16366_v60 = vld [vmem:[#allocation222_spill] sm:$0xff] }
 0x4c1   : > { %v16368_v6 = vld [vmem:[#allocation150_spill] sm:$0xff] }
 0x4c2   : > { %10300 = vmatmul.msk.f32.vlgmr.msrb.gmra.mxu0 %vm1857_vm1, %v2206_v40  ;;  %v16367_v40 = vld [vmem:[#allocation235_spill] sm:$0xff] }
 0x4c3   : > { %10312 = vmatpush.xpose.msk.msrb.mxu0 %vm1024_vm0, %v16323_v57  ;;  %v10738_v57 = vunpack.i.l.bf16 %v16368_v6 }
 0x4c4   : > { %v11332_v33 = vpop.eup %11331 }
 0x4c5   : > { %v2207_v31 = vmul.f32 %v11332_v33, %v13410_v50  ;;  %v16369_v33 = vld [vmem:[#allocation72_spill] sm:$0xff] }
 0x4c7   : > { %10309 = vmatmul.msk.f32.vlgmr.msrb.gmra.mxu2 %vm1024_vm0, %v16324_v17  ;;  %10301 = vmatmul.msk.f32.vlgmr.msra.gmra.mxu1 %vm1857_vm1, %v2207_v31  ;;  %v16370_v31 = vld [vmem:[#allocation117_spill] sm:$0xff]  ;;  %v16371_v17 = vld [vmem:[#allocation148_spill] sm:$0xff] }
 0x4c8   : > { %10324 = vmatpush.xpose.msk.msrb.mxu2 %vm1024_vm0, %v16325_v45  ;;  %v2145_v2 = vpop.xlane.xlu0 %2144  ;;  %10314 = vmatpush.xpose.msk.msra.mxu1 %vm1024_vm0, %v16326_v21  ;;  %v10728_v45 = vunpack.i.l.bf16 %v16371_v17  ;;  %v16373_v21 = vld [vmem:[#allocation101_spill] sm:$0xff] }
 0x4c9   : > { %11333 = vrcp.f32 %v2145_v2  ;;  %v16372_v2 = vld [vmem:[#allocation237_spill] sm:$0xff] }
 0x4ca   : > { %10305 = vmatmul.msk.f32.vlgmr.msra.gmra.mxu0 %vm1024_vm0, %v16327_v61  ;;  %v16374_v61 = vld [vmem:[#allocation129_spill] sm:$0xff] }
 0x4cb   : > { %10320 = vmatpush.xpose.msk.msra.mxu0 %vm1024_vm0, %v16328_v13  ;;  %v13637_v13 = vpop.f32.mrf.mxu3 }
 0x4cc   : > { %16375 = vst [vmem:[#allocation206_spill] sm:$0xff] %v13637_v13 }
 0x4cf   : > { %v11334_v50 = vpop.eup %11333  ;;  %10317 = vmatmul.msk.f32.vlgmr.msra.gmra.mxu2 %vm1024_vm0, %v16329_v19  ;;  %10307 = vmatmul.msk.f32.vlgmr.msrb.gmra.mxu1 %vm1024_vm0, %v16330_v10  ;;  %v16377_v19 = vld [vmem:[#allocation174_spill] sm:$0xff]  ;;  %v10729_v10 = vunpack.i.h.bf16 %v16371_v17 }
 0x4d0   : > { %v2209_v63 = vmul.f32 %v11334_v50, %v13418_v55  ;;  %10332 = vmatpush.xpose.msk.msra.mxu2 %vm1024_vm0, %v16331_v54  ;;  %10322 = vmatpush.xpose.msk.msrb.mxu1 %vm1024_vm0, %v16332_v41  ;;  %v16336_v55 = vld [vmem:[#allocation115_spill] sm:$0xff]  ;;  %v16376_v50 = vld [vmem:[#allocation232_spill] sm:$0xff]  ;;  %v16379_v41 = vld [vmem:[#allocation142_spill] sm:$0xff] }
 0x4d1   : > { %v16378_v54 = vld [vmem:[#allocation108_spill] sm:$0xff] }
 0x4d2   : > { %10303 = vmatmul.msk.f32.vlgmr.msrb.gmra.mxu3 %vm1857_vm1, %v2209_v63  ;;  %10313 = vmatmul.msk.f32.vlgmr.msrb.gmra.mxu0 %vm1024_vm0, %v16333_v59  ;;  %v10758_v63 = vunpack.i.l.bf16 %v16377_v19  ;;  %v16380_v59 = vld [vmem:[#allocation163_spill] sm:$0xff] }
 0x4d3   : > { %10318 = vmatpush.xpose.msk.msrb.mxu3 %vm1024_vm0, %v16334_v26  ;;  %10328 = vmatpush.xpose.msk.msrb.mxu0 %vm1024_vm0, %v16335_v37  ;;  %v10748_v26 = vunpack.i.l.bf16 %v16380_v59  ;;  %v16381_v37 = vld [vmem:[#allocation137_spill] sm:$0xff] }
 0x4d7   : > { %10325 = vmatmul.msk.f32.vlgmr.msrb.gmra.mxu2 %vm1024_vm0, %v16336_v55  ;;  %10315 = vmatmul.msk.f32.vlgmr.msra.gmra.mxu1 %vm1024_vm0, %v16337_v32  ;;  %v16382_v55 = vld [vmem:[#allocation98_spill] sm:$0xff]  ;;  %v16383_v32 = vld [vmem:[#allocation240_spill] sm:$0xff] }
 0x4d8   : > { %10340 = vmatpush.xpose.msk.msrb.mxu2 %vm1024_vm0, %v16338_v0  ;;  %10330 = vmatpush.xpose.msk.msra.mxu1 %vm1024_vm0, %v16339_v20  ;;  %v13654_v0 = vpop.f32.mrf.mxu3  ;;  %v10749_v20 = vunpack.i.h.bf16 %v16380_v59 }
 0x4d9   : > { %16384 = vst [vmem:[#allocation162_spill] sm:$0xff] %v13654_v0 }
 0x4da   : > { %10311 = vmatmul.msk.f32.vlgmr.msra.gmra.mxu3 %vm1024_vm0, %v16340_v46  ;;  %10321 = vmatmul.msk.f32.vlgmr.msra.gmra.mxu0 %vm1024_vm0, %v16341_v23  ;;  %v16385_v46 = vld [vmem:[#allocation102_spill] sm:$0xff]  ;;  %v10739_v23 = vunpack.i.h.bf16 %v16368_v6 }
 0x4db   : > { %10326 = vmatpush.xpose.msk.msra.mxu3 %vm1024_vm0, %v16342_v15  ;;  %10336 = vmatpush.xpose.msk.msra.mxu0 %vm1024_vm0, %v16343_v43  ;;  %v16386_v15 = vld [vmem:[#allocation76_spill] sm:$0xff]  ;;  %v13662_v43 = vpop.f32.mrf.mxu0 }
 0x4dc   : > { %16387 = vst [vmem:[#allocation151_spill] sm:$0xff] %v13662_v43 }
 0x4df   : > { %10333 = vmatmul.msk.f32.vlgmr.msra.gmra.mxu2 %vm1024_vm0, %v16344_v58  ;;  %10323 = vmatmul.msk.f32.vlgmr.msrb.gmra.mxu1 %vm1024_vm0, %v16345_v62  ;;  %v10759_v62 = vunpack.i.h.bf16 %v16377_v19 }
 0x4e0   : > { %10348 = vmatpush.xpose.msk.msra.mxu2 %vm1024_vm0, %v16346_v42  ;;  %10338 = vmatpush.xpose.msk.msrb.mxu1 %vm1024_vm0, %v16347_v9  ;;  %v13664_v58 = vpop.f32.mrf.mxu3  ;;  %v13667_v42 = vpop.f32.mrf.mxu1  ;;  %v16390_v9 = vld [vmem:[#allocation127_spill] sm:$0xff] }
 0x4e1   : > { %16388 = vst [vmem:[#allocation114_spill] sm:$0xff] %v13664_v58 }
 0x4e2   : > { %10319 = vmatmul.msk.f32.vlgmr.msrb.gmra.mxu3 %vm1024_vm0, %v16348_v44  ;;  %10329 = vmatmul.msk.f32.vlgmr.msrb.gmra.mxu0 %vm1024_vm0, %v16349_v22  ;;  %16389 = vst [vmem:[#allocation21_spill] sm:$0xff] %v13667_v42 }
 0x4e3   : > { %10334 = vmatpush.xpose.msk.msrb.mxu3 %vm1024_vm0, %v16350_v35  ;;  %10344 = vmatpush.xpose.msk.msrb.mxu0 %vm1024_vm0, %v16351_v34  ;;  %v13671_v44 = vpop.f32.mrf.mxu0 }
 0x4e4   : > { %16391 = vst [vmem:[#allocation168_spill] sm:$0xff] %v13671_v44 }
 0x4e7   : > { %10341 = vmatmul.msk.f32.vlgmr.msrb.gmra.mxu2 %vm1024_vm0, %v16352_v14  ;;  %10331 = vmatmul.msk.f32.vlgmr.msra.gmra.mxu1 %vm1024_vm0, %v16353_v16  ;;  %v13679_v14 = vpop.f32.mrf.mxu2 }
 0x4e8   : > { %10356 = vmatpush.xpose.msk.msrb.mxu2 %vm1024_vm0, %v16354_v51  ;;  %10346 = vmatpush.xpose.msk.msra.mxu1 %vm1024_vm0, %v16355_v39  ;;  %v13673_v22 = vpop.f32.mrf.mxu3  ;;  %v13675_v35 = vpop.f32.mrf.mxu1  ;;  %16395 = vst [vmem:[#allocation13_spill] sm:$0xff] %v13679_v14 }
 0x4e9   : > { %16392 = vst [vmem:[#allocation23_spill] sm:$0xff] %v13673_v22 }
 0x4ea   : > { %10327 = vmatmul.msk.f32.vlgmr.msra.gmra.mxu3 %vm1024_vm0, %v16356_v52  ;;  %10337 = vmatmul.msk.f32.vlgmr.msra.gmra.mxu0 %vm1024_vm0, %v16357_v7  ;;  %16393 = vst [vmem:[#allocation2_spill] sm:$0xff] %v13675_v35 }
 0x4eb   : > { %10342 = vmatpush.xpose.msk.msra.mxu3 %vm1024_vm0, %v16358_v49  ;;  %10352 = vmatpush.xpose.msk.msra.mxu0 %vm1024_vm0, %v16359_v56  ;;  %v13677_v34 = vpop.f32.mrf.mxu0 }
 0x4ec   : > { %16394 = vst [vmem:[#allocation18_spill] sm:$0xff] %v13677_v34 }
 0x4ef   : > { %10349 = vmatmul.msk.f32.vlgmr.msra.gmra.mxu2 %vm1024_vm0, %v16360_v25  ;;  %10339 = vmatmul.msk.f32.vlgmr.msrb.gmra.mxu1 %vm1024_vm0, %v16361_v53  ;;  %v13687_v52 = vpop.f32.mrf.mxu2 }
 0x4f0   : > { %10364 = vmatpush.xpose.msk.msra.mxu2 %vm1024_vm0, %v16362_v1  ;;  %10354 = vmatpush.xpose.msk.msrb.mxu1 %vm1024_vm0, %v16363_v5  ;;  %v13681_v16 = vpop.f32.mrf.mxu3  ;;  %v13683_v51 = vpop.f32.mrf.mxu1  ;;  %16399 = vst [vmem:[#allocation28_spill] sm:$0xff] %v13687_v52 }
 0x4f1   : > { %16396 = vst [vmem:[#allocation25_spill] sm:$0xff] %v13681_v16 }
 0x4f2   : > { %10335 = vmatmul.msk.f32.vlgmr.msrb.gmra.mxu3 %vm1024_vm0, %v16364_v28  ;;  %10345 = vmatmul.msk.f32.vlgmr.msrb.gmra.mxu0 %vm1024_vm0, %v16365_v27  ;;  %16397 = vst [vmem:[#allocation6_spill] sm:$0xff] %v13683_v51 }
 0x4f3   : > { %10350 = vmatpush.xpose.msk.msrb.mxu3 %vm1024_vm0, %v16366_v60  ;;  %10360 = vmatpush.xpose.msk.msrb.mxu0 %vm1024_vm0, %v16367_v40 }
 0x4f7   : > { %10357 = vmatmul.msk.f32.vlgmr.msrb.gmra.mxu2 %vm1024_vm0, %v16369_v33  ;;  %10347 = vmatmul.msk.f32.vlgmr.msra.gmra.mxu1 %vm1024_vm0, %v16370_v31  ;;  %v13695_v25 = vpop.f32.mrf.mxu2 }
 0x4f8   : > { %4270 = vmatpush.msrb.mxu2 %v10738_v57  ;;  %10362 = vmatpush.xpose.msk.msra.mxu1 %vm1024_vm0, %v16372_v2  ;;  %v13689_v7 = vpop.f32.mrf.mxu3  ;;  %16403 = vst [vmem:[#allocation31_spill] sm:$0xff] %v13695_v25 }
 0x4f9   : > { %16400 = vst [vmem:[#allocation11_spill] sm:$0xff] %v13689_v7 }
 0x4fa   : > { %10343 = vmatmul.msk.f32.vlgmr.msra.gmra.mxu3 %vm1024_vm0, %v16373_v21  ;;  %10353 = vmatmul.msk.f32.vlgmr.msra.gmra.mxu0 %vm1024_vm0, %v16374_v61 }
 0x4fb   : > { %10358 = vmatpush.xpose.msk.msra.mxu3 %vm1024_vm0, %v16376_v50  ;;  %4216 = vmatpush.msra.mxu0 %v10728_v45 }
 0x4ff   : > { %10365 = vmatmul.msk.f32.vlgmr.msra.gmra.mxu2 %vm1024_vm0, %v16378_v54  ;;  %10355 = vmatmul.msk.f32.vlgmr.msrb.gmra.mxu1 %vm1024_vm0, %v16379_v41  ;;  %v13685_v39 = vpop.f32.mrf.mxu0 }
 0x500   : > { %4378 = vmatpush.msra.mxu2 %v10758_v63  ;;  %4243 = vmatpush.msrb.mxu1 %v10729_v10  ;;  %16398 = vst [vmem:[#allocation19_spill] sm:$0xff] %v13685_v39  ;;  %v13697_v53 = vpop.f32.mrf.mxu3 }
 0x501   : > { %16404 = vst [vmem:[#allocation38_spill] sm:$0xff] %v13697_v53 }
 0x502   : > { %10351 = vmatmul.msk.f32.vlgmr.msrb.gmra.mxu3 %vm1024_vm0, %v16381_v37  ;;  %10361 = vmatmul.msk.f32.vlgmr.msrb.gmra.mxu0 %vm1024_vm0, %v16382_v55  ;;  %v13703_v28 = vpop.f32.mrf.mxu2 }
 0x503   : > { %10366 = vmatpush.xpose.msk.msrb.mxu3 %vm1024_vm0, %v16383_v32  ;;  %4324 = vmatpush.msrb.mxu0 %v10748_v26  ;;  %16407 = vst [vmem:[#allocation33_spill] sm:$0xff] %v13703_v28  ;;  %v13743_v26 = vpop.permute.xlu1 %10851 }
 0x504   : > { %v13691_v49 = vpop.f32.mrf.mxu1 }
 0x505   : > { %16401 = vst [vmem:[#allocation36_spill] sm:$0xff] %v13691_v49 }
 0x507   : > { %10363 = vmatmul.msk.f32.vlgmr.msra.gmra.mxu1 %vm1024_vm0, %v16385_v46 }
 0x508   : > { %4351 = vmatpush.msra.mxu1 %v10749_v20 }
 0x50a   : > { %10359 = vmatmul.msk.f32.vlgmr.msra.gmra.mxu3 %vm1024_vm0, %v16386_v15  ;;  %v13757_v15 = vpop.permute.xlu0 %10841 }
 0x50b   : > { %4297 = vmatpush.msra.mxu3 %v10739_v23 }
 0x50c   : > { %v13699_v1 = vpop.f32.mrf.mxu1 }
 0x50d   : > { %16405 = vst [vmem:[#allocation3_spill] sm:$0xff] %v13699_v1 }
 0x512   : > { %10367 = vmatmul.msk.f32.vlgmr.msrb.gmra.mxu3 %vm1024_vm0, %v16390_v9 }
 0x513   : > { %4405 = vmatpush.msrb.mxu3 %v10759_v62  ;;  %v13759_v62 = vpop.permute.xlu1 %10866 }
 0x514   : > { %v13693_v56 = vpop.f32.mrf.mxu0 }
 0x515   : > { %16402 = vst [vmem:[#allocation27_spill] sm:$0xff] %v13693_v56  ;;  %v13705_v27 = vpop.f32.mrf.mxu3 }
 0x516   : > { %16408 = vst [vmem:[#allocation15_spill] sm:$0xff] %v13705_v27 }
 0x51c   : > { %v13701_v5 = vpop.f32.mrf.mxu0 }
 0x51d   : > { %16406 = vst [vmem:[#allocation141_spill] sm:$0xff] %v13701_v5 }
 0x525   : > { %v13711_v6 = vpop.f32.mrf.mxu2 }
 0x526   : > { %16411 = vst [vmem:[#allocation214_spill] sm:$0xff] %v13711_v6 }
 0x52a   : > { %v13713_v57 = vpop.f32.mrf.mxu3 }
 0x52b   : > { %16412 = vst [vmem:[#allocation8_spill] sm:$0xff] %v13713_v57 }
 0x52f   : > { %v13707_v60 = vpop.f32.mrf.mxu1 }
 0x530   : > { %16409 = vst [vmem:[#allocation213_spill] sm:$0xff] %v13707_v60 }
 0x532   : > { %v13723_v2 = vpop.f32.mrf.mxu3 }
 0x533   : > { %16415 = vst [vmem:[#allocation12_spill] sm:$0xff] %v13723_v2 }
 0x53a   : > { %v13721_v45 = vpop.f32.mrf.mxu2 }
 0x53b   : > { %16414 = vst [vmem:[#allocation153_spill] sm:$0xff] %v13721_v45 }
 0x53f   : > { %v13709_v40 = vpop.f32.mrf.mxu0 }
 0x540   : > { %16410 = vst [vmem:[#allocation40_spill] sm:$0xff] %v13709_v40 }
 0x542   : > { %v13731_v19 = vpop.f32.mrf.mxu2 }
 0x543   : > { %16416 = vst [vmem:[#allocation144_spill] sm:$0xff] %v13731_v19 }
 0x544   : > { %v13715_v33 = vpop.f32.mrf.mxu1 }
 0x545   : > { %16413 = vst [vmem:[#allocation43_spill] sm:$0xff] %v13715_v33  ;;  %v13781_v33 = vpop.permute.xlu1 %10881 }
 0x547   : > { %v13717_v31 = vpop.f32.mrf.mxu0 }
 0x548   : > { %v3842_v17 = vsel %vm1857_vm1, %v13717_v31, -inf }
 0x549   : > { %3843 = vmax.xlane.f32.xlu1 %v3842_v17 }
 0x54a   : > { %v13745_v37 = vpop.f32.mrf.mxu2 }
 0x54b   : > { %v3848_v17 = vsel %vm1857_vm1, %v13745_v37, -inf }
 0x54c   : > { %v13725_v21 = vpop.f32.mrf.mxu1 }
 0x54d   : > { %v3845_v61 = vsel %vm1857_vm1, %v13725_v21, -inf }
 0x54e   : > { %3846 = vmax.xlane.f32.xlu0 %v3845_v61 }
 0x54f   : > { %v13729_v50 = vpop.f32.mrf.mxu0 }
 0x550   : > { %v3854_v54 = vsel %vm1857_vm1, %v13729_v50, -inf }
 0x554   : > { %v13733_v63 = vpop.f32.mrf.mxu1 }
 0x555   : > { %v13735_v10 = vpop.f32.mrf.mxu3  ;;  %v3857_v41 = vsel %vm1857_vm1, %v13733_v63, -inf }
 0x556   : > { %16417 = vst [vmem:[#allocation152_spill] sm:$0xff] %v13735_v10  ;;  %3855 = vmax.xlane.f32.xlu0 %v3854_v54  ;;  %3858 = vmax.xlane.f32.xlu2 %v3857_v41  ;;  %v13769_v41 = vpop.f32.mrf.mxu2  ;;  %v13777_v10 = vpop.permute.xlu0 %10856 }
 0x557   : > { %v13741_v59 = vpop.f32.mrf.mxu0  ;;  %v3860_v57 = vsel %vm1857_vm1, %v13769_v41, -inf }
 0x558   : > { %v3866_v20 = vsel %vm1857_vm1, %v13741_v59, -inf }
 0x55c   : > { %v13747_v55 = vpop.f32.mrf.mxu1 }
 0x55d   : > { %v13749_v32 = vpop.f32.mrf.mxu3  ;;  %v3869_v46 = vsel %vm1857_vm1, %v13747_v55, -inf }
 0x55e   : > { %3867 = vmax.xlane.f32.xlu2 %v3866_v20  ;;  %3870 = vmax.xlane.f32.xlu1 %v3869_v46  ;;  %v13771_v20 = vpop.permute.xlu2 %10846  ;;  %v3851_v45 = vsel %vm1857_vm1, %v13749_v32, -inf  ;;  %v13797_v6 = vpop.permute.xlu0 %10871 }
 0x55f   : > { %v13755_v23 = vpop.f32.mrf.mxu0 }
 0x560   : > { %v3878_v61 = vsel %vm1857_vm1, %v13755_v23, -inf }
 0x564   : > { %v13761_v9 = vpop.f32.mrf.mxu1 }
 0x565   : > { %v3881_v54 = vsel %vm1857_vm1, %v13761_v9, -inf  ;;  %v13773_v46 = vpop.f32.mrf.mxu3 }
 0x566   : > { %3849 = vmax.xlane.f32.xlu2 %v3848_v17  ;;  %3879 = vmax.xlane.f32.xlu1 %v3878_v61  ;;  %v13791_v2 = vpop.permute.xlu2 %10861  ;;  %v13815_v39 = vpop.permute.xlu0 %7140 }
 0x567   : > { %3882 = vmax.xlane.f32.xlu0 %v3881_v54  ;;  %v13775_v19 = vpop.f32.mrf.mxu0  ;;  %v13789_v54 = vpop.f32.mrf.mxu2 }
 0x568   : > { %v3890_v61 = vsel %vm1857_vm1, %v13775_v19, -inf }
 0x56c   : > { %v13779_v40 = vpop.f32.mrf.mxu1 }
 0x56d   : > { %v3893_v17 = vsel %vm1857_vm1, %v13779_v40, -inf  ;;  %v13793_v5 = vpop.f32.mrf.mxu3 }
 0x56e   : > { %3852 = vmax.xlane.f32.xlu1 %v3851_v45  ;;  %3894 = vmax.xlane.f32.xlu2 %v3893_v17  ;;  %v3863_v17 = vsel %vm1857_vm1, %v13773_v46, -inf  ;;  %v13811_v28 = vpop.permute.xlu2 %10876  ;;  %v3875_v49 = vsel %vm1857_vm1, %v13793_v5, -inf }
 0x56f   : > { %3891 = vmax.xlane.f32.xlu0 %v3890_v61  ;;  %v13795_v60 = vpop.f32.mrf.mxu0  ;;  %v13807_v61 = vpop.permute.xlu1 %7138 }
 0x570   : > { %v3902_v45 = vsel %vm1857_vm1, %v13795_v60, -inf  ;;  %v13809_v1 = vpop.f32.mrf.mxu2 }
 0x571   : > { %v3884_v7 = vsel %vm1857_vm1, %v13809_v1, -inf }
 0x574   : > { %v13803_v56 = vpop.f32.mrf.mxu1 }
 0x575   : > { %v13813_v27 = vpop.f32.mrf.mxu3 }
 0x576   : > { %3861 = vmax.xlane.f32.xlu1 %v3860_v57  ;;  %3903 = vmax.xlane.f32.xlu2 %v3902_v45  ;;  %v3905_v57 = vsel %vm1857_vm1, %v13803_v56, -inf  ;;  %v3872_v45 = vsel %vm1857_vm1, %v13789_v54, -inf  ;;  %v13831_v51 = vpop.permute.xlu2 %7168  ;;  %v3887_v22 = vsel %vm1857_vm1, %v13813_v27, -inf }
 0x577   : > { %3864 = vmax.xlane.f32.xlu0 %v3863_v17  ;;  %v13825_v25 = vpop.permute.xlu1 %7224  ;;  %v13827_v53 = vpop.f32.mrf.mxu0 }
 0x578   : > { %16418 = vst [vmem:[#allocation169_spill] sm:$0xff] %v13825_v25  ;;  %v13829_v34 = vpop.f32.mrf.mxu2 }
 0x579   : > { %v3896_v43 = vsel %vm1857_vm1, %v13829_v34, -inf }
 0x57c   : > { %v13823_v17 = vpop.f32.mrf.mxu1 }
 0x57d   : > { %v13833_v52 = vpop.f32.mrf.mxu3 }
 0x57e   : > { %3876 = vmax.xlane.f32.xlu2 %v3875_v49  ;;  %3906 = vmax.xlane.f32.xlu1 %v3905_v57  ;;  %v3914_v49 = vsel %vm1857_vm1, %v13827_v53, -inf  ;;  %v3917_v57 = vsel %vm1857_vm1, %v13823_v17, -inf }
 0x57f   : > { %3873 = vmax.xlane.f32.xlu0 %v3872_v45  ;;  %v13841_v45 = vpop.permute.xlu0 %7166  ;;  %v13845_v35 = vpop.permute.xlu1 %7252 }
 0x580   : > { %16419 = vst [vmem:[#allocation158_spill] sm:$0xff] %v13841_v45  ;;  %v13847_v58 = vpop.f32.mrf.mxu0 }
 0x584   : > { %v13843_v44 = vpop.f32.mrf.mxu1 }
 0x585   : > { %v3929_v4 = vsel %vm1857_vm1, %v13843_v44, -inf  ;;  %v13859_v14 = vpop.f32.mrf.mxu3 }
 0x586   : > { %3885 = vmax.xlane.f32.xlu2 %v3884_v7  ;;  %3915 = vmax.xlane.f32.xlu1 %v3914_v49  ;;  %v13853_v7 = vpop.f32.mrf.mxu2  ;;  %v3926_v49 = vsel %vm1857_vm1, %v13847_v58, -inf  ;;  %v3911_v18 = vsel %vm1857_vm1, %v13859_v14, -inf }
 0x587   : > { %3918 = vmax.xlane.f32.xlu0 %v3917_v57  ;;  %v13857_v57 = vpop.permute.xlu2 %7196  ;;  %v13861_v16 = vpop.permute.xlu0 %7194 }
 0x588   : > { %16420 = vst [vmem:[#allocation93_spill] sm:$0xff] %v13857_v57  ;;  %v13863_v42 = vpop.permute.xlu1 %7278 }
 0x589   : > { %16421 = vst [vmem:[#allocation179_spill] sm:$0xff] %v13861_v16 }
 0x58a   : > { %16422 = vst [vmem:[#allocation161_spill] sm:$0xff] %v13863_v42 }
 0x58e   : > { %3888 = vmax.xlane.f32.xlu1 %v3887_v22  ;;  %3930 = vmax.xlane.f32.xlu2 %v3929_v4  ;;  %v3899_v22 = vsel %vm1857_vm1, %v13833_v52, -inf  ;;  %v13871_v4 = vpop.f32.mrf.mxu2 }
 0x58f   : > { %3927 = vmax.xlane.f32.xlu0 %v3926_v49  ;;  %v13873_v48 = vpop.permute.xlu2 %7222  ;;  %v13875_v49 = vpop.f32.mrf.mxu3  ;;  %v3920_v13 = vsel %vm1857_vm1, %v13871_v4, -inf }
 0x590   : > { %16423 = vst [vmem:[#allocation67_spill] sm:$0xff] %v13873_v48  ;;  %v13877_v47 = vpop.permute.xlu0 %7280  ;;  %v3923_v8 = vsel %vm1857_vm1, %v13875_v49, -inf }
 0x596   : > { %3897 = vmax.xlane.f32.xlu1 %v3896_v43  ;;  %3912 = vmax.xlane.f32.xlu2 %v3911_v18  ;;  %v3908_v43 = vsel %vm1857_vm1, %v13853_v7, -inf  ;;  %v13885_v18 = vpop.permute.xlu1 %7306 }
 0x597   : > { %3900 = vmax.xlane.f32.xlu0 %v3899_v22  ;;  %16424 = vst [vmem:[#allocation177_spill] sm:$0xff] %v13885_v18  ;;  %v13887_v22 = vpop.f32.mrf.mxu2  ;;  %v13889_v0 = vpop.permute.xlu2 %7250 }
 0x598   : > { %16425 = vst [vmem:[#allocation62_spill] sm:$0xff] %v13889_v0  ;;  %v13891_v48 = vpop.f32.mrf.mxu3  ;;  %v13893_v16 = vpop.permute.xlu0 %7308  ;;  %v3932_v12 = vsel %vm1857_vm1, %v13887_v22, -inf }
 0x599   : > { %16426 = vst [vmem:[#allocation79_spill] sm:$0xff] %v13893_v16 }
 0x59e   : > { %3924 = vmax.xlane.f32.xlu1 %v3923_v8  ;;  %3921 = vmax.xlane.f32.xlu2 %v3920_v13  ;;  %v3935_v8 = vsel %vm1857_vm1, %v13891_v48, -inf  ;;  %v13899_v13 = vpop.permute.xlu1 %7392 }
 0x59f   : > { %3909 = vmax.xlane.f32.xlu0 %v3908_v43  ;;  %16427 = vst [vmem:[#allocation195_spill] sm:$0xff] %v13899_v13  ;;  %v13901_v18 = vpop.permute.xlu2 %7336 }
 0x5a0   : > { %16428 = vst [vmem:[#allocation178_spill] sm:$0xff] %v13901_v18  ;;  %v13903_v43 = vpop.permute.xlu0 %7334 }
 0x5a1   : > { %16429 = vst [vmem:[#allocation109_spill] sm:$0xff] %v13903_v43 }
 0x5a6   : > { %3933 = vmax.xlane.f32.xlu1 %v3932_v12  ;;  %v13905_v11 = vpop.permute.xlu1 %7420 }
 0x5a7   : > { %3936 = vmax.xlane.f32.xlu0 %v3935_v8  ;;  %16430 = vst [vmem:[#allocation170_spill] sm:$0xff] %v13905_v11  ;;  %v13907_v36 = vpop.permute.xlu2 %7364 }
 0x5a8   : > { %v13909_v25 = vpop.permute.xlu0 %7362 }
 0x5a9   : > { %16431 = vst [vmem:[#allocation184_spill] sm:$0xff] %v13909_v25  ;;  %v16445_v25 = vld [vmem:[#allocation187_spill] sm:$0xff] }
 0x5af   : > { %v13912_v24 = vpop.permute.xlu2 %7390 }
 0x5b0   : > { %16432 = vst [vmem:[#allocation115_spill] sm:$0xff] %v13912_v24 }
 0x5bc   : > { %v3844_v16 = vpop.xlane.xlu1 %3843 }
 0x5bd   : > { %v3938_v57 = vsub.f32 %v13717_v31, %v3844_v16 }
 0x5bf   : > { %v3970_v12 = vmul.f32 1.442695, %v3938_v57 }
 0x5c1   : > { %11335 = vpow2.f32 %v3970_v12  ;;  %v3847_v8 = vpop.xlane.xlu0 %3846 }
 0x5c2   : > { %v3939_v30 = vsub.f32 %v13725_v21, %v3847_v8 }
 0x5c4   : > { %v3972_v29 = vmul.f32 1.442695, %v3939_v30 }
 0x5c6   : > { %11337 = vpow2.f32 %v3972_v29 }
 0x5c7   : > { %v13915_v18 = vpop.eup %11335 }
 0x5c8   : > { %v4034_v43 = vsel %vm1857_vm1, %v13915_v18, 0.0 }
 0x5c9   : > { %4035 = vadd.xlane.f32.xlu2 %v4034_v43  ;;  %v3856_v11 = vpop.xlane.xlu0 %3855  ;;  %v3859_v38 = vpop.xlane.xlu2 %3858 }
 0x5ca   : > { %v3942_v3 = vsub.f32 %v13729_v50, %v3856_v11  ;;  %v3943_v16 = vsub.f32 %v13733_v63, %v3859_v38 }
 0x5cc   : > { %v13921_v31 = vpop.eup %11337  ;;  %v3978_v57 = vmul.f32 1.442695, %v3942_v3  ;;  %v3980_v12 = vmul.f32 1.442695, %v3943_v16 }
 0x5cd   : > { %v4037_v30 = vsel %vm1857_vm1, %v13921_v31, 0.0 }
 0x5ce   : > { %11339 = vpow2.f32 %v3978_v57  ;;  %4038 = vadd.xlane.f32.xlu1 %v4037_v30 }
 0x5cf   : > { %11341 = vpow2.f32 %v3980_v12 }
 0x5d1   : > { %v3868_v29 = vpop.xlane.xlu2 %3867  ;;  %v3871_v21 = vpop.xlane.xlu1 %3870 }
 0x5d2   : > { %v3946_v43 = vsub.f32 %v13741_v59, %v3868_v29  ;;  %v3947_v8 = vsub.f32 %v13747_v55, %v3871_v21 }
 0x5d4   : > { %v13927_v24 = vpop.eup %11339  ;;  %v3986_v11 = vmul.f32 1.442695, %v3946_v43  ;;  %v3988_v38 = vmul.f32 1.442695, %v3947_v8 }
 0x5d5   : > { %v13929_v50 = vpop.eup %11341  ;;  %v4046_v3 = vsel %vm1857_vm1, %v13927_v24, 0.0 }
 0x5d6   : > { %11343 = vpow2.f32 %v3986_v11  ;;  %4047 = vadd.xlane.f32.xlu1 %v4046_v3  ;;  %v4049_v63 = vsel %vm1857_vm1, %v13929_v50, 0.0 }
 0x5d7   : > { %11345 = vpow2.f32 %v3988_v38  ;;  %4050 = vadd.xlane.f32.xlu0 %v4049_v63 }
 0x5d9   : > { %v3850_v16 = vpop.xlane.xlu2 %3849  ;;  %v3880_v59 = vpop.xlane.xlu1 %3879 }
 0x5da   : > { %v3940_v55 = vsub.f32 %v13745_v37, %v3850_v16  ;;  %v3883_v57 = vpop.xlane.xlu0 %3882  ;;  %v3950_v12 = vsub.f32 %v13755_v23, %v3880_v59 }
 0x5db   : > { %v3951_v30 = vsub.f32 %v13761_v9, %v3883_v57 }
 0x5dc   : > { %v13938_v29 = vpop.eup %11343  ;;  %v3974_v21 = vmul.f32 1.442695, %v3940_v55  ;;  %v3994_v43 = vmul.f32 1.442695, %v3950_v12 }
 0x5dd   : > { %v13940_v8 = vpop.eup %11345  ;;  %v3996_v11 = vmul.f32 1.442695, %v3951_v30  ;;  %v4058_v38 = vsel %vm1857_vm1, %v13938_v29, 0.0 }
 0x5de   : > { %11347 = vpow2.f32 %v3974_v21  ;;  %v4061_v3 = vsel %vm1857_vm1, %v13940_v8, 0.0 }
 0x5df   : > { %11349 = vpow2.f32 %v3996_v11  ;;  %4059 = vadd.xlane.f32.xlu0 %v4058_v38  ;;  %4062 = vadd.xlane.f32.xlu2 %v4061_v3 }
 0x5e0   : > { %11351 = vpow2.f32 %v3994_v43 }
 0x5e1   : > { %v3895_v37 = vpop.xlane.xlu2 %3894  ;;  %v3853_v23 = vpop.xlane.xlu1 %3852 }
 0x5e2   : > { %v3892_v9 = vpop.xlane.xlu0 %3891  ;;  %v3955_v63 = vsub.f32 %v13779_v40, %v3895_v37  ;;  %v3941_v16 = vsub.f32 %v13749_v32, %v3853_v23 }
 0x5e3   : > { %v3954_v59 = vsub.f32 %v13775_v19, %v3892_v9 }
 0x5e4   : > { %v13949_v55 = vpop.eup %11347  ;;  %v4004_v57 = vmul.f32 1.442695, %v3955_v63  ;;  %v3976_v12 = vmul.f32 1.442695, %v3941_v16 }
 0x5e5   : > { %v13951_v30 = vpop.eup %11349  ;;  %v4002_v21 = vmul.f32 1.442695, %v3954_v59  ;;  %v4040_v11 = vsel %vm1857_vm1, %v13949_v55, 0.0 }
 0x5e6   : > { %v13955_v43 = vpop.eup %11351  ;;  %11353 = vpow2.f32 %v4004_v57  ;;  %v4073_v40 = vsel %vm1857_vm1, %v13951_v30, 0.0 }
 0x5e7   : > { %11355 = vpow2.f32 %v4002_v21  ;;  %4074 = vadd.xlane.f32.xlu1 %v4073_v40  ;;  %4041 = vadd.xlane.f32.xlu0 %v4040_v11  ;;  %v4070_v19 = vsel %vm1857_vm1, %v13955_v43, 0.0 }
 0x5e8   : > { %11357 = vpow2.f32 %v3976_v12  ;;  %4071 = vadd.xlane.f32.xlu2 %v4070_v19 }
 0x5e9   : > { %v3904_v32 = vpop.xlane.xlu2 %3903  ;;  %v3862_v38 = vpop.xlane.xlu1 %3861 }
 0x5ea   : > { %v3865_v3 = vpop.xlane.xlu0 %3864  ;;  %v3958_v37 = vsub.f32 %v13795_v60, %v3904_v32  ;;  %v3944_v23 = vsub.f32 %v13769_v41, %v3862_v38 }
 0x5eb   : > { %v3945_v9 = vsub.f32 %v13773_v46, %v3865_v3 }
 0x5ec   : > { %v13964_v63 = vpop.eup %11353  ;;  %v4010_v16 = vmul.f32 1.442695, %v3958_v37  ;;  %v3982_v59 = vmul.f32 1.442695, %v3944_v23 }
 0x5ed   : > { %v13966_v57 = vpop.eup %11355  ;;  %v3984_v21 = vmul.f32 1.442695, %v3945_v9  ;;  %v4085_v12 = vsel %vm1857_vm1, %v13964_v63, 0.0 }
 0x5ee   : > { %v13970_v11 = vpop.eup %11357  ;;  %11359 = vpow2.f32 %v4010_v16  ;;  %v4082_v60 = vsel %vm1857_vm1, %v13966_v57, 0.0 }
 0x5ef   : > { %11361 = vpow2.f32 %v3984_v21  ;;  %4083 = vadd.xlane.f32.xlu1 %v4082_v60  ;;  %4086 = vadd.xlane.f32.xlu0 %v4085_v12  ;;  %v4043_v41 = vsel %vm1857_vm1, %v13970_v11, 0.0 }
 0x5f0   : > { %11363 = vpow2.f32 %v3982_v59  ;;  %4044 = vadd.xlane.f32.xlu2 %v4043_v41 }
 0x5f1   : > { %v3877_v46 = vpop.xlane.xlu2 %3876  ;;  %v3907_v40 = vpop.xlane.xlu1 %3906 }
 0x5f2   : > { %v3874_v19 = vpop.xlane.xlu0 %3873  ;;  %v3949_v32 = vsub.f32 %v13793_v5, %v3877_v46  ;;  %v3959_v38 = vsub.f32 %v13803_v56, %v3907_v40 }
 0x5f3   : > { %v3948_v3 = vsub.f32 %v13789_v54, %v3874_v19 }
 0x5f4   : > { %v13979_v37 = vpop.eup %11359  ;;  %v3992_v23 = vmul.f32 1.442695, %v3949_v32  ;;  %v4012_v9 = vmul.f32 1.442695, %v3959_v38 }
 0x5f5   : > { %v13981_v16 = vpop.eup %11361  ;;  %v3990_v21 = vmul.f32 1.442695, %v3948_v3  ;;  %v4094_v59 = vsel %vm1857_vm1, %v13979_v37, 0.0 }
 0x5f6   : > { %v13985_v12 = vpop.eup %11363  ;;  %11365 = vpow2.f32 %v3992_v23  ;;  %v4055_v5 = vsel %vm1857_vm1, %v13981_v16, 0.0 }
 0x5f7   : > { %11367 = vpow2.f32 %v3990_v21  ;;  %4056 = vadd.xlane.f32.xlu1 %v4055_v5  ;;  %4095 = vadd.xlane.f32.xlu0 %v4094_v59  ;;  %v4052_v56 = vsel %vm1857_vm1, %v13985_v12, 0.0 }
 0x5f8   : > { %11369 = vpow2.f32 %v4012_v9  ;;  %4053 = vadd.xlane.f32.xlu2 %v4052_v56 }
 0x5f9   : > { %v3886_v54 = vpop.xlane.xlu2 %3885  ;;  %v3916_v60 = vpop.xlane.xlu1 %3915 }
 0x5fa   : > { %v3952_v41 = vsub.f32 %v13809_v1, %v3886_v54  ;;  %v3919_v46 = vpop.xlane.xlu0 %3918  ;;  %v3962_v40 = vsub.f32 %v13827_v53, %v3916_v60 }
 0x5fb   : > { %v3963_v19 = vsub.f32 %v13823_v17, %v3919_v46 }
 0x5fc   : > { %v13994_v32 = vpop.eup %11365  ;;  %v3998_v38 = vmul.f32 1.442695, %v3952_v41  ;;  %v4018_v3 = vmul.f32 1.442695, %v3962_v40 }
 0x5fd   : > { %v13996_v23 = vpop.eup %11367  ;;  %v4020_v21 = vmul.f32 1.442695, %v3963_v19  ;;  %v4067_v9 = vsel %vm1857_vm1, %v13994_v32, 0.0 }
 0x5fe   : > { %v14000_v59 = vpop.eup %11369  ;;  %11371 = vpow2.f32 %v3998_v38  ;;  %v4064_v1 = vsel %vm1857_vm1, %v13996_v23, 0.0 }
 0x5ff   : > { %11373 = vpow2.f32 %v4020_v21  ;;  %4065 = vadd.xlane.f32.xlu1 %v4064_v1  ;;  %4068 = vadd.xlane.f32.xlu0 %v4067_v9  ;;  %v4097_v53 = vsel %vm1857_vm1, %v14000_v59, 0.0 }
 0x600   : > { %11375 = vpow2.f32 %v4018_v3  ;;  %4098 = vadd.xlane.f32.xlu2 %v4097_v53 }
 0x601   : > { %v3931_v17 = vpop.xlane.xlu2 %3930  ;;  %v3889_v5 = vpop.xlane.xlu1 %3888 }
 0x602   : > { %v3928_v56 = vpop.xlane.xlu0 %3927  ;;  %v3967_v54 = vsub.f32 %v13843_v44, %v3931_v17  ;;  %v3953_v60 = vsub.f32 %v13813_v27, %v3889_v5 }
 0x603   : > { %v3966_v41 = vsub.f32 %v13847_v58, %v3928_v56 }
 0x604   : > { %v14009_v46 = vpop.eup %11371  ;;  %v4028_v40 = vmul.f32 1.442695, %v3967_v54  ;;  %v4000_v19 = vmul.f32 1.442695, %v3953_v60 }
 0x605   : > { %v14011_v38 = vpop.eup %11373  ;;  %v4026_v21 = vmul.f32 1.442695, %v3966_v41  ;;  %v4076_v3 = vsel %vm1857_vm1, %v14009_v46, 0.0 }
 0x606   : > { %v14015_v9 = vpop.eup %11375  ;;  %11377 = vpow2.f32 %v4028_v40  ;;  %v4109_v44 = vsel %vm1857_vm1, %v14011_v38, 0.0 }
 0x607   : > { %11379 = vpow2.f32 %v4026_v21  ;;  %4077 = vadd.xlane.f32.xlu0 %v4076_v3  ;;  %4110 = vadd.xlane.f32.xlu1 %v4109_v44  ;;  %v4106_v58 = vsel %vm1857_vm1, %v14015_v9, 0.0 }
 0x608   : > { %11381 = vpow2.f32 %v4000_v19  ;;  %4107 = vadd.xlane.f32.xlu2 %v4106_v58 }
 0x609   : > { %v3913_v27 = vpop.xlane.xlu2 %3912  ;;  %v3898_v1 = vpop.xlane.xlu1 %3897 }
 0x60a   : > { %v3901_v53 = vpop.xlane.xlu0 %3900  ;;  %v3961_v17 = vsub.f32 %v13859_v14, %v3913_v27  ;;  %v3956_v5 = vsub.f32 %v13829_v34, %v3898_v1 }
 0x60b   : > { %v3957_v56 = vsub.f32 %v13833_v52, %v3901_v53 }
 0x60c   : > { %v14024_v54 = vpop.eup %11377  ;;  %v4016_v60 = vmul.f32 1.442695, %v3961_v17  ;;  %v4006_v41 = vmul.f32 1.442695, %v3956_v5 }
 0x60d   : > { %v14026_v40 = vpop.eup %11379  ;;  %v4008_v21 = vmul.f32 1.442695, %v3957_v56  ;;  %v4121_v19 = vsel %vm1857_vm1, %v14024_v54, 0.0 }
 0x60e   : > { %v14030_v3 = vpop.eup %11381  ;;  %11383 = vpow2.f32 %v4016_v60  ;;  %v4118_v14 = vsel %vm1857_vm1, %v14026_v40, 0.0 }
 0x60f   : > { %11385 = vpow2.f32 %v4008_v21  ;;  %4119 = vadd.xlane.f32.xlu1 %v4118_v14  ;;  %4122 = vadd.xlane.f32.xlu0 %v4121_v19  ;;  %v4079_v34 = vsel %vm1857_vm1, %v14030_v3, 0.0 }
 0x610   : > { %11387 = vpow2.f32 %v4006_v41  ;;  %4080 = vadd.xlane.f32.xlu2 %v4079_v34 }
 0x611   : > { %v3922_v52 = vpop.xlane.xlu2 %3921  ;;  %v14058_v34 = vpop.xlane.xlu1 %3924 }
 0x612   : > { %v3910_v44 = vpop.xlane.xlu0 %3909  ;;  %v3964_v58 = vsub.f32 %v13871_v4, %v3922_v52  ;;  %v16433_v52 = vld [vmem:[#allocation22_spill] sm:$0xff] }
 0x613   : > { %v3960_v27 = vsub.f32 %v13853_v7, %v3910_v44  ;;  %v16434_v44 = vld [vmem:[#allocation45_spill] sm:$0xff] }
 0x614   : > { %v14038_v1 = vpop.eup %11383  ;;  %v4022_v53 = vmul.f32 1.442695, %v3964_v58  ;;  %v16435_v58 = vld [vmem:[#allocation49_spill] sm:$0xff] }
 0x615   : > { %v14040_v17 = vpop.eup %11385  ;;  %v4014_v5 = vmul.f32 1.442695, %v3960_v27  ;;  %v4103_v56 = vsel %vm1857_vm1, %v14038_v1, 0.0  ;;  %v16436_v27 = vld [vmem:[#allocation29_spill] sm:$0xff] }
 0x616   : > { %v14044_v60 = vpop.eup %11387  ;;  %11389 = vpow2.f32 %v4022_v53  ;;  %v4091_v41 = vsel %vm1857_vm1, %v14040_v17, 0.0 }
 0x617   : > { %11391 = vpow2.f32 %v4014_v5  ;;  %4092 = vadd.xlane.f32.xlu1 %v4091_v41  ;;  %4104 = vadd.xlane.f32.xlu0 %v4103_v56  ;;  %v4088_v7 = vsel %vm1857_vm1, %v14044_v60, 0.0  ;;  %v16437_v5 = vld [vmem:[#allocation47_spill] sm:$0xff]  ;;  %v16438_v41 = vld [vmem:[#allocation50_spill] sm:$0xff] }
 0x618   : > { %4089 = vadd.xlane.f32.xlu2 %v4088_v7  ;;  %v16439_v7 = vld [vmem:[#allocation30_spill] sm:$0xff] }
 0x619   : > { %v14068_v53 = vpop.xlane.xlu1 %3933 }
 0x61c   : > { %v14050_v4 = vpop.eup %11389 }
 0x61d   : > { %v14052_v21 = vpop.eup %11391  ;;  %v4112_v19 = vsel %vm1857_vm1, %v14050_v4, 0.0 }
 0x61e   : > { %v4100_v14 = vsel %vm1857_vm1, %v14052_v21, 0.0 }
 0x61f   : > { %4101 = vadd.xlane.f32.xlu1 %v4100_v14  ;;  %4113 = vadd.xlane.f32.xlu0 %v4112_v19 }
 0x630   : > { %7418 = vrot.lane.b32.xlu2 %v16433_v52, %s11729_s23  ;;  %v14076_v52 = vpop.xlane.xlu0 %3936 }
 0x633   : > { %7448 = vrot.lane.b32.xlu0 %v16434_v44, %s11729_s23 }
 0x638   : > { %7504 = vrot.lane.b32.xlu2 %v16435_v58, %s11729_s23  ;;  %7446 = vrot.lane.b32.xlu1 %v16436_v27, %s11729_s23  ;;  %v16440_v58 = vld [vmem:[#allocation37_spill] sm:$0xff]  ;;  %v16441_v27 = vld [vmem:[#allocation176_spill] sm:$0xff] }
 0x63b   : > { %7476 = vrot.lane.b32.xlu0 %v16437_v5, %s11729_s23  ;;  %v10768_v5 = vunpack.i.l.bf16 %v16441_v27 }
 0x63c   : > { %v4036_v56 = vpop.xlane.xlu2 %4035 }
 0x63d   : > { %11393 = vrcp.f32 %v4036_v56 }
 0x640   : > { %7532 = vrot.lane.b32.xlu2 %v16438_v41, %s11729_s23  ;;  %7474 = vrot.lane.b32.xlu1 %v16439_v7, %s11729_s23  ;;  %v16442_v41 = vld [vmem:[#allocation41_spill] sm:$0xff]  ;;  %v16443_v7 = vld [vmem:[#allocation52_spill] sm:$0xff] }
 0x641   : > { %v4039_v19 = vpop.xlane.xlu1 %4038 }
 0x642   : > { %11395 = vrcp.f32 %v4039_v19 }
 0x643   : > { %v11394_v14 = vpop.eup %11393  ;;  %7502 = vrot.lane.b32.xlu0 %v16440_v58, %s11729_s23  ;;  %v16444_v58 = vld [vmem:[#allocation42_spill] sm:$0xff] }
 0x644   : > { %v4162_v44 = vmul.f32 %v11394_v14, %v13915_v18  ;;  %v10769_v18 = vunpack.i.h.bf16 %v16441_v27  ;;  %v10789_v27 = vunpack.i.h.bf16 %v16445_v25 }
 0x646   : > { %10368 = vmatmul.msk.f32.vlgmr.msra.gmra.mxu0 %vm1857_vm1, %v4162_v44 }
 0x647   : > { %4432 = vmatpush.msra.mxu0 %v10768_v5 }
 0x648   : > { %v11396_v56 = vpop.eup %11395  ;;  %7558 = vrot.lane.b32.xlu2 %v16442_v41, %s11729_s23  ;;  %7560 = vrot.lane.b32.xlu1 %v16443_v7, %s11729_s23  ;;  %v10788_v7 = vunpack.i.l.bf16 %v16445_v25 }
 0x649   : > { %v4163_v42 = vmul.f32 %v11396_v56, %v13921_v31  ;;  %v4048_v19 = vpop.xlane.xlu1 %4047 }
 0x64a   : > { %v4051_v14 = vpop.xlane.xlu0 %4050  ;;  %11397 = vrcp.f32 %v4048_v19 }
 0x64b   : > { %11399 = vrcp.f32 %v4051_v14  ;;  %7530 = vrot.lane.b32.xlu0 %v16444_v58, %s11729_s23  ;;  %10369 = vmatmul.msk.f32.vlgmr.msrb.gmra.mxu1 %vm1857_vm1, %v4163_v42  ;;  %v16446_v58 = vld [vmem:[#allocation208_spill] sm:$0xff] }
 0x64c   : > { %4459 = vmatpush.msrb.mxu1 %v10769_v18 }
 0x650   : > { %v11398_v44 = vpop.eup %11397 }
 0x651   : > { %v11400_v5 = vpop.eup %11399  ;;  %v4166_v41 = vmul.f32 %v11398_v44, %v13927_v24 }
 0x652   : > { %v4167_v31 = vmul.f32 %v11400_v5, %v13929_v50  ;;  %v4060_v56 = vpop.xlane.xlu0 %4059  ;;  %v4063_v13 = vpop.xlane.xlu2 %4062  ;;  %v10803_v50 = vunpack.i.l.bf16 %v16446_v58  ;;  %v10804_v5 = vunpack.i.h.bf16 %v16446_v58  ;;  %v16448_v58 = vld [vmem:[#allocation210_spill] sm:$0xff] }
 0x653   : > { %11401 = vrcp.f32 %v4060_v56  ;;  %10372 = vmatmul.msk.f32.vlgmr.msrb.gmra.mxu0 %vm1857_vm1, %v4166_v41 }
 0x654   : > { %11403 = vrcp.f32 %v4063_v13  ;;  %10373 = vmatmul.msk.f32.vlgmr.msra.gmra.mxu1 %vm1857_vm1, %v4167_v31  ;;  %4540 = vmatpush.msrb.mxu0 %v10788_v7  ;;  %v3965_v13 = vsub.f32 %v13875_v49, %v14058_v34 }
 0x655   : > { %4567 = vmatpush.msra.mxu1 %v10789_v27 }
 0x659   : > { %v11402_v42 = vpop.eup %11401 }
 0x65a   : > { %v11404_v19 = vpop.eup %11403  ;;  %v4170_v24 = vmul.f32 %v11402_v42, %v13938_v29  ;;  %v4042_v18 = vpop.xlane.xlu0 %4041  ;;  %v3969_v29 = vsub.f32 %v13891_v48, %v14076_v52  ;;  %v16447_v42 = vld [vmem:[#allocation189_spill] sm:$0xff]  ;;  %v10814_v48 = vunpack.i.h.bf16 %v16448_v58 }
 0x65b   : > { %v4075_v14 = vpop.xlane.xlu1 %4074  ;;  %v4171_v44 = vmul.f32 %v11404_v19, %v13940_v8  ;;  %11405 = vrcp.f32 %v4042_v18  ;;  %v4072_v25 = vpop.xlane.xlu2 %4071  ;;  %v10778_v19 = vunpack.i.l.bf16 %v16447_v42 }
 0x65c   : > { %11407 = vrcp.f32 %v4072_v25  ;;  %10376 = vmatmul.msk.f32.vlgmr.msra.gmra.mxu0 %vm1857_vm1, %v4170_v24  ;;  %v4024_v24 = vmul.f32 1.442695, %v3965_v13  ;;  %v4032_v49 = vmul.f32 1.442695, %v3969_v29 }
 0x65d   : > { %11409 = vrcp.f32 %v4075_v14  ;;  %10377 = vmatmul.msk.f32.vlgmr.msrb.gmra.mxu1 %vm1857_vm1, %v4171_v44  ;;  %4648 = vmatpush.msra.mxu0 %v10803_v50  ;;  %v10813_v50 = vunpack.i.l.bf16 %v16448_v58 }
 0x65e   : > { %4675 = vmatpush.msrb.mxu1 %v10804_v5 }
 0x661   : > { %v11406_v41 = vpop.eup %11405 }
 0x662   : > { %v11408_v8 = vpop.eup %11407  ;;  %v4164_v7 = vmul.f32 %v11406_v41, %v13949_v55  ;;  %v4087_v31 = vpop.xlane.xlu0 %4086  ;;  %v3968_v55 = vsub.f32 %v13887_v22, %v14068_v53  ;;  %v16449_v53 = vld [vmem:[#allocation226_spill] sm:$0xff] }
 0x663   : > { %v4084_v56 = vpop.xlane.xlu1 %4083  ;;  %v11410_v27 = vpop.eup %11409  ;;  %v4174_v18 = vmul.f32 %v11408_v8, %v13955_v43  ;;  %11411 = vrcp.f32 %v4087_v31  ;;  %v10779_v8 = vunpack.i.h.bf16 %v16447_v42  ;;  %v10823_v31 = vunpack.i.l.bf16 %v16449_v53 }
 0x664   : > { %v4045_v14 = vpop.xlane.xlu2 %4044  ;;  %v4175_v34 = vmul.f32 %v11410_v27, %v13951_v30  ;;  %10370 = vmatmul.msk.f32.vlgmr.msrb.gmra.mxu2 %vm1857_vm1, %v4164_v7  ;;  %v4030_v5 = vmul.f32 1.442695, %v3968_v55 }
 0x665   : > { %11413 = vrcp.f32 %v4045_v14  ;;  %4486 = vmatpush.msrb.mxu2 %v10778_v19  ;;  %10380 = vmatmul.msk.f32.vlgmr.msrb.gmra.mxu0 %vm1857_vm1, %v4174_v18 }
 0x666   : > { %11415 = vrcp.f32 %v4084_v56  ;;  %10381 = vmatmul.msk.f32.vlgmr.msra.gmra.mxu1 %vm1857_vm1, %v4175_v34  ;;  %4756 = vmatpush.msrb.mxu0 %v10813_v50 }
 0x667   : > { %11417 = vpow2.f32 %v4024_v24  ;;  %4783 = vmatpush.msra.mxu1 %v10814_v48 }
 0x668   : > { %11419 = vpow2.f32 %v4032_v49  ;;  %v16450_v49 = vld [vmem:[#allocation194_spill] sm:$0xff] }
 0x669   : > { %v11412_v43 = vpop.eup %11411  ;;  %v10798_v34 = vunpack.i.l.bf16 %v16450_v49 }
 0x66a   : > { %v4096_v52 = vpop.xlane.xlu0 %4095  ;;  %v4179_v13 = vmul.f32 %v11412_v43, %v13964_v63  ;;  %v10824_v63 = vunpack.i.h.bf16 %v16449_v53  ;;  %v10799_v43 = vunpack.i.h.bf16 %v16450_v49 }
 0x66b   : > { %v11414_v30 = vpop.eup %11413  ;;  %v4057_v44 = vpop.xlane.xlu1 %4056  ;;  %11421 = vrcp.f32 %v4096_v52 }
 0x66c   : > { %v11416_v25 = vpop.eup %11415  ;;  %v4165_v29 = vmul.f32 %v11414_v30, %v13970_v11  ;;  %v4054_v41 = vpop.xlane.xlu2 %4053  ;;  %v16451_v30 = vld [vmem:[#allocation238_spill] sm:$0xff] }
 0x66d   : > { %v4178_v7 = vmul.f32 %v11416_v25, %v13966_v57  ;;  %11423 = vrcp.f32 %v4054_v41  ;;  %v14123_v22 = vpop.eup %11417  ;;  %v10833_v52 = vunpack.i.l.bf16 %v16451_v30 }
 0x66e   : > { %11425 = vrcp.f32 %v4057_v44  ;;  %10371 = vmatmul.msk.f32.vlgmr.msra.gmra.mxu3 %vm1857_vm1, %v4165_v29  ;;  %v14127_v56 = vpop.eup %11419  ;;  %10385 = vmatmul.msk.f32.vlgmr.msrb.gmra.mxu1 %vm1857_vm1, %v4179_v13  ;;  %v4115_v57 = vsel %vm1857_vm1, %v14123_v22, 0.0 }
 0x66f   : > { %4513 = vmatpush.msra.mxu3 %v10779_v8  ;;  %10384 = vmatmul.msk.f32.vlgmr.msra.gmra.mxu0 %vm1857_vm1, %v4178_v7  ;;  %11427 = vpow2.f32 %v4030_v5  ;;  %v4127_v27 = vsel %vm1857_vm1, %v14127_v56, 0.0  ;;  %v16452_v7 = vld [vmem:[#allocation209_spill] sm:$0xff] }
 0x670   : > { %4864 = vmatpush.msra.mxu0 %v10823_v31  ;;  %4891 = vmatpush.msrb.mxu1 %v10824_v63  ;;  %v10809_v53 = vunpack.i.h.bf16 %v16452_v7  ;;  %v10808_v31 = vunpack.i.l.bf16 %v16452_v7  ;;  %v10834_v63 = vunpack.i.h.bf16 %v16451_v30  ;;  %v16456_v30 = vld [vmem:[#allocation54_spill] sm:$0xff] }
 0x671   : > { %v11422_v11 = vpop.eup %11421  ;;  %4116 = vadd.xlane.f32.xlu2 %v4115_v57  ;;  %v16460_v7 = vld [vmem:[#allocation66_spill] sm:$0xff] }
 0x672   : > { %4128 = vadd.xlane.f32.xlu1 %v4127_v27  ;;  %v4069_v19 = vpop.xlane.xlu0 %4068  ;;  %v4182_v14 = vmul.f32 %v11422_v11, %v13979_v37 }
 0x673   : > { %v11424_v42 = vpop.eup %11423  ;;  %v4066_v24 = vpop.xlane.xlu1 %4065  ;;  %11429 = vrcp.f32 %v4069_v19 }
 0x674   : > { %v11426_v18 = vpop.eup %11425  ;;  %v4168_v58 = vmul.f32 %v11424_v42, %v13985_v12  ;;  %v4099_v50 = vpop.xlane.xlu2 %4098 }
 0x675   : > { %v4169_v48 = vmul.f32 %v11426_v18, %v13981_v16  ;;  %11431 = vrcp.f32 %v4099_v50  ;;  %v14140_v55 = vpop.eup %11427  ;;  %v16453_v18 = vld [vmem:[#allocation225_spill] sm:$0xff] }
 0x676   : > { %11433 = vrcp.f32 %v4066_v24  ;;  %10374 = vmatmul.msk.f32.vlgmr.msra.gmra.mxu2 %vm1857_vm1, %v4168_v58  ;;  %v4124_v37 = vsel %vm1857_vm1, %v14140_v55, 0.0  ;;  %v16455_v58 = vld [vmem:[#allocation147_spill] sm:$0xff] }
 0x677   : > { %10375 = vmatmul.msk.f32.vlgmr.msrb.gmra.mxu3 %vm1857_vm1, %v4169_v48  ;;  %4594 = vmatpush.msra.mxu2 %v10798_v34 }
 0x678   : > { %4621 = vmatpush.msrb.mxu3 %v10799_v43  ;;  %10388 = vmatmul.msk.f32.vlgmr.msrb.gmra.mxu0 %vm1857_vm1, %v4182_v14  ;;  %v10818_v14 = vunpack.i.l.bf16 %v16453_v18 }
 0x679   : > { %4972 = vmatpush.msrb.mxu0 %v10833_v52  ;;  %v11430_v16 = vpop.eup %11429  ;;  %4125 = vadd.xlane.f32.xlu2 %v4124_v37  ;;  %v10819_v52 = vunpack.i.h.bf16 %v16453_v18  ;;  %v16469_v18 = vld [vmem:[#allocation149_spill] sm:$0xff] }
 0x67a   : > { %v4173_v44 = vmul.f32 %v11430_v16, %v13994_v32  ;;  %v4078_v25 = vpop.xlane.xlu0 %4077 }
 0x67b   : > { %v11432_v12 = vpop.eup %11431  ;;  %v4111_v5 = vpop.xlane.xlu1 %4110  ;;  %11435 = vrcp.f32 %v4078_v25 }
 0x67c   : > { %v11434_v13 = vpop.eup %11433  ;;  %v4183_v29 = vmul.f32 %v11432_v12, %v14000_v59  ;;  %v4108_v41 = vpop.xlane.xlu2 %4107 }
 0x67d   : > { %v4172_v8 = vmul.f32 %v11434_v13, %v13996_v23  ;;  %11437 = vrcp.f32 %v4108_v41 }
 0x67e   : > { %11439 = vrcp.f32 %v4111_v5  ;;  %10389 = vmatmul.msk.f32.vlgmr.msra.gmra.mxu1 %vm1857_vm1, %v4183_v29  ;;  %v16459_v5 = vld [vmem:[#allocation230_spill] sm:$0xff] }
 0x67f   : > { %10378 = vmatmul.msk.f32.vlgmr.msrb.gmra.mxu2 %vm1857_vm1, %v4172_v8  ;;  %10379 = vmatmul.msk.f32.vlgmr.msra.gmra.mxu3 %vm1857_vm1, %v4173_v44  ;;  %v10828_v13 = vunpack.i.l.bf16 %v16459_v5  ;;  %v10829_v41 = vunpack.i.h.bf16 %v16459_v5 }
 0x680   : > { %4702 = vmatpush.msrb.mxu2 %v10808_v31  ;;  %4729 = vmatpush.msra.mxu3 %v10809_v53  ;;  %v16461_v53 = vld [vmem:[#allocation81_spill] sm:$0xff]  ;;  %v16463_v31 = vld [vmem:[#allocation180_spill] sm:$0xff] }
 0x681   : > { %4999 = vmatpush.msra.mxu1 %v10834_v63  ;;  %v11436_v32 = vpop.eup %11435 }
 0x682   : > { %v4176_v23 = vmul.f32 %v11436_v32, %v14009_v46  ;;  %v4123_v57 = vpop.xlane.xlu0 %4122  ;;  %v16454_v46 = vld [vmem:[#allocation145_spill] sm:$0xff] }
 0x683   : > { %v11438_v59 = vpop.eup %11437  ;;  %v4120_v11 = vpop.xlane.xlu1 %4119  ;;  %11441 = vrcp.f32 %v4123_v57 }
 0x684   : > { %v11440_v27 = vpop.eup %11439  ;;  %v4186_v42 = vmul.f32 %v11438_v59, %v14015_v9  ;;  %v4081_v19 = vpop.xlane.xlu2 %4080  ;;  %v16464_v59 = vld [vmem:[#allocation243_spill] sm:$0xff] }
 0x685   : > { %v4187_v24 = vmul.f32 %v11440_v27, %v14011_v38  ;;  %11443 = vrcp.f32 %v4081_v19  ;;  %v16465_v27 = vld [vmem:[#allocation110_spill] sm:$0xff]  ;;  %v16466_v19 = vld [vmem:[#allocation121_spill] sm:$0xff] }
 0x686   : > { %11445 = vrcp.f32 %v4120_v11  ;;  %10392 = vmatmul.msk.f32.vlgmr.msra.gmra.mxu0 %vm1857_vm1, %v4186_v42  ;;  %v10839_v11 = vunpack.i.h.bf16 %v16464_v59 }
 0x687   : > { %10382 = vmatmul.msk.f32.vlgmr.msra.gmra.mxu2 %vm1857_vm1, %v4176_v23  ;;  %10393 = vmatmul.msk.f32.vlgmr.msrb.gmra.mxu1 %vm1857_vm1, %v4187_v24  ;;  %v10838_v23 = vunpack.i.l.bf16 %v16464_v59  ;;  %v16468_v24 = vld [vmem:[#allocation191_spill] sm:$0xff] }
 0x688   : > { %4810 = vmatpush.msra.mxu2 %v10818_v14  ;;  %10400 = vmatpush.xpose.msk.msra.mxu0 %vm1024_vm0, %v16454_v46  ;;  %v16470_v14 = vld [vmem:[#allocation95_spill] sm:$0xff] }
 0x689   : > { %10402 = vmatpush.xpose.msk.msrb.mxu1 %vm1024_vm0, %v16455_v58  ;;  %v11442_v9 = vpop.eup %11441  ;;  %v16471_v46 = vld [vmem:[#allocation103_spill] sm:$0xff]  ;;  %v16472_v58 = vld [vmem:[#allocation200_spill] sm:$0xff] }
 0x68a   : > { %v4191_v34 = vmul.f32 %v11442_v9, %v14024_v54  ;;  %v4105_v16 = vpop.xlane.xlu0 %4104  ;;  %v16457_v54 = vld [vmem:[#allocation164_spill] sm:$0xff]  ;;  %v16473_v9 = vld [vmem:[#allocation199_spill] sm:$0xff] }
 0x68b   : > { %v11444_v50 = vpop.eup %11443  ;;  %v4093_v38 = vpop.xlane.xlu1 %4092  ;;  %7588 = vrot.lane.b32.xlu1 %v16456_v30, %s11729_s23  ;;  %v16481_v30 = vld [vmem:[#allocation227_spill] sm:$0xff] }
 0x68c   : > { %v11446_v49 = vpop.eup %11445  ;;  %v4177_v48 = vmul.f32 %v11444_v50, %v14030_v3  ;;  %v4090_v43 = vpop.xlane.xlu2 %4089  ;;  %v16458_v3 = vld [vmem:[#allocation157_spill] sm:$0xff]  ;;  %v16474_v50 = vld [vmem:[#allocation126_spill] sm:$0xff] }
 0x68d   : > { %v4190_v37 = vmul.f32 %v11446_v49, %v14026_v40  ;;  %11447 = vrcp.f32 %v4090_v43  ;;  %v16477_v49 = vld [vmem:[#allocation219_spill] sm:$0xff]  ;;  %v16480_v43 = vld [vmem:[#allocation228_spill] sm:$0xff] }
 0x68e   : > { %11449 = vrcp.f32 %v4093_v38  ;;  %10383 = vmatmul.msk.f32.vlgmr.msrb.gmra.mxu3 %vm1857_vm1, %v4177_v48  ;;  %v16476_v38 = vld [vmem:[#allocation212_spill] sm:$0xff]  ;;  %v16479_v48 = vld [vmem:[#allocation87_spill] sm:$0xff] }
 0x68f   : > { %4837 = vmatpush.msrb.mxu3 %v10819_v52  ;;  %10396 = vmatmul.msk.f32.vlgmr.msrb.gmra.mxu0 %vm1857_vm1, %v4190_v37  ;;  %11451 = vrcp.f32 %v4105_v16  ;;  %v16483_v37 = vld [vmem:[#allocation118_spill] sm:$0xff]  ;;  %v16484_v16 = vld [vmem:[#allocation120_spill] sm:$0xff] }
 0x690   : > { %10397 = vmatmul.msk.f32.vlgmr.msra.gmra.mxu1 %vm1857_vm1, %v4191_v34  ;;  %10408 = vmatpush.xpose.msk.msrb.mxu0 %vm1024_vm0, %v16457_v54  ;;  %v16478_v34 = vld [vmem:[#allocation77_spill] sm:$0xff]  ;;  %v16485_v54 = vld [vmem:[#allocation236_spill] sm:$0xff] }
 0x691   : > { %10410 = vmatpush.xpose.msk.msra.mxu1 %vm1024_vm0, %v16458_v3  ;;  %v16486_v3 = vld [vmem:[#allocation234_spill] sm:$0xff] }
 0x692   : > { %v4114_v8 = vpop.xlane.xlu0 %4113 }
 0x693   : > { %v11448_v12 = vpop.eup %11447  ;;  %v4102_v44 = vpop.xlane.xlu1 %4101 }
 0x694   : > { %v11450_v25 = vpop.eup %11449  ;;  %v4180_v40 = vmul.f32 %v11448_v12, %v14044_v60  ;;  %11453 = vrcp.f32 %v4102_v44  ;;  %v16462_v60 = vld [vmem:[#allocation175_spill] sm:$0xff]  ;;  %v14238_v52 = vpop.permute.xlu2 %7418  ;;  %v16487_v12 = vld [vmem:[#allocation146_spill] sm:$0xff] }
 0x695   : > { %v4181_v29 = vmul.f32 %v11450_v25, %v14040_v17  ;;  %v11452_v17 = vpop.eup %11451  ;;  %11455 = vrcp.f32 %v4114_v8  ;;  %16482 = vst [vmem:[#allocation122_spill] sm:$0xff] %v14238_v52  ;;  %v10733_v44 = vunpack.i.l.bf16 %v16487_v12  ;;  %v10734_v25 = vunpack.i.h.bf16 %v16487_v12  ;;  %v16520_v12 = vld [vmem:[#allocation71_spill] sm:$0xff] }
 0x696   : > { %10386 = vmatmul.msk.f32.vlgmr.msrb.gmra.mxu2 %vm1857_vm1, %v4180_v40  ;;  %v4185_v57 = vmul.f32 %v11452_v17, %v14038_v1  ;;  %v16488_v40 = vld [vmem:[#allocation132_spill] sm:$0xff]  ;;  %v16495_v17 = vld [vmem:[#allocation99_spill] sm:$0xff] }
 0x697   : > { %10387 = vmatmul.msk.f32.vlgmr.msra.gmra.mxu3 %vm1857_vm1, %v4181_v29  ;;  %4918 = vmatpush.msrb.mxu2 %v10828_v13  ;;  %v16490_v13 = vld [vmem:[#allocation143_spill] sm:$0xff] }
 0x698   : > { %4945 = vmatpush.msra.mxu3 %v10829_v41  ;;  %10401 = vmatmul.msk.f32.vlgmr.msra.gmra.mxu0 %vm1024_vm0, %v16460_v7  ;;  %v16494_v7 = vld [vmem:[#allocation167_spill] sm:$0xff] }
 0x699   : > { %10403 = vmatmul.msk.f32.vlgmr.msrb.gmra.mxu1 %vm1024_vm0, %v16461_v53  ;;  %10416 = vmatpush.xpose.msk.msra.mxu0 %vm1024_vm0, %v16462_v60  ;;  %v10753_v53 = vunpack.i.l.bf16 %v16494_v7  ;;  %v10754_v60 = vunpack.i.h.bf16 %v16494_v7 }
 0x69a   : > { %10418 = vmatpush.xpose.msk.msrb.mxu1 %vm1024_vm0, %v16463_v31  ;;  %v11454_v63 = vpop.eup %11453  ;;  %v16496_v31 = vld [vmem:[#allocation105_spill] sm:$0xff] }
 0x69b   : > { %v4184_v32 = vmul.f32 %v11454_v63, %v14052_v21  ;;  %v11456_v42 = vpop.eup %11455  ;;  %v16467_v21 = vld [vmem:[#allocation192_spill] sm:$0xff] }
 0x69c   : > { %v4188_v1 = vmul.f32 %v11456_v42, %v14050_v4  ;;  %v16475_v4 = vld [vmem:[#allocation134_spill] sm:$0xff]  ;;  %v14252_v5 = vpop.permute.xlu2 %7504 }
 0x69d   : > { %16489 = vst [vmem:[#allocation201_spill] sm:$0xff] %v14252_v5 }
 0x69e   : > { %10390 = vmatmul.msk.f32.vlgmr.msra.gmra.mxu2 %vm1857_vm1, %v4184_v32 }
 0x69f   : > { %10391 = vmatmul.msk.f32.vlgmr.msrb.gmra.mxu3 %vm1857_vm1, %v4185_v57  ;;  %5026 = vmatpush.msra.mxu2 %v10838_v23 }
 0x6a0   : > { %5053 = vmatpush.msrb.mxu3 %v10839_v11  ;;  %10409 = vmatmul.msk.f32.vlgmr.msrb.gmra.mxu0 %vm1024_vm0, %v16465_v27 }
 0x6a1   : > { %10411 = vmatmul.msk.f32.vlgmr.msra.gmra.mxu1 %vm1024_vm0, %v16466_v19  ;;  %10424 = vmatpush.xpose.msk.msrb.mxu0 %vm1024_vm0, %v16467_v21 }
 0x6a2   : > { %10426 = vmatpush.xpose.msk.msra.mxu1 %vm1024_vm0, %v16468_v24 }
 0x6a4   : > { %v14268_v63 = vpop.permute.xlu2 %7532 }
 0x6a5   : > { %16497 = vst [vmem:[#allocation186_spill] sm:$0xff] %v14268_v63 }
 0x6a6   : > { %10394 = vmatmul.msk.f32.vlgmr.msrb.gmra.mxu2 %vm1857_vm1, %v4188_v1 }
 0x6a7   : > { %10404 = vmatpush.xpose.msk.msrb.mxu2 %vm1024_vm0, %v16469_v18 }
 0x6a8   : > { %10417 = vmatmul.msk.f32.vlgmr.msra.gmra.mxu0 %vm1024_vm0, %v16470_v14 }
 0x6a9   : > { %10419 = vmatmul.msk.f32.vlgmr.msrb.gmra.mxu1 %vm1024_vm0, %v16471_v46  ;;  %10432 = vmatpush.xpose.msk.msra.mxu0 %vm1024_vm0, %v16472_v58  ;;  %v16507_v58 = vld [vmem:[#allocation156_spill] sm:$0xff] }
 0x6aa   : > { %10434 = vmatpush.xpose.msk.msrb.mxu1 %vm1024_vm0, %v16473_v9  ;;  %v14260_v8 = vpop.permute.xlu1 %7446 }
 0x6ab   : > { %16493 = vst [vmem:[#allocation96_spill] sm:$0xff] %v14260_v8 }
 0x6ac   : > { %v14276_v57 = vpop.permute.xlu2 %7558 }
 0x6ad   : > { %16501 = vst [vmem:[#allocation218_spill] sm:$0xff] %v14276_v57 }
 0x6b0   : > { %10425 = vmatmul.msk.f32.vlgmr.msrb.gmra.mxu0 %vm1024_vm0, %v16474_v50 }
 0x6b1   : > { %10427 = vmatmul.msk.f32.vlgmr.msra.gmra.mxu1 %vm1024_vm0, %v16475_v4  ;;  %10440 = vmatpush.xpose.msk.msrb.mxu0 %vm1024_vm0, %v16476_v38 }
 0x6b2   : > { %10442 = vmatpush.xpose.msk.msra.mxu1 %vm1024_vm0, %v16477_v49  ;;  %v14274_v23 = vpop.permute.xlu1 %7474 }
 0x6b3   : > { %16500 = vst [vmem:[#allocation97_spill] sm:$0xff] %v14274_v23 }
 0x6b8   : > { %10433 = vmatmul.msk.f32.vlgmr.msra.gmra.mxu0 %vm1024_vm0, %v16478_v34 }
 0x6b9   : > { %10435 = vmatmul.msk.f32.vlgmr.msrb.gmra.mxu1 %vm1024_vm0, %v16479_v48  ;;  %10448 = vmatpush.xpose.msk.msra.mxu0 %vm1024_vm0, %v16480_v43  ;;  %v16511_v48 = vld [vmem:[#allocation173_spill] sm:$0xff] }
 0x6ba   : > { %10450 = vmatpush.xpose.msk.msrb.mxu1 %vm1024_vm0, %v16481_v30  ;;  %v14282_v42 = vpop.permute.xlu1 %7560 }
 0x6bb   : > { %16504 = vst [vmem:[#allocation123_spill] sm:$0xff] %v14282_v42 }
 0x6c0   : > { %10441 = vmatmul.msk.f32.vlgmr.msrb.gmra.mxu0 %vm1024_vm0, %v16483_v37  ;;  %v16514_v37 = vld [vmem:[#allocation92_spill] sm:$0xff] }
 0x6c1   : > { %10443 = vmatmul.msk.f32.vlgmr.msra.gmra.mxu1 %vm1024_vm0, %v16484_v16  ;;  %10456 = vmatpush.xpose.msk.msrb.mxu0 %vm1024_vm0, %v16485_v54  ;;  %v16517_v16 = vld [vmem:[#allocation181_spill] sm:$0xff] }
 0x6c2   : > { %10458 = vmatpush.xpose.msk.msra.mxu1 %vm1024_vm0, %v16486_v3 }
 0x6c3   : > { %v14256_v29 = vpop.f32.mrf.mxu0 }
 0x6c4   : > { %16491 = vst [vmem:[#allocation188_spill] sm:$0xff] %v14256_v29 }
 0x6c8   : > { %10449 = vmatmul.msk.f32.vlgmr.msra.gmra.mxu0 %vm1024_vm0, %v16488_v40  ;;  %v14258_v41 = vpop.f32.mrf.mxu1  ;;  %v16523_v40 = vld [vmem:[#allocation198_spill] sm:$0xff] }
 0x6c9   : > { %10451 = vmatmul.msk.f32.vlgmr.msrb.gmra.mxu1 %vm1024_vm0, %v16490_v13  ;;  %6327 = vmatpush.msra.mxu0 %v10733_v44  ;;  %16492 = vst [vmem:[#allocation94_spill] sm:$0xff] %v14258_v41  ;;  %v16521_v44 = vld [vmem:[#allocation84_spill] sm:$0xff] }
 0x6ca   : > { %6353 = vmatpush.msrb.mxu1 %v10734_v25  ;;  %v16522_v25 = vld [vmem:[#allocation193_spill] sm:$0xff] }
 0x6d0   : > { %10457 = vmatmul.msk.f32.vlgmr.msrb.gmra.mxu0 %vm1024_vm0, %v16495_v17  ;;  %v14270_v32 = vpop.f32.mrf.mxu0  ;;  %v16528_v17 = vld [vmem:[#allocation211_spill] sm:$0xff] }
 0x6d1   : > { %10459 = vmatmul.msk.f32.vlgmr.msra.gmra.mxu1 %vm1024_vm0, %v16496_v31  ;;  %6431 = vmatpush.msrb.mxu0 %v10753_v53  ;;  %16498 = vst [vmem:[#allocation197_spill] sm:$0xff] %v14270_v32  ;;  %v14272_v59 = vpop.f32.mrf.mxu1  ;;  %v16526_v53 = vld [vmem:[#allocation116_spill] sm:$0xff]  ;;  %v16529_v31 = vld [vmem:[#allocation207_spill] sm:$0xff] }
 0x6d2   : > { %6457 = vmatpush.msra.mxu1 %v10754_v60  ;;  %16499 = vst [vmem:[#allocation140_spill] sm:$0xff] %v14272_v59  ;;  %v16527_v60 = vld [vmem:[#allocation124_spill] sm:$0xff] }
 0x6d9   : > { %v14278_v11 = vpop.f32.mrf.mxu0 }
 0x6da   : > { %16502 = vst [vmem:[#allocation204_spill] sm:$0xff] %v14278_v11  ;;  %v14280_v27 = vpop.f32.mrf.mxu1 }
 0x6db   : > { %16503 = vst [vmem:[#allocation83_spill] sm:$0xff] %v14280_v27 }
 0x6e2   : > { %v14284_v21 = vpop.f32.mrf.mxu0 }
 0x6e3   : > { %16505 = vst [vmem:[#allocation196_spill] sm:$0xff] %v14284_v21  ;;  %v14286_v24 = vpop.f32.mrf.mxu1 }
 0x6e4   : > { %v4117_v19 = vpop.xlane.xlu2 %4116  ;;  %16506 = vst [vmem:[#allocation216_spill] sm:$0xff] %v14286_v24 }
 0x6e5   : > { %11457 = vrcp.f32 %v4117_v19  ;;  %v4129_v1 = vpop.xlane.xlu1 %4128 }
 0x6e6   : > { %11459 = vrcp.f32 %v4129_v1 }
 0x6eb   : > { %v11458_v18 = vpop.eup %11457  ;;  %v14294_v4 = vpop.f32.mrf.mxu1 }
 0x6ec   : > { %v4189_v14 = vmul.f32 %v11458_v18, %v14123_v22  ;;  %v4126_v46 = vpop.xlane.xlu2 %4125  ;;  %v14292_v9 = vpop.f32.mrf.mxu0  ;;  %16509 = vst [vmem:[#allocation133_spill] sm:$0xff] %v14294_v4  ;;  %v16510_v22 = vld [vmem:[#allocation171_spill] sm:$0xff] }
 0x6ed   : > { %11461 = vrcp.f32 %v4126_v46  ;;  %16508 = vst [vmem:[#allocation86_spill] sm:$0xff] %v14292_v9  ;;  %v11460_v50 = vpop.eup %11459  ;;  %v16530_v46 = vld [vmem:[#allocation139_spill] sm:$0xff] }
 0x6ee   : > { %10395 = vmatmul.msk.f32.vlgmr.msra.gmra.mxu3 %vm1857_vm1, %v4189_v14  ;;  %v4193_v49 = vmul.f32 %v11460_v50, %v14127_v56  ;;  %v16515_v56 = vld [vmem:[#allocation100_spill] sm:$0xff]  ;;  %v16532_v50 = vld [vmem:[#allocation221_spill] sm:$0xff] }
 0x6ef   : > { %10406 = vmatpush.xpose.msk.msra.mxu3 %vm1024_vm0, %v16507_v58  ;;  %v16531_v58 = vld [vmem:[#allocation138_spill] sm:$0xff] }
 0x6f3   : > { %v11462_v38 = vpop.eup %11461 }
 0x6f4   : > { %v4192_v34 = vmul.f32 %v11462_v38, %v14140_v55  ;;  %v16516_v55 = vld [vmem:[#allocation182_spill] sm:$0xff]  ;;  %v16533_v38 = vld [vmem:[#allocation220_spill] sm:$0xff] }
 0x6f5   : > { %v14304_v43 = vpop.f32.mrf.mxu0 }
 0x6f6   : > { %10398 = vmatmul.msk.f32.vlgmr.msra.gmra.mxu2 %vm1857_vm1, %v4192_v34  ;;  %10399 = vmatmul.msk.f32.vlgmr.msrb.gmra.mxu3 %vm1857_vm1, %v4193_v49  ;;  %16512 = vst [vmem:[#allocation231_spill] sm:$0xff] %v14304_v43 }
 0x6f7   : > { %10412 = vmatpush.xpose.msk.msra.mxu2 %vm1024_vm0, %v16510_v22  ;;  %10414 = vmatpush.xpose.msk.msrb.mxu3 %vm1024_vm0, %v16511_v48 }
 0x6fb   : > { %v14306_v30 = vpop.f32.mrf.mxu1 }
 0x6fc   : > { %16513 = vst [vmem:[#allocation217_spill] sm:$0xff] %v14306_v30 }
 0x6fe   : > { %10405 = vmatmul.msk.f32.vlgmr.msrb.gmra.mxu2 %vm1024_vm0, %v16514_v37  ;;  %10407 = vmatmul.msk.f32.vlgmr.msra.gmra.mxu3 %vm1024_vm0, %v16515_v56  ;;  %v16534_v37 = vld [vmem:[#allocation90_spill] sm:$0xff] }
 0x6ff   : > { %10420 = vmatpush.xpose.msk.msrb.mxu2 %vm1024_vm0, %v16516_v55  ;;  %10422 = vmatpush.xpose.msk.msra.mxu3 %vm1024_vm0, %v16517_v16  ;;  %v16535_v56 = vld [vmem:[#allocation106_spill] sm:$0xff]  ;;  %v16536_v55 = vld [vmem:[#allocation229_spill] sm:$0xff] }
 0x700   : > { %v16537_v16 = vld [vmem:[#allocation233_spill] sm:$0xff] }
 0x703   : > { %v14316_v54 = vpop.f32.mrf.mxu0 }
 0x704   : > { %16518 = vst [vmem:[#allocation125_spill] sm:$0xff] %v14316_v54  ;;  %v14318_v3 = vpop.f32.mrf.mxu1 }
 0x705   : > { %16519 = vst [vmem:[#allocation69_spill] sm:$0xff] %v14318_v3 }
 0x706   : > { %10413 = vmatmul.msk.f32.vlgmr.msra.gmra.mxu2 %vm1024_vm0, %v16520_v12  ;;  %10415 = vmatmul.msk.f32.vlgmr.msrb.gmra.mxu3 %vm1024_vm0, %v16521_v44 }
 0x707   : > { %10428 = vmatpush.xpose.msk.msra.mxu2 %vm1024_vm0, %v16522_v25  ;;  %10430 = vmatpush.xpose.msk.msrb.mxu3 %vm1024_vm0, %v16523_v40 }
 0x70c   : > { %v14328_v13 = vpop.f32.mrf.mxu0 }
 0x70d   : > { %16524 = vst [vmem:[#allocation202_spill] sm:$0xff] %v14328_v13  ;;  %v14330_v7 = vpop.f32.mrf.mxu1 }
 0x70e   : > { %16525 = vst [vmem:[#allocation223_spill] sm:$0xff] %v14330_v7  ;;  %10421 = vmatmul.msk.f32.vlgmr.msrb.gmra.mxu2 %vm1024_vm0, %v16526_v53  ;;  %10423 = vmatmul.msk.f32.vlgmr.msra.gmra.mxu3 %vm1024_vm0, %v16527_v60  ;;  %v16538_v53 = vld [vmem:[#allocation131_spill] sm:$0xff]  ;;  %v16539_v60 = vld [vmem:[#allocation136_spill] sm:$0xff] }
 0x70f   : > { %10436 = vmatpush.xpose.msk.msrb.mxu2 %vm1024_vm0, %v16528_v17  ;;  %10438 = vmatpush.xpose.msk.msra.mxu3 %vm1024_vm0, %v16529_v31  ;;  %v16540_v17 = vld [vmem:[#allocation239_spill] sm:$0xff]  ;;  %v16541_v31 = vld [vmem:[#allocation242_spill] sm:$0xff] }
 0x715   : > { %v14340_v19 = vpop.f32.mrf.mxu0 }
 0x716   : > { %v14342_v1 = vpop.f32.mrf.mxu1  ;;  %v5954_v18 = vsel %vm1857_vm1, %v14340_v19, -inf  ;;  %10429 = vmatmul.msk.f32.vlgmr.msra.gmra.mxu2 %vm1024_vm0, %v16530_v46  ;;  %10431 = vmatmul.msk.f32.vlgmr.msrb.gmra.mxu3 %vm1024_vm0, %v16531_v58  ;;  %v16542_v58 = vld [vmem:[#allocation154_spill] sm:$0xff] }
 0x717   : > { %v5957_v14 = vsel %vm1857_vm1, %v14342_v1, -inf  ;;  %5955 = vmax.xlane.f32.xlu0 %v5954_v18  ;;  %10444 = vmatpush.xpose.msk.msra.mxu2 %vm1024_vm0, %v16532_v50  ;;  %v10743_v50 = vunpack.i.l.bf16 %v16542_v58 }
 0x718   : > { %5958 = vmax.xlane.f32.xlu1 %v5957_v14  ;;  %10446 = vmatpush.xpose.msk.msrb.mxu3 %vm1024_vm0, %v16533_v38 }
 0x71d   : > { %v14356_v49 = vpop.f32.mrf.mxu0 }
 0x71e   : > { %v14358_v34 = vpop.f32.mrf.mxu1  ;;  %v5966_v22 = vsel %vm1857_vm1, %v14356_v49, -inf  ;;  %10437 = vmatmul.msk.f32.vlgmr.msrb.gmra.mxu2 %vm1024_vm0, %v16534_v37  ;;  %10439 = vmatmul.msk.f32.vlgmr.msra.gmra.mxu3 %vm1024_vm0, %v16535_v56  ;;  %v16544_v37 = vld [vmem:[#allocation80_spill] sm:$0xff] }
 0x71f   : > { %v5969_v48 = vsel %vm1857_vm1, %v14358_v34, -inf  ;;  %10452 = vmatpush.xpose.msk.msrb.mxu2 %vm1024_vm0, %v16536_v55  ;;  %10454 = vmatpush.xpose.msk.msra.mxu3 %vm1024_vm0, %v16537_v16  ;;  %v16545_v55 = vld [vmem:[#allocation172_spill] sm:$0xff] }
 0x720   : > { %5970 = vmax.xlane.f32.xlu2 %v5969_v48  ;;  %5967 = vmax.xlane.f32.xlu1 %v5966_v22  ;;  %v16543_v22 = vld [vmem:[#allocation75_spill] sm:$0xff]  ;;  %v10744_v48 = vunpack.i.h.bf16 %v16542_v58  ;;  %v10763_v16 = vunpack.i.l.bf16 %v16545_v55 }
 0x725   : > { %v14372_v12 = vpop.f32.mrf.mxu0 }
 0x726   : > { %v14374_v44 = vpop.f32.mrf.mxu1  ;;  %v5978_v25 = vsel %vm1857_vm1, %v14372_v12, -inf  ;;  %10445 = vmatmul.msk.f32.vlgmr.msra.gmra.mxu2 %vm1024_vm0, %v16538_v53  ;;  %10447 = vmatmul.msk.f32.vlgmr.msrb.gmra.mxu3 %vm1024_vm0, %v16539_v60  ;;  %v10764_v53 = vunpack.i.h.bf16 %v16545_v55  ;;  %v16547_v60 = vld [vmem:[#allocation128_spill] sm:$0xff] }
 0x727   : > { %v5981_v40 = vsel %vm1857_vm1, %v14374_v44, -inf  ;;  %10460 = vmatpush.xpose.msk.msra.mxu2 %vm1024_vm0, %v16540_v17  ;;  %10462 = vmatpush.xpose.msk.msrb.mxu3 %vm1024_vm0, %v16541_v31  ;;  %v14412_v17 = vpop.f32.mrf.mxu2  ;;  %v14414_v31 = vpop.f32.mrf.mxu3 }
 0x728   : > { %5982 = vmax.xlane.f32.xlu0 %v5981_v40  ;;  %5979 = vmax.xlane.f32.xlu2 %v5978_v25  ;;  %v16546_v40 = vld [vmem:[#allocation113_spill] sm:$0xff]  ;;  %16548 = vst [vmem:[#allocation130_spill] sm:$0xff] %v14412_v17 }
 0x729   : > { %16549 = vst [vmem:[#allocation89_spill] sm:$0xff] %v14414_v31 }
 0x72d   : > { %v14388_v18 = vpop.f32.mrf.mxu0 }
 0x72e   : > { %v14390_v14 = vpop.f32.mrf.mxu1  ;;  %v5990_v46 = vsel %vm1857_vm1, %v14388_v18, -inf  ;;  %10453 = vmatmul.msk.f32.vlgmr.msrb.gmra.mxu2 %vm1024_vm0, %v16543_v22  ;;  %10455 = vmatmul.msk.f32.vlgmr.msra.gmra.mxu3 %vm1024_vm0, %v16544_v37 }
 0x72f   : > { %v5993_v38 = vsel %vm1857_vm1, %v14390_v14, -inf  ;;  %6379 = vmatpush.msrb.mxu2 %v10743_v50  ;;  %6405 = vmatpush.msra.mxu3 %v10744_v48  ;;  %v14418_v58 = vpop.f32.mrf.mxu3 }
 0x730   : > { %5994 = vmax.xlane.f32.xlu1 %v5993_v38  ;;  %5991 = vmax.xlane.f32.xlu0 %v5990_v46  ;;  %v14416_v46 = vpop.f32.mrf.mxu2  ;;  %16551 = vst [vmem:[#allocation224_spill] sm:$0xff] %v14418_v58 }
 0x731   : > { %16550 = vst [vmem:[#allocation241_spill] sm:$0xff] %v14416_v46 }
 0x735   : > { %v14402_v56 = vpop.f32.mrf.mxu0 }
 0x736   : > { %v6002_v25 = vsel %vm1857_vm1, %v14402_v56, -inf  ;;  %10461 = vmatmul.msk.f32.vlgmr.msra.gmra.mxu2 %vm1024_vm0, %v16546_v40  ;;  %10463 = vmatmul.msk.f32.vlgmr.msrb.gmra.mxu3 %vm1024_vm0, %v16547_v60 }
 0x737   : > { %6483 = vmatpush.msra.mxu2 %v10763_v16  ;;  %6509 = vmatpush.msrb.mxu3 %v10764_v53  ;;  %v14422_v38 = vpop.f32.mrf.mxu3 }
 0x738   : > { %6003 = vmax.xlane.f32.xlu1 %v6002_v25  ;;  %v14420_v50 = vpop.f32.mrf.mxu2  ;;  %16553 = vst [vmem:[#allocation119_spill] sm:$0xff] %v14422_v38 }
 0x739   : > { %16552 = vst [vmem:[#allocation135_spill] sm:$0xff] %v14420_v50 }
 0x73f   : > { %v14426_v48 = vpop.f32.mrf.mxu3 }
 0x740   : > { %v14424_v22 = vpop.f32.mrf.mxu2  ;;  %16555 = vst [vmem:[#allocation235_spill] sm:$0xff] %v14426_v48 }
 0x741   : > { %16554 = vst [vmem:[#allocation222_spill] sm:$0xff] %v14424_v22 }
 0x747   : > { %v14430_v55 = vpop.f32.mrf.mxu3 }
 0x748   : > { %v14428_v37 = vpop.f32.mrf.mxu2  ;;  %16557 = vst [vmem:[#allocation72_spill] sm:$0xff] %v14430_v55 }
 0x749   : > { %16556 = vst [vmem:[#allocation150_spill] sm:$0xff] %v14428_v37 }
 0x74f   : > { %v14434_v25 = vpop.f32.mrf.mxu3 }
 0x750   : > { %v14432_v16 = vpop.f32.mrf.mxu2  ;;  %16559 = vst [vmem:[#allocation148_spill] sm:$0xff] %v14434_v25  ;;  %v14452_v25 = vpop.f32.mrf.mxu1 }
 0x751   : > { %16558 = vst [vmem:[#allocation117_spill] sm:$0xff] %v14432_v16 }
 0x758   : > { %v14436_v40 = vpop.f32.mrf.mxu2  ;;  %v14468_v43 = vpop.f32.mrf.mxu1 }
 0x759   : > { %16560 = vst [vmem:[#allocation237_spill] sm:$0xff] %v14436_v40  ;;  %v14454_v40 = vpop.permute.xlu0 %7448  ;;  %v6017_v9 = vsel %vm1857_vm1, %v14468_v43, -inf }
 0x75a   : > { %16564 = vst [vmem:[#allocation174_spill] sm:$0xff] %v14454_v40 }
 0x760   : > { %v14484_v48 = vpop.f32.mrf.mxu1 }
 0x761   : > { %v14470_v55 = vpop.permute.xlu0 %7476 }
 0x762   : > { %16565 = vst [vmem:[#allocation108_spill] sm:$0xff] %v14470_v55 }
 0x769   : > { %v14488_v24 = vpop.permute.xlu0 %7502 }
 0x76a   : > { %16566 = vst [vmem:[#allocation142_spill] sm:$0xff] %v14488_v24 }
 0x771   : > { %v14438_v53 = vpop.f32.mrf.mxu3  ;;  %v14510_v46 = vpop.permute.xlu0 %7530 }
 0x772   : > { %16561 = vst [vmem:[#allocation101_spill] sm:$0xff] %v14438_v53 }
 0x773   : > { %16567 = vst [vmem:[#allocation163_spill] sm:$0xff] %v14510_v46 }
 0x779   : > { %v14440_v60 = vpop.f32.mrf.mxu2  ;;  %v14442_v7 = vpop.f32.mrf.mxu3 }
 0x77a   : > { %16562 = vst [vmem:[#allocation129_spill] sm:$0xff] %v14440_v60 }
 0x77b   : > { %16563 = vst [vmem:[#allocation232_spill] sm:$0xff] %v14442_v7  ;;  %v6005_v7 = vsel %vm1857_vm1, %v14452_v25, -inf }
 0x781   : > { %v14444_v13 = vpop.f32.mrf.mxu2  ;;  %v14446_v3 = vpop.f32.mrf.mxu3 }
 0x782   : > { %v5960_v54 = vsel %vm1857_vm1, %v14444_v13, -inf  ;;  %v5963_v16 = vsel %vm1857_vm1, %v14446_v3, -inf }
 0x783   : > { %5961 = vmax.xlane.f32.xlu2 %v5960_v54  ;;  %5964 = vmax.xlane.f32.xlu0 %v5963_v16  ;;  %v14466_v16 = vpop.f32.mrf.mxu0 }
 0x784   : > { %v6014_v4 = vsel %vm1857_vm1, %v14466_v16, -inf }
 0x789   : > { %v14456_v53 = vpop.f32.mrf.mxu2  ;;  %v14458_v60 = vpop.f32.mrf.mxu3 }
 0x78a   : > { %v5972_v30 = vsel %vm1857_vm1, %v14456_v53, -inf  ;;  %v5975_v54 = vsel %vm1857_vm1, %v14458_v60, -inf }
 0x78b   : > { %6006 = vmax.xlane.f32.xlu2 %v6005_v7  ;;  %5973 = vmax.xlane.f32.xlu0 %v5972_v30 }
 0x78c   : > { %5976 = vmax.xlane.f32.xlu1 %v5975_v54  ;;  %v14482_v54 = vpop.f32.mrf.mxu0 }
 0x78d   : > { %v6026_v21 = vsel %vm1857_vm1, %v14482_v54, -inf }
 0x791   : > { %v14472_v37 = vpop.f32.mrf.mxu2  ;;  %v14480_v7 = vpop.f32.mrf.mxu3 }
 0x792   : > { %v5984_v30 = vsel %vm1857_vm1, %v14472_v37, -inf  ;;  %v5987_v38 = vsel %vm1857_vm1, %v14480_v7, -inf }
 0x793   : > { %6015 = vmax.xlane.f32.xlu2 %v6014_v4  ;;  %6018 = vmax.xlane.f32.xlu0 %v6017_v9  ;;  %v6029_v9 = vsel %vm1857_vm1, %v14484_v48, -inf }
 0x794   : > { %5985 = vmax.xlane.f32.xlu1 %v5984_v30  ;;  %v14498_v4 = vpop.f32.mrf.mxu0 }
 0x799   : > { %v14486_v22 = vpop.f32.mrf.mxu2  ;;  %v14494_v50 = vpop.f32.mrf.mxu3 }
 0x79a   : > { %v5996_v27 = vsel %vm1857_vm1, %v14486_v22, -inf  ;;  %v5999_v11 = vsel %vm1857_vm1, %v14494_v50, -inf }
 0x79b   : > { %6027 = vmax.xlane.f32.xlu0 %v6026_v21  ;;  %5988 = vmax.xlane.f32.xlu2 %v5987_v38  ;;  %v6038_v21 = vsel %vm1857_vm1, %v14498_v4, -inf  ;;  %v14512_v38 = vpop.permute.xlu1 %7588 }
 0x79c   : > { %6030 = vmax.xlane.f32.xlu1 %v6029_v9  ;;  %16568 = vst [vmem:[#allocation137_spill] sm:$0xff] %v14512_v38  ;;  %v14514_v9 = vpop.f32.mrf.mxu1 }
 0x79d   : > { %v6041_v32 = vsel %vm1857_vm1, %v14514_v9, -inf }
 0x7a1   : > { %v14500_v30 = vpop.f32.mrf.mxu2  ;;  %v14506_v58 = vpop.f32.mrf.mxu3 }
 0x7a2   : > { %v6008_v57 = vsel %vm1857_vm1, %v14500_v30, -inf }
 0x7a3   : > { %5997 = vmax.xlane.f32.xlu2 %v5996_v27  ;;  %6000 = vmax.xlane.f32.xlu0 %v5999_v11  ;;  %v6011_v11 = vsel %vm1857_vm1, %v14506_v58, -inf  ;;  %v5956_v27 = vpop.xlane.xlu0 %5955  ;;  %v5959_v46 = vpop.xlane.xlu1 %5958 }
 0x7a4   : > { %6039 = vmax.xlane.f32.xlu1 %v6038_v21  ;;  %v5971_v21 = vpop.xlane.xlu2 %5970  ;;  %v6050_v52 = vsub.f32 %v14340_v19, %v5956_v27  ;;  %v6051_v63 = vsub.f32 %v14342_v1, %v5959_v46 }
 0x7a5   : > { %v6055_v41 = vsub.f32 %v14358_v34, %v5971_v21 }
 0x7a6   : > { %v6084_v27 = vmul.f32 1.442695, %v6051_v63 }
 0x7a7   : > { %v6092_v46 = vmul.f32 1.442695, %v6055_v41 }
 0x7a9   : > { %v14516_v59 = vpop.f32.mrf.mxu2  ;;  %v14522_v8 = vpop.f32.mrf.mxu3 }
 0x7aa   : > { %v6023_v40 = vsel %vm1857_vm1, %v14522_v8, -inf }
 0x7ab   : > { %6042 = vmax.xlane.f32.xlu2 %v6041_v32  ;;  %6009 = vmax.xlane.f32.xlu0 %v6008_v57  ;;  %v6020_v57 = vsel %vm1857_vm1, %v14516_v59, -inf  ;;  %v5983_v29 = vpop.xlane.xlu0 %5982  ;;  %v5968_v1 = vpop.xlane.xlu1 %5967 }
 0x7ac   : > { %6012 = vmax.xlane.f32.xlu1 %v6011_v11  ;;  %v6082_v11 = vmul.f32 1.442695, %v6050_v52  ;;  %v5980_v31 = vpop.xlane.xlu2 %5979  ;;  %v6059_v34 = vsub.f32 %v14374_v44, %v5983_v29  ;;  %v6054_v17 = vsub.f32 %v14356_v49, %v5968_v1 }
 0x7ad   : > { %v6058_v52 = vsub.f32 %v14372_v12, %v5980_v31 }
 0x7ae   : > { %11463 = vpow2.f32 %v6082_v11  ;;  %v6100_v41 = vmul.f32 1.442695, %v6059_v34  ;;  %v6090_v44 = vmul.f32 1.442695, %v6054_v17 }
 0x7af   : > { %11465 = vpow2.f32 %v6084_v27  ;;  %v6098_v27 = vmul.f32 1.442695, %v6058_v52 }
 0x7b0   : > { %11467 = vpow2.f32 %v6092_v46 }
 0x7b1   : > { %v14527_v42 = vpop.f32.mrf.mxu2  ;;  %v14533_v32 = vpop.f32.mrf.mxu3  ;;  %11469 = vpow2.f32 %v6100_v41 }
 0x7b2   : > { %v6035_v19 = vsel %vm1857_vm1, %v14533_v32, -inf  ;;  %11471 = vpow2.f32 %v6090_v44 }
 0x7b3   : > { %6024 = vmax.xlane.f32.xlu2 %v6023_v40  ;;  %6036 = vmax.xlane.f32.xlu0 %v6035_v19  ;;  %v6032_v40 = vsel %vm1857_vm1, %v14527_v42, -inf  ;;  %v5992_v49 = vpop.xlane.xlu0 %5991  ;;  %v5995_v19 = vpop.xlane.xlu1 %5994  ;;  %11473 = vpow2.f32 %v6098_v27 }
 0x7b4   : > { %6021 = vmax.xlane.f32.xlu1 %v6020_v57  ;;  %v14552_v11 = vpop.eup %11463  ;;  %v6062_v12 = vsub.f32 %v14388_v18, %v5992_v49  ;;  %v6063_v34 = vsub.f32 %v14390_v14, %v5995_v19 }
 0x7b5   : > { %v14554_v1 = vpop.eup %11465  ;;  %v6146_v31 = vsel %vm1857_vm1, %v14552_v11, 0.0 }
 0x7b6   : > { %v14556_v46 = vpop.eup %11467  ;;  %v6108_v18 = vmul.f32 1.442695, %v6063_v34 }
 0x7b7   : > { %v6161_v17 = vsel %vm1857_vm1, %v14556_v46, 0.0  ;;  %v14566_v52 = vpop.eup %11469 }
 0x7b8   : > { %v6173_v14 = vsel %vm1857_vm1, %v14566_v52, 0.0 }
 0x7b9   : > { %v14540_v21 = vpop.f32.mrf.mxu2  ;;  %v14548_v63 = vpop.f32.mrf.mxu3 }
 0x7ba   : > { %v6044_v57 = vsel %vm1857_vm1, %v14540_v21, -inf  ;;  %v6047_v29 = vsel %vm1857_vm1, %v14548_v63, -inf }
 0x7bb   : > { %6033 = vmax.xlane.f32.xlu2 %v6032_v40  ;;  %6045 = vmax.xlane.f32.xlu0 %v6044_v57  ;;  %v6149_v40 = vsel %vm1857_vm1, %v14554_v1, 0.0  ;;  %v6106_v57 = vmul.f32 1.442695, %v6062_v12  ;;  %v6004_v41 = vpop.xlane.xlu1 %6003 }
 0x7bc   : > { %6048 = vmax.xlane.f32.xlu1 %v6047_v29  ;;  %v14568_v29 = vpop.eup %11471  ;;  %v6066_v49 = vsub.f32 %v14402_v56, %v6004_v41 }
 0x7bd   : > { %v14570_v44 = vpop.eup %11473  ;;  %11475 = vpow2.f32 %v6106_v57  ;;  %v6158_v27 = vsel %vm1857_vm1, %v14568_v29, 0.0 }
 0x7be   : > { %11477 = vpow2.f32 %v6108_v18  ;;  %v6170_v19 = vsel %vm1857_vm1, %v14570_v44, 0.0 }
 0x7c3   : > { %6147 = vadd.xlane.f32.xlu2 %v6146_v31  ;;  %6150 = vadd.xlane.f32.xlu0 %v6149_v40  ;;  %v14579_v12 = vpop.eup %11475  ;;  %v6114_v31 = vmul.f32 1.442695, %v6066_v49 }
 0x7c4   : > { %6162 = vadd.xlane.f32.xlu1 %v6161_v17  ;;  %v14581_v34 = vpop.eup %11477  ;;  %v6182_v17 = vsel %vm1857_vm1, %v14579_v12, 0.0 }
 0x7c5   : > { %11479 = vpow2.f32 %v6114_v31  ;;  %v6185_v56 = vsel %vm1857_vm1, %v14581_v34, 0.0 }
 0x7cb   : > { %6174 = vadd.xlane.f32.xlu2 %v6173_v14  ;;  %6159 = vadd.xlane.f32.xlu0 %v6158_v27  ;;  %v14587_v40 = vpop.eup %11479 }
 0x7cc   : > { %6171 = vadd.xlane.f32.xlu1 %v6170_v19  ;;  %v6194_v57 = vsel %vm1857_vm1, %v14587_v40, 0.0 }
 0x7d3   : > { %6183 = vadd.xlane.f32.xlu2 %v6182_v17  ;;  %6186 = vadd.xlane.f32.xlu0 %v6185_v56 }
 0x7db   : > { %6195 = vadd.xlane.f32.xlu0 %v6194_v57 }
 0x7f6   : > { %v5962_v18 = vpop.xlane.xlu2 %5961  ;;  %v5965_v41 = vpop.xlane.xlu0 %5964 }
 0x7f7   : > { %v6052_v14 = vsub.f32 %v14444_v13, %v5962_v18  ;;  %v6053_v49 = vsub.f32 %v14446_v3, %v5965_v41 }
 0x7f9   : > { %v6086_v19 = vmul.f32 1.442695, %v6052_v14  ;;  %v6088_v27 = vmul.f32 1.442695, %v6053_v49 }
 0x7fb   : > { %11481 = vpow2.f32 %v6086_v19 }
 0x7fc   : > { %11483 = vpow2.f32 %v6088_v27 }
 0x7fe   : > { %v6007_v31 = vpop.xlane.xlu2 %6006  ;;  %v5974_v17 = vpop.xlane.xlu0 %5973 }
 0x7ff   : > { %v6067_v56 = vsub.f32 %v14452_v25, %v6007_v31  ;;  %v6056_v24 = vsub.f32 %v14456_v53, %v5974_v17  ;;  %v5977_v23 = vpop.xlane.xlu1 %5976 }
 0x800   : > { %v6057_v5 = vsub.f32 %v14458_v60, %v5977_v23 }
 0x801   : > { %v14596_v57 = vpop.eup %11481  ;;  %v6116_v38 = vmul.f32 1.442695, %v6067_v56  ;;  %v6094_v45 = vmul.f32 1.442695, %v6056_v24 }
 0x802   : > { %v14598_v13 = vpop.eup %11483  ;;  %v6096_v3 = vmul.f32 1.442695, %v6057_v5  ;;  %v6152_v18 = vsel %vm1857_vm1, %v14596_v57, 0.0 }
 0x803   : > { %11485 = vpow2.f32 %v6116_v38  ;;  %v6155_v41 = vsel %vm1857_vm1, %v14598_v13, 0.0  ;;  %6153 = vadd.xlane.f32.xlu1 %v6152_v18 }
 0x804   : > { %11487 = vpow2.f32 %v6094_v45  ;;  %6156 = vadd.xlane.f32.xlu2 %v6155_v41 }
 0x805   : > { %11489 = vpow2.f32 %v6096_v3 }
 0x806   : > { %v6016_v25 = vpop.xlane.xlu2 %6015  ;;  %v6019_v23 = vpop.xlane.xlu0 %6018 }
 0x807   : > { %v6070_v53 = vsub.f32 %v14466_v16, %v6016_v25  ;;  %v6071_v24 = vsub.f32 %v14468_v43, %v6019_v23  ;;  %v5986_v60 = vpop.xlane.xlu1 %5985 }
 0x808   : > { %v6060_v5 = vsub.f32 %v14472_v37, %v5986_v60 }
 0x809   : > { %v14607_v14 = vpop.eup %11485  ;;  %v6122_v49 = vmul.f32 1.442695, %v6070_v53  ;;  %v6124_v38 = vmul.f32 1.442695, %v6071_v24 }
 0x80a   : > { %v14609_v19 = vpop.eup %11487  ;;  %v6102_v27 = vmul.f32 1.442695, %v6060_v5  ;;  %v6197_v45 = vsel %vm1857_vm1, %v14607_v14, 0.0 }
 0x80b   : > { %v14613_v31 = vpop.eup %11489  ;;  %11491 = vpow2.f32 %v6122_v49  ;;  %v6164_v16 = vsel %vm1857_vm1, %v14609_v19, 0.0  ;;  %6198 = vadd.xlane.f32.xlu1 %v6197_v45 }
 0x80c   : > { %11493 = vpow2.f32 %v6124_v38  ;;  %6165 = vadd.xlane.f32.xlu2 %v6164_v16  ;;  %v6167_v43 = vsel %vm1857_vm1, %v14613_v31, 0.0 }
 0x80d   : > { %11495 = vpow2.f32 %v6102_v27  ;;  %6168 = vadd.xlane.f32.xlu0 %v6167_v43 }
 0x80e   : > { %v6028_v37 = vpop.xlane.xlu0 %6027  ;;  %v5989_v17 = vpop.xlane.xlu2 %5988 }
 0x80f   : > { %v6074_v56 = vsub.f32 %v14482_v54, %v6028_v37  ;;  %v6061_v3 = vsub.f32 %v14480_v7, %v5989_v17  ;;  %v6031_v18 = vpop.xlane.xlu1 %6030 }
 0x810   : > { %v6075_v41 = vsub.f32 %v14484_v48, %v6031_v18 }
 0x811   : > { %v14622_v25 = vpop.eup %11491  ;;  %v6130_v23 = vmul.f32 1.442695, %v6074_v56  ;;  %v6104_v53 = vmul.f32 1.442695, %v6061_v3 }
 0x812   : > { %v14624_v24 = vpop.eup %11493  ;;  %v6132_v60 = vmul.f32 1.442695, %v6075_v41  ;;  %v6206_v5 = vsel %vm1857_vm1, %v14622_v25, 0.0 }
 0x813   : > { %v14628_v49 = vpop.eup %11495  ;;  %11497 = vpow2.f32 %v6130_v23  ;;  %v6209_v54 = vsel %vm1857_vm1, %v14624_v24, 0.0  ;;  %6207 = vadd.xlane.f32.xlu1 %v6206_v5 }
 0x814   : > { %11499 = vpow2.f32 %v6104_v53  ;;  %6210 = vadd.xlane.f32.xlu2 %v6209_v54  ;;  %v6176_v48 = vsel %vm1857_vm1, %v14628_v49, 0.0 }
 0x815   : > { %11501 = vpow2.f32 %v6132_v60  ;;  %6177 = vadd.xlane.f32.xlu0 %v6176_v48 }
 0x816   : > { %v5998_v7 = vpop.xlane.xlu2 %5997  ;;  %v6001_v38 = vpop.xlane.xlu0 %6000 }
 0x817   : > { %v6064_v27 = vsub.f32 %v14486_v22, %v5998_v7  ;;  %v6065_v45 = vsub.f32 %v14494_v50, %v6001_v38  ;;  %v6040_v16 = vpop.xlane.xlu1 %6039 }
 0x818   : > { %v6078_v43 = vsub.f32 %v14498_v4, %v6040_v16 }
 0x819   : > { %v14637_v37 = vpop.eup %11497  ;;  %v6110_v17 = vmul.f32 1.442695, %v6064_v27  ;;  %v6112_v56 = vmul.f32 1.442695, %v6065_v45 }
 0x81a   : > { %v14639_v3 = vpop.eup %11499  ;;  %v6138_v18 = vmul.f32 1.442695, %v6078_v43  ;;  %v6218_v41 = vsel %vm1857_vm1, %v14637_v37, 0.0 }
 0x81b   : > { %v14643_v23 = vpop.eup %11501  ;;  %11503 = vpow2.f32 %v6110_v17  ;;  %v6179_v22 = vsel %vm1857_vm1, %v14639_v3, 0.0 }
 0x81c   : > { %11505 = vpow2.f32 %v6112_v56  ;;  %6219 = vadd.xlane.f32.xlu2 %v6218_v41  ;;  %6180 = vadd.xlane.f32.xlu1 %v6179_v22  ;;  %v6221_v50 = vsel %vm1857_vm1, %v14643_v23, 0.0 }
 0x81d   : > { %11507 = vpow2.f32 %v6138_v18  ;;  %6222 = vadd.xlane.f32.xlu0 %v6221_v50 }
 0x81e   : > { %v6043_v4 = vpop.xlane.xlu2 %6042  ;;  %v6010_v53 = vpop.xlane.xlu0 %6009 }
 0x81f   : > { %v6079_v60 = vsub.f32 %v14514_v9, %v6043_v4  ;;  %v6068_v5 = vsub.f32 %v14500_v30, %v6010_v53  ;;  %v6013_v54 = vpop.xlane.xlu1 %6012 }
 0x820   : > { %v6069_v48 = vsub.f32 %v14506_v58, %v6013_v54 }
 0x821   : > { %v14652_v7 = vpop.eup %11503  ;;  %v6140_v38 = vmul.f32 1.442695, %v6079_v60  ;;  %v6118_v27 = vmul.f32 1.442695, %v6068_v5 }
 0x822   : > { %v14654_v45 = vpop.eup %11505  ;;  %v6120_v16 = vmul.f32 1.442695, %v6069_v48  ;;  %v6188_v43 = vsel %vm1857_vm1, %v14652_v7, 0.0 }
 0x823   : > { %v14658_v17 = vpop.eup %11507  ;;  %11509 = vpow2.f32 %v6140_v38  ;;  %v6191_v9 = vsel %vm1857_vm1, %v14654_v45, 0.0 }
 0x824   : > { %11511 = vpow2.f32 %v6118_v27  ;;  %6192 = vadd.xlane.f32.xlu2 %v6191_v9  ;;  %6189 = vadd.xlane.f32.xlu1 %v6188_v43  ;;  %v6230_v58 = vsel %vm1857_vm1, %v14658_v17, 0.0 }
 0x825   : > { %11513 = vpow2.f32 %v6120_v16  ;;  %6231 = vadd.xlane.f32.xlu0 %v6230_v58 }
 0x826   : > { %v14664_v30 = vpop.xlane.xlu2 %6024  ;;  %v14666_v18 = vpop.xlane.xlu0 %6036 }
 0x827   : > { %v6022_v56 = vpop.xlane.xlu1 %6021 }
 0x828   : > { %v6072_v41 = vsub.f32 %v14516_v59, %v6022_v56 }
 0x829   : > { %v14669_v22 = vpop.eup %11509 }
 0x82a   : > { %v14671_v50 = vpop.eup %11511  ;;  %v6126_v4 = vmul.f32 1.442695, %v6072_v41  ;;  %v6233_v53 = vsel %vm1857_vm1, %v14669_v22, 0.0 }
 0x82b   : > { %v14675_v60 = vpop.eup %11513  ;;  %v6200_v5 = vsel %vm1857_vm1, %v14671_v50, 0.0 }
 0x82c   : > { %11515 = vpow2.f32 %v6126_v4  ;;  %6201 = vadd.xlane.f32.xlu2 %v6200_v5  ;;  %6234 = vadd.xlane.f32.xlu1 %v6233_v53  ;;  %v6203_v54 = vsel %vm1857_vm1, %v14675_v60, 0.0  ;;  %v16569_v53 = vld [vmem:[#allocation183_spill] sm:$0xff] }
 0x82d   : > { %6204 = vadd.xlane.f32.xlu0 %v6203_v54  ;;  %v10773_v5 = vunpack.i.l.bf16 %v16569_v53  ;;  %v10774_v0 = vunpack.i.h.bf16 %v16569_v53 }
 0x82e   : > { %v14681_v59 = vpop.xlane.xlu2 %6033  ;;  %v14683_v48 = vpop.xlane.xlu0 %6045 }
 0x82f   : > { %v14685_v38 = vpop.xlane.xlu1 %6048 }
 0x832   : > { %v14687_v27 = vpop.eup %11515 }
 0x833   : > { %v6212_v16 = vsel %vm1857_vm1, %v14687_v27, 0.0 }
 0x835   : > { %6213 = vadd.xlane.f32.xlu0 %v6212_v16 }
 0x836   : > { %v6148_v43 = vpop.xlane.xlu2 %6147  ;;  %v6151_v9 = vpop.xlane.xlu0 %6150 }
 0x837   : > { %11517 = vrcp.f32 %v6148_v43  ;;  %v6163_v58 = vpop.xlane.xlu1 %6162 }
 0x838   : > { %11519 = vrcp.f32 %v6151_v9 }
 0x839   : > { %11521 = vrcp.f32 %v6163_v58  ;;  %v16571_v58 = vld [vmem:[#allocation59_spill] sm:$0xff] }
 0x83d   : > { %v11518_v56 = vpop.eup %11517 }
 0x83e   : > { %v6274_v41 = vmul.f32 %v11518_v56, %v14552_v11  ;;  %v11520_v4 = vpop.eup %11519  ;;  %v6160_v55 = vpop.xlane.xlu0 %6159  ;;  %v16570_v11 = vld [vmem:[#allocation55_spill] sm:$0xff] }
 0x83f   : > { %v6275_v54 = vmul.f32 %v11520_v4, %v14554_v1  ;;  %v6175_v16 = vpop.xlane.xlu2 %6174  ;;  %11523 = vrcp.f32 %v6160_v55  ;;  %v6172_v43 = vpop.xlane.xlu1 %6171  ;;  %v16572_v55 = vld [vmem:[#allocation190_spill] sm:$0xff] }
 0x840   : > { %10464 = vmatmul.msk.f32.vlgmr.msra.gmra.mxu0 %vm1857_vm1, %v6274_v41  ;;  %v11522_v9 = vpop.eup %11521  ;;  %11525 = vrcp.f32 %v6175_v16  ;;  %v10794_v4 = vunpack.i.h.bf16 %v16572_v55  ;;  %v10793_v53 = vunpack.i.l.bf16 %v16572_v55  ;;  %v10858_v55 = vunpack.i.l.bf16 %v13777_v10 }
 0x841   : > { %6535 = vmatpush.msra.mxu0 %v10773_v5  ;;  %10465 = vmatmul.msk.f32.vlgmr.msrb.gmra.mxu1 %vm1857_vm1, %v6275_v54  ;;  %11527 = vrcp.f32 %v6172_v43  ;;  %v6279_v56 = vmul.f32 %v11522_v9, %v14556_v46  ;;  %v10848_v9 = vunpack.i.l.bf16 %v13771_v20 }
 0x842   : > { %6561 = vmatpush.msrb.mxu1 %v10774_v0  ;;  %v16573_v0 = vld [vmem:[#allocation4_spill] sm:$0xff] }
 0x844   : > { %7616 = vrot.lane.b32.xlu2 %v16570_v11, %s11729_s23  ;;  %v10849_v11 = vunpack.i.h.bf16 %v13771_v20  ;;  %v6077_v20 = vsub.f32 %v14533_v32, %v14666_v18  ;;  %v6080_v32 = vsub.f32 %v14540_v21, %v14683_v48 }
 0x845   : > { %7700 = vrot.lane.b32.xlu1 %v16571_v58, %s11729_s23  ;;  %v11524_v1 = vpop.eup %11523 }
 0x846   : > { %v6278_v41 = vmul.f32 %v11524_v1, %v14568_v29  ;;  %v6187_v5 = vpop.xlane.xlu0 %6186  ;;  %v11526_v16 = vpop.eup %11525  ;;  %v6142_v18 = vmul.f32 1.442695, %v6080_v32 }
 0x847   : > { %v6184_v54 = vpop.xlane.xlu2 %6183  ;;  %v11528_v43 = vpop.eup %11527  ;;  %v6283_v46 = vmul.f32 %v11526_v16, %v14566_v52 }
 0x848   : > { %10468 = vmatmul.msk.f32.vlgmr.msrb.gmra.mxu0 %vm1857_vm1, %v6278_v41  ;;  %11529 = vrcp.f32 %v6184_v54  ;;  %v6282_v29 = vmul.f32 %v11528_v43, %v14570_v44  ;;  %v10859_v44 = vunpack.i.h.bf16 %v13777_v10  ;;  %v6081_v10 = vsub.f32 %v14548_v63, %v14685_v38 }
 0x849   : > { %7586 = vrot.lane.b32.xlu0 %v16573_v0, %s11729_s23  ;;  %10469 = vmatmul.msk.f32.vlgmr.msra.gmra.mxu1 %vm1857_vm1, %v6279_v56  ;;  %11531 = vrcp.f32 %v6187_v5  ;;  %v10868_v0 = vunpack.i.l.bf16 %v13759_v62 }
 0x84a   : > { %6639 = vmatpush.msrb.mxu0 %v10793_v53  ;;  %6665 = vmatpush.msra.mxu1 %v10794_v4  ;;  %v6073_v53 = vsub.f32 %v14522_v8, %v14664_v30  ;;  %v6076_v8 = vsub.f32 %v14527_v42, %v14681_v59  ;;  %v6144_v30 = vmul.f32 1.442695, %v6081_v10  ;;  %v16575_v10 = vld [vmem:[#allocation10_spill] sm:$0xff] }
 0x84c   : > { %v6128_v5 = vmul.f32 1.442695, %v6073_v53  ;;  %v6134_v54 = vmul.f32 1.442695, %v6076_v8  ;;  %v10843_v8 = vunpack.i.l.bf16 %v13757_v15 }
 0x84e   : > { %v11530_v58 = vpop.eup %11529  ;;  %v6196_v1 = vpop.xlane.xlu0 %6195 }
 0x84f   : > { %v11532_v56 = vpop.eup %11531  ;;  %11533 = vrcp.f32 %v6196_v1  ;;  %v6286_v41 = vmul.f32 %v11530_v58, %v14579_v12  ;;  %v6136_v12 = vmul.f32 1.442695, %v6077_v20 }
 0x850   : > { %10472 = vmatmul.msk.f32.vlgmr.msra.gmra.mxu0 %vm1857_vm1, %v6282_v29  ;;  %v6287_v52 = vmul.f32 %v11532_v56, %v14581_v34 }
 0x851   : > { %10473 = vmatmul.msk.f32.vlgmr.msrb.gmra.mxu1 %vm1857_vm1, %v6283_v46  ;;  %6743 = vmatpush.msra.mxu0 %v10848_v9  ;;  %11535 = vpow2.f32 %v6136_v12 }
 0x852   : > { %6769 = vmatpush.msrb.mxu1 %v10849_v11  ;;  %11537 = vpow2.f32 %v6128_v5 }
 0x853   : > { %11539 = vpow2.f32 %v6144_v30 }
 0x854   : > { %11541 = vpow2.f32 %v6142_v18 }
 0x855   : > { %v11534_v4 = vpop.eup %11533  ;;  %11543 = vpow2.f32 %v6134_v54 }
 0x856   : > { %v6290_v34 = vmul.f32 %v11534_v4, %v14587_v40 }
 0x857   : > { %v14734_v40 = vpop.eup %11535 }
 0x858   : > { %10476 = vmatmul.msk.f32.vlgmr.msrb.gmra.mxu0 %vm1857_vm1, %v6286_v41  ;;  %v14736_v16 = vpop.eup %11537  ;;  %v6227_v63 = vsel %vm1857_vm1, %v14734_v40, 0.0  ;;  %v16574_v41 = vld [vmem:[#allocation185_spill] sm:$0xff] }
 0x859   : > { %10477 = vmatmul.msk.f32.vlgmr.msra.gmra.mxu1 %vm1857_vm1, %v6287_v52  ;;  %6847 = vmatpush.msrb.mxu0 %v10858_v55  ;;  %v6215_v21 = vsel %vm1857_vm1, %v14736_v16, 0.0  ;;  %v14742_v48 = vpop.eup %11539  ;;  %v10783_v52 = vunpack.i.l.bf16 %v16574_v41  ;;  %v10784_v20 = vunpack.i.h.bf16 %v16574_v41 }
 0x85a   : > { %6873 = vmatpush.msra.mxu1 %v10859_v44  ;;  %v14744_v42 = vpop.eup %11541  ;;  %v6239_v59 = vsel %vm1857_vm1, %v14742_v48, 0.0 }
 0x85b   : > { %v14748_v38 = vpop.eup %11543  ;;  %v6236_v43 = vsel %vm1857_vm1, %v14744_v42, 0.0 }
 0x85c   : > { %v6224_v46 = vsel %vm1857_vm1, %v14748_v38, 0.0 }
 0x860   : > { %10480 = vmatmul.msk.f32.vlgmr.msra.gmra.mxu0 %vm1857_vm1, %v6290_v34 }
 0x861   : > { %6951 = vmatpush.msra.mxu0 %v10868_v0 }
 0x86d   : > { %6228 = vadd.xlane.f32.xlu2 %v6227_v63 }
 0x86f   : > { %6216 = vadd.xlane.f32.xlu1 %v6215_v21  ;;  %v10878_v21 = vunpack.i.l.bf16 %v13811_v28 }
 0x873   : > { %6240 = vadd.xlane.f32.xlu0 %v6239_v59  ;;  %v16577_v59 = vld [vmem:[#allocation24_spill] sm:$0xff] }
 0x875   : > { %6237 = vadd.xlane.f32.xlu2 %v6236_v43 }
 0x876   : > { %v6154_v29 = vpop.xlane.xlu1 %6153 }
 0x877   : > { %v6157_v11 = vpop.xlane.xlu2 %6156  ;;  %6225 = vadd.xlane.f32.xlu1 %v6224_v46  ;;  %11545 = vrcp.f32 %v6154_v29  ;;  %v10879_v29 = vunpack.i.h.bf16 %v13811_v28  ;;  %v16579_v28 = vld [vmem:[#allocation9_spill] sm:$0xff] }
 0x878   : > { %11547 = vrcp.f32 %v6157_v11 }
 0x87d   : > { %v11546_v9 = vpop.eup %11545 }
 0x87e   : > { %v11548_v58 = vpop.eup %11547  ;;  %v6276_v1 = vmul.f32 %v11546_v9, %v14596_v57  ;;  %v6199_v56 = vpop.xlane.xlu1 %6198 }
 0x87f   : > { %v6277_v44 = vmul.f32 %v11548_v58, %v14598_v13  ;;  %v6166_v55 = vpop.xlane.xlu2 %6165  ;;  %11549 = vrcp.f32 %v6199_v56  ;;  %v10869_v13 = vunpack.i.h.bf16 %v13759_v62  ;;  %v16578_v58 = vld [vmem:[#allocation58_spill] sm:$0xff]  ;;  %v16580_v56 = vld [vmem:[#allocation68_spill] sm:$0xff] }
 0x880   : > { %11551 = vrcp.f32 %v6166_v55  ;;  %v6169_v4 = vpop.xlane.xlu0 %6168  ;;  %10466 = vmatmul.msk.f32.vlgmr.msrb.gmra.mxu2 %vm1857_vm1, %v6276_v1 }
 0x881   : > { %11553 = vrcp.f32 %v6169_v4  ;;  %10467 = vmatmul.msk.f32.vlgmr.msra.gmra.mxu3 %vm1857_vm1, %v6277_v44  ;;  %6587 = vmatpush.msrb.mxu2 %v10783_v52  ;;  %v16581_v4 = vld [vmem:[#allocation16_spill] sm:$0xff] }
 0x882   : > { %6613 = vmatpush.msra.mxu3 %v10784_v20 }
 0x885   : > { %v11550_v53 = vpop.eup %11549 }
 0x886   : > { %v11552_v57 = vpop.eup %11551  ;;  %v6291_v12 = vmul.f32 %v11550_v53, %v14607_v14  ;;  %v6208_v34 = vpop.xlane.xlu1 %6207  ;;  %v10844_v14 = vunpack.i.h.bf16 %v13757_v15 }
 0x887   : > { %v11554_v0 = vpop.eup %11553  ;;  %v6280_v5 = vmul.f32 %v11552_v57, %v14609_v19  ;;  %7614 = vrot.lane.b32.xlu0 %v16575_v10, %s11729_s23  ;;  %v6211_v32 = vpop.xlane.xlu2 %6210  ;;  %11555 = vrcp.f32 %v6208_v34  ;;  %v16576_v19 = vld [vmem:[#allocation56_spill] sm:$0xff] }
 0x888   : > { %v6281_v30 = vmul.f32 %v11554_v0, %v14613_v31  ;;  %11557 = vrcp.f32 %v6211_v32  ;;  %v6178_v18 = vpop.xlane.xlu0 %6177  ;;  %10481 = vmatmul.msk.f32.vlgmr.msrb.gmra.mxu1 %vm1857_vm1, %v6291_v12  ;;  %v10864_v32 = vunpack.i.h.bf16 %v13791_v2 }
 0x889   : > { %11559 = vrcp.f32 %v6178_v18  ;;  %10470 = vmatmul.msk.f32.vlgmr.msra.gmra.mxu2 %vm1857_vm1, %v6280_v5  ;;  %6977 = vmatpush.msrb.mxu1 %v10869_v13 }
 0x88a   : > { %10471 = vmatmul.msk.f32.vlgmr.msrb.gmra.mxu3 %vm1857_vm1, %v6281_v30  ;;  %6691 = vmatpush.msra.mxu2 %v10843_v8 }
 0x88b   : > { %6717 = vmatpush.msrb.mxu3 %v10844_v14 }
 0x88d   : > { %v11556_v62 = vpop.eup %11555  ;;  %7644 = vrot.lane.b32.xlu2 %v16576_v19, %s11729_s23  ;;  %v16587_v19 = vld [vmem:[#allocation14_spill] sm:$0xff] }
 0x88e   : > { %v11558_v54 = vpop.eup %11557  ;;  %v6294_v31 = vmul.f32 %v11556_v62, %v14622_v25  ;;  %v10853_v25 = vunpack.i.l.bf16 %v13743_v26 }
 0x88f   : > { %v11560_v63 = vpop.eup %11559  ;;  %v6295_v15 = vmul.f32 %v11558_v54, %v14624_v24  ;;  %7698 = vrot.lane.b32.xlu0 %v16577_v59, %s11729_s23  ;;  %v6220_v43 = vpop.xlane.xlu2 %6219  ;;  %v16596_v59 = vld [vmem:[#allocation44_spill] sm:$0xff] }
 0x890   : > { %v6181_v46 = vpop.xlane.xlu1 %6180  ;;  %v6284_v11 = vmul.f32 %v11560_v63, %v14628_v49  ;;  %11561 = vrcp.f32 %v6220_v43  ;;  %v6223_v9 = vpop.xlane.xlu0 %6222  ;;  %7672 = vrot.lane.b32.xlu1 %v16578_v58, %s11729_s23  ;;  %10484 = vmatmul.msk.f32.vlgmr.msrb.gmra.mxu0 %vm1857_vm1, %v6294_v31  ;;  %v10873_v31 = vunpack.i.l.bf16 %v13797_v6  ;;  %v10883_v63 = vunpack.i.l.bf16 %v13781_v33  ;;  %v16597_v43 = vld [vmem:[#allocation70_spill] sm:$0xff]  ;;  %v16601_v58 = vld [vmem:[#allocation201_spill] sm:$0xff] }
 0x891   : > { %11563 = vrcp.f32 %v6223_v9  ;;  %10485 = vmatmul.msk.f32.vlgmr.msra.gmra.mxu1 %vm1857_vm1, %v6295_v15  ;;  %7055 = vmatpush.msrb.mxu0 %v10878_v21  ;;  %v16591_v21 = vld [vmem:[#allocation62_spill] sm:$0xff]  ;;  %v16594_v15 = vld [vmem:[#allocation195_spill] sm:$0xff] }
 0x892   : > { %11565 = vrcp.f32 %v6181_v46  ;;  %10474 = vmatmul.msk.f32.vlgmr.msrb.gmra.mxu2 %vm1857_vm1, %v6284_v11  ;;  %7081 = vmatpush.msra.mxu1 %v10879_v29  ;;  %v16598_v46 = vld [vmem:[#allocation184_spill] sm:$0xff]  ;;  %v16599_v29 = vld [vmem:[#allocation137_spill] sm:$0xff] }
 0x893   : > { %6795 = vmatpush.msrb.mxu2 %v10853_v25  ;;  %v16600_v11 = vld [vmem:[#allocation161_spill] sm:$0xff]  ;;  %v16602_v25 = vld [vmem:[#allocation7_spill] sm:$0xff] }
 0x895   : > { %7642 = vrot.lane.b32.xlu2 %v16579_v28, %s11729_s23 }
 0x896   : > { %v11562_v24 = vpop.eup %11561 }
 0x897   : > { %v11564_v49 = vpop.eup %11563  ;;  %v6298_v1 = vmul.f32 %v11562_v24, %v14637_v37  ;;  %7812 = vrot.lane.b32.xlu0 %v16580_v56, %s11729_s23  ;;  %v6193_v41 = vpop.xlane.xlu2 %6192  ;;  %v10854_v37 = vunpack.i.h.bf16 %v13743_v26  ;;  %v16583_v26 = vld [vmem:[#allocation82_spill] sm:$0xff]  ;;  %v16605_v56 = vld [vmem:[#allocation97_spill] sm:$0xff] }
 0x898   : > { %v6190_v52 = vpop.xlane.xlu1 %6189  ;;  %v11566_v44 = vpop.eup %11565  ;;  %v6299_v55 = vmul.f32 %v11564_v49, %v14643_v23  ;;  %11567 = vrcp.f32 %v6193_v41  ;;  %7670 = vrot.lane.b32.xlu1 %v16581_v4, %s11729_s23  ;;  %v16582_v23 = vld [vmem:[#allocation35_spill] sm:$0xff]  ;;  %v16603_v24 = vld [vmem:[#allocation78_spill] sm:$0xff]  ;;  %v16604_v49 = vld [vmem:[#allocation5_spill] sm:$0xff] }
 0x899   : > { %v6232_v20 = vpop.xlane.xlu0 %6231  ;;  %v6285_v53 = vmul.f32 %v11566_v44, %v14639_v3  ;;  %10488 = vmatmul.msk.f32.vlgmr.msra.gmra.mxu0 %vm1857_vm1, %v6298_v1  ;;  %v16607_v44 = vld [vmem:[#allocation17_spill] sm:$0xff] }
 0x89a   : > { %11569 = vrcp.f32 %v6232_v20  ;;  %10489 = vmatmul.msk.f32.vlgmr.msrb.gmra.mxu1 %vm1857_vm1, %v6299_v55  ;;  %10496 = vmatpush.xpose.msk.msra.mxu0 %vm1024_vm0, %v13815_v39  ;;  %v16608_v20 = vld [vmem:[#allocation88_spill] sm:$0xff] }
 0x89b   : > { %11571 = vrcp.f32 %v6190_v52  ;;  %10475 = vmatmul.msk.f32.vlgmr.msra.gmra.mxu3 %vm1857_vm1, %v6285_v53  ;;  %10498 = vmatpush.xpose.msk.msrb.mxu1 %vm1024_vm0, %v13831_v51  ;;  %v16584_v51 = vld [vmem:[#allocation60_spill] sm:$0xff]  ;;  %v16606_v52 = vld [vmem:[#allocation115_spill] sm:$0xff]  ;;  %v16609_v53 = vld [vmem:[#allocation85_spill] sm:$0xff] }
 0x89c   : > { %6821 = vmatpush.msra.mxu3 %v10854_v37 }
 0x89d   : > { %7810 = vrot.lane.b32.xlu2 %v16582_v23, %s11729_s23  ;;  %v16610_v23 = vld [vmem:[#allocation142_spill] sm:$0xff] }
 0x89e   : > { %v11568_v3 = vpop.eup %11567 }
 0x89f   : > { %v6289_v12 = vmul.f32 %v11568_v3, %v14654_v45  ;;  %7924 = vrot.lane.b32.xlu0 %v16583_v26, %s11729_s23  ;;  %v6202_v34 = vpop.xlane.xlu2 %6201  ;;  %v10863_v45 = vunpack.i.l.bf16 %v13791_v2  ;;  %v16586_v2 = vld [vmem:[#allocation61_spill] sm:$0xff]  ;;  %v16611_v3 = vld [vmem:[#allocation20_spill] sm:$0xff] }
 0x8a0   : > { %v11570_v57 = vpop.eup %11569  ;;  %v6235_v0 = vpop.xlane.xlu1 %6234  ;;  %11573 = vrcp.f32 %v6202_v34  ;;  %7728 = vrot.lane.b32.xlu1 %v16584_v51, %s11729_s23  ;;  %v16619_v51 = vld [vmem:[#allocation112_spill] sm:$0xff] }
 0x8a1   : > { %v11572_v13 = vpop.eup %11571  ;;  %v6302_v39 = vmul.f32 %v11570_v57, %v14658_v17  ;;  %v6205_v5 = vpop.xlane.xlu0 %6204  ;;  %v16585_v17 = vld [vmem:[#allocation26_spill] sm:$0xff]  ;;  %v16612_v57 = vld [vmem:[#allocation48_spill] sm:$0xff] }
 0x8a2   : > { %v6288_v10 = vmul.f32 %v11572_v13, %v14652_v7  ;;  %11575 = vrcp.f32 %v6205_v5  ;;  %v16616_v13 = vld [vmem:[#allocation65_spill] sm:$0xff]  ;;  %v16618_v5 = vld [vmem:[#allocation32_spill] sm:$0xff] }
 0x8a3   : > { %11577 = vrcp.f32 %v6235_v0  ;;  %10492 = vmatmul.msk.f32.vlgmr.msrb.gmra.mxu0 %vm1857_vm1, %v6302_v39  ;;  %10479 = vmatmul.msk.f32.vlgmr.msrb.gmra.mxu3 %vm1857_vm1, %v6289_v12  ;;  %v16615_v0 = vld [vmem:[#allocation91_spill] sm:$0xff] }
 0x8a4   : > { %10478 = vmatmul.msk.f32.vlgmr.msra.gmra.mxu2 %vm1857_vm1, %v6288_v10  ;;  %6925 = vmatpush.msrb.mxu3 %v10864_v32  ;;  %v16617_v39 = vld [vmem:[#allocation51_spill] sm:$0xff]  ;;  %v16620_v10 = vld [vmem:[#allocation205_spill] sm:$0xff] }
 0x8a5   : > { %6899 = vmatpush.msra.mxu2 %v10863_v45  ;;  %10504 = vmatpush.xpose.msk.msrb.mxu0 %vm1024_vm0, %v13845_v35  ;;  %v10874_v35 = vunpack.i.h.bf16 %v13797_v6  ;;  %v10940_v32 = vpack.i.bf16 %v16620_v10, %v16619_v51  ;;  %v16621_v45 = vld [vmem:[#allocation53_spill] sm:$0xff] }
 0x8a6   : > { %7726 = vrot.lane.b32.xlu2 %v16585_v17, %s11729_s23  ;;  %v11574_v7 = vpop.eup %11573 }
 0x8a7   : > { %v6292_v30 = vmul.f32 %v11574_v7, %v14671_v50  ;;  %7756 = vrot.lane.b32.xlu0 %v16586_v2, %s11729_s23  ;;  %v7617_v41 = vpop.permute.xlu2 %7616  ;;  %v16622_v7 = vld [vmem:[#allocation46_spill] sm:$0xff] }
 0x8a8   : > { %v11576_v8 = vpop.eup %11575  ;;  %7922 = vrot.lane.b32.xlu1 %v16587_v19, %s11729_s23  ;;  %v16624_v2 = vld [vmem:[#allocation74_spill] sm:$0xff] }
 0x8a9   : > { %v11578_v18 = vpop.eup %11577  ;;  %v6293_v14 = vmul.f32 %v11576_v8, %v14675_v60  ;;  %v6214_v62 = vpop.xlane.xlu0 %6213  ;;  %v16590_v60 = vld [vmem:[#allocation34_spill] sm:$0xff] }
 0x8aa   : > { %v6303_v54 = vmul.f32 %v11578_v18, %v14669_v22  ;;  %11579 = vrcp.f32 %v6214_v62  ;;  %v16588_v22 = vld [vmem:[#allocation63_spill] sm:$0xff] }
 0x8ab   : > { %10497 = vmatmul.msk.f32.vlgmr.msra.gmra.mxu0 %vm1024_vm0, %v13807_v61  ;;  %10483 = vmatmul.msk.f32.vlgmr.msra.gmra.mxu3 %vm1857_vm1, %v6293_v14  ;;  %v16589_v61 = vld [vmem:[#allocation39_spill] sm:$0xff]  ;;  %v16625_v14 = vld [vmem:[#allocation57_spill] sm:$0xff] }
 0x8ac   : > { %10482 = vmatmul.msk.f32.vlgmr.msrb.gmra.mxu2 %vm1857_vm1, %v6292_v30  ;;  %7029 = vmatpush.msra.mxu3 %v10874_v35  ;;  %v16623_v30 = vld [vmem:[#allocation155_spill] sm:$0xff]  ;;  %v10884_v35 = vunpack.i.h.bf16 %v13781_v33 }
 0x8ad   : > { %7003 = vmatpush.msrb.mxu2 %v10873_v31  ;;  %10493 = vmatmul.msk.f32.vlgmr.msra.gmra.mxu1 %vm1857_vm1, %v6303_v54  ;;  %v16626_v31 = vld [vmem:[#allocation130_spill] sm:$0xff] }
 0x8ae   : > { %10512 = vmatpush.xpose.msk.msra.mxu0 %vm1024_vm0, %v13907_v36  ;;  %10506 = vmatpush.xpose.msk.msra.mxu1 %vm1024_vm0, %v13877_v47  ;;  %v16592_v36 = vld [vmem:[#allocation108_spill] sm:$0xff]  ;;  %v16593_v47 = vld [vmem:[#allocation158_spill] sm:$0xff] }
 0x8af   : > { %7784 = vrot.lane.b32.xlu2 %v16588_v22, %s11729_s23  ;;  %7782 = vrot.lane.b32.xlu0 %v16589_v61, %s11729_s23  ;;  %v16627_v22 = vld [vmem:[#allocation89_spill] sm:$0xff] }
 0x8b0   : > { %v11580_v6 = vpop.eup %11579  ;;  %7754 = vrot.lane.b32.xlu1 %v16590_v60, %s11729_s23  ;;  %v16628_v60 = vld [vmem:[#allocation107_spill] sm:$0xff] }
 0x8b1   : > { %v6296_v50 = vmul.f32 %v11580_v6, %v14687_v27  ;;  %v16595_v27 = vld [vmem:[#allocation73_spill] sm:$0xff]  ;;  %v10955_v6 = vpack.i.bf16 %v16627_v22, %v16626_v31  ;;  %v16653_v31 = vld [vmem:[#allocation122_spill] sm:$0xff]  ;;  %v16654_v22 = vld [vmem:[#allocation96_spill] sm:$0xff] }
 0x8b3   : > { %10505 = vmatmul.msk.f32.vlgmr.msrb.gmra.mxu0 %vm1024_vm0, %v16591_v21 }
 0x8b4   : > { %10486 = vmatmul.msk.f32.vlgmr.msra.gmra.mxu2 %vm1857_vm1, %v6296_v50  ;;  %10520 = vmatpush.xpose.msk.msrb.mxu0 %vm1024_vm0, %v16592_v36 }
 0x8b5   : > { %7107 = vmatpush.msra.mxu2 %v10883_v63  ;;  %10499 = vmatmul.msk.f32.vlgmr.msrb.gmra.mxu1 %vm1024_vm0, %v16593_v47  ;;  %v16630_v47 = vld [vmem:[#allocation188_spill] sm:$0xff] }
 0x8b6   : > { %10514 = vmatpush.xpose.msk.msrb.mxu1 %vm1024_vm0, %v16594_v15  ;;  %v16631_v15 = vld [vmem:[#allocation94_spill] sm:$0xff] }
 0x8b7   : > { %7868 = vrot.lane.b32.xlu2 %v16595_v27, %s11729_s23  ;;  %7838 = vrot.lane.b32.xlu0 %v16596_v59, %s11729_s23  ;;  %v7701_v1 = vpop.permute.xlu1 %7700  ;;  %v10945_v27 = vpack.i.bf16 %v16631_v15, %v16630_v47  ;;  %v16632_v59 = vld [vmem:[#allocation93_spill] sm:$0xff] }
 0x8b8   : > { %7840 = vrot.lane.b32.xlu1 %v16597_v43, %s11729_s23  ;;  %v16633_v43 = vld [vmem:[#allocation169_spill] sm:$0xff] }
 0x8bb   : > { %10513 = vmatmul.msk.f32.vlgmr.msra.gmra.mxu0 %vm1024_vm0, %v16598_v46  ;;  %v7587_v37 = vpop.permute.xlu0 %7586 }
 0x8bc   : > { %10528 = vmatpush.xpose.msk.msra.mxu0 %vm1024_vm0, %v16599_v29 }
 0x8bd   : > { %10507 = vmatmul.msk.f32.vlgmr.msra.gmra.mxu1 %vm1024_vm0, %v16600_v11  ;;  %v14868_v9 = vpop.f32.mrf.mxu0 }
 0x8be   : > { %10522 = vmatpush.xpose.msk.msra.mxu1 %vm1024_vm0, %v16601_v58  ;;  %v14874_v28 = vpop.f32.mrf.mxu1 }
 0x8bf   : > { %7894 = vrot.lane.b32.xlu2 %v16602_v25, %s11729_s23  ;;  %7896 = vrot.lane.b32.xlu0 %v16603_v24, %s11729_s23  ;;  %v10960_v51 = vpack.i.bf16 %v14874_v28, %v14868_v9  ;;  %v16649_v9 = vld [vmem:[#allocation186_spill] sm:$0xff]  ;;  %v16650_v28 = vld [vmem:[#allocation123_spill] sm:$0xff] }
 0x8c0   : > { %7866 = vrot.lane.b32.xlu1 %v16604_v49, %s11729_s23 }
 0x8c3   : > { %10521 = vmatmul.msk.f32.vlgmr.msrb.gmra.mxu0 %vm1024_vm0, %v16605_v56  ;;  %v16638_v56 = vld [vmem:[#allocation178_spill] sm:$0xff] }
 0x8c4   : > { %10536 = vmatpush.xpose.msk.msrb.mxu0 %vm1024_vm0, %v7701_v1  ;;  %v16637_v1 = vld [vmem:[#allocation79_spill] sm:$0xff] }
 0x8c5   : > { %10515 = vmatmul.msk.f32.vlgmr.msrb.gmra.mxu1 %vm1024_vm0, %v16606_v52  ;;  %v14888_v55 = vpop.f32.mrf.mxu0 }
 0x8c6   : > { %10530 = vmatpush.xpose.msk.msrb.mxu1 %vm1024_vm0, %v7617_v41  ;;  %v14892_v4 = vpop.f32.mrf.mxu1  ;;  %v16639_v41 = vld [vmem:[#allocation111_spill] sm:$0xff] }
 0x8c7   : > { %7950 = vrot.lane.b32.xlu2 %v16607_v44, %s11729_s23  ;;  %7980 = vrot.lane.b32.xlu0 %v16608_v20, %s11729_s23 }
 0x8c8   : > { %7952 = vrot.lane.b32.xlu1 %v16609_v53, %s11729_s23 }
 0x8cb   : > { %10529 = vmatmul.msk.f32.vlgmr.msra.gmra.mxu0 %vm1024_vm0, %v7587_v37 }
 0x8cd   : > { %10523 = vmatmul.msk.f32.vlgmr.msra.gmra.mxu1 %vm1024_vm0, %v16610_v23  ;;  %v14903_v12 = vpop.f32.mrf.mxu0  ;;  %v16641_v23 = vld [vmem:[#allocation179_spill] sm:$0xff] }
 0x8ce   : > { %16613 = vst [vmem:[#allocation98_spill] sm:$0xff] %v14903_v12  ;;  %v14905_v26 = vpop.f32.mrf.mxu1 }
 0x8cf   : > { %7978 = vrot.lane.b32.xlu2 %v16611_v3, %s11729_s23  ;;  %10886 = vrot.lane.b32.xlu0 %v16612_v57, %s11729_s23  ;;  %16614 = vst [vmem:[#allocation240_spill] sm:$0xff] %v14905_v26  ;;  %v16642_v3 = vld [vmem:[#allocation67_spill] sm:$0xff] }
 0x8d0   : > { %8008 = vrot.lane.b32.xlu1 %v16615_v0, %s11729_s23 }
 0x8d5   : > { %v14960_v24 = vpop.f32.mrf.mxu0 }
 0x8d6   : > { %16635 = vst [vmem:[#allocation102_spill] sm:$0xff] %v14960_v24  ;;  %v14964_v49 = vpop.f32.mrf.mxu1 }
 0x8d7   : > { %10916 = vrot.lane.b32.xlu2 %v16616_v13, %s11729_s23  ;;  %10891 = vrot.lane.b32.xlu0 %v16617_v39, %s11729_s23  ;;  %16636 = vst [vmem:[#allocation76_spill] sm:$0xff] %v14964_v49  ;;  %v16644_v13 = vld [vmem:[#allocation170_spill] sm:$0xff] }
 0x8d8   : > { %8006 = vrot.lane.b32.xlu1 %v16618_v5, %s11729_s23  ;;  %v16645_v39 = vld [vmem:[#allocation174_spill] sm:$0xff] }
 0x8dd   : > { %v14982_v57 = vpop.f32.mrf.mxu0 }
 0x8de   : > { %16643 = vst [vmem:[#allocation127_spill] sm:$0xff] %v14982_v57 }
 0x8df   : > { %10941 = vrot.lane.b32.xlu2 %v10940_v32, %s11729_s23  ;;  %10906 = vrot.lane.b32.xlu0 %v16621_v45, %s11729_s23 }
 0x8e0   : > { %v6229_v17 = vpop.xlane.xlu2 %6228  ;;  %10896 = vrot.lane.b32.xlu1 %v16622_v7, %s11729_s23 }
 0x8e2   : > { %v6217_v8 = vpop.xlane.xlu1 %6216 }
 0x8e3   : > { %11581 = vrcp.f32 %v6217_v8  ;;  %v16647_v8 = vld [vmem:[#allocation177_spill] sm:$0xff] }
 0x8e4   : > { %11583 = vrcp.f32 %v6229_v17 }
 0x8e6   : > { %v6241_v61 = vpop.xlane.xlu0 %6240 }
 0x8e7   : > { %10951 = vrot.lane.b32.xlu2 %v16623_v30, %s11729_s23  ;;  %10921 = vrot.lane.b32.xlu0 %v16624_v2, %s11729_s23  ;;  %v16648_v30 = vld [vmem:[#allocation109_spill] sm:$0xff] }
 0x8e8   : > { %v6238_v18 = vpop.xlane.xlu2 %6237  ;;  %10901 = vrot.lane.b32.xlu1 %v16625_v14, %s11729_s23 }
 0x8e9   : > { %v11582_v62 = vpop.eup %11581 }
 0x8ea   : > { %v6297_v19 = vmul.f32 %v11582_v62, %v14736_v16  ;;  %v6226_v54 = vpop.xlane.xlu1 %6225  ;;  %v11584_v50 = vpop.eup %11583  ;;  %v16629_v16 = vld [vmem:[#allocation64_spill] sm:$0xff] }
 0x8eb   : > { %11585 = vrcp.f32 %v6226_v54  ;;  %v6301_v21 = vmul.f32 %v11584_v50, %v14734_v40 }
 0x8ec   : > { %10487 = vmatmul.msk.f32.vlgmr.msrb.gmra.mxu3 %vm1857_vm1, %v6297_v19  ;;  %11587 = vrcp.f32 %v6241_v61 }
 0x8ed   : > { %7133 = vmatpush.msrb.mxu3 %v10884_v35  ;;  %11589 = vrcp.f32 %v6238_v18 }
 0x8ef   : > { %10956 = vrot.lane.b32.xlu2 %v10955_v6, %s11729_s23  ;;  %10936 = vrot.lane.b32.xlu0 %v16628_v60, %s11729_s23 }
 0x8f0   : > { %v14938_v63 = vpop.permute.xlu2 %7644  ;;  %10911 = vrot.lane.b32.xlu1 %v16629_v16, %s11729_s23 }
 0x8f1   : > { %v11586_v33 = vpop.eup %11585 }
 0x8f2   : > { %v6300_v36 = vmul.f32 %v11586_v33, %v14748_v38  ;;  %v11588_v46 = vpop.eup %11587  ;;  %v16634_v38 = vld [vmem:[#allocation104_spill] sm:$0xff]  ;;  %v16657_v33 = vld [vmem:[#allocation163_spill] sm:$0xff] }
 0x8f3   : > { %v11590_v29 = vpop.eup %11589  ;;  %v6305_v58 = vmul.f32 %v11588_v46, %v14742_v48  ;;  %v16640_v48 = vld [vmem:[#allocation160_spill] sm:$0xff] }
 0x8f4   : > { %10490 = vmatmul.msk.f32.vlgmr.msrb.gmra.mxu2 %vm1857_vm1, %v6300_v36  ;;  %10491 = vmatmul.msk.f32.vlgmr.msra.gmra.mxu3 %vm1857_vm1, %v6301_v21  ;;  %v6304_v25 = vmul.f32 %v11590_v29, %v14744_v42  ;;  %v10930_v52 = vpack.i.bf16 %v16640_v48, %v16639_v41  ;;  %v16658_v21 = vld [vmem:[#allocation218_spill] sm:$0xff] }
 0x8f5   : > { %10500 = vmatpush.xpose.msk.msrb.mxu2 %vm1024_vm0, %v16632_v59  ;;  %10502 = vmatpush.xpose.msk.msra.mxu3 %vm1024_vm0, %v16633_v43 }
 0x8f7   : > { %10946 = vrot.lane.b32.xlu0 %v10945_v27, %s11729_s23 }
 0x8f8   : > { %v14953_v40 = vpop.permute.xlu2 %7642  ;;  %10926 = vrot.lane.b32.xlu1 %v16634_v38, %s11729_s23 }
 0x8f9   : > { %v7615_v11 = vpop.permute.xlu0 %7614 }
 0x8fa   : > { %10531 = vmatmul.msk.f32.vlgmr.msrb.gmra.mxu1 %vm1024_vm0, %v7615_v11 }
 0x8fc   : > { %10494 = vmatmul.msk.f32.vlgmr.msra.gmra.mxu2 %vm1857_vm1, %v6304_v25  ;;  %10495 = vmatmul.msk.f32.vlgmr.msrb.gmra.mxu3 %vm1857_vm1, %v6305_v58 }
 0x8fd   : > { %10508 = vmatpush.xpose.msk.msra.mxu2 %vm1024_vm0, %v16637_v1  ;;  %10510 = vmatpush.xpose.msk.msrb.mxu3 %vm1024_vm0, %v16638_v56 }
 0x900   : > { %v7811_v42 = vpop.permute.xlu2 %7810  ;;  %10931 = vrot.lane.b32.xlu1 %v10930_v52, %s11729_s23 }
 0x901   : > { %v7699_v44 = vpop.permute.xlu0 %7698 }
 0x902   : > { %10537 = vmatmul.msk.f32.vlgmr.msrb.gmra.mxu0 %vm1024_vm0, %v7699_v44  ;;  %v7673_v20 = vpop.permute.xlu1 %7672 }
 0x903   : > { %v14974_v53 = vpop.f32.mrf.mxu2 }
 0x904   : > { %v14976_v37 = vpop.f32.mrf.mxu3  ;;  %10501 = vmatmul.msk.f32.vlgmr.msrb.gmra.mxu2 %vm1024_vm0, %v16641_v23  ;;  %10503 = vmatmul.msk.f32.vlgmr.msra.gmra.mxu3 %vm1024_vm0, %v16642_v3 }
 0x905   : > { %10516 = vmatpush.xpose.msk.msrb.mxu2 %vm1024_vm0, %v16644_v13  ;;  %10518 = vmatpush.xpose.msk.msra.mxu3 %vm1024_vm0, %v16645_v39  ;;  %v14990_v5 = vpop.f32.mrf.mxu1 }
 0x906   : > { %16646 = vst [vmem:[#allocation22_spill] sm:$0xff] %v14990_v5 }
 0x908   : > { %10961 = vrot.lane.b32.xlu1 %v10960_v51, %s11728_s24  ;;  %v7727_v32 = vpop.permute.xlu2 %7726 }
 0x909   : > { %v7813_v45 = vpop.permute.xlu0 %7812 }
 0x90a   : > { %10544 = vmatpush.xpose.msk.msra.mxu0 %vm1024_vm0, %v7813_v45  ;;  %v7671_v17 = vpop.permute.xlu1 %7670 }
 0x90c   : > { %v14998_v7 = vpop.f32.mrf.mxu2  ;;  %10509 = vmatmul.msk.f32.vlgmr.msra.gmra.mxu2 %vm1024_vm0, %v16647_v8  ;;  %10511 = vmatmul.msk.f32.vlgmr.msrb.gmra.mxu3 %vm1024_vm0, %v16648_v30 }
 0x90d   : > { %v15004_v2 = vpop.f32.mrf.mxu3  ;;  %10524 = vmatpush.xpose.msk.msra.mxu2 %vm1024_vm0, %v16649_v9  ;;  %10526 = vmatpush.xpose.msk.msrb.mxu3 %vm1024_vm0, %v16650_v28  ;;  %v15010_v18 = vpop.f32.mrf.mxu0 }
 0x90e   : > { %16651 = vst [vmem:[#allocation45_spill] sm:$0xff] %v15010_v18  ;;  %10545 = vmatmul.msk.f32.vlgmr.msra.gmra.mxu0 %vm1024_vm0, %v7811_v42  ;;  %v15015_v62 = vpop.f32.mrf.mxu1 }
 0x90f   : > { %16652 = vst [vmem:[#allocation49_spill] sm:$0xff] %v15015_v62 }
 0x910   : > { %v7785_v35 = vpop.permute.xlu2 %7784 }
 0x911   : > { %v7925_v19 = vpop.permute.xlu0 %7924 }
 0x912   : > { %10552 = vmatpush.xpose.msk.msrb.mxu0 %vm1024_vm0, %v7925_v19  ;;  %v7729_v54 = vpop.permute.xlu1 %7728 }
 0x913   : > { %10538 = vmatpush.xpose.msk.msra.mxu1 %vm1024_vm0, %v7729_v54 }
 0x914   : > { %10517 = vmatmul.msk.f32.vlgmr.msrb.gmra.mxu2 %vm1024_vm0, %v16653_v31  ;;  %10519 = vmatmul.msk.f32.vlgmr.msra.gmra.mxu3 %vm1024_vm0, %v16654_v22 }
 0x915   : > { %10532 = vmatpush.xpose.msk.msrb.mxu2 %vm1024_vm0, %v14938_v63  ;;  %10534 = vmatpush.xpose.msk.msra.mxu3 %vm1024_vm0, %v7673_v20  ;;  %v15040_v36 = vpop.f32.mrf.mxu2 }
 0x916   : > { %v15026_v6 = vpop.f32.mrf.mxu0  ;;  %10539 = vmatmul.msk.f32.vlgmr.msra.gmra.mxu1 %vm1024_vm0, %v7727_v32  ;;  %16659 = vst [vmem:[#allocation50_spill] sm:$0xff] %v15040_v36 }
 0x917   : > { %16655 = vst [vmem:[#allocation29_spill] sm:$0xff] %v15026_v6  ;;  %v15029_v61 = vpop.f32.mrf.mxu1 }
 0x918   : > { %16656 = vst [vmem:[#allocation47_spill] sm:$0xff] %v15029_v61  ;;  %v7869_v63 = vpop.permute.xlu2 %7868 }
 0x919   : > { %v7757_v60 = vpop.permute.xlu0 %7756 }
 0x91a   : > { %v7923_v16 = vpop.permute.xlu1 %7922 }
 0x91b   : > { %10553 = vmatmul.msk.f32.vlgmr.msrb.gmra.mxu0 %vm1024_vm0, %v7923_v16 }
 0x91c   : > { %10525 = vmatmul.msk.f32.vlgmr.msra.gmra.mxu2 %vm1024_vm0, %v16657_v33  ;;  %10527 = vmatmul.msk.f32.vlgmr.msrb.gmra.mxu3 %vm1024_vm0, %v16658_v21 }
 0x91d   : > { %10540 = vmatpush.xpose.msk.msra.mxu2 %vm1024_vm0, %v7757_v60  ;;  %10542 = vmatpush.xpose.msk.msrb.mxu3 %vm1024_vm0, %v7785_v35 }
 0x91e   : > { %v15042_v47 = vpop.f32.mrf.mxu3 }
 0x91f   : > { %16660 = vst [vmem:[#allocation30_spill] sm:$0xff] %v15042_v47 }
 0x920   : > { %v15046_v27 = vpop.f32.mrf.mxu0  ;;  %v7895_v38 = vpop.permute.xlu2 %7894 }
 0x921   : > { %16661 = vst [vmem:[#allocation37_spill] sm:$0xff] %v15046_v27  ;;  %v7783_v59 = vpop.permute.xlu0 %7782 }
 0x922   : > { %v7755_v43 = vpop.permute.xlu1 %7754 }
 0x924   : > { %10533 = vmatmul.msk.f32.vlgmr.msrb.gmra.mxu2 %vm1024_vm0, %v14953_v40  ;;  %10535 = vmatmul.msk.f32.vlgmr.msra.gmra.mxu3 %vm1024_vm0, %v7671_v17 }
 0x925   : > { %10548 = vmatpush.xpose.msk.msrb.mxu2 %vm1024_vm0, %v7869_v63 }
 0x926   : > { %v15054_v29 = vpop.f32.mrf.mxu3 }
 0x927   : > { %v15052_v46 = vpop.f32.mrf.mxu2  ;;  %16663 = vst [vmem:[#allocation41_spill] sm:$0xff] %v15054_v29 }
 0x928   : > { %16662 = vst [vmem:[#allocation176_spill] sm:$0xff] %v15052_v46  ;;  %v15058_v58 = vpop.f32.mrf.mxu0  ;;  %v7951_v20 = vpop.permute.xlu2 %7950 }
 0x929   : > { %v8034_v25 = vsel %vm1857_vm1, %v15058_v58, -inf  ;;  %v7839_v1 = vpop.permute.xlu0 %7838 }
 0x92a   : > { %8035 = vmax.xlane.f32.xlu2 %v8034_v25  ;;  %v15062_v40 = vpop.f32.mrf.mxu1  ;;  %v7841_v56 = vpop.permute.xlu1 %7840 }
 0x92b   : > { %16664 = vst [vmem:[#allocation52_spill] sm:$0xff] %v15062_v40  ;;  %10546 = vmatpush.xpose.msk.msrb.mxu1 %vm1024_vm0, %v7841_v56 }
 0x92c   : > { %10541 = vmatmul.msk.f32.vlgmr.msra.gmra.mxu2 %vm1024_vm0, %v7755_v43  ;;  %10543 = vmatmul.msk.f32.vlgmr.msrb.gmra.mxu3 %vm1024_vm0, %v7783_v59 }
 0x92e   : > { %v15069_v48 = vpop.f32.mrf.mxu3  ;;  %10547 = vmatmul.msk.f32.vlgmr.msrb.gmra.mxu1 %vm1024_vm0, %v7839_v1 }
 0x92f   : > { %v15067_v41 = vpop.f32.mrf.mxu2  ;;  %16666 = vst [vmem:[#allocation187_spill] sm:$0xff] %v15069_v48 }
 0x930   : > { %16665 = vst [vmem:[#allocation42_spill] sm:$0xff] %v15067_v41  ;;  %v15074_v42 = vpop.f32.mrf.mxu0  ;;  %v7979_v8 = vpop.permute.xlu2 %7978 }
 0x931   : > { %v8046_v44 = vsel %vm1857_vm1, %v15074_v42, -inf  ;;  %v7897_v23 = vpop.permute.xlu0 %7896 }
 0x932   : > { %8047 = vmax.xlane.f32.xlu0 %v8046_v44  ;;  %v15078_v3 = vpop.f32.mrf.mxu1  ;;  %10550 = vmatpush.xpose.msk.msra.mxu3 %vm1024_vm0, %v7897_v23  ;;  %v7867_v13 = vpop.permute.xlu1 %7866 }
 0x933   : > { %v8037_v39 = vsel %vm1857_vm1, %v15078_v3, -inf }
 0x934   : > { %8038 = vmax.xlane.f32.xlu1 %v8037_v39  ;;  %10549 = vmatmul.msk.f32.vlgmr.msrb.gmra.mxu2 %vm1024_vm0, %v7867_v13 }
 0x935   : > { %10551 = vmatmul.msk.f32.vlgmr.msra.gmra.mxu3 %vm1024_vm0, %v7895_v38 }
 0x938   : > { %v15092_v30 = vpop.f32.mrf.mxu0 }
 0x939   : > { %v7981_v51 = vpop.permute.xlu0 %7980  ;;  %v8058_v22 = vsel %vm1857_vm1, %v15092_v30, -inf }
 0x93a   : > { %v15085_v32 = vpop.f32.mrf.mxu1  ;;  %10556 = vmatpush.xpose.msk.msra.mxu2 %vm1024_vm0, %v7981_v51  ;;  %v7953_v45 = vpop.permute.xlu1 %7952 }
 0x93b   : > { %v8049_v17 = vsel %vm1857_vm1, %v15085_v32, -inf  ;;  %10554 = vmatpush.xpose.msk.msra.mxu1 %vm1024_vm0, %v7953_v45 }
 0x93c   : > { %8050 = vmax.xlane.f32.xlu1 %v8049_v17 }
 0x93d   : > { %10557 = vmatmul.msk.f32.vlgmr.msra.gmra.mxu2 %vm1024_vm0, %v7979_v8 }
 0x93e   : > { %10555 = vmatmul.msk.f32.vlgmr.msra.gmra.mxu1 %vm1024_vm0, %v7951_v20 }
 0x940   : > { %v15102_v60 = vpop.f32.mrf.mxu0 }
 0x941   : > { %v10887_v9 = vpop.permute.xlu0 %10886  ;;  %v8070_v59 = vsel %vm1857_vm1, %v15102_v60, -inf }
 0x942   : > { %v15095_v28 = vpop.f32.mrf.mxu1  ;;  %v10889_v19 = vunpack.i.h.bf16 %v10887_v9  ;;  %v10888_v54 = vunpack.i.l.bf16 %v10887_v9  ;;  %v8009_v35 = vpop.permute.xlu1 %8008 }
 0x943   : > { %v8061_v31 = vsel %vm1857_vm1, %v15095_v28, -inf  ;;  %10558 = vmatpush.xpose.msk.msrb.mxu3 %vm1024_vm0, %v8009_v35 }
 0x944   : > { %8062 = vmax.xlane.f32.xlu2 %v8061_v31  ;;  %8059 = vmax.xlane.f32.xlu1 %v8058_v22 }
 0x945   : > { %8407 = vmatpush.msra.mxu0 %v10888_v54  ;;  %8433 = vmatpush.msrb.mxu1 %v10889_v19  ;;  %v15125_v19 = vpop.f32.mrf.mxu2 }
 0x946   : > { %16667 = vst [vmem:[#allocation208_spill] sm:$0xff] %v15125_v19 }
 0x948   : > { %v15113_v20 = vpop.f32.mrf.mxu0 }
 0x949   : > { %v10892_v16 = vpop.permute.xlu0 %10891  ;;  %v8082_v13 = vsel %vm1857_vm1, %v15113_v20, -inf }
 0x94a   : > { %v10894_v33 = vunpack.i.h.bf16 %v10892_v16  ;;  %v10893_v21 = vunpack.i.l.bf16 %v10892_v16  ;;  %v8007_v63 = vpop.permute.xlu1 %8006  ;;  %v15107_v43 = vpop.f32.mrf.mxu1 }
 0x94b   : > { %10559 = vmatmul.msk.f32.vlgmr.msrb.gmra.mxu3 %vm1024_vm0, %v8007_v63  ;;  %v8073_v25 = vsel %vm1857_vm1, %v15107_v43, -inf }
 0x94c   : > { %8071 = vmax.xlane.f32.xlu2 %v8070_v59  ;;  %8459 = vmatpush.msrb.mxu2 %v10893_v21 }
 0x94d   : > { %8485 = vmatpush.msra.mxu3 %v10894_v33 }
 0x951   : > { %v15111_v44 = vpop.permute.xlu0 %10906 }
 0x952   : > { %v10897_v38 = vpop.permute.xlu1 %10896 }
 0x953   : > { %v10899_v1 = vunpack.i.h.bf16 %v10897_v38  ;;  %v10898_v56 = vunpack.i.l.bf16 %v10897_v38 }
 0x954   : > { %8074 = vmax.xlane.f32.xlu2 %v8073_v25 }
 0x955   : > { %8511 = vmatpush.msrb.mxu0 %v10898_v56  ;;  %8537 = vmatpush.msra.mxu1 %v10899_v1 }
 0x959   : > { %v15117_v45 = vpop.permute.xlu0 %10921 }
 0x95a   : > { %v10902_v23 = vpop.permute.xlu1 %10901 }
 0x95b   : > { %v10904_v39 = vunpack.i.h.bf16 %v10902_v23  ;;  %v10903_v51 = vunpack.i.l.bf16 %v10902_v23 }
 0x95c   : > { %8083 = vmax.xlane.f32.xlu2 %v8082_v13  ;;  %v16671_v13 = vld [vmem:[#allocation162_spill] sm:$0xff] }
 0x95d   : > { %8563 = vmatpush.msra.mxu2 %v10903_v51  ;;  %8589 = vmatpush.msrb.mxu3 %v10904_v39  ;;  %v16672_v51 = vld [vmem:[#allocation206_spill] sm:$0xff] }
 0x961   : > { %v15123_v9 = vpop.permute.xlu0 %10936 }
 0x962   : > { %v15119_v17 = vpop.permute.xlu1 %10911 }
 0x969   : > { %v10947_v22 = vpop.permute.xlu0 %10946 }
 0x96a   : > { %v15121_v8 = vpop.permute.xlu1 %10926  ;;  %v10949_v21 = vunpack.i.h.bf16 %v10947_v22  ;;  %v10948_v63 = vunpack.i.l.bf16 %v10947_v22 }
 0x96c   : > { %v9603_v39 = vsel %vm1024_vm0, %v16671_v13, %v10949_v21  ;;  %v9602_v50 = vsel %vm1024_vm0, %v16672_v51, %v10948_v63 }
 0x96f   : > { %v15127_v54 = vpop.f32.mrf.mxu3 }
 0x970   : > { %16668 = vst [vmem:[#allocation189_spill] sm:$0xff] %v15127_v54 }
 0x972   : > { %v15131_v31 = vpop.permute.xlu1 %10931 }
 0x977   : > { %v15133_v16 = vpop.f32.mrf.mxu1  ;;  %v15135_v33 = vpop.f32.mrf.mxu2 }
 0x978   : > { %16669 = vst [vmem:[#allocation210_spill] sm:$0xff] %v15135_v33  ;;  %v15137_v59 = vpop.f32.mrf.mxu3  ;;  %v8085_v38 = vsel %vm1857_vm1, %v15133_v16, -inf }
 0x979   : > { %16670 = vst [vmem:[#allocation226_spill] sm:$0xff] %v15137_v59  ;;  %8086 = vmax.xlane.f32.xlu2 %v8085_v38 }
 0x97a   : > { %v10962_v1 = vpop.permute.xlu1 %10961 }
 0x97b   : > { %v10964_v56 = vunpack.i.h.bf16 %v10962_v1  ;;  %v10963_v23 = vunpack.i.l.bf16 %v10962_v1 }
 0x97d   : > { %v15148_v22 = vsel %vm9634_vm2, %v9603_v39, %v10964_v56  ;;  %v15151_v35 = vsel %vm9634_vm2, %v9602_v50, %v10963_v23 }
 0x97e   : > { %16673 = vst [vmem:[#allocation194_spill] sm:$0xff] %v15148_v22 }
 0x97f   : > { %16674 = vst [vmem:[#allocation238_spill] sm:$0xff] %v15151_v35  ;;  %v15153_v52 = vpop.f32.mrf.mxu2  ;;  %v15167_v50 = vpop.f32.mrf.mxu0 }
 0x980   : > { %16675 = vst [vmem:[#allocation209_spill] sm:$0xff] %v15153_v52  ;;  %v15155_v25 = vpop.f32.mrf.mxu3  ;;  %v8094_v23 = vsel %vm1857_vm1, %v15167_v50, -inf }
 0x981   : > { %16676 = vst [vmem:[#allocation225_spill] sm:$0xff] %v15155_v25 }
 0x987   : > { %v15159_v1 = vpop.f32.mrf.mxu2 }
 0x988   : > { %v15161_v10 = vpop.f32.mrf.mxu3  ;;  %v8040_v21 = vsel %vm1857_vm1, %v15159_v1, -inf }
 0x989   : > { %v8043_v63 = vsel %vm1857_vm1, %v15161_v10, -inf  ;;  %8041 = vmax.xlane.f32.xlu0 %v8040_v21 }
 0x98a   : > { %8044 = vmax.xlane.f32.xlu2 %v8043_v63 }
 0x98b   : > { %v15179_v38 = vpop.f32.mrf.mxu0 }
 0x98c   : > { %v8106_v15 = vsel %vm1857_vm1, %v15179_v38, -inf }
 0x98f   : > { %v15169_v56 = vpop.f32.mrf.mxu2 }
 0x990   : > { %v8052_v13 = vsel %vm1857_vm1, %v15169_v56, -inf  ;;  %v15175_v39 = vpop.f32.mrf.mxu3 }
 0x991   : > { %8095 = vmax.xlane.f32.xlu0 %v8094_v23  ;;  %v15189_v23 = vpop.permute.xlu2 %10916  ;;  %v8055_v14 = vsel %vm1857_vm1, %v15175_v39, -inf }
 0x992   : > { %8053 = vmax.xlane.f32.xlu2 %v8052_v13 }
 0x993   : > { %v15177_v51 = vpop.f32.mrf.mxu1 }
 0x994   : > { %v8097_v63 = vsel %vm1857_vm1, %v15177_v51, -inf }
 0x997   : > { %v15181_v21 = vpop.f32.mrf.mxu2 }
 0x998   : > { %v8064_v11 = vsel %vm1857_vm1, %v15181_v21, -inf  ;;  %v15191_v13 = vpop.f32.mrf.mxu3  ;;  %v15193_v34 = vpop.f32.mrf.mxu0 }
 0x999   : > { %8098 = vmax.xlane.f32.xlu0 %v8097_v63  ;;  %8065 = vmax.xlane.f32.xlu1 %v8064_v11  ;;  %v8118_v0 = vsel %vm1857_vm1, %v15193_v34, -inf  ;;  %v15199_v63 = vpop.permute.xlu2 %10941 }
 0x99a   : > { %8107 = vmax.xlane.f32.xlu2 %v8106_v15 }
 0x99f   : > { %v15213_v27 = vpop.f32.mrf.mxu2 }
 0x9a0   : > { %v15201_v52 = vpop.f32.mrf.mxu3 }
 0x9a1   : > { %8056 = vmax.xlane.f32.xlu0 %v8055_v14  ;;  %v15207_v25 = vpop.permute.xlu2 %10951  ;;  %v8067_v14 = vsel %vm1857_vm1, %v15191_v13, -inf }
 0x9a2   : > { %8119 = vmax.xlane.f32.xlu2 %v8118_v0 }
 0x9a7   : > { %v15225_v61 = vpop.f32.mrf.mxu2  ;;  %v8039_v54 = vpop.xlane.xlu1 %8038 }
 0x9a8   : > { %v15209_v40 = vpop.f32.mrf.mxu3  ;;  %v8131_v62 = vsub.f32 %v15078_v3, %v8039_v54 }
 0x9a9   : > { %v15215_v0 = vpop.permute.xlu2 %10956  ;;  %v8091_v57 = vsel %vm1857_vm1, %v15209_v40, -inf }
 0x9aa   : > { %16677 = vst [vmem:[#allocation145_spill] sm:$0xff] %v15215_v0  ;;  %v8088_v0 = vsel %vm1857_vm1, %v15225_v61, -inf }
 0x9ab   : > { %v15203_v11 = vpop.f32.mrf.mxu1 }
 0x9ac   : > { %v8109_v15 = vsel %vm1857_vm1, %v15203_v11, -inf }
 0x9ad   : > { %8110 = vmax.xlane.f32.xlu2 %v8109_v15  ;;  %v8076_v15 = vsel %vm1857_vm1, %v15213_v27, -inf }
 0x9af   : > { %v15234_v41 = vpop.f32.mrf.mxu2 }
 0x9b0   : > { %v15219_v59 = vpop.f32.mrf.mxu3  ;;  %v8100_v5 = vsel %vm1857_vm1, %v15234_v41, -inf }
 0x9b1   : > { %v8036_v19 = vpop.xlane.xlu2 %8035 }
 0x9b2   : > { %v8130_v48 = vsub.f32 %v15058_v58, %v8036_v19 }
 0x9b5   : > { %8068 = vmax.xlane.f32.xlu2 %v8067_v14  ;;  %v8079_v14 = vsel %vm1857_vm1, %v15201_v52, -inf }
 0x9b8   : > { %v15232_v18 = vpop.f32.mrf.mxu3 }
 0x9bb   : > { %v15217_v33 = vpop.f32.mrf.mxu1 }
 0x9bc   : > { %v8121_v6 = vsel %vm1857_vm1, %v15217_v33, -inf }
 0x9bd   : > { %8122 = vmax.xlane.f32.xlu1 %v8121_v6  ;;  %8077 = vmax.xlane.f32.xlu2 %v8076_v15  ;;  %v8164_v6 = vmul.f32 1.442695, %v8131_v62  ;;  %v8063_v15 = vpop.xlane.xlu2 %8062 }
 0x9be   : > { %v8139_v3 = vsub.f32 %v15095_v28, %v8063_v15 }
 0x9bf   : > { %11591 = vpow2.f32 %v8164_v6  ;;  %v15253_v6 = vpop.f32.mrf.mxu2 }
 0x9c0   : > { %v8180_v58 = vmul.f32 1.442695, %v8139_v3 }
 0x9c5   : > { %8080 = vmax.xlane.f32.xlu1 %v8079_v14  ;;  %8089 = vmax.xlane.f32.xlu2 %v8088_v0  ;;  %v8051_v0 = vpop.xlane.xlu1 %8050  ;;  %v8162_v14 = vmul.f32 1.442695, %v8130_v48  ;;  %v15247_v35 = vpop.eup %11591 }
 0x9c6   : > { %v8135_v19 = vsub.f32 %v15085_v32, %v8051_v0  ;;  %v8072_v22 = vpop.xlane.xlu2 %8071  ;;  %v8048_v48 = vpop.xlane.xlu0 %8047  ;;  %v8229_v15 = vsel %vm1857_vm1, %v15247_v35, 0.0 }
 0x9c7   : > { %11593 = vpow2.f32 %v8162_v14  ;;  %v8134_v3 = vsub.f32 %v15074_v42, %v8048_v48  ;;  %v8142_v48 = vsub.f32 %v15102_v60, %v8072_v22 }
 0x9c8   : > { %11595 = vpow2.f32 %v8180_v58  ;;  %v8172_v28 = vmul.f32 1.442695, %v8135_v19  ;;  %v8112_v19 = vsel %vm1857_vm1, %v15253_v6, -inf }
 0x9ca   : > { %11597 = vpow2.f32 %v8172_v28 }
 0x9cd   : > { %8092 = vmax.xlane.f32.xlu2 %v8091_v57  ;;  %8101 = vmax.xlane.f32.xlu1 %v8100_v5  ;;  %v8115_v57 = vsel %vm1857_vm1, %v15232_v18, -inf  ;;  %v8103_v5 = vsel %vm1857_vm1, %v15219_v59, -inf  ;;  %v8060_v32 = vpop.xlane.xlu1 %8059  ;;  %v15257_v0 = vpop.eup %11593 }
 0x9ce   : > { %v15242_v54 = vpop.f32.mrf.mxu3  ;;  %v8138_v14 = vsub.f32 %v15092_v30, %v8060_v32  ;;  %v8226_v58 = vsel %vm1857_vm1, %v15257_v0, 0.0  ;;  %v15271_v30 = vpop.f32.mrf.mxu2 }
 0x9cf   : > { %16678 = vst [vmem:[#allocation147_spill] sm:$0xff] %v15242_v54  ;;  %v8127_v62 = vsel %vm1857_vm1, %v15242_v54, -inf }
 0x9d0   : > { %8128 = vmax.xlane.f32.xlu0 %v8127_v62  ;;  %v15261_v62 = vpop.eup %11595 }
 0x9d1   : > { %v8253_v46 = vsel %vm1857_vm1, %v15261_v62, 0.0  ;;  %v15269_v42 = vpop.eup %11597 }
 0x9d2   : > { %v8241_v32 = vsel %vm1857_vm1, %v15269_v42, 0.0 }
 0x9d5   : > { %8116 = vmax.xlane.f32.xlu2 %v8115_v57  ;;  %8104 = vmax.xlane.f32.xlu1 %v8103_v5  ;;  %v8170_v57 = vmul.f32 1.442695, %v8134_v3  ;;  %v8075_v5 = vpop.xlane.xlu2 %8074  ;;  %v8124_v3 = vsel %vm1857_vm1, %v15271_v30, -inf }
 0x9d6   : > { %v8143_v28 = vsub.f32 %v15107_v43, %v8075_v5 }
 0x9d7   : > { %11599 = vpow2.f32 %v8170_v57 }
 0x9d8   : > { %8230 = vadd.xlane.f32.xlu0 %v8229_v15  ;;  %v8178_v15 = vmul.f32 1.442695, %v8138_v14  ;;  %v8186_v14 = vmul.f32 1.442695, %v8142_v48 }
 0x9da   : > { %11601 = vpow2.f32 %v8178_v15 }
 0x9db   : > { %11603 = vpow2.f32 %v8186_v14 }
 0x9dd   : > { %8227 = vadd.xlane.f32.xlu2 %v8226_v58  ;;  %8113 = vmax.xlane.f32.xlu1 %v8112_v19  ;;  %v15279_v58 = vpop.eup %11599  ;;  %v8084_v19 = vpop.xlane.xlu2 %8083 }
 0x9de   : > { %v8146_v60 = vsub.f32 %v15113_v20, %v8084_v19  ;;  %v8238_v22 = vsel %vm1857_vm1, %v15279_v58, 0.0 }
 0x9e0   : > { %8254 = vadd.xlane.f32.xlu0 %v8253_v46  ;;  %v8188_v46 = vmul.f32 1.442695, %v8143_v28  ;;  %v15281_v29 = vpop.eup %11601  ;;  %v8194_v57 = vmul.f32 1.442695, %v8146_v60 }
 0x9e1   : > { %v8250_v43 = vsel %vm1857_vm1, %v15281_v29, 0.0  ;;  %v15288_v5 = vpop.eup %11603 }
 0x9e2   : > { %11605 = vpow2.f32 %v8188_v46  ;;  %v8262_v20 = vsel %vm1857_vm1, %v15288_v5, 0.0 }
 0x9e3   : > { %11607 = vpow2.f32 %v8194_v57 }
 0x9e5   : > { %8242 = vadd.xlane.f32.xlu2 %v8241_v32  ;;  %8125 = vmax.xlane.f32.xlu1 %v8124_v3 }
 0x9e8   : > { %v15290_v15 = vpop.eup %11605 }
 0x9e9   : > { %v8265_v48 = vsel %vm1857_vm1, %v15290_v15, 0.0  ;;  %v15296_v32 = vpop.eup %11607 }
 0x9ea   : > { %v8274_v14 = vsel %vm1857_vm1, %v15296_v32, 0.0 }
 0x9ec   : > { %v8087_v28 = vpop.xlane.xlu2 %8086 }
 0x9ed   : > { %8251 = vadd.xlane.f32.xlu2 %v8250_v43  ;;  %8239 = vadd.xlane.f32.xlu1 %v8238_v22  ;;  %v8147_v43 = vsub.f32 %v15133_v16, %v8087_v28 }
 0x9f5   : > { %8266 = vadd.xlane.f32.xlu2 %v8265_v48  ;;  %8263 = vadd.xlane.f32.xlu1 %v8262_v20  ;;  %v8196_v48 = vmul.f32 1.442695, %v8147_v43 }
 0x9fc   : > { %v8042_v3 = vpop.xlane.xlu0 %8041 }
 0x9fd   : > { %v8045_v46 = vpop.xlane.xlu2 %8044  ;;  %v8132_v19 = vsub.f32 %v15159_v1, %v8042_v3  ;;  %8275 = vadd.xlane.f32.xlu1 %v8274_v14 }
 0x9fe   : > { %v8133_v60 = vsub.f32 %v15161_v10, %v8045_v46 }
 0x9ff   : > { %v8166_v22 = vmul.f32 1.442695, %v8132_v19 }
 0xa00   : > { %v8168_v57 = vmul.f32 1.442695, %v8133_v60 }
 0xa01   : > { %11609 = vpow2.f32 %v8166_v22 }
 0xa02   : > { %11611 = vpow2.f32 %v8168_v57 }
 0xa03   : > { %11613 = vpow2.f32 %v8196_v48 }
 0xa04   : > { %v8096_v20 = vpop.xlane.xlu0 %8095 }
 0xa05   : > { %v8150_v54 = vsub.f32 %v15167_v50, %v8096_v20  ;;  %v8054_v49 = vpop.xlane.xlu2 %8053 }
 0xa06   : > { %v8136_v1 = vsub.f32 %v15169_v56, %v8054_v49 }
 0xa07   : > { %v15304_v24 = vpop.eup %11609  ;;  %v8202_v36 = vmul.f32 1.442695, %v8150_v54 }
 0xa08   : > { %v15307_v3 = vpop.eup %11611  ;;  %v8232_v10 = vsel %vm1857_vm1, %v15304_v24, 0.0  ;;  %v8174_v28 = vmul.f32 1.442695, %v8136_v1 }
 0xa09   : > { %11615 = vpow2.f32 %v8202_v36  ;;  %8233 = vadd.xlane.f32.xlu0 %v8232_v10  ;;  %v8235_v16 = vsel %vm1857_vm1, %v15307_v3, 0.0  ;;  %v15313_v14 = vpop.eup %11613 }
 0xa0a   : > { %8236 = vadd.xlane.f32.xlu2 %v8235_v16  ;;  %11617 = vpow2.f32 %v8174_v28  ;;  %v8277_v36 = vsel %vm1857_vm1, %v15313_v14, 0.0 }
 0xa0c   : > { %v8099_v50 = vpop.xlane.xlu0 %8098 }
 0xa0d   : > { %v8108_v46 = vpop.xlane.xlu2 %8107  ;;  %v8151_v49 = vsub.f32 %v15177_v51, %v8099_v50  ;;  %v8066_v50 = vpop.xlane.xlu1 %8065 }
 0xa0e   : > { %v8154_v54 = vsub.f32 %v15179_v38, %v8108_v46 }
 0xa0f   : > { %v15316_v19 = vpop.eup %11615  ;;  %v8204_v43 = vmul.f32 1.442695, %v8151_v49 }
 0xa10   : > { %v8210_v56 = vmul.f32 1.442695, %v8154_v54  ;;  %v8286_v60 = vsel %vm1857_vm1, %v15316_v19, 0.0  ;;  %v15323_v22 = vpop.eup %11617  ;;  %v8140_v54 = vsub.f32 %v15181_v21, %v8066_v50  ;;  %v16679_v50 = vld [vmem:[#allocation159_spill] sm:$0xff] }
 0xa11   : > { %8278 = vadd.xlane.f32.xlu0 %v8277_v36  ;;  %8287 = vadd.xlane.f32.xlu1 %v8286_v60  ;;  %v8244_v10 = vsel %vm1857_vm1, %v15323_v22, 0.0 }
 0xa12   : > { %11619 = vpow2.f32 %v8210_v56 }
 0xa13   : > { %11621 = vpow2.f32 %v8204_v43  ;;  %v8182_v43 = vmul.f32 1.442695, %v8140_v54  ;;  %v16680_v54 = vld [vmem:[#allocation197_spill] sm:$0xff] }
 0xa14   : > { %v8057_v57 = vpop.xlane.xlu0 %8056 }
 0xa15   : > { %v8120_v38 = vpop.xlane.xlu2 %8119  ;;  %v8137_v51 = vsub.f32 %v15175_v39, %v8057_v57 }
 0xa16   : > { %v8158_v48 = vsub.f32 %v15193_v34, %v8120_v38 }
 0xa17   : > { %v8176_v28 = vmul.f32 1.442695, %v8137_v51 }
 0xa18   : > { %v15326_v20 = vpop.eup %11619  ;;  %v8218_v1 = vmul.f32 1.442695, %v8158_v48 }
 0xa19   : > { %8245 = vadd.xlane.f32.xlu0 %v8244_v10  ;;  %v8298_v16 = vsel %vm1857_vm1, %v15326_v20, 0.0  ;;  %v15333_v46 = vpop.eup %11621 }
 0xa1a   : > { %11623 = vpow2.f32 %v8218_v1  ;;  %8299 = vadd.xlane.f32.xlu2 %v8298_v16  ;;  %v8289_v36 = vsel %vm1857_vm1, %v15333_v46, 0.0 }
 0xa1b   : > { %11625 = vpow2.f32 %v8176_v28 }
 0xa20   : > { %v15335_v34 = vpop.eup %11623  ;;  %v8111_v39 = vpop.xlane.xlu2 %8110 }
 0xa21   : > { %v8155_v49 = vsub.f32 %v15203_v11, %v8111_v39  ;;  %v8310_v56 = vsel %vm1857_vm1, %v15335_v34, 0.0  ;;  %v15343_v57 = vpop.eup %11625  ;;  %v10970_v39 = vpack.i.bf16 %v16680_v54, %v16679_v50 }
 0xa22   : > { %8311 = vadd.xlane.f32.xlu0 %v8310_v56  ;;  %8290 = vadd.xlane.f32.xlu2 %v8289_v36  ;;  %v8247_v11 = vsel %vm1857_vm1, %v15343_v57, 0.0 }
 0xa23   : > { %v8212_v60 = vmul.f32 1.442695, %v8155_v49 }
 0xa25   : > { %11627 = vpow2.f32 %v8212_v60 }
 0xa26   : > { %11629 = vpow2.f32 %v8182_v43 }
 0xa28   : > { %v8069_v38 = vpop.xlane.xlu2 %8068 }
 0xa29   : > { %v8141_v21 = vsub.f32 %v15191_v13, %v8069_v38 }
 0xa2a   : > { %8248 = vadd.xlane.f32.xlu2 %v8247_v11  ;;  %v16682_v11 = vld [vmem:[#allocation140_spill] sm:$0xff] }
 0xa2b   : > { %v15348_v48 = vpop.eup %11627  ;;  %v8184_v51 = vmul.f32 1.442695, %v8141_v21 }
 0xa2c   : > { %v8301_v1 = vsel %vm1857_vm1, %v15348_v48, 0.0  ;;  %v15352_v10 = vpop.eup %11629 }
 0xa2d   : > { %8302 = vadd.xlane.f32.xlu1 %v8301_v1  ;;  %11631 = vpow2.f32 %v8184_v51  ;;  %v8256_v13 = vsel %vm1857_vm1, %v15352_v10, 0.0  ;;  %v16683_v51 = vld [vmem:[#allocation165_spill] sm:$0xff] }
 0xa2e   : > { %v10975_v1 = vpack.i.bf16 %v16683_v51, %v16682_v11  ;;  %v10909_v51 = vunpack.i.h.bf16 %v15111_v44 }
 0xa30   : > { %v15354_v16 = vpop.xlane.xlu1 %8122  ;;  %v8078_v28 = vpop.xlane.xlu2 %8077 }
 0xa32   : > { %8257 = vadd.xlane.f32.xlu2 %v8256_v13 }
 0xa33   : > { %v15360_v49 = vpop.eup %11631 }
 0xa34   : > { %v8259_v60 = vsel %vm1857_vm1, %v15360_v49, 0.0 }
 0xa36   : > { %10971 = vrot.lane.b32.xlu0 %v10970_v39, %s11729_s23  ;;  %v8144_v39 = vsub.f32 %v15213_v27, %v8078_v28 }
 0xa38   : > { %v8081_v56 = vpop.xlane.xlu1 %8080  ;;  %v15363_v36 = vpop.xlane.xlu2 %8089  ;;  %v8190_v26 = vmul.f32 1.442695, %v8144_v39  ;;  %v10908_v39 = vunpack.i.l.bf16 %v15111_v44 }
 0xa39   : > { %v8145_v27 = vsub.f32 %v15201_v52, %v8081_v56 }
 0xa3a   : > { %8260 = vadd.xlane.f32.xlu2 %v8259_v60 }
 0xa40   : > { %v15367_v43 = vpop.xlane.xlu2 %8092  ;;  %v15369_v38 = vpop.xlane.xlu1 %8101 }
 0xa43   : > { %v15371_v21 = vpop.xlane.xlu0 %8128 }
 0xa44   : > { %16681 = vst [vmem:[#allocation54_spill] sm:$0xff] %v15371_v21  ;;  %v16684_v21 = vpack.i.bf16 %v14976_v37, %v14974_v53  ;;  %v8192_v53 = vmul.f32 1.442695, %v8145_v27 }
 0xa46   : > { %10976 = vrot.lane.b32.xlu1 %v10975_v1, %s11729_s23 }
 0xa48   : > { %v15376_v13 = vpop.xlane.xlu2 %8116  ;;  %v8105_v50 = vpop.xlane.xlu1 %8104 }
 0xa4b   : > { %v8231_v54 = vpop.xlane.xlu0 %8230 }
 0xa4c   : > { %11633 = vrcp.f32 %v8231_v54 }
 0xa50   : > { %v8228_v47 = vpop.xlane.xlu2 %8227  ;;  %v15379_v60 = vpop.xlane.xlu1 %8113 }
 0xa51   : > { %11635 = vrcp.f32 %v8228_v47 }
 0xa52   : > { %v11634_v12 = vpop.eup %11633  ;;  %10966 = vrot.lane.b32.xlu2 %v16684_v21, %s11728_s24  ;;  %11637 = vpow2.f32 %v8190_v26  ;;  %v8153_v26 = vsub.f32 %v15219_v59, %v8105_v50  ;;  %v10919_v21 = vunpack.i.h.bf16 %v15189_v23 }
 0xa53   : > { %v8355_v11 = vmul.f32 %v11634_v12, %v15247_v35  ;;  %v8255_v37 = vpop.xlane.xlu0 %8254 }
 0xa55   : > { %10561 = vmatmul.msk.f32.vlgmr.msrb.gmra.mxu1 %vm1857_vm1, %v8355_v11  ;;  %v8208_v11 = vmul.f32 1.442695, %v8153_v26 }
 0xa56   : > { %8641 = vmatpush.msrb.mxu1 %v10909_v51 }
 0xa57   : > { %v11636_v28 = vpop.eup %11635 }
 0xa58   : > { %v8354_v47 = vmul.f32 %v11636_v28, %v15257_v0  ;;  %v8243_v1 = vpop.xlane.xlu2 %8242  ;;  %v15390_v54 = vpop.xlane.xlu1 %8125 }
 0xa59   : > { %11639 = vrcp.f32 %v8243_v1  ;;  %v15394_v12 = vpop.eup %11637  ;;  %v8148_v1 = vsub.f32 %v15225_v61, %v15363_v36  ;;  %v8149_v36 = vsub.f32 %v15209_v40, %v15367_v43  ;;  %v8152_v40 = vsub.f32 %v15234_v41, %v15369_v38 }
 0xa5a   : > { %10560 = vmatmul.msk.f32.vlgmr.msra.gmra.mxu0 %vm1857_vm1, %v8354_v47  ;;  %11641 = vpow2.f32 %v8192_v53  ;;  %v8268_v35 = vsel %vm1857_vm1, %v15394_v12, 0.0  ;;  %v10929_v47 = vunpack.i.h.bf16 %v15121_v8  ;;  %v10918_v53 = vunpack.i.l.bf16 %v15189_v23 }
 0xa5b   : > { %8615 = vmatpush.msra.mxu0 %v10908_v39  ;;  %11643 = vrcp.f32 %v8255_v37  ;;  %v8198_v26 = vmul.f32 1.442695, %v8148_v1  ;;  %v10943_v23 = vunpack.i.l.bf16 %v15199_v63  ;;  %v10933_v43 = vunpack.i.l.bf16 %v15131_v31 }
 0xa5c   : > { %v10934_v1 = vunpack.i.h.bf16 %v15131_v31 }
 0xa5f   : > { %v11640_v52 = vpop.eup %11639 }
 0xa60   : > { %v8359_v0 = vmul.f32 %v11640_v52, %v15269_v42  ;;  %8269 = vadd.xlane.f32.xlu0 %v8268_v35  ;;  %v8252_v44 = vpop.xlane.xlu2 %8251  ;;  %v8240_v56 = vpop.xlane.xlu1 %8239 }
 0xa61   : > { %11645 = vrcp.f32 %v8240_v56  ;;  %v15402_v51 = vpop.eup %11641  ;;  %v8200_v56 = vmul.f32 1.442695, %v8149_v36 }
 0xa62   : > { %10565 = vmatmul.msk.f32.vlgmr.msra.gmra.mxu1 %vm1857_vm1, %v8359_v0  ;;  %v11644_v59 = vpop.eup %11643  ;;  %11647 = vpow2.f32 %v8208_v11  ;;  %v8271_v50 = vsel %vm1857_vm1, %v15402_v51, 0.0 }
 0xa63   : > { %8745 = vmatpush.msra.mxu1 %v10919_v21  ;;  %v8363_v42 = vmul.f32 %v11644_v59, %v15261_v62  ;;  %11649 = vrcp.f32 %v8252_v44  ;;  %v10928_v44 = vunpack.i.l.bf16 %v15121_v8  ;;  %v10980_v8 = vpack.i.bf16 %v14892_v4, %v14888_v55 }
 0xa64   : > { %v8156_v55 = vsub.f32 %v15253_v6, %v15379_v60  ;;  %v10913_v60 = vunpack.i.l.bf16 %v15119_v17 }
 0xa67   : > { %v11646_v27 = vpop.eup %11645 }
 0xa68   : > { %8272 = vadd.xlane.f32.xlu0 %v8271_v50  ;;  %v8267_v28 = vpop.xlane.xlu2 %8266  ;;  %v8358_v39 = vmul.f32 %v11646_v27, %v15279_v58  ;;  %v8264_v37 = vpop.xlane.xlu1 %8263  ;;  %v8206_v27 = vmul.f32 1.442695, %v8152_v40  ;;  %v10944_v40 = vunpack.i.h.bf16 %v15199_v63 }
 0xa69   : > { %11651 = vrcp.f32 %v8267_v28  ;;  %v15414_v62 = vpop.eup %11647  ;;  %v16686_v28 = vld [vmem:[#allocation241_spill] sm:$0xff] }
 0xa6a   : > { %10569 = vmatmul.msk.f32.vlgmr.msrb.gmra.mxu1 %vm1857_vm1, %v8363_v42  ;;  %10564 = vmatmul.msk.f32.vlgmr.msrb.gmra.mxu0 %vm1857_vm1, %v8358_v39  ;;  %v11650_v52 = vpop.eup %11649  ;;  %v8295_v61 = vsel %vm1857_vm1, %v15414_v62, 0.0  ;;  %11653 = vrcp.f32 %v8264_v37  ;;  %v16685_v42 = vld [vmem:[#allocation166_spill] sm:$0xff] }
 0xa6b   : > { %8849 = vmatpush.msrb.mxu1 %v10929_v47  ;;  %8719 = vmatpush.msrb.mxu0 %v10918_v53  ;;  %11655 = vpow2.f32 %v8198_v26  ;;  %v8362_v0 = vmul.f32 %v11650_v52, %v15281_v29  ;;  %v10985_v47 = vpack.i.bf16 %v16686_v28, %v16685_v42  ;;  %v8214_v52 = vmul.f32 1.442695, %v8156_v55 }
 0xa6c   : > { %v8159_v55 = vsub.f32 %v15217_v33, %v15354_v16  ;;  %v8157_v33 = vsub.f32 %v15232_v18, %v15376_v13 }
 0xa6e   : > { %v8220_v42 = vmul.f32 1.442695, %v8159_v55 }
 0xa6f   : > { %v11652_v35 = vpop.eup %11651 }
 0xa70   : > { %v8367_v58 = vmul.f32 %v11652_v35, %v15290_v15  ;;  %8296 = vadd.xlane.f32.xlu1 %v8295_v61  ;;  %v8276_v15 = vpop.xlane.xlu1 %8275  ;;  %v11654_v21 = vpop.eup %11653  ;;  %v10914_v35 = vunpack.i.h.bf16 %v15119_v17 }
 0xa71   : > { %v15426_v11 = vpop.eup %11655  ;;  %11657 = vrcp.f32 %v8276_v15  ;;  %v8366_v29 = vmul.f32 %v11654_v21, %v15288_v5 }
 0xa72   : > { %10573 = vmatmul.msk.f32.vlgmr.msra.gmra.mxu1 %vm1857_vm1, %v8367_v58  ;;  %10568 = vmatmul.msk.f32.vlgmr.msra.gmra.mxu0 %vm1857_vm1, %v8362_v0  ;;  %11659 = vpow2.f32 %v8200_v56  ;;  %v8280_v59 = vsel %vm1857_vm1, %v15426_v11, 0.0  ;;  %v16687_v58 = vld [vmem:[#allocation224_spill] sm:$0xff] }
 0xa73   : > { %8953 = vmatpush.msra.mxu1 %v10943_v23  ;;  %8823 = vmatpush.msra.mxu0 %v10928_v44  ;;  %v16689_v44 = vpack.i.bf16 %v15004_v2, %v14998_v7 }
 0xa77   : > { %v11658_v38 = vpop.eup %11657 }
 0xa78   : > { %v15438_v5 = vpop.eup %11659  ;;  %v8370_v4 = vmul.f32 %v11658_v38, %v15296_v32 }
 0xa79   : > { %v8283_v39 = vsel %vm1857_vm1, %v15438_v5, 0.0 }
 0xa7a   : > { %10572 = vmatmul.msk.f32.vlgmr.msrb.gmra.mxu0 %vm1857_vm1, %v8366_v29 }
 0xa7b   : > { %8281 = vadd.xlane.f32.xlu2 %v8280_v59  ;;  %8927 = vmatpush.msrb.mxu0 %v10933_v43 }
 0xa7c   : > { %10981 = vrot.lane.b32.xlu0 %v10980_v8, %s11728_s24  ;;  %v8234_v50 = vpop.xlane.xlu0 %8233  ;;  %v10923_v8 = vunpack.i.l.bf16 %v15117_v45 }
 0xa7d   : > { %11661 = vrcp.f32 %v8234_v50  ;;  %v8237_v41 = vpop.xlane.xlu2 %8236 }
 0xa7e   : > { %11663 = vrcp.f32 %v8237_v41 }
 0xa7f   : > { %11665 = vpow2.f32 %v8206_v27 }
 0xa82   : > { %10576 = vmatmul.msk.f32.vlgmr.msra.gmra.mxu0 %vm1857_vm1, %v8370_v4 }
 0xa83   : > { %v11662_v53 = vpop.eup %11661  ;;  %8284 = vadd.xlane.f32.xlu2 %v8283_v39  ;;  %9031 = vmatpush.msra.mxu0 %v10934_v1 }
 0xa84   : > { %v11664_v37 = vpop.eup %11663  ;;  %v8356_v26 = vmul.f32 %v11662_v53, %v15304_v24  ;;  %10986 = vrot.lane.b32.xlu0 %v10985_v47, %s11729_s23  ;;  %v8279_v6 = vpop.xlane.xlu0 %8278  ;;  %v16688_v24 = vld [vmem:[#allocation203_spill] sm:$0xff] }
 0xa85   : > { %v8288_v32 = vpop.xlane.xlu1 %8287  ;;  %v8357_v31 = vmul.f32 %v11664_v37, %v15307_v3  ;;  %11667 = vrcp.f32 %v8279_v6  ;;  %v15455_v61 = vpop.eup %11665  ;;  %v10990_v23 = vpack.i.bf16 %v16688_v24, %v16687_v58 }
 0xa86   : > { %11669 = vrcp.f32 %v8288_v32  ;;  %10562 = vmatmul.msk.f32.vlgmr.msrb.gmra.mxu2 %vm1857_vm1, %v8356_v26  ;;  %v8292_v3 = vsel %vm1857_vm1, %v15455_v61, 0.0  ;;  %v10938_v26 = vunpack.i.l.bf16 %v15123_v9  ;;  %v10939_v32 = vunpack.i.h.bf16 %v15123_v9 }
 0xa87   : > { %10563 = vmatmul.msk.f32.vlgmr.msra.gmra.mxu3 %vm1857_vm1, %v8357_v31  ;;  %8667 = vmatpush.msrb.mxu2 %v10913_v60  ;;  %11671 = vpow2.f32 %v8214_v52  ;;  %v16690_v52 = vld [vmem:[#allocation204_spill] sm:$0xff]  ;;  %v16691_v31 = vld [vmem:[#allocation83_spill] sm:$0xff] }
 0xa88   : > { %8693 = vmatpush.msra.mxu3 %v10914_v35  ;;  %v11020_v35 = vpack.i.bf16 %v16691_v31, %v16690_v52  ;;  %v8160_v31 = vsub.f32 %v15271_v30, %v15390_v54 }
 0xa89   : > { %10991 = vrot.lane.b32.xlu1 %v10990_v23, %s11729_s23 }
 0xa8b   : > { %v11668_v36 = vpop.eup %11667  ;;  %8293 = vadd.xlane.f32.xlu2 %v8292_v3  ;;  %v16692_v3 = vld [vmem:[#allocation135_spill] sm:$0xff] }
 0xa8c   : > { %v11670_v17 = vpop.eup %11669  ;;  %v8371_v0 = vmul.f32 %v11668_v36, %v15313_v14  ;;  %10996 = vrot.lane.b32.xlu0 %v16689_v44, %s11728_s24  ;;  %v8246_v56 = vpop.xlane.xlu0 %8245  ;;  %v16693_v36 = vld [vmem:[#allocation119_spill] sm:$0xff] }
 0xa8d   : > { %v8374_v15 = vmul.f32 %v11670_v17, %v15316_v19  ;;  %11673 = vrcp.f32 %v8246_v56  ;;  %v8300_v21 = vpop.xlane.xlu2 %8299  ;;  %v15471_v29 = vpop.eup %11671  ;;  %v11040_v17 = vpack.i.bf16 %v16693_v36, %v16692_v3  ;;  %v10953_v56 = vunpack.i.l.bf16 %v15207_v25 }
 0xa8e   : > { %11675 = vrcp.f32 %v8300_v21  ;;  %10577 = vmatmul.msk.f32.vlgmr.msrb.gmra.mxu1 %vm1857_vm1, %v8371_v0  ;;  %v8304_v14 = vsel %vm1857_vm1, %v15471_v29, 0.0 }
 0xa8f   : > { %10580 = vmatmul.msk.f32.vlgmr.msrb.gmra.mxu0 %vm1857_vm1, %v8374_v15 }
 0xa90   : > { %9135 = vmatpush.msrb.mxu0 %v10944_v40  ;;  %v10954_v40 = vunpack.i.h.bf16 %v15207_v25  ;;  %v16694_v25 = vld [vmem:[#allocation151_spill] sm:$0xff] }
 0xa93   : > { %v11674_v7 = vpop.eup %11673  ;;  %8305 = vadd.xlane.f32.xlu2 %v8304_v14 }
 0xa94   : > { %v11676_v2 = vpop.eup %11675  ;;  %v8360_v19 = vmul.f32 %v11674_v7, %v15323_v22 }
 0xa95   : > { %v8378_v63 = vmul.f32 %v11676_v2, %v15326_v20  ;;  %v8312_v43 = vpop.xlane.xlu0 %8311  ;;  %v8291_v59 = vpop.xlane.xlu2 %8290 }
 0xa96   : > { %11677 = vrcp.f32 %v8312_v43  ;;  %10566 = vmatmul.msk.f32.vlgmr.msra.gmra.mxu2 %vm1857_vm1, %v8360_v19 }
 0xa97   : > { %11679 = vrcp.f32 %v8291_v59  ;;  %8771 = vmatpush.msra.mxu2 %v10923_v8  ;;  %10584 = vmatmul.msk.f32.vlgmr.msra.gmra.mxu0 %vm1857_vm1, %v8378_v63 }
 0xa9c   : > { %v11678_v50 = vpop.eup %11677 }
 0xa9d   : > { %v11680_v27 = vpop.eup %11679  ;;  %v8382_v41 = vmul.f32 %v11678_v50, %v15335_v34  ;;  %v8249_v38 = vpop.xlane.xlu2 %8248  ;;  %v10924_v34 = vunpack.i.h.bf16 %v15117_v45  ;;  %v8216_v45 = vmul.f32 1.442695, %v8157_v33 }
 0xa9e   : > { %v8375_v22 = vmul.f32 %v11680_v27, %v15333_v46  ;;  %11681 = vrcp.f32 %v8249_v38 }
 0xa9f   : > { %10588 = vmatmul.msk.f32.vlgmr.msrb.gmra.mxu0 %vm1857_vm1, %v8382_v41  ;;  %v16695_v41 = vld [vmem:[#allocation21_spill] sm:$0xff] }
 0xaa0   : > { %10581 = vmatmul.msk.f32.vlgmr.msra.gmra.mxu1 %vm1857_vm1, %v8375_v22  ;;  %v8303_v20 = vpop.xlane.xlu1 %8302 }
 0xaa1   : > { %11683 = vrcp.f32 %v8303_v20 }
 0xaa4   : > { %v11682_v4 = vpop.eup %11681 }
 0xaa5   : > { %v8361_v28 = vmul.f32 %v11682_v4, %v15343_v57  ;;  %v8258_v47 = vpop.xlane.xlu2 %8257 }
 0xaa6   : > { %11685 = vrcp.f32 %v8258_v47 }
 0xaa7   : > { %v11684_v1 = vpop.eup %11683  ;;  %10567 = vmatmul.msk.f32.vlgmr.msrb.gmra.mxu3 %vm1857_vm1, %v8361_v28  ;;  %11687 = vpow2.f32 %v8220_v42 }
 0xaa8   : > { %v8379_v46 = vmul.f32 %v11684_v1, %v15348_v48  ;;  %8797 = vmatpush.msrb.mxu3 %v10924_v34  ;;  %v15491_v39 = vpop.permute.xlu0 %10971 }
 0xaa9   : > { %v10973_v16 = vunpack.i.l.bf16 %v15491_v39  ;;  %v10974_v8 = vunpack.i.h.bf16 %v15491_v39 }
 0xaab   : > { %9057 = vmatpush.msrb.mxu1 %v10973_v16  ;;  %v9606_v27 = vsel %vm1024_vm0, %v16694_v25, %v10974_v8  ;;  %v10682_v25 = vld [vmem:[%s15895_s4] sm:$0xff] }
 0xaac   : > { %v11686_v57 = vpop.eup %11685  ;;  %10585 = vmatmul.msk.f32.vlgmr.msrb.gmra.mxu1 %vm1857_vm1, %v8379_v46 }
 0xaad   : > { %v8364_v53 = vmul.f32 %v11686_v57, %v15352_v10  ;;  %v8261_v37 = vpop.xlane.xlu2 %8260  ;;  %v15499_v48 = vpop.eup %11687 }
 0xaae   : > { %11689 = vrcp.f32 %v8261_v37  ;;  %v8313_v18 = vsel %vm1857_vm1, %v15499_v48, 0.0 }
 0xaaf   : > { %10570 = vmatmul.msk.f32.vlgmr.msrb.gmra.mxu2 %vm1857_vm1, %v8364_v53  ;;  %11691 = vpow2.f32 %v8216_v45  ;;  %v16696_v45 = vld [vmem:[#allocation25_spill] sm:$0xff] }
 0xab0   : > { %8875 = vmatpush.msrb.mxu2 %v10938_v26 }
 0xab3   : > { %8314 = vadd.xlane.f32.xlu1 %v8313_v18 }
 0xab4   : > { %v11690_v13 = vpop.eup %11689 }
 0xab5   : > { %v8365_v6 = vmul.f32 %v11690_v13, %v15360_v49  ;;  %v15506_v10 = vpop.eup %11691  ;;  %v15524_v14 = vpop.permute.xlu2 %10966 }
 0xab6   : > { %v8307_v60 = vsel %vm1857_vm1, %v15506_v10, 0.0 }
 0xab7   : > { %10571 = vmatmul.msk.f32.vlgmr.msra.gmra.mxu3 %vm1857_vm1, %v8365_v6  ;;  %v16697_v6 = vld [vmem:[#allocation13_spill] sm:$0xff] }
 0xab8   : > { %8901 = vmatpush.msra.mxu3 %v10939_v32  ;;  %v10977_v2 = vpop.permute.xlu1 %10976 }
 0xab9   : > { %v10978_v63 = vunpack.i.l.bf16 %v10977_v2  ;;  %v10979_v34 = vunpack.i.h.bf16 %v10977_v2 }
 0xabb   : > { %8308 = vadd.xlane.f32.xlu1 %v8307_v60  ;;  %v9607_v38 = vsel %vm1024_vm0, %v16695_v41, %v10978_v63  ;;  %v10683_v63 = vld [vmem:[%s15895_s4 + $0x8] sm:$0xff] }
 0xad2   : > { %v8435_v24 = vpop.f32.mrf.mxu1 }
 0xad3   : > { %v8270_v58 = vpop.xlane.xlu0 %8269 }
 0xad4   : > { %11693 = vrcp.f32 %v8270_v58  ;;  %11021 = vrot.lane.b32.xlu1 %v11020_v35, %s11729_s23 }
 0xad7   : > { %v8409_v49 = vpop.f32.mrf.mxu0 }
 0xad8   : > { %v11000_v23 = vpack.i.bf16 %v8435_v24, %v8409_v49 }
 0xada   : > { %v11694_v9 = vpop.eup %11693  ;;  %11001 = vrot.lane.b32.xlu0 %v11000_v23, %s11727_s21  ;;  %v8222_v23 = vmul.f32 1.442695, %v8160_v31  ;;  %v16716_v31 = vld [vmem:[#allocation86_spill] sm:$0xff] }
 0xadb   : > { %v8368_v0 = vmul.f32 %v11694_v9, %v15394_v12  ;;  %v8273_v44 = vpop.xlane.xlu0 %8272 }
 0xadc   : > { %11695 = vrcp.f32 %v8273_v44  ;;  %11041 = vrot.lane.b32.xlu1 %v11040_v17, %s11729_s23  ;;  %v10686_v44 = vld [vmem:[%s15895_s4 + $0x20] sm:$0xff] }
 0xadd   : > { %10574 = vmatmul.msk.f32.vlgmr.msra.gmra.mxu2 %vm1857_vm1, %v8368_v0  ;;  %v10688_v0 = vld [vmem:[%s15895_s4 + $0x30] sm:$0xff] }
 0xade   : > { %8979 = vmatpush.msra.mxu2 %v10953_v56  ;;  %v10685_v56 = vld [vmem:[%s15895_s4 + $0x18] sm:$0xff] }
 0xadf   : > { %v8539_v12 = vpop.f32.mrf.mxu1 }
 0xae2   : > { %v11696_v15 = vpop.eup %11695 }
 0xae3   : > { %v8369_v21 = vmul.f32 %v11696_v15, %v15402_v51  ;;  %v8297_v55 = vpop.xlane.xlu1 %8296 }
 0xae5   : > { %10575 = vmatmul.msk.f32.vlgmr.msrb.gmra.mxu3 %vm1857_vm1, %v8369_v21  ;;  %v16698_v21 = vld [vmem:[#allocation240_spill] sm:$0xff] }
 0xae6   : > { %9005 = vmatpush.msrb.mxu3 %v10954_v40  ;;  %v16699_v40 = vld [vmem:[#allocation98_spill] sm:$0xff] }
 0xae7   : > { %v8513_v7 = vpop.f32.mrf.mxu0 }
 0xae8   : > { %v11005_v19 = vpack.i.bf16 %v8539_v12, %v8513_v7  ;;  %v16700_v12 = vpack.i.bf16 %v16698_v21, %v16699_v40  ;;  %v10684_v7 = vld [vmem:[%s15895_s4 + $0x10] sm:$0xff] }
 0xaea   : > { %11006 = vrot.lane.b32.xlu0 %v11005_v19, %s11727_s21 }
 0xaee   : > { %v10982_v43 = vpop.permute.xlu0 %10981  ;;  %v8282_v59 = vpop.xlane.xlu2 %8281 }
 0xaef   : > { %v10984_v50 = vunpack.i.h.bf16 %v10982_v43  ;;  %v10983_v51 = vunpack.i.l.bf16 %v10982_v43  ;;  %11697 = vrcp.f32 %v8282_v59 }
 0xaf1   : > { %v15533_v22 = vsel %vm9634_vm2, %v9606_v27, %v10983_v51  ;;  %v15536_v20 = vsel %vm9634_vm2, %v9607_v38, %v10984_v50  ;;  %v16701_v51 = vld [vmem:[#allocation215_spill] sm:$0xff]  ;;  %v16703_v38 = vld [vmem:[#allocation50_spill] sm:$0xff] }
 0xaf5   : > { %v11698_v4 = vpop.eup %11697 }
 0xaf6   : > { %v8372_v42 = vmul.f32 %v11698_v4, %v15426_v11  ;;  %v10987_v28 = vpop.permute.xlu0 %10986  ;;  %v8285_v47 = vpop.xlane.xlu2 %8284 }
 0xaf7   : > { %11699 = vrcp.f32 %v8285_v47  ;;  %v10989_v46 = vunpack.i.h.bf16 %v10987_v28  ;;  %v10988_v26 = vunpack.i.l.bf16 %v10987_v28  ;;  %v16705_v47 = vld [vmem:[#allocation196_spill] sm:$0xff] }
 0xaf8   : > { %10578 = vmatmul.msk.f32.vlgmr.msrb.gmra.mxu2 %vm1857_vm1, %v8372_v42  ;;  %11701 = vrcp.f32 %v8297_v55 }
 0xaf9   : > { %9083 = vmatpush.msrb.mxu2 %v10979_v34  ;;  %v9608_v32 = vsel %vm1024_vm0, %v16697_v6, %v10989_v46  ;;  %v16706_v34 = vld [vmem:[#allocation216_spill] sm:$0xff]  ;;  %v16707_v46 = vld [vmem:[#allocation102_spill] sm:$0xff]  ;;  %v16713_v6 = vld [vmem:[#allocation41_spill] sm:$0xff] }
 0xafb   : > { %v10992_v1 = vpop.permute.xlu1 %10991 }
 0xafc   : > { %v10994_v39 = vunpack.i.h.bf16 %v10992_v1  ;;  %v10993_v33 = vunpack.i.l.bf16 %v10992_v1  ;;  %v11055_v1 = vpack.i.bf16 %v16706_v34, %v16705_v47  ;;  %v16735_v47 = vld [vmem:[#allocation23_spill] sm:$0xff] }
 0xafd   : > { %v11700_v16 = vpop.eup %11699 }
 0xafe   : > { %v8373_v57 = vmul.f32 %v11700_v16, %v15438_v5  ;;  %v9609_v53 = vsel %vm1024_vm0, %v16696_v45, %v10993_v33  ;;  %v10997_v37 = vpop.permute.xlu0 %10996  ;;  %v8294_v11 = vpop.xlane.xlu2 %8293  ;;  %9161 = vmatpush.msra.mxu1 %v10994_v39  ;;  %v16708_v39 = vld [vmem:[#allocation76_spill] sm:$0xff]  ;;  %v16709_v33 = vld [vmem:[#allocation54_spill] sm:$0xff]  ;;  %v16710_v16 = vld [vmem:[#allocation147_spill] sm:$0xff] }
 0xaff   : > { %v10999_v18 = vunpack.i.h.bf16 %v10997_v37  ;;  %v10998_v13 = vunpack.i.l.bf16 %v10997_v37  ;;  %11703 = vrcp.f32 %v8294_v11  ;;  %v11702_v52 = vpop.eup %11701  ;;  %v16711_v45 = vld [vmem:[#allocation222_spill] sm:$0xff] }
 0xb00   : > { %10579 = vmatmul.msk.f32.vlgmr.msra.gmra.mxu3 %vm1857_vm1, %v8373_v57  ;;  %v8377_v58 = vmul.f32 %v11702_v52, %v15414_v62  ;;  %v8161_v57 = vsub.f32 %v16710_v16, %v16709_v33 }
 0xb01   : > { %v15547_v60 = vsel %vm9634_vm2, %v9608_v32, %v10998_v13  ;;  %v15550_v5 = vsel %vm9634_vm2, %v9609_v53, %v10999_v18  ;;  %9109 = vmatpush.msra.mxu3 %v10988_v26  ;;  %v16712_v53 = vld [vmem:[#allocation235_spill] sm:$0xff]  ;;  %v16714_v32 = vld [vmem:[#allocation176_spill] sm:$0xff] }
 0xb02   : > { %v11070_v37 = vpack.i.bf16 %v16712_v53, %v16711_v45  ;;  %v8224_v11 = vmul.f32 1.442695, %v8161_v57  ;;  %v16715_v52 = vpack.i.bf16 %v16713_v6, %v16714_v32  ;;  %v16741_v6 = vld [vmem:[#allocation69_spill] sm:$0xff] }
 0xb05   : > { %v11704_v35 = vpop.eup %11703 }
 0xb06   : > { %v8376_v24 = vmul.f32 %v11704_v35, %v15455_v61  ;;  %v8306_v49 = vpop.xlane.xlu2 %8305  ;;  %v10689_v61 = vld [vmem:[%s15895_s4 + $0x38] sm:$0xff] }
 0xb07   : > { %11705 = vrcp.f32 %v8306_v49  ;;  %9784 = vmatpush.bf16.msra.mxu0 %v10689_v61  ;;  %v16717_v35 = vld [vmem:[#allocation133_spill] sm:$0xff] }
 0xb08   : > { %10582 = vmatmul.msk.f32.vlgmr.msra.gmra.mxu2 %vm1857_vm1, %v8376_v24  ;;  %10583 = vmatmul.msk.f32.vlgmr.msrb.gmra.mxu3 %vm1857_vm1, %v8377_v58  ;;  %11707 = vpow2.f32 %v8222_v23  ;;  %v11085_v58 = vpack.i.bf16 %v16717_v35, %v16716_v31  ;;  %v16718_v24 = vld [vmem:[#allocation194_spill] sm:$0xff] }
 0xb09   : > { %v8461_v9 = vpop.f32.mrf.mxu2  ;;  %v16719_v23 = vld [vmem:[#allocation238_spill] sm:$0xff] }
 0xb0a   : > { %v8487_v3 = vpop.f32.mrf.mxu3 }
 0xb0b   : > { %v11010_v36 = vpack.i.bf16 %v8487_v3, %v8461_v9  ;;  %9785 = vmatpush.bf16.msra.mxu0 %v10688_v0  ;;  %v16723_v0 = vld [vmem:[#allocation150_spill] sm:$0xff] }
 0xb0d   : > { %v11706_v17 = vpop.eup %11705  ;;  %11011 = vrot.lane.b32.xlu2 %v11010_v36, %s11727_s21 }
 0xb0e   : > { %v8380_v30 = vmul.f32 %v11706_v17, %v15471_v29  ;;  %v15561_v54 = vpop.eup %11707  ;;  %v10687_v29 = vld [vmem:[%s15895_s4 + $0x28] sm:$0xff]  ;;  %v16720_v17 = vld [vmem:[#allocation22_spill] sm:$0xff] }
 0xb0f   : > { %v8316_v62 = vsel %vm1857_vm1, %v15561_v54, 0.0  ;;  %9786 = vmatpush.bf16.msra.mxu0 %v10687_v29  ;;  %v16724_v29 = vld [vmem:[#allocation72_spill] sm:$0xff] }
 0xb10   : > { %10586 = vmatmul.msk.f32.vlgmr.msrb.gmra.mxu2 %vm1857_vm1, %v8380_v30  ;;  %v16721_v30 = vld [vmem:[#allocation127_spill] sm:$0xff] }
 0xb13   : > { %9787 = vmatpush.bf16.msra.mxu0 %v10686_v44  ;;  %v11100_v44 = vpack.i.bf16 %v16724_v29, %v16723_v0  ;;  %v16748_v0 = vld [vmem:[#allocation210_spill] sm:$0xff] }
 0xb14   : > { %8317 = vadd.xlane.f32.xlu0 %v8316_v62  ;;  %v16722_v62 = vpack.i.bf16 %v16720_v17, %v16721_v30 }
 0xb17   : > { %9788 = vmatpush.bf16.msra.mxu0 %v10685_v56  ;;  %v16725_v56 = vld [vmem:[#allocation187_spill] sm:$0xff] }
 0xb19   : > { %v8565_v2 = vpop.f32.mrf.mxu2 }
 0xb1b   : > { %9789 = vmatpush.bf16.msra.mxu0 %v10684_v7 }
 0xb1f   : > { %9790 = vmatpush.bf16.msra.mxu0 %v10683_v63 }
 0xb23   : > { %9791 = vmatpush.bf16.msra.mxu0 %v10682_v25 }
 0xb26   : > { %v8315_v15 = vpop.xlane.xlu1 %8314 }
 0xb27   : > { %11709 = vrcp.f32 %v8315_v15  ;;  %v16726_v15 = vld [vmem:[#allocation42_spill] sm:$0xff] }
 0xb28   : > { %11026 = vrot.lane.b32.xlu0 %v16700_v12, %s11728_s24  ;;  %v16727_v21 = vpack.i.bf16 %v16725_v56, %v16726_v15  ;;  %v16751_v56 = vld [vmem:[#allocation223_spill] sm:$0xff] }
 0xb2a   : > { %v8591_v19 = vpop.f32.mrf.mxu3 }
 0xb2b   : > { %v11015_v8 = vpack.i.bf16 %v8591_v19, %v8565_v2  ;;  %v16728_v2 = vld [vmem:[#allocation231_spill] sm:$0xff]  ;;  %v16729_v19 = vld [vmem:[#allocation217_spill] sm:$0xff] }
 0xb2d   : > { %v11710_v43 = vpop.eup %11709  ;;  %11016 = vrot.lane.b32.xlu2 %v11015_v8, %s11727_s21  ;;  %v11115_v8 = vpack.i.bf16 %v16729_v19, %v16728_v2 }
 0xb2e   : > { %v8383_v59 = vmul.f32 %v11710_v43, %v15499_v48  ;;  %v8309_v50 = vpop.xlane.xlu1 %8308  ;;  %v16702_v48 = vld [vmem:[#allocation30_spill] sm:$0xff] }
 0xb2f   : > { %11711 = vrcp.f32 %v8309_v50  ;;  %v16704_v55 = vpack.i.bf16 %v16702_v48, %v16703_v38  ;;  %v16730_v50 = vld [vmem:[#allocation45_spill] sm:$0xff]  ;;  %v10969_v38 = vunpack.i.h.bf16 %v15524_v14 }
 0xb30   : > { %10589 = vmatmul.msk.f32.vlgmr.msra.gmra.mxu1 %vm1857_vm1, %v8383_v59  ;;  %11036 = vrot.lane.b32.xlu0 %v16701_v51, %s11729_s23  ;;  %11713 = vpow2.f32 %v8224_v11  ;;  %v16731_v51 = vld [vmem:[#allocation49_spill] sm:$0xff] }
 0xb31   : > { %v11120_v25 = vpack.i.bf16 %v16731_v51, %v16730_v50  ;;  %v16737_v11 = vld [vmem:[#allocation189_spill] sm:$0xff] }
 0xb32   : > { %v8669_v4 = vpop.f32.mrf.mxu2 }
 0xb35   : > { %v11712_v27 = vpop.eup %11711 }
 0xb36   : > { %v8381_v41 = vmul.f32 %v11712_v27, %v15506_v10  ;;  %v11060_v10 = vpack.i.bf16 %v16708_v39, %v16707_v46  ;;  %v15627_v36 = vpop.eup %11713  ;;  %v16732_v27 = vld [vmem:[#allocation145_spill] sm:$0xff] }
 0xb37   : > { %v8319_v61 = vsel %vm1857_vm1, %v15627_v36, 0.0  ;;  %v10958_v48 = vunpack.i.l.bf16 %v16732_v27 }
 0xb38   : > { %10587 = vmatmul.msk.f32.vlgmr.msra.gmra.mxu3 %vm1857_vm1, %v8381_v41  ;;  %11046 = vrot.lane.b32.xlu0 %v16704_v55, %s11728_s24  ;;  %v10959_v41 = vunpack.i.h.bf16 %v16732_v27  ;;  %v10968_v55 = vunpack.i.l.bf16 %v15524_v14  ;;  %v8643_v14 = vpop.f32.mrf.mxu1 }
 0xb3a   : > { %v8695_v42 = vpop.f32.mrf.mxu3  ;;  %v9605_v34 = vsel %vm1024_vm0, %v16735_v47, %v10959_v41 }
 0xb3b   : > { %v11050_v28 = vpack.i.bf16 %v8695_v42, %v8669_v4  ;;  %v16734_v4 = vld [vmem:[#allocation148_spill] sm:$0xff]  ;;  %v9638_v33 = vsel %vm9634_vm2, %v9605_v34, %v10969_v38 }
 0xb3d   : > { %11051 = vrot.lane.b32.xlu1 %v11050_v28, %s11727_s21 }
 0xb40   : > { %11056 = vrot.lane.b32.xlu0 %v11055_v1, %s11729_s23  ;;  %v16736_v1 = vld [vmem:[#allocation114_spill] sm:$0xff]  ;;  %v8747_v31 = vpop.f32.mrf.mxu1 }
 0xb41   : > { %v9604_v46 = vsel %vm1024_vm0, %v16736_v1, %v10958_v48 }
 0xb42   : > { %v9637_v16 = vsel %vm9634_vm2, %v9604_v46, %v10968_v55 }
 0xb45   : > { %11061 = vrot.lane.b32.xlu1 %v11060_v10, %s11728_s24 }
 0xb48   : > { %11071 = vrot.lane.b32.xlu0 %v11070_v37, %s11729_s23 }
 0xb4c   : > { %v11002_v26 = vpop.permute.xlu0 %11001 }
 0xb4d   : > { %v11004_v18 = vunpack.i.h.bf16 %v11002_v26  ;;  %v11003_v13 = vunpack.i.l.bf16 %v11002_v26  ;;  %11076 = vrot.lane.b32.xlu1 %v16715_v52, %s11728_s24  ;;  %v16738_v26 = vld [vmem:[#allocation208_spill] sm:$0xff] }
 0xb4f   : > { %v9669_v49 = vsel %vm9667_vm3, %v16718_v24, %v11004_v18  ;;  %v9668_v9 = vsel %vm9667_vm3, %v16719_v23, %v11003_v13  ;;  %v16739_v18 = vpack.i.bf16 %v16737_v11, %v16738_v26  ;;  %v16740_v13 = vld [vmem:[#allocation125_spill] sm:$0xff] }
 0xb50   : > { %v9700_v3 = vpack.c.bf16 %v9669_v49, %v9668_v9  ;;  %11086 = vrot.lane.b32.xlu0 %v11085_v58, %s11729_s23  ;;  %v11145_v32 = vpack.i.bf16 %v16741_v6, %v16740_v13  ;;  %v16742_v58 = vld [vmem:[#allocation47_spill] sm:$0xff]  ;;  %v16743_v24 = vld [vmem:[#allocation29_spill] sm:$0xff] }
 0xb51   : > { %v16744_v49 = vpack.i.bf16 %v16742_v58, %v16743_v24  ;;  %v16745_v23 = vld [vmem:[#allocation237_spill] sm:$0xff] }
 0xb52   : > { %9792 = vmatmul.bf16.vlgmr.msra.gmra.mxu0 %v9700_v3  ;;  %v16746_v9 = vld [vmem:[#allocation101_spill] sm:$0xff] }
 0xb53   : > { %v11160_v3 = vpack.i.bf16 %v16746_v9, %v16745_v23 }
 0xb55   : > { %11091 = vrot.lane.b32.xlu1 %v16722_v62, %s11728_s24 }
 0xb56   : > { %8320 = vadd.xlane.f32.xlu2 %v8319_v61  ;;  %v16747_v61 = vld [vmem:[#allocation226_spill] sm:$0xff] }
 0xb57   : > { %v16749_v29 = vpack.i.bf16 %v16747_v61, %v16748_v0  ;;  %v16760_v61 = vld [vmem:[#allocation168_spill] sm:$0xff] }
 0xb58   : > { %11101 = vrot.lane.b32.xlu0 %v11100_v44, %s11729_s23  ;;  %v16750_v44 = vld [vmem:[#allocation202_spill] sm:$0xff] }
 0xb59   : > { %v11175_v15 = vpack.i.bf16 %v16751_v56, %v16750_v44 }
 0xb5c   : > { %v11007_v40 = vpop.permute.xlu0 %11006 }
 0xb5d   : > { %11106 = vrot.lane.b32.xlu1 %v16727_v21, %s11728_s24  ;;  %v11009_v12 = vunpack.i.h.bf16 %v11007_v40  ;;  %v11008_v7 = vunpack.i.l.bf16 %v11007_v40  ;;  %v8851_v21 = vpop.f32.mrf.mxu1  ;;  %v16752_v40 = vld [vmem:[#allocation37_spill] sm:$0xff] }
 0xb5f   : > { %v9672_v63 = vsel %vm9667_vm3, %v15533_v22, %v11008_v7  ;;  %v9673_v43 = vsel %vm9667_vm3, %v15536_v20, %v11009_v12  ;;  %v16733_v22 = vld [vmem:[#allocation117_spill] sm:$0xff]  ;;  %v8617_v20 = vpop.f32.mrf.mxu0  ;;  %v16753_v12 = vld [vmem:[#allocation52_spill] sm:$0xff] }
 0xb60   : > { %11116 = vrot.lane.b32.xlu0 %v11115_v8, %s11729_s23  ;;  %v9702_v59 = vpack.c.bf16 %v9673_v43, %v9672_v63  ;;  %v11130_v42 = vpack.i.bf16 %v16734_v4, %v16733_v22  ;;  %v11030_v37 = vpack.i.bf16 %v8643_v14, %v8617_v20  ;;  %v8773_v30 = vpop.f32.mrf.mxu2  ;;  %v11180_v7 = vpack.i.bf16 %v16753_v12, %v16752_v40  ;;  %v16754_v8 = vld [vmem:[#allocation129_spill] sm:$0xff]  ;;  %v16755_v63 = vld [vmem:[#allocation232_spill] sm:$0xff] }
 0xb61   : > { %v11190_v43 = vpack.i.bf16 %v16755_v63, %v16754_v8  ;;  %v16756_v22 = vld [vmem:[#allocation225_spill] sm:$0xff] }
 0xb62   : > { %v16757_v4 = vld [vmem:[#allocation209_spill] sm:$0xff] }
 0xb65   : > { %11121 = vrot.lane.b32.xlu1 %v11120_v25, %s11728_s24  ;;  %v8955_v20 = vpop.f32.mrf.mxu1 }
 0xb67   : > { %v11012_v28 = vpop.permute.xlu2 %11011  ;;  %v8721_v52 = vpop.f32.mrf.mxu0 }
 0xb68   : > { %v11014_v39 = vunpack.i.h.bf16 %v11012_v28  ;;  %v11013_v10 = vunpack.i.l.bf16 %v11012_v28  ;;  %11131 = vrot.lane.b32.xlu0 %v11130_v42, %s11729_s23  ;;  %v11065_v35 = vpack.i.bf16 %v8747_v31, %v8721_v52  ;;  %v8799_v17 = vpop.f32.mrf.mxu3  ;;  %v16758_v42 = vpack.i.bf16 %v16756_v22, %v16757_v4 }
 0xb69   : > { %v11080_v62 = vpack.i.bf16 %v8799_v17, %v8773_v30  ;;  %v16759_v30 = vld [vmem:[#allocation2_spill] sm:$0xff] }
 0xb6a   : > { %v9670_v57 = vsel %vm9667_vm3, %v9637_v16, %v11013_v10  ;;  %v9671_v45 = vsel %vm9667_vm3, %v9638_v33, %v11014_v39 }
 0xb6b   : > { %v9701_v53 = vpack.c.bf16 %v9671_v45, %v9670_v57 }
 0xb6d   : > { %11136 = vrot.lane.b32.xlu1 %v16739_v18, %s11728_s24  ;;  %9797 = vmatmul.bf16.gmra.mxu0 %v9701_v53  ;;  %v9059_v39 = vpop.f32.mrf.mxu1 }
 0xb6e   : > { %11031 = vrot.lane.b32.xlu2 %v11030_v37, %s11727_s21 }
 0xb6f   : > { %v8825_v2 = vpop.f32.mrf.mxu0 }
 0xb70   : > { %11146 = vrot.lane.b32.xlu0 %v11145_v32, %s11729_s23  ;;  %v11095_v19 = vpack.i.bf16 %v8851_v21, %v8825_v2  ;;  %v11022_v32 = vpop.permute.xlu1 %11021 }
 0xb71   : > { %v11024_v31 = vunpack.i.h.bf16 %v11022_v32 }
 0xb75   : > { %11151 = vrot.lane.b32.xlu1 %v16744_v49, %s11728_s24 }
 0xb76   : > { %11066 = vrot.lane.b32.xlu2 %v11065_v35, %s11727_s21  ;;  %v11023_v35 = vunpack.i.l.bf16 %v11022_v32 }
 0xb77   : > { %v8929_v28 = vpop.f32.mrf.mxu0 }
 0xb78   : > { %11161 = vrot.lane.b32.xlu0 %v11160_v3, %s11729_s23  ;;  %v11125_v34 = vpack.i.bf16 %v8955_v20, %v8929_v28  ;;  %v9610_v0 = vsel %vm1024_vm0, %v16760_v61, %v11023_v35  ;;  %v11042_v56 = vpop.permute.xlu1 %11041 }
 0xb79   : > { %v11044_v63 = vunpack.i.h.bf16 %v11042_v56 }
 0xb7b   : > { %v8877_v48 = vpop.f32.mrf.mxu2 }
 0xb7d   : > { %11166 = vrot.lane.b32.xlu1 %v16749_v29, %s11728_s24  ;;  %9802 = vmatmul.bf16.gmra.mxu0 %v9702_v59 }
 0xb7e   : > { %11081 = vrot.lane.b32.xlu2 %v11080_v62, %s11727_s21  ;;  %v9611_v62 = vsel %vm1024_vm0, %v16759_v30, %v11024_v31 }
 0xb7f   : > { %v9033_v33 = vpop.f32.mrf.mxu0 }
 0xb80   : > { %11176 = vrot.lane.b32.xlu0 %v11175_v15, %s11729_s23  ;;  %v11155_v14 = vpack.i.bf16 %v9059_v39, %v9033_v33 }
 0xb83   : > { %v8903_v25 = vpop.f32.mrf.mxu3 }
 0xb84   : > { %v11110_v55 = vpack.i.bf16 %v8903_v25, %v8877_v48  ;;  %v16762_v48 = vld [vmem:[#allocation28_spill] sm:$0xff] }
 0xb85   : > { %11181 = vrot.lane.b32.xlu1 %v11180_v7, %s11728_s24 }
 0xb86   : > { %11096 = vrot.lane.b32.xlu2 %v11095_v19, %s11727_s21 }
 0xb87   : > { %v11017_v59 = vpop.permute.xlu2 %11016  ;;  %v8318_v47 = vpop.xlane.xlu0 %8317 }
 0xb88   : > { %v11019_v50 = vunpack.i.h.bf16 %v11017_v59  ;;  %v11018_v51 = vunpack.i.l.bf16 %v11017_v59  ;;  %11191 = vrot.lane.b32.xlu0 %v11190_v43, %s11729_s23  ;;  %11715 = vrcp.f32 %v8318_v47  ;;  %v9137_v13 = vpop.f32.mrf.mxu0  ;;  %v11043_v43 = vunpack.i.l.bf16 %v11042_v56 }
 0xb8a   : > { %v9674_v27 = vsel %vm9667_vm3, %v15547_v60, %v11018_v51  ;;  %v9675_v41 = vsel %vm9667_vm3, %v15550_v5, %v11019_v50 }
 0xb8b   : > { %v9703_v38 = vpack.c.bf16 %v9675_v41, %v9674_v27  ;;  %v8981_v60 = vpop.f32.mrf.mxu2  ;;  %v9007_v1 = vpop.f32.mrf.mxu3  ;;  %v16761_v27 = vld [vmem:[#allocation11_spill] sm:$0xff] }
 0xb8c   : > { %v11140_v46 = vpack.i.bf16 %v9007_v1, %v8981_v60  ;;  %v9613_v41 = vsel %vm1024_vm0, %v16761_v27, %v11044_v63 }
 0xb8d   : > { %11196 = vrot.lane.b32.xlu1 %v16758_v42, %s11728_s24  ;;  %9807 = vmatmul.bf16.gmra.mxu0 %v9703_v38  ;;  %s9983_s24 = sshll.u32 %s16784_s15, 3  ;;  %v9612_v38 = vsel %vm1024_vm0, %v16762_v48, %v11043_v43 }
 0xb8e   : > { %11111 = vrot.lane.b32.xlu2 %v11110_v55, %s11727_s21  ;;  %v11716_v10 = vpop.eup %11715  ;;  %s15723_s30 = scalar_lea.vmem %s15899_s8, %s9983_s24 }
 0xb8f   : > { %v8384_v53 = vmul.f32 %v11716_v10, %v15561_v54  ;;  %v15718_v54 = vld [vmem:[%s15898_s7] ss:$0 sm:$0xff] }
 0xb93   : > { %v9085_v37 = vpop.f32.mrf.mxu2 }
 0xb96   : > { %11126 = vrot.lane.b32.xlu2 %v11125_v34, %s11727_s21 }
 0xb9a   : > { %v11027_v5 = vpop.permute.xlu0 %11026 }
 0xb9b   : > { %v11029_v58 = vunpack.i.h.bf16 %v11027_v5  ;;  %v11028_v24 = vunpack.i.l.bf16 %v11027_v5 }
 0xb9d   : > { %v9643_v15 = vsel %vm9634_vm2, %v9610_v0, %v11028_v24  ;;  %v9644_v21 = vsel %vm9634_vm2, %v9611_v62, %v11029_v58  ;;  %v16765_v62 = vld [vmem:[#allocation38_spill] sm:$0xff]  ;;  %v16766_v0 = vld [vmem:[#allocation31_spill] sm:$0xff] }
 0xb9e   : > { %11141 = vrot.lane.b32.xlu2 %v11140_v46, %s11727_s21 }
 0xba2   : > { %v11037_v16 = vpop.permute.xlu0 %11036 }
 0xba3   : > { %v11039_v57 = vunpack.i.h.bf16 %v11037_v16  ;;  %v11038_v45 = vunpack.i.l.bf16 %v11037_v16 }
 0xba5   : > { %9213 = vmatpush.msrb.mxu3 %v11039_v57  ;;  %9187 = vmatpush.msra.mxu2 %v11038_v45  ;;  %v16764_v45 = vld [vmem:[#allocation18_spill] sm:$0xff] }
 0xba6   : > { %11156 = vrot.lane.b32.xlu2 %v11155_v14, %s11727_s21  ;;  %10590 = vmatmul.msk.f32.vlgmr.msra.gmra.mxu2 %vm1857_vm1, %v8384_v53  ;;  %v16763_v14 = vld [vmem:[#allocation6_spill] sm:$0xff] }
 0xbaa   : > { %v11047_v19 = vpop.permute.xlu0 %11046 }
 0xbab   : > { %v11049_v59 = vunpack.i.h.bf16 %v11047_v19  ;;  %v11048_v50 = vunpack.i.l.bf16 %v11047_v19 }
 0xbad   : > { %v9163_v18 = vpop.f32.mrf.mxu1  ;;  %v9645_v55 = vsel %vm9634_vm2, %v9612_v38, %v11048_v50  ;;  %v9646_v22 = vsel %vm9634_vm2, %v9613_v41, %v11049_v59  ;;  %v16767_v41 = vld [vmem:[#allocation36_spill] sm:$0xff]  ;;  %v16768_v38 = vld [vmem:[#allocation19_spill] sm:$0xff] }
 0xbae   : > { %v11185_v6 = vpack.i.bf16 %v9163_v18, %v9137_v13 }
 0xbaf   : > { %v11052_v8 = vpop.permute.xlu1 %11051 }
 0xbb0   : > { %v11054_v51 = vunpack.i.h.bf16 %v11052_v8  ;;  %v11053_v25 = vunpack.i.l.bf16 %v11052_v8 }
 0xbb2   : > { %v9678_v4 = vsel %vm9667_vm3, %v9645_v55, %v11053_v25  ;;  %v9679_v42 = vsel %vm9667_vm3, %v9646_v22, %v11054_v51  ;;  %v11057_v28 = vpop.permute.xlu0 %11056 }
 0xbb3   : > { %v9705_v20 = vpack.c.bf16 %v9679_v42, %v9678_v4  ;;  %v11059_v5 = vunpack.i.h.bf16 %v11057_v28  ;;  %v11058_v46 = vunpack.i.l.bf16 %v11057_v28 }
 0xbb5   : > { %v9615_v57 = vsel %vm1024_vm0, %v16763_v14, %v11059_v5  ;;  %v9614_v53 = vsel %vm1024_vm0, %v16764_v45, %v11058_v46 }
 0xbb7   : > { %v11062_v47 = vpop.permute.xlu1 %11061 }
 0xbb8   : > { %v11064_v39 = vunpack.i.h.bf16 %v11062_v47  ;;  %v11063_v10 = vunpack.i.l.bf16 %v11062_v47 }
 0xbbb   : > { %v9111_v11 = vpop.f32.mrf.mxu3 }
 0xbbc   : > { %v11170_v26 = vpack.i.bf16 %v9111_v11, %v9085_v37  ;;  %v9648_v37 = vsel %vm9634_vm2, %v9615_v57, %v11064_v39  ;;  %v9647_v11 = vsel %vm9634_vm2, %v9614_v53, %v11063_v10  ;;  %v16769_v57 = vld [vmem:[#allocation15_spill] sm:$0xff]  ;;  %v16770_v53 = vld [vmem:[#allocation33_spill] sm:$0xff] }
 0xbbe   : > { %11171 = vrot.lane.b32.xlu2 %v11170_v26, %s11727_s21 }
 0xbbf   : > { %v11077_v31 = vpop.permute.xlu1 %11076 }
 0xbc6   : > { %11186 = vrot.lane.b32.xlu2 %v11185_v6, %s11727_s21 }
 0xbc9   : > { %v8321_v52 = vpop.xlane.xlu2 %8320 }
 0xbca   : > { %11717 = vrcp.f32 %v8321_v52  ;;  %v11072_v52 = vpop.permute.xlu0 %11071 }
 0xbcf   : > { %v9793_v49 = vpop.f32.mrf.mxu0 }
 0xbd0   : > { %v11718_v23 = vpop.eup %11717  ;;  %v9794_v9 = vadd.f32 %v15718_v54, %v9793_v49  ;;  %v11074_v49 = vunpack.i.h.bf16 %v11072_v52 }
 0xbd1   : > { %v8385_v3 = vmul.f32 %v11718_v23, %v15627_v36  ;;  %v11032_v17 = vpop.permute.xlu2 %11031  ;;  %v11073_v23 = vunpack.i.l.bf16 %v11072_v52 }
 0xbd2   : > { %9873 = vst [vmem:[%s15723_s30] sm:$0xff] %v9794_v9  ;;  %v11034_v29 = vunpack.i.h.bf16 %v11032_v17  ;;  %v11033_v44 = vunpack.i.l.bf16 %v11032_v17  ;;  %v11079_v9 = vunpack.i.h.bf16 %v11077_v31  ;;  %v9617_v61 = vsel %vm1024_vm0, %v16765_v62, %v11074_v49 }
 0xbd3   : > { %10591 = vmatmul.msk.f32.vlgmr.msrb.gmra.mxu3 %vm1857_vm1, %v8385_v3  ;;  %v11078_v3 = vunpack.i.l.bf16 %v11077_v31 }
 0xbd4   : > { %v9676_v36 = vsel %vm9667_vm3, %v9643_v15, %v11033_v44  ;;  %v9677_v40 = vsel %vm9667_vm3, %v9644_v21, %v11034_v29  ;;  %v9616_v29 = vsel %vm1024_vm0, %v16766_v0, %v11073_v23  ;;  %v9650_v44 = vsel %vm9634_vm2, %v9617_v61, %v11079_v9 }
 0xbd5   : > { %v9704_v12 = vpack.c.bf16 %v9677_v40, %v9676_v36  ;;  %v9649_v56 = vsel %vm9634_vm2, %v9616_v29, %v11078_v3  ;;  %v16771_v3 = vld [vmem:[#allocation3_spill] sm:$0xff] }
 0xbd7   : > { %9812 = vmatmul.bf16.gmra.mxu0 %v9704_v12  ;;  %v9795_v7 = vpop.f32.mrf.mxu0 }
 0xbd8   : > { %v9796_v2 = vadd.f32 %v15718_v54, %v9795_v7  ;;  %v11087_v7 = vpop.permute.xlu0 %11086 }
 0xbd9   : > { %v11067_v60 = vpop.permute.xlu2 %11066  ;;  %v11089_v43 = vunpack.i.h.bf16 %v11087_v7  ;;  %v11088_v59 = vunpack.i.l.bf16 %v11087_v7 }
 0xbda   : > { %9874 = vst [vmem:[%s15723_s30 + $0x8] sm:$0xff] %v9796_v2  ;;  %v11069_v33 = vunpack.i.h.bf16 %v11067_v60  ;;  %v11068_v16 = vunpack.i.l.bf16 %v11067_v60  ;;  %v11092_v2 = vpop.permute.xlu1 %11091 }
 0xbdb   : > { %v11094_v50 = vunpack.i.h.bf16 %v11092_v2  ;;  %v11093_v51 = vunpack.i.l.bf16 %v11092_v2  ;;  %v9619_v48 = vsel %vm1024_vm0, %v16767_v41, %v11089_v43  ;;  %v9618_v55 = vsel %vm1024_vm0, %v16768_v38, %v11088_v59  ;;  %v16774_v59 = vld [vmem:[#allocation214_spill] sm:$0xff] }
 0xbdc   : > { %v9680_v18 = vsel %vm9667_vm3, %v9647_v11, %v11068_v16  ;;  %v9681_v13 = vsel %vm9667_vm3, %v9648_v37, %v11069_v33 }
 0xbdd   : > { %v9706_v32 = vpack.c.bf16 %v9681_v13, %v9680_v18  ;;  %v9652_v22 = vsel %vm9634_vm2, %v9619_v48, %v11094_v50  ;;  %v9651_v4 = vsel %vm9634_vm2, %v9618_v55, %v11093_v51 }
 0xbe0   : > { %v11102_v60 = vpop.permute.xlu0 %11101 }
 0xbe1   : > { %v11082_v58 = vpop.permute.xlu2 %11081  ;;  %v11104_v46 = vunpack.i.h.bf16 %v11102_v60  ;;  %v11103_v39 = vunpack.i.l.bf16 %v11102_v60  ;;  %v16775_v60 = vld [vmem:[#allocation213_spill] sm:$0xff] }
 0xbe2   : > { %v11084_v17 = vunpack.i.h.bf16 %v11082_v58  ;;  %v11083_v30 = vunpack.i.l.bf16 %v11082_v58 }
 0xbe3   : > { %v9621_v45 = vsel %vm1024_vm0, %v16769_v57, %v11104_v46  ;;  %v9620_v37 = vsel %vm1024_vm0, %v16770_v53, %v11103_v39 }
 0xbe4   : > { %v9682_v21 = vsel %vm9667_vm3, %v9649_v56, %v11083_v30  ;;  %v9683_v36 = vsel %vm9667_vm3, %v9650_v44, %v11084_v17  ;;  %v16772_v30 = vld [vmem:[#allocation27_spill] sm:$0xff] }
 0xbe5   : > { %v9707_v12 = vpack.c.bf16 %v9683_v36, %v9682_v21 }
 0xbe7   : > { %9817 = vmatmul.bf16.gmra.mxu0 %v9705_v20 }
 0xbe9   : > { %v11097_v8 = vpop.permute.xlu2 %11096 }
 0xbea   : > { %v9798_v34 = vpop.f32.mrf.mxu0  ;;  %v11099_v25 = vunpack.i.h.bf16 %v11097_v8  ;;  %v11098_v27 = vunpack.i.l.bf16 %v11097_v8 }
 0xbeb   : > { %v9799_v1 = vadd.f32 %v15718_v54, %v9798_v34 }
 0xbec   : > { %v9684_v20 = vsel %vm9667_vm3, %v9651_v4, %v11098_v27  ;;  %v9685_v28 = vsel %vm9667_vm3, %v9652_v22, %v11099_v25 }
 0xbed   : > { %9875 = vst [vmem:[%s15723_s30 + $0x10] sm:$0xff] %v9799_v1  ;;  %v9708_v34 = vpack.c.bf16 %v9685_v28, %v9684_v20  ;;  %v11107_v1 = vpop.permute.xlu1 %11106 }
 0xbee   : > { %v11109_v10 = vunpack.i.h.bf16 %v11107_v1  ;;  %v11108_v33 = vunpack.i.l.bf16 %v11107_v1 }
 0xbf0   : > { %v9654_v11 = vsel %vm9634_vm2, %v9621_v45, %v11109_v10 }
 0xbf1   : > { %v11112_v5 = vpop.permute.xlu2 %11111 }
 0xbf2   : > { %v9800_v26 = vpop.f32.mrf.mxu0  ;;  %v11114_v16 = vunpack.i.h.bf16 %v11112_v5  ;;  %v11113_v14 = vunpack.i.l.bf16 %v11112_v5  ;;  %v16776_v5 = vld [vmem:[#allocation141_spill] sm:$0xff] }
 0xbf3   : > { %v9801_v6 = vadd.f32 %v15718_v54, %v9800_v26  ;;  %v9653_v26 = vsel %vm9634_vm2, %v9620_v37, %v11108_v33 }
 0xbf4   : > { %v9686_v18 = vsel %vm9667_vm3, %v9653_v26, %v11113_v14  ;;  %v9687_v13 = vsel %vm9667_vm3, %v9654_v11, %v11114_v16 }
 0xbf5   : > { %9876 = vst [vmem:[%s15723_s30 + $0x18] sm:$0xff] %v9801_v6  ;;  %v9709_v6 = vpack.c.bf16 %v9687_v13, %v9686_v18  ;;  %v11122_v52 = vpop.permute.xlu1 %11121 }
 0xbf6   : > { %v11123_v49 = vunpack.i.l.bf16 %v11122_v52 }
 0xbf7   : > { %9822 = vmatmul.bf16.gmra.mxu0 %v9706_v32  ;;  %v11117_v32 = vpop.permute.xlu0 %11116 }
 0xbf8   : > { %v11118_v58 = vunpack.i.l.bf16 %v11117_v32 }
 0xbf9   : > { %v11127_v31 = vpop.permute.xlu2 %11126 }
 0xbfa   : > { %v9803_v35 = vpop.f32.mrf.mxu0  ;;  %v11129_v23 = vunpack.i.h.bf16 %v11127_v31  ;;  %v11128_v9 = vunpack.i.l.bf16 %v11127_v31  ;;  %v9622_v62 = vsel %vm1024_vm0, %v16772_v30, %v11118_v58 }
 0xbfb   : > { %v9804_v24 = vadd.f32 %v15718_v54, %v9803_v35  ;;  %v11119_v35 = vunpack.i.h.bf16 %v11117_v32  ;;  %v9655_v0 = vsel %vm9634_vm2, %v9622_v62, %v11123_v49 }
 0xbfc   : > { %v9688_v29 = vsel %vm9667_vm3, %v9655_v0, %v11128_v9 }
 0xbfd   : > { %9877 = vst [vmem:[%s15723_s30 + $0x20] sm:$0xff] %v9804_v24  ;;  %v11124_v24 = vunpack.i.h.bf16 %v11122_v52  ;;  %v9623_v17 = vsel %vm1024_vm0, %v16771_v3, %v11119_v35  ;;  %v11137_v21 = vpop.permute.xlu1 %11136  ;;  %v16778_v3 = vld [vmem:[#allocation153_spill] sm:$0xff] }
 0xbfe   : > { %v11139_v7 = vunpack.i.h.bf16 %v11137_v21  ;;  %v11138_v2 = vunpack.i.l.bf16 %v11137_v21 }
 0xbff   : > { %v9656_v61 = vsel %vm9634_vm2, %v9623_v17, %v11124_v24 }
 0xc00   : > { %v9689_v44 = vsel %vm9667_vm3, %v9656_v61, %v11129_v23  ;;  %v16777_v23 = vld [vmem:[#allocation12_spill] sm:$0xff] }
 0xc01   : > { %v9710_v56 = vpack.c.bf16 %v9689_v44, %v9688_v29  ;;  %v11142_v36 = vpop.permute.xlu2 %11141 }
 0xc02   : > { %v9805_v15 = vpop.f32.mrf.mxu0  ;;  %v11143_v8 = vunpack.i.l.bf16 %v11142_v36 }
 0xc03   : > { %v9806_v40 = vadd.f32 %v15718_v54, %v9805_v15  ;;  %v11132_v15 = vpop.permute.xlu0 %11131 }
 0xc05   : > { %9878 = vst [vmem:[%s15723_s30 + $0x28] sm:$0xff] %v9806_v40  ;;  %v11134_v40 = vunpack.i.h.bf16 %v11132_v15  ;;  %v11152_v55 = vpop.permute.xlu1 %11151 }
 0xc06   : > { %v11154_v20 = vunpack.i.h.bf16 %v11152_v55  ;;  %v11153_v28 = vunpack.i.l.bf16 %v11152_v55 }
 0xc07   : > { %9827 = vmatmul.bf16.gmra.mxu0 %v9707_v12  ;;  %v11133_v12 = vunpack.i.l.bf16 %v11132_v15 }
 0xc09   : > { %v9624_v50 = vsel %vm1024_vm0, %v16774_v59, %v11133_v12  ;;  %v11157_v22 = vpop.permute.xlu2 %11156  ;;  %v16779_v59 = vld [vmem:[#allocation43_spill] sm:$0xff] }
 0xc0a   : > { %v9808_v19 = vpop.f32.mrf.mxu0  ;;  %v9657_v25 = vsel %vm9634_vm2, %v9624_v50, %v11138_v2 }
 0xc0b   : > { %v9809_v63 = vadd.f32 %v15718_v54, %v9808_v19  ;;  %v11144_v19 = vunpack.i.h.bf16 %v11142_v36  ;;  %v9690_v27 = vsel %vm9667_vm3, %v9657_v25, %v11143_v8  ;;  %v11147_v38 = vpop.permute.xlu0 %11146 }
 0xc0c   : > { %v11149_v4 = vunpack.i.h.bf16 %v11147_v38 }
 0xc0d   : > { %9879 = vst [vmem:[%s15723_s30 + $0x30] sm:$0xff] %v9809_v63  ;;  %v16773_v63 = vld [vmem:[#allocation8_spill] sm:$0xff]  ;;  %v11167_v18 = vpop.permute.xlu1 %11166 }
 0xc0e   : > { %v9625_v43 = vsel %vm1024_vm0, %v16773_v63, %v11134_v40  ;;  %v9627_v1 = vsel %vm1024_vm0, %v16775_v60, %v11149_v4  ;;  %v11169_v31 = vunpack.i.h.bf16 %v11167_v18  ;;  %v11168_v35 = vunpack.i.l.bf16 %v11167_v18 }
 0xc0f   : > { %v9658_v51 = vsel %vm9634_vm2, %v9625_v43, %v11139_v7  ;;  %v9660_v39 = vsel %vm9634_vm2, %v9627_v1, %v11154_v20 }
 0xc10   : > { %v9691_v41 = vsel %vm9667_vm3, %v9658_v51, %v11144_v19  ;;  %v16780_v51 = vld [vmem:[#allocation40_spill] sm:$0xff] }
 0xc11   : > { %v9711_v48 = vpack.c.bf16 %v9691_v41, %v9690_v27 }
 0xc12   : > { %v9810_v42 = vpop.f32.mrf.mxu0 }
 0xc13   : > { %v9811_v47 = vadd.f32 %v15718_v54, %v9810_v42  ;;  %v11148_v42 = vunpack.i.l.bf16 %v11147_v38  ;;  %v11162_v26 = vpop.permute.xlu0 %11161 }
 0xc14   : > { %v11163_v32 = vunpack.i.l.bf16 %v11162_v26 }
 0xc15   : > { %9880 = vst [vmem:[%s15723_s30 + $0x38] sm:$0xff] %v9811_v47  ;;  %v11159_v47 = vunpack.i.h.bf16 %v11157_v22  ;;  %v9626_v46 = vsel %vm1024_vm0, %v16776_v5, %v11148_v42  ;;  %v11182_v21 = vpop.permute.xlu1 %11181 }
 0xc16   : > { %v9659_v10 = vsel %vm9634_vm2, %v9626_v46, %v11153_v28  ;;  %v9628_v17 = vsel %vm1024_vm0, %v16778_v3, %v11163_v32  ;;  %v11184_v2 = vunpack.i.h.bf16 %v11182_v21  ;;  %v11183_v19 = vunpack.i.l.bf16 %v11182_v21  ;;  %v16782_v32 = vld [vmem:[#allocation144_spill] sm:$0xff] }
 0xc17   : > { %9832 = vmatmul.bf16.gmra.mxu0 %v9708_v34  ;;  %v11158_v34 = vunpack.i.l.bf16 %v11157_v22  ;;  %v9693_v16 = vsel %vm9667_vm3, %v9660_v39, %v11159_v47  ;;  %v9661_v62 = vsel %vm9634_vm2, %v9628_v17, %v11168_v35 }
 0xc18   : > { %v11172_v13 = vpop.permute.xlu2 %11171 }
 0xc19   : > { %v9692_v33 = vsel %vm9667_vm3, %v9659_v10, %v11158_v34  ;;  %v11174_v24 = vunpack.i.h.bf16 %v11172_v13  ;;  %v11173_v49 = vunpack.i.l.bf16 %v11172_v13  ;;  %v16781_v13 = vld [vmem:[#allocation152_spill] sm:$0xff] }
 0xc1a   : > { %v9712_v45 = vpack.c.bf16 %v9693_v16, %v9692_v33 }
 0xc1b   : > { %v9694_v61 = vsel %vm9667_vm3, %v9661_v62, %v11173_v49  ;;  %v11177_v15 = vpop.permute.xlu0 %11176 }
 0xc1c   : > { %v11179_v40 = vunpack.i.h.bf16 %v11177_v15  ;;  %v11178_v12 = vunpack.i.l.bf16 %v11177_v15 }
 0xc1e   : > { %v9631_v50 = vsel %vm1024_vm0, %v16779_v59, %v11179_v40  ;;  %v9630_v25 = vsel %vm1024_vm0, %v16780_v51, %v11178_v12 }
 0xc1f   : > { %v9664_v27 = vsel %vm9634_vm2, %v9631_v50, %v11184_v2  ;;  %v9663_v41 = vsel %vm9634_vm2, %v9630_v25, %v11183_v19 }
 0xc20   : > { %v11187_v36 = vpop.permute.xlu2 %11186 }
 0xc21   : > { %v11189_v63 = vunpack.i.h.bf16 %v11187_v36  ;;  %v11188_v43 = vunpack.i.l.bf16 %v11187_v36 }
 0xc23   : > { %v9697_v38 = vsel %vm9667_vm3, %v9664_v27, %v11189_v63 }
 0xc27   : > { %9837 = vmatmul.bf16.gmra.mxu0 %v9709_v6  ;;  %v11164_v6 = vunpack.i.h.bf16 %v11162_v26 }
 0xc29   : > { %v9189_v53 = vpop.f32.mrf.mxu2  ;;  %v9629_v9 = vsel %vm1024_vm0, %v16777_v23, %v11164_v6 }
 0xc2a   : > { %v9662_v30 = vsel %vm9634_vm2, %v9629_v9, %v11169_v31 }
 0xc2b   : > { %v9695_v0 = vsel %vm9667_vm3, %v9662_v30, %v11174_v24 }
 0xc37   : > { %9842 = vmatmul.bf16.gmra.mxu0 %v9710_v56  ;;  %v9713_v56 = vpack.c.bf16 %v9695_v0, %v9694_v61 }
 0xc47   : > { %9847 = vmatmul.bf16.gmra.mxu0 %v9711_v48  ;;  %v9696_v48 = vsel %vm9667_vm3, %v9663_v41, %v11188_v43 }
 0xc48   : > { %v9714_v4 = vpack.c.bf16 %v9697_v38, %v9696_v48 }
 0xc54   : > { %v9813_v14 = vpop.f32.mrf.mxu0 }
 0xc55   : > { %v9814_v57 = vadd.f32 %v15718_v54, %v9813_v14  ;;  %v11192_v14 = vpop.permute.xlu0 %11191 }
 0xc56   : > { %v9215_v37 = vpop.f32.mrf.mxu3 }
 0xc57   : > { %9881 = vst [vmem:[%s15723_s30 + $0x40] sm:$0xff] %v9814_v57  ;;  %v11200_v11 = vpack.i.bf16 %v9215_v37, %v9189_v53  ;;  %9852 = vmatmul.bf16.gmra.mxu0 %v9712_v45  ;;  %v11197_v45 = vpop.permute.xlu1 %11196  ;;  %v11194_v53 = vunpack.i.h.bf16 %v11192_v14  ;;  %v11193_v37 = vunpack.i.l.bf16 %v11192_v14 }
 0xc58   : > { %v11198_v26 = vunpack.i.l.bf16 %v11197_v45 }
 0xc59   : > { %11201 = vrot.lane.b32.xlu2 %v11200_v11, %s11727_s21  ;;  %v11199_v11 = vunpack.i.h.bf16 %v11197_v45  ;;  %v9633_v6 = vsel %vm1024_vm0, %v16781_v13, %v11194_v53 }
 0xc5b   : > { %v9666_v24 = vsel %vm9634_vm2, %v9633_v6, %v11199_v11 }
 0xc5c   : > { %v9815_v52 = vpop.f32.mrf.mxu0 }
 0xc5d   : > { %v9816_v58 = vadd.f32 %v15718_v54, %v9815_v52  ;;  %v9632_v52 = vsel %vm1024_vm0, %v16782_v32, %v11193_v37 }
 0xc5e   : > { %v9665_v49 = vsel %vm9634_vm2, %v9632_v52, %v11198_v26 }
 0xc5f   : > { %9882 = vst [vmem:[%s15723_s30 + $0x48] sm:$0xff] %v9816_v58 }
 0xc64   : > { %v9818_v29 = vpop.f32.mrf.mxu0 }
 0xc65   : > { %v9819_v44 = vadd.f32 %v15718_v54, %v9818_v29 }
 0xc67   : > { %9883 = vst [vmem:[%s15723_s30 + $0x50] sm:$0xff] %v9819_v44  ;;  %9857 = vmatmul.bf16.gmra.mxu0 %v9713_v56 }
 0xc6c   : > { %v9820_v7 = vpop.f32.mrf.mxu0 }
 0xc6d   : > { %v9821_v8 = vadd.f32 %v15718_v54, %v9820_v7 }
 0xc6f   : > { %9884 = vst [vmem:[%s15723_s30 + $0x58] sm:$0xff] %v9821_v8 }
 0xc74   : > { %v9823_v55 = vpop.f32.mrf.mxu0 }
 0xc75   : > { %v9824_v22 = vadd.f32 %v15718_v54, %v9823_v55 }
 0xc77   : > { %9885 = vst [vmem:[%s15723_s30 + $0x60] sm:$0xff] %v9824_v22  ;;  %9862 = vmatmul.bf16.gmra.mxu0 %v9714_v4 }
 0xc7c   : > { %v9825_v42 = vpop.f32.mrf.mxu0 }
 0xc7d   : > { %v9826_v20 = vadd.f32 %v15718_v54, %v9825_v42 }
 0xc7f   : > { %9886 = vst [vmem:[%s15723_s30 + $0x68] sm:$0xff] %v9826_v20 }
 0xc84   : > { %v9828_v28 = vpop.f32.mrf.mxu0 }
 0xc85   : > { %v9829_v47 = vadd.f32 %v15718_v54, %v9828_v28 }
 0xc87   : > { %9887 = vst [vmem:[%s15723_s30 + $0x70] sm:$0xff] %v9829_v47 }
 0xc8c   : > { %v9830_v34 = vpop.f32.mrf.mxu0 }
 0xc8d   : > { %v9831_v60 = vadd.f32 %v15718_v54, %v9830_v34 }
 0xc8f   : > { %9888 = vst [vmem:[%s15723_s30 + $0x78] sm:$0xff] %v9831_v60 }
 0xc94   : > { %v9833_v1 = vpop.f32.mrf.mxu0 }
 0xc95   : > { %v9834_v5 = vadd.f32 %v15718_v54, %v9833_v1 }
 0xc97   : > { %9889 = vst [vmem:[%s15723_s30 + $0x80] sm:$0xff] %v9834_v5 }
 0xc9c   : > { %v9835_v46 = vpop.f32.mrf.mxu0 }
 0xc9d   : > { %v9836_v39 = vadd.f32 %v15718_v54, %v9835_v46 }
 0xc9f   : > { %9890 = vst [vmem:[%s15723_s30 + $0x88] sm:$0xff] %v9836_v39 }
 0xca4   : > { %v9838_v10 = vpop.f32.mrf.mxu0 }
 0xca5   : > { %v9839_v33 = vadd.f32 %v15718_v54, %v9838_v10 }
 0xca7   : > { %9891 = vst [vmem:[%s15723_s30 + $0x90] sm:$0xff] %v9839_v33 }
 0xcac   : > { %v9840_v16 = vpop.f32.mrf.mxu0 }
 0xcad   : > { %v9841_v57 = vadd.f32 %v15718_v54, %v9840_v16 }
 0xcaf   : > { %9892 = vst [vmem:[%s15723_s30 + $0x98] sm:$0xff] %v9841_v57 }
 0xcb3   : > { %v11202_v18 = vpop.permute.xlu2 %11201 }
 0xcb4   : > { %v11204_v31 = vunpack.i.h.bf16 %v11202_v18  ;;  %v11203_v35 = vunpack.i.l.bf16 %v11202_v18  ;;  %v9843_v58 = vpop.f32.mrf.mxu0 }
 0xcb5   : > { %v9844_v23 = vadd.f32 %v15718_v54, %v9843_v58 }
 0xcb6   : > { %v9698_v9 = vsel %vm9667_vm3, %v9665_v49, %v11203_v35  ;;  %v9699_v3 = vsel %vm9667_vm3, %v9666_v24, %v11204_v31 }
 0xcb7   : > { %9893 = vst [vmem:[%s15723_s30 + $0xa0] sm:$0xff] %v9844_v23  ;;  %v9715_v17 = vpack.c.bf16 %v9699_v3, %v9698_v9 }
 0xcb9   : > { %9867 = vmatmul.bf16.gmra.mxu0 %v9715_v17 }
 0xcbc   : > { %v9845_v30 = vpop.f32.mrf.mxu0 }
 0xcbd   : > { %v9846_v62 = vadd.f32 %v15718_v54, %v9845_v30 }
 0xcbf   : > { %9894 = vst [vmem:[%s15723_s30 + $0xa8] sm:$0xff] %v9846_v62 }
 0xcc4   : > { %v9848_v61 = vpop.f32.mrf.mxu0 }
 0xcc5   : > { %v9849_v0 = vadd.f32 %v15718_v54, %v9848_v61 }
 0xcc7   : > { %9895 = vst [vmem:[%s15723_s30 + $0xb0] sm:$0xff] %v9849_v0 }
 0xccc   : > { %v9850_v29 = vpop.f32.mrf.mxu0 }
 0xccd   : > { %v9851_v44 = vadd.f32 %v15718_v54, %v9850_v29 }
 0xccf   : > { %9896 = vst [vmem:[%s15723_s30 + $0xb8] sm:$0xff] %v9851_v44 }
 0xcd4   : > { %v9853_v56 = vpop.f32.mrf.mxu0 }
 0xcd5   : > { %v9854_v15 = vadd.f32 %v15718_v54, %v9853_v56 }
 0xcd7   : > { %9897 = vst [vmem:[%s15723_s30 + $0xc0] sm:$0xff] %v9854_v15 }
 0xcdc   : > { %v9855_v21 = vpop.f32.mrf.mxu0 }
 0xcdd   : > { %v9856_v36 = vadd.f32 %v15718_v54, %v9855_v21 }
 0xcdf   : > { %9898 = vst [vmem:[%s15723_s30 + $0xc8] sm:$0xff] %v9856_v36 }
 0xce4   : > { %v9858_v40 = vpop.f32.mrf.mxu0 }
 0xce5   : > { %v9859_v12 = vadd.f32 %v15718_v54, %v9858_v40 }
 0xce7   : > { %9899 = vst [vmem:[%s15723_s30 + $0xd0] sm:$0xff] %v9859_v12 }
 0xcec   : > { %v9860_v7 = vpop.f32.mrf.mxu0 }
 0xced   : > { %v9861_v2 = vadd.f32 %v15718_v54, %v9860_v7 }
 0xcef   : > { %9900 = vst [vmem:[%s15723_s30 + $0xd8] sm:$0xff] %v9861_v2 }
 0xcf4   : > { %v9863_v19 = vpop.f32.mrf.mxu0 }
 0xcf5   : > { %v9864_v8 = vadd.f32 %v15718_v54, %v9863_v19 }
 0xcf7   : > { %9901 = vst [vmem:[%s15723_s30 + $0xe0] sm:$0xff] %v9864_v8 }
 0xcfc   : > { %v9865_v63 = vpop.f32.mrf.mxu0 }
 0xcfd   : > { %v9866_v43 = vadd.f32 %v15718_v54, %v9865_v63 }
 0xcff   : > { %9902 = vst [vmem:[%s15723_s30 + $0xe8] sm:$0xff] %v9866_v43 }
 0xd36   : > { %v9868_v59 = vpop.f32.mrf.mxu0 }
 0xd37   : > { %v9869_v50 = vadd.f32 %v15718_v54, %v9868_v59 }
 0xd39   : > { %9903 = vst [vmem:[%s15723_s30 + $0xf0] sm:$0xff] %v9869_v50 }
 0xd3e   : > { %v9870_v51 = vpop.f32.mrf.mxu0 }
 0xd3f   : > { %v9871_v25 = vadd.f32 %v15718_v54, %v9870_v51 }
 0xd41   : > { %9904 = vst [vmem:[%s15723_s30 + $0xf8] sm:$0xff] %v9871_v25 }
 0xd42 PF: > { %s18_s27 = sadd.s32 1, %s11725_s27  }
 0xd43   : > { %p15_p4 = scmp.ge.s32.totalorder %s18_s27, 4  }
 0xd45   :  { %17 = sbr.rel (!%p15_p4) target bundleno = 1 (0x1), region = 85 }

</bundles_post_ra>
